<compile_context>
chip_gen: v5e
topology: v5e:2x2
jax: 0.10.0
libtpu: 0.0.40
codegen_flags: <defaults>
</compile_context>

<pallas_src>
import jax
import jax.numpy as jnp
from jax import lax
from jax.experimental import pallas as pl
from jax.experimental.pallas import tpu as pltpu

RTOL = 1e-6
ATOL = 1e-7
MAX_STEPS_PER_INTERVAL = 1000  # reject-storm guard: never spin forever under jit

# ---------------------------------------------------------------------------
# Dormand–Prince 5(4) Butcher tableau
# ---------------------------------------------------------------------------
_A21 = 1.0 / 5.0
_A31, _A32 = 3.0 / 40.0, 9.0 / 40.0
_A41, _A42, _A43 = 44.0 / 45.0, -56.0 / 15.0, 32.0 / 9.0
_A51, _A52, _A53, _A54 = (19372.0 / 6561.0, -25360.0 / 2187.0,
                          64448.0 / 6561.0, -212.0 / 729.0)
_A61, _A62, _A63, _A64, _A65 = (9017.0 / 3168.0, -355.0 / 33.0,
                                46732.0 / 5247.0, 49.0 / 176.0,
                                -5103.0 / 18656.0)
_B1, _B3, _B4, _B5, _B6 = (35.0 / 384.0, 500.0 / 1113.0, 125.0 / 192.0,
                           -2187.0 / 6784.0, 11.0 / 84.0)
# (5th-order minus embedded 4th-order) weights:  err = sum_i E_i * (h*k_i)
_E1, _E3, _E4, _E5, _E6, _E7 = (71.0 / 57600.0, -71.0 / 16695.0, 71.0 / 1920.0,
                                -17253.0 / 339200.0, 22.0 / 525.0, -1.0 / 40.0)


def _tree_sum(terms):
    """Balanced-tree summation (XLA won't re-associate f32)."""
    terms = list(terms)
    while len(terms) > 1:
        nxt = []
        for i in range(0, len(terms) - 1, 2):
            nxt.append(terms[i] + terms[i + 1])
        if len(terms) % 2:
            nxt.append(terms[-1])
        terms = nxt
    return terms[0]


# ---------------------------------------------------------------------------
# Fused Pallas kernel: whole trajectory in one invocation
# ---------------------------------------------------------------------------
def _node_kernel(t_ref, x0_ref, w1_ref, b1_ref, w2t_ref, b2_ref, out_ref):
    y0 = x0_ref[...]
    N, d = y0.shape
    H = w1_ref.shape[1]

    # ---- weights resident, broadcasts hoisted (done ONCE per call) ----------
    w1 = w1_ref[...]                       # [d, H]
    w2t = w2t_ref[...]                     # [d, H]  (= W2ᵀ, transposed in wrapper)
    b1b = jnp.broadcast_to(b1_ref[...], (N, H))        # [N, H]
    b2b = jnp.broadcast_to(b2_ref[...], (N, d))        # [N, d]
    w1b = [jnp.broadcast_to(w1[i:i + 1, :], (N, H)) for i in range(d)]
    w2b = [jnp.broadcast_to(w2t[j:j + 1, :], (N, H)) for j in range(d)]

    def rhs(x):
        # Linear(d -> H): unrolled over the tiny d-sized contraction.
        # x[:, i:i+1] lane-broadcasts against the pre-broadcast W1 row: pure
        # VPU FMAs, combined as a balanced tree.  No MXU.
        terms = [b1b] + [x[:, i:i + 1] * w1b[i] for i in range(d)]
        z = jnp.tanh(_tree_sum(terms))                           # EUP, [N, H]
        # Linear(H -> d): one elementwise multiply + one lane (XLU) reduce per
        # output column; the d reductions are independent and pipeline.
        cols = [jnp.sum(z * w2b[j], axis=1, keepdims=True) for j in range(d)]
        return jnp.concatenate(cols, axis=1) + b2b               # [N, d]

    out_ref[0] = y0                        # trajectory starts at x0
    h0 = 0.1 * (t_ref[1] - t_ref[0])       # initial step guess (matches driver)
    k1_0 = rhs(y0)                         # FSAL seed
    n_intervals = out_ref.shape[0] - 1
    inv_size = 1.0 / float(N * d)

    # Carried across intervals: state, step size, FSAL derivative.
    y, h, k1 = y0, h0, k1_0

    # Interval loop is Python-unrolled (T-1 small & static): static store
    # indices, scheduler visibility across interval boundaries.
    for i in range(n_intervals):
        t0 = t_ref[i]
        t1 = t_ref[i + 1]
        span = t1 - t0
        eps = 1e-10 * jnp.maximum(jnp.abs(t1), 1.0)

        def cond(state, t1=t1, eps=eps):
            t, _, _, _, n = state
            return jnp.logical_and(t1 - t > eps, n < MAX_STEPS_PER_INTERVAL)

        def attempt(state, t1=t1, span=span):
            t, y_c, h_c, k1_c, n = state
            h_use = jnp.minimum(h_c, t1 - t)

            # Scale each stage once; tableau coefficients are compile-time
            # constants; accumulations are balanced trees.
            hk1 = h_use * k1_c
            k2 = rhs(y_c + _A21 * hk1)
            hk2 = h_use * k2
            k3 = rhs(y_c + (_A31 * hk1 + _A32 * hk2))
            hk3 = h_use * k3
            k4 = rhs((y_c + _A41 * hk1) + (_A42 * hk2 + _A43 * hk3))
            hk4 = h_use * k4
            k5 = rhs((y_c + _A51 * hk1)
                     + ((_A52 * hk2 + _A53 * hk3) + _A54 * hk4))
            hk5 = h_use * k5
            k6 = rhs(((y_c + _A61 * hk1) + (_A62 * hk2 + _A63 * hk3))
                     + (_A64 * hk4 + _A65 * hk5))
            hk6 = h_use * k6
            y5 = (((y_c + _B1 * hk1) + (_B3 * hk3 + _B4 * hk4))
                  + (_B5 * hk5 + _B6 * hk6))
            k7 = rhs(y5)                   # FSAL: becomes k1 of the next step
            hk7 = h_use * k7

            # Embedded 4(5) error estimate and controller (all in-kernel).
            err = ((_E1 * hk1 + _E3 * hk3) + (_E4 * hk4 + _E5 * hk5)
                   + (_E6 * hk6 + _E7 * hk7))
            tol = ATOL + RTOL * jnp.maximum(jnp.abs(y_c), jnp.abs(y5))
            r = err / tol
            # Exactly ONE full XLU reduce; pow via EUP log/exp on a [1,1] view
            # (no full-vreg splat, no second cross-lane reduce).
            rr_11 = jnp.sum(r * r, keepdims=True) * inv_size          # [1,1]
            fac_11 = 0.9 * jnp.exp(-0.1 * jnp.log(rr_11 + 1e-24))     # [1,1]
            rr = rr_11[0, 0]
            factor = jnp.clip(fac_11[0, 0], 0.2, 10.0)

            accept = rr <= 1.0
            t_new = jnp.where(accept, t + h_use, t)
            y_new = jnp.where(accept, y5, y_c)
            k1_new = jnp.where(accept, k7, k1_c)
            h_new = jnp.maximum(h_use * factor, 1e-6 * span)
            return (t_new, y_new, h_new, k1_new, n + 1)

        init = (t0, y, jnp.minimum(h, span), k1, jnp.int32(0))
        _, y, h, k1, _ = lax.while_loop(cond, attempt, init)
        out_ref[i + 1] = y                 # static-index contiguous store


def node_forward(t, x0, params):
    """NODE.forward: t [T], x0 [N, d]  ->  X [N, T, d] (float32).

    The whole adaptive dopri5 integration runs in a single pallas_call.
    """
    w1, b1, w2, b2 = params
    T = t.shape[0]
    N, d = x0.shape
    H = w1.shape[1]

    # Advisory cost hint: ~8 attempted steps/interval, 6 RHS evals/step (FSAL).
    est_steps = 8 * (T - 1)
    flops = int(est_steps * 6 * (4 * N * d * H + 24 * N * d))
    transcendentals = int(est_steps * 6 * N * H)
    bytes_accessed = int(4 * (T * N * d + N * d + d * H + H + H * d + d + T))

    vmem = pl.BlockSpec(memory_space=pltpu.MemorySpace.VMEM)
    smem = pl.BlockSpec(memory_space=pltpu.MemorySpace.SMEM)

    traj = pl.pallas_call(
        _node_kernel,
        out_shape=jax.ShapeDtypeStruct((T, N, d), jnp.float32),
        in_specs=[smem, vmem, vmem, vmem, vmem, vmem],
        out_specs=vmem,
        cost_estimate=pl.CostEstimate(flops=flops,
                                      transcendentals=transcendentals,
                                      bytes_accessed=bytes_accessed),
    )(t.astype(jnp.float32), x0.astype(jnp.float32),
      w1.astype(jnp.float32), b1.astype(jnp.float32),
      jnp.transpose(w2).astype(jnp.float32),   # W2ᵀ [d, H]: rows = output cols
      b2.astype(jnp.float32))

    # [T, N, d] -> [N, T, d]   (matches odeint(...).permute(1, 0, 2).float()).
    # Negligible at these sizes; for large N/T write lane-dense in-kernel.
    return jnp.transpose(traj, (1, 0, 2)).astype(jnp.float32)


# ---------------------------------------------------------------------------
# Pure-JAX reference (identical adaptive algorithm, host control flow)
# ---------------------------------------------------------------------------
def _node_forward_ref(t, x0, params):
    w1, b1, w2, b2 = params
    hp = jax.lax.Precision.HIGHEST

    def f(x):
        z = jnp.tanh(jnp.dot(x, w1, precision=hp) + b1)
        return jnp.dot(z, w2, precision=hp) + b2

    t_list = [float(v) for v in t]
    inv_size = 1.0 / float(x0.size)
    y = x0
    k1 = f(y)
    h = 0.1 * (t_list[1] - t_list[0])
    traj = [x0]
    for t0, t1 in zip(t_list[:-1], t_list[1:]):
        span = t1 - t0
        tc = t0
        h = min(h, span)
        steps = 0
        while (t1 - tc) > 1e-10 * max(abs(t1), 1.0) and steps < MAX_STEPS_PER_INTERVAL:
            steps += 1
            hu = min(h, t1 - tc)
            k2 = f(y + (hu * _A21) * k1)
            k3 = f(y + (hu * _A31) * k1 + (hu * _A32) * k2)
            k4 = f(y + (hu * _A41) * k1 + (hu * _A42) * k2 + (hu * _A43) * k3)
            k5 = f(y + (hu * _A51) * k1 + (hu * _A52) * k2 + (hu * _A53) * k3
                   + (hu * _A54) * k4)
            k6 = f(y + (hu * _A61) * k1 + (hu * _A62) * k2 + (hu * _A63) * k3
                   + (hu * _A64) * k4 + (hu * _A65) * k5)
            y5 = (y + (hu * _B1) * k1 + (hu * _B3) * k3 + (hu * _B4) * k4
                  + (hu * _B5) * k5 + (hu * _B6) * k6)
            k7 = f(y5)
            err = ((hu * _E1) * k1 + (hu * _E3) * k3 + (hu * _E4) * k4
                   + (hu * _E5) * k5 + (hu * _E6) * k6 + (hu * _E7) * k7)
            tol = ATOL + RTOL * jnp.maximum(jnp.abs(y), jnp.abs(y5))
            rr = float(jnp.sum((err / tol) ** 2)) * inv_size
            if rr <= 1.0:
                tc = tc + hu
                y = y5
                k1 = k7
            factor = min(max(0.9 * (rr + 1e-24) ** (-0.1), 0.2), 10.0)
            h = max(hu * factor, 1e-6 * span)
        traj.append(y)
    X = jnp.stack(traj, axis=0)                      # [T, N, d]
    return jnp.transpose(X, (1, 0, 2)).astype(jnp.float32)


if __name__ == "__main__":
    N, d, H, T = 8, 4, 32, 8

    key = jax.random.PRNGKey(0)
    kw1, kb1, kw2, kb2, kx = jax.random.split(key, 5)
    s1 = 1.0 / (d ** 0.5)
    s2 = 1.0 / (H ** 0.5)
    w1 = jax.random.uniform(kw1, (d, H), jnp.float32, -s1, s1)
    b1 = jax.random.uniform(kb1, (1, H), jnp.float32, -s1, s1)
    w2 = jax.random.uniform(kw2, (H, d), jnp.float32, -s2, s2)
    b2 = jax.random.uniform(kb2, (1, d), jnp.float32, -s2, s2)
    params = (w1, b1, w2, b2)

    x0 = jax.random.normal(kx, (N, d), jnp.float32)
    t = jnp.linspace(0.0, 1.0, T).astype(jnp.float32)

    X = jax.jit(node_forward)(t, x0, params)
    X = jax.block_until_ready(X)

    assert X.shape == (N, T, d), X.shape
    assert X.dtype == jnp.float32
    assert bool(jnp.all(jnp.isfinite(X)))
    assert bool(jnp.allclose(X[:, 0, :], x0, atol=1e-6))  # trajectory starts at x0

    # Fused Pallas integration matches the pure-JAX adaptive dopri5 reference.
    X_ref = _node_forward_ref(t, x0, params)
    assert bool(jnp.allclose(X, X_ref, rtol=2e-3, atol=2e-4)), (
        "max abs diff = %f" % float(jnp.max(jnp.abs(X - X_ref))))

    print("KERNEL_OK")
</pallas_src>

<mosaic_0001>
module attributes {stable_mosaic.version = 11 : i64} {
  func.func @_node_kernel(%arg0: memref<8xf32, #tpu.memory_space<smem>>, %arg1: memref<8x4xf32, #tpu.memory_space<vmem>>, %arg2: memref<4x32xf32, #tpu.memory_space<vmem>>, %arg3: memref<1x32xf32, #tpu.memory_space<vmem>>, %arg4: memref<4x32xf32, #tpu.memory_space<vmem>>, %arg5: memref<1x4xf32, #tpu.memory_space<vmem>>, %arg6: memref<8x8x4xf32, #tpu.memory_space<vmem>>) attributes {dimension_semantics = [], scalar_prefetch = 0 : i64, scratch_operands = 0 : i64, tpu.core_type = #tpu.core_type<tc>} {
    %c0 = arith.constant 0 : index
    %c0_0 = arith.constant 0 : index
    %0 = vector.load %arg1[%c0, %c0_0] : memref<8x4xf32, #tpu.memory_space<vmem>>, vector<8x4xf32>
    %c0_1 = arith.constant 0 : index
    %c0_2 = arith.constant 0 : index
    %1 = vector.load %arg2[%c0_1, %c0_2] : memref<4x32xf32, #tpu.memory_space<vmem>>, vector<4x32xf32>
    %c0_3 = arith.constant 0 : index
    %c0_4 = arith.constant 0 : index
    %2 = vector.load %arg4[%c0_3, %c0_4] : memref<4x32xf32, #tpu.memory_space<vmem>>, vector<4x32xf32>
    %c0_5 = arith.constant 0 : index
    %c0_6 = arith.constant 0 : index
    %3 = vector.load %arg3[%c0_5, %c0_6] : memref<1x32xf32, #tpu.memory_space<vmem>>, vector<1x32xf32>
    %4 = vector.shape_cast %3 : vector<1x32xf32> to vector<1x32xf32>
    %5 = vector.broadcast %4 : vector<1x32xf32> to vector<8x32xf32>
    %c0_7 = arith.constant 0 : index
    %c0_8 = arith.constant 0 : index
    %6 = vector.load %arg5[%c0_7, %c0_8] : memref<1x4xf32, #tpu.memory_space<vmem>>, vector<1x4xf32>
    %7 = vector.shape_cast %6 : vector<1x4xf32> to vector<1x4xf32>
    %8 = vector.broadcast %7 : vector<1x4xf32> to vector<8x4xf32>
    %9 = vector.extract_strided_slice %1 {offsets = [0, 0], sizes = [1, 32], strides = [1, 1]} : vector<4x32xf32> to vector<1x32xf32>
    %10 = vector.shape_cast %9 : vector<1x32xf32> to vector<1x32xf32>
    %11 = vector.broadcast %10 : vector<1x32xf32> to vector<8x32xf32>
    %12 = vector.extract_strided_slice %1 {offsets = [1, 0], sizes = [1, 32], strides = [1, 1]} : vector<4x32xf32> to vector<1x32xf32>
    %13 = vector.shape_cast %12 : vector<1x32xf32> to vector<1x32xf32>
    %14 = vector.broadcast %13 : vector<1x32xf32> to vector<8x32xf32>
    %15 = vector.extract_strided_slice %1 {offsets = [2, 0], sizes = [1, 32], strides = [1, 1]} : vector<4x32xf32> to vector<1x32xf32>
    %16 = vector.shape_cast %15 : vector<1x32xf32> to vector<1x32xf32>
    %17 = vector.broadcast %16 : vector<1x32xf32> to vector<8x32xf32>
    %18 = vector.extract_strided_slice %1 {offsets = [3, 0], sizes = [1, 32], strides = [1, 1]} : vector<4x32xf32> to vector<1x32xf32>
    %19 = vector.shape_cast %18 : vector<1x32xf32> to vector<1x32xf32>
    %20 = vector.broadcast %19 : vector<1x32xf32> to vector<8x32xf32>
    %21 = vector.extract_strided_slice %2 {offsets = [0, 0], sizes = [1, 32], strides = [1, 1]} : vector<4x32xf32> to vector<1x32xf32>
    %22 = vector.shape_cast %21 : vector<1x32xf32> to vector<1x32xf32>
    %23 = vector.broadcast %22 : vector<1x32xf32> to vector<8x32xf32>
    %24 = vector.extract_strided_slice %2 {offsets = [1, 0], sizes = [1, 32], strides = [1, 1]} : vector<4x32xf32> to vector<1x32xf32>
    %25 = vector.shape_cast %24 : vector<1x32xf32> to vector<1x32xf32>
    %26 = vector.broadcast %25 : vector<1x32xf32> to vector<8x32xf32>
    %27 = vector.extract_strided_slice %2 {offsets = [2, 0], sizes = [1, 32], strides = [1, 1]} : vector<4x32xf32> to vector<1x32xf32>
    %28 = vector.shape_cast %27 : vector<1x32xf32> to vector<1x32xf32>
    %29 = vector.broadcast %28 : vector<1x32xf32> to vector<8x32xf32>
    %30 = vector.extract_strided_slice %2 {offsets = [3, 0], sizes = [1, 32], strides = [1, 1]} : vector<4x32xf32> to vector<1x32xf32>
    %31 = vector.shape_cast %30 : vector<1x32xf32> to vector<1x32xf32>
    %32 = vector.broadcast %31 : vector<1x32xf32> to vector<8x32xf32>
    %c0_9 = arith.constant 0 : index
    %c0_10 = arith.constant 0 : index
    %c0_11 = arith.constant 0 : index
    %33 = vector.load %arg6[%c0_9, %c0_10, %c0_11] : memref<8x8x4xf32, #tpu.memory_space<vmem>>, vector<1x8x4xf32>
    %34 = vector.shape_cast %33 : vector<1x8x4xf32> to vector<8x4xf32>
    %35 = vector.shape_cast %0 : vector<8x4xf32> to vector<1x8x4xf32>
    tpu.vector_store %arg6[%c0_9, %c0_10, %c0_11], %35 {strides = array<i32>} : memref<8x8x4xf32, #tpu.memory_space<vmem>>, vector<1x8x4xf32>,
    %c1 = arith.constant 1 : index
    %36 = memref.load %arg0[%c1] : memref<8xf32, #tpu.memory_space<smem>>
    %c0_12 = arith.constant 0 : index
    %37 = memref.load %arg0[%c0_12] : memref<8xf32, #tpu.memory_space<smem>>
    %38 = arith.subf %36, %37 : f32
    %cst = arith.constant 1.000000e-01 : f32
    %39 = arith.mulf %cst, %38 : f32
    %40 = vector.extract_strided_slice %0 {offsets = [0, 0], sizes = [8, 1], strides = [1, 1]} : vector<8x4xf32> to vector<8x1xf32>
    %41 = vector.broadcast %40 : vector<8x1xf32> to vector<8x32xf32>
    %42 = arith.mulf %41, %11 : vector<8x32xf32>
    %43 = vector.extract_strided_slice %0 {offsets = [0, 1], sizes = [8, 1], strides = [1, 1]} : vector<8x4xf32> to vector<8x1xf32>
    %44 = vector.broadcast %43 : vector<8x1xf32> to vector<8x32xf32>
    %45 = arith.mulf %44, %14 : vector<8x32xf32>
    %46 = vector.extract_strided_slice %0 {offsets = [0, 2], sizes = [8, 1], strides = [1, 1]} : vector<8x4xf32> to vector<8x1xf32>
    %47 = vector.broadcast %46 : vector<8x1xf32> to vector<8x32xf32>
    %48 = arith.mulf %47, %17 : vector<8x32xf32>
    %49 = vector.extract_strided_slice %0 {offsets = [0, 3], sizes = [8, 1], strides = [1, 1]} : vector<8x4xf32> to vector<8x1xf32>
    %50 = vector.broadcast %49 : vector<8x1xf32> to vector<8x32xf32>
    %51 = arith.mulf %50, %20 : vector<8x32xf32>
    %52 = arith.addf %5, %42 : vector<8x32xf32>
    %53 = arith.addf %45, %48 : vector<8x32xf32>
    %54 = arith.addf %52, %53 : vector<8x32xf32>
    %55 = arith.addf %54, %51 : vector<8x32xf32>
    %56 = math.tanh %55 : vector<8x32xf32>
    %57 = arith.mulf %56, %23 : vector<8x32xf32>
    %cst_13 = arith.constant dense<0.000000e+00> : vector<8xf32>
    %58 = vector.multi_reduction <add>, %57, %cst_13 [1] : vector<8x32xf32> to vector<8xf32>
    %59 = vector.shape_cast %58 : vector<8xf32> to vector<8x1xf32>
    %60 = arith.mulf %56, %26 : vector<8x32xf32>
    %cst_14 = arith.constant dense<0.000000e+00> : vector<8xf32>
    %61 = vector.multi_reduction <add>, %60, %cst_14 [1] : vector<8x32xf32> to vector<8xf32>
    %62 = vector.shape_cast %61 : vector<8xf32> to vector<8x1xf32>
    %63 = arith.mulf %56, %29 : vector<8x32xf32>
    %cst_15 = arith.constant dense<0.000000e+00> : vector<8xf32>
    %64 = vector.multi_reduction <add>, %63, %cst_15 [1] : vector<8x32xf32> to vector<8xf32>
    %65 = vector.shape_cast %64 : vector<8xf32> to vector<8x1xf32>
    %66 = arith.mulf %56, %32 : vector<8x32xf32>
    %cst_16 = arith.constant dense<0.000000e+00> : vector<8xf32>
    %67 = vector.multi_reduction <add>, %66, %cst_16 [1] : vector<8x32xf32> to vector<8xf32>
    %68 = vector.shape_cast %67 : vector<8xf32> to vector<8x1xf32>
    %69 = tpu.concatenate %59, %62, %65, %68 in 1 : vector<8x1xf32>, vector<8x1xf32>, vector<8x1xf32>, vector<8x1xf32> -> vector<8x4xf32>
    %70 = arith.addf %69, %8 : vector<8x4xf32>
    %c0_17 = arith.constant 0 : index
    %71 = memref.load %arg0[%c0_17] : memref<8xf32, #tpu.memory_space<smem>>
    %c1_18 = arith.constant 1 : index
    %72 = memref.load %arg0[%c1_18] : memref<8xf32, #tpu.memory_space<smem>>
    %73 = arith.subf %72, %71 : f32
    %74 = math.absf %72 : f32
    %cst_19 = arith.constant 1.000000e+00 : f32
    %75 = arith.maximumf %74, %cst_19 : f32
    %cst_20 = arith.constant 1.000000e-10 : f32
    %76 = arith.mulf %cst_20, %75 : f32
    %77 = arith.minimumf %39, %73 : f32
    %c0_i32 = arith.constant 0 : i32
    %78:5 = scf.while (%arg7 = %71, %arg8 = %0, %arg9 = %77, %arg10 = %70, %arg11 = %c0_i32) : (f32, vector<8x4xf32>, f32, vector<8x4xf32>, i32) -> (f32, vector<8x4xf32>, f32, vector<8x4xf32>, i32) {
      %148 = arith.subf %72, %arg7 : f32
      %149 = arith.cmpf ogt, %148, %76 : f32
      %c1000_i32 = arith.constant 1000 : i32
      %150 = arith.cmpi slt, %arg11, %c1000_i32 : i32
      %151 = arith.andi %149, %150 : i1
      scf.condition(%151) %arg7, %arg8, %arg9, %arg10, %arg11 : f32, vector<8x4xf32>, f32, vector<8x4xf32>, i32
    } do {
    ^bb0(%arg7: f32, %arg8: vector<8x4xf32>, %arg9: f32, %arg10: vector<8x4xf32>, %arg11: i32):
      %148 = arith.subf %72, %arg7 : f32
      %149 = arith.minimumf %arg9, %148 : f32
      %150 = vector.broadcast %149 : f32 to vector<8x4xf32>
      %151 = arith.mulf %150, %arg10 : vector<8x4xf32>
      %cst_66 = arith.constant 2.000000e-01 : f32
      %152 = vector.broadcast %cst_66 : f32 to vector<8x4xf32>
      %153 = arith.mulf %152, %151 : vector<8x4xf32>
      %154 = arith.addf %arg8, %153 : vector<8x4xf32>
      %155 = vector.extract_strided_slice %154 {offsets = [0, 0], sizes = [8, 1], strides = [1, 1]} : vector<8x4xf32> to vector<8x1xf32>
      %156 = vector.broadcast %155 : vector<8x1xf32> to vector<8x32xf32>
      %157 = arith.mulf %156, %11 : vector<8x32xf32>
      %158 = vector.extract_strided_slice %154 {offsets = [0, 1], sizes = [8, 1], strides = [1, 1]} : vector<8x4xf32> to vector<8x1xf32>
      %159 = vector.broadcast %158 : vector<8x1xf32> to vector<8x32xf32>
      %160 = arith.mulf %159, %14 : vector<8x32xf32>
      %161 = vector.extract_strided_slice %154 {offsets = [0, 2], sizes = [8, 1], strides = [1, 1]} : vector<8x4xf32> to vector<8x1xf32>
      %162 = vector.broadcast %161 : vector<8x1xf32> to vector<8x32xf32>
      %163 = arith.mulf %162, %17 : vector<8x32xf32>
      %164 = vector.extract_strided_slice %154 {offsets = [0, 3], sizes = [8, 1], strides = [1, 1]} : vector<8x4xf32> to vector<8x1xf32>
      %165 = vector.broadcast %164 : vector<8x1xf32> to vector<8x32xf32>
      %166 = arith.mulf %165, %20 : vector<8x32xf32>
      %167 = arith.addf %5, %157 : vector<8x32xf32>
      %168 = arith.addf %160, %163 : vector<8x32xf32>
      %169 = arith.addf %167, %168 : vector<8x32xf32>
      %170 = arith.addf %169, %166 : vector<8x32xf32>
      %171 = math.tanh %170 : vector<8x32xf32>
      %172 = arith.mulf %171, %23 : vector<8x32xf32>
      %cst_67 = arith.constant dense<0.000000e+00> : vector<8xf32>
      %173 = vector.multi_reduction <add>, %172, %cst_67 [1] : vector<8x32xf32> to vector<8xf32>
      %174 = vector.shape_cast %173 : vector<8xf32> to vector<8x1xf32>
      %175 = arith.mulf %171, %26 : vector<8x32xf32>
      %cst_68 = arith.constant dense<0.000000e+00> : vector<8xf32>
      %176 = vector.multi_reduction <add>, %175, %cst_68 [1] : vector<8x32xf32> to vector<8xf32>
      %177 = vector.shape_cast %176 : vector<8xf32> to vector<8x1xf32>
      %178 = arith.mulf %171, %29 : vector<8x32xf32>
      %cst_69 = arith.constant dense<0.000000e+00> : vector<8xf32>
      %179 = vector.multi_reduction <add>, %178, %cst_69 [1] : vector<8x32xf32> to vector<8xf32>
      %180 = vector.shape_cast %179 : vector<8xf32> to vector<8x1xf32>
      %181 = arith.mulf %171, %32 : vector<8x32xf32>
      %cst_70 = arith.constant dense<0.000000e+00> : vector<8xf32>
      %182 = vector.multi_reduction <add>, %181, %cst_70 [1] : vector<8x32xf32> to vector<8xf32>
      %183 = vector.shape_cast %182 : vector<8xf32> to vector<8x1xf32>
      %184 = tpu.concatenate %174, %177, %180, %183 in 1 : vector<8x1xf32>, vector<8x1xf32>, vector<8x1xf32>, vector<8x1xf32> -> vector<8x4xf32>
      %185 = arith.addf %184, %8 : vector<8x4xf32>
      %186 = vector.broadcast %149 : f32 to vector<8x4xf32>
      %187 = arith.mulf %186, %185 : vector<8x4xf32>
      %cst_71 = arith.constant 7.500000e-02 : f32
      %188 = vector.broadcast %cst_71 : f32 to vector<8x4xf32>
      %189 = arith.mulf %188, %151 : vector<8x4xf32>
      %cst_72 = arith.constant 2.250000e-01 : f32
      %190 = vector.broadcast %cst_72 : f32 to vector<8x4xf32>
      %191 = arith.mulf %190, %187 : vector<8x4xf32>
      %192 = arith.addf %189, %191 : vector<8x4xf32>
      %193 = arith.addf %arg8, %192 : vector<8x4xf32>
      %194 = vector.extract_strided_slice %193 {offsets = [0, 0], sizes = [8, 1], strides = [1, 1]} : vector<8x4xf32> to vector<8x1xf32>
      %195 = vector.broadcast %194 : vector<8x1xf32> to vector<8x32xf32>
      %196 = arith.mulf %195, %11 : vector<8x32xf32>
      %197 = vector.extract_strided_slice %193 {offsets = [0, 1], sizes = [8, 1], strides = [1, 1]} : vector<8x4xf32> to vector<8x1xf32>
      %198 = vector.broadcast %197 : vector<8x1xf32> to vector<8x32xf32>
      %199 = arith.mulf %198, %14 : vector<8x32xf32>
      %200 = vector.extract_strided_slice %193 {offsets = [0, 2], sizes = [8, 1], strides = [1, 1]} : vector<8x4xf32> to vector<8x1xf32>
      %201 = vector.broadcast %200 : vector<8x1xf32> to vector<8x32xf32>
      %202 = arith.mulf %201, %17 : vector<8x32xf32>
      %203 = vector.extract_strided_slice %193 {offsets = [0, 3], sizes = [8, 1], strides = [1, 1]} : vector<8x4xf32> to vector<8x1xf32>
      %204 = vector.broadcast %203 : vector<8x1xf32> to vector<8x32xf32>
      %205 = arith.mulf %204, %20 : vector<8x32xf32>
      %206 = arith.addf %5, %196 : vector<8x32xf32>
      %207 = arith.addf %199, %202 : vector<8x32xf32>
      %208 = arith.addf %206, %207 : vector<8x32xf32>
      %209 = arith.addf %208, %205 : vector<8x32xf32>
      %210 = math.tanh %209 : vector<8x32xf32>
      %211 = arith.mulf %210, %23 : vector<8x32xf32>
      %cst_73 = arith.constant dense<0.000000e+00> : vector<8xf32>
      %212 = vector.multi_reduction <add>, %211, %cst_73 [1] : vector<8x32xf32> to vector<8xf32>
      %213 = vector.shape_cast %212 : vector<8xf32> to vector<8x1xf32>
      %214 = arith.mulf %210, %26 : vector<8x32xf32>
      %cst_74 = arith.constant dense<0.000000e+00> : vector<8xf32>
      %215 = vector.multi_reduction <add>, %214, %cst_74 [1] : vector<8x32xf32> to vector<8xf32>
      %216 = vector.shape_cast %215 : vector<8xf32> to vector<8x1xf32>
      %217 = arith.mulf %210, %29 : vector<8x32xf32>
      %cst_75 = arith.constant dense<0.000000e+00> : vector<8xf32>
      %218 = vector.multi_reduction <add>, %217, %cst_75 [1] : vector<8x32xf32> to vector<8xf32>
      %219 = vector.shape_cast %218 : vector<8xf32> to vector<8x1xf32>
      %220 = arith.mulf %210, %32 : vector<8x32xf32>
      %cst_76 = arith.constant dense<0.000000e+00> : vector<8xf32>
      %221 = vector.multi_reduction <add>, %220, %cst_76 [1] : vector<8x32xf32> to vector<8xf32>
      %222 = vector.shape_cast %221 : vector<8xf32> to vector<8x1xf32>
      %223 = tpu.concatenate %213, %216, %219, %222 in 1 : vector<8x1xf32>, vector<8x1xf32>, vector<8x1xf32>, vector<8x1xf32> -> vector<8x4xf32>
      %224 = arith.addf %223, %8 : vector<8x4xf32>
      %225 = vector.broadcast %149 : f32 to vector<8x4xf32>
      %226 = arith.mulf %225, %224 : vector<8x4xf32>
      %cst_77 = arith.constant 0.977777779 : f32
      %227 = vector.broadcast %cst_77 : f32 to vector<8x4xf32>
      %228 = arith.mulf %227, %151 : vector<8x4xf32>
      %229 = arith.addf %arg8, %228 : vector<8x4xf32>
      %cst_78 = arith.constant -3.73333335 : f32
      %230 = vector.broadcast %cst_78 : f32 to vector<8x4xf32>
      %231 = arith.mulf %230, %187 : vector<8x4xf32>
      %cst_79 = arith.constant 3.55555558 : f32
      %232 = vector.broadcast %cst_79 : f32 to vector<8x4xf32>
      %233 = arith.mulf %232, %226 : vector<8x4xf32>
      %234 = arith.addf %231, %233 : vector<8x4xf32>
      %235 = arith.addf %229, %234 : vector<8x4xf32>
      %236 = vector.extract_strided_slice %235 {offsets = [0, 0], sizes = [8, 1], strides = [1, 1]} : vector<8x4xf32> to vector<8x1xf32>
      %237 = vector.broadcast %236 : vector<8x1xf32> to vector<8x32xf32>
      %238 = arith.mulf %237, %11 : vector<8x32xf32>
      %239 = vector.extract_strided_slice %235 {offsets = [0, 1], sizes = [8, 1], strides = [1, 1]} : vector<8x4xf32> to vector<8x1xf32>
      %240 = vector.broadcast %239 : vector<8x1xf32> to vector<8x32xf32>
      %241 = arith.mulf %240, %14 : vector<8x32xf32>
      %242 = vector.extract_strided_slice %235 {offsets = [0, 2], sizes = [8, 1], strides = [1, 1]} : vector<8x4xf32> to vector<8x1xf32>
      %243 = vector.broadcast %242 : vector<8x1xf32> to vector<8x32xf32>
      %244 = arith.mulf %243, %17 : vector<8x32xf32>
      %245 = vector.extract_strided_slice %235 {offsets = [0, 3], sizes = [8, 1], strides = [1, 1]} : vector<8x4xf32> to vector<8x1xf32>
      %246 = vector.broadcast %245 : vector<8x1xf32> to vector<8x32xf32>
      %247 = arith.mulf %246, %20 : vector<8x32xf32>
      %248 = arith.addf %5, %238 : vector<8x32xf32>
      %249 = arith.addf %241, %244 : vector<8x32xf32>
      %250 = arith.addf %248, %249 : vector<8x32xf32>
      %251 = arith.addf %250, %247 : vector<8x32xf32>
      %252 = math.tanh %251 : vector<8x32xf32>
      %253 = arith.mulf %252, %23 : vector<8x32xf32>
      %cst_80 = arith.constant dense<0.000000e+00> : vector<8xf32>
      %254 = vector.multi_reduction <add>, %253, %cst_80 [1] : vector<8x32xf32> to vector<8xf32>
      %255 = vector.shape_cast %254 : vector<8xf32> to vector<8x1xf32>
      %256 = arith.mulf %252, %26 : vector<8x32xf32>
      %cst_81 = arith.constant dense<0.000000e+00> : vector<8xf32>
      %257 = vector.multi_reduction <add>, %256, %cst_81 [1] : vector<8x32xf32> to vector<8xf32>
      %258 = vector.shape_cast %257 : vector<8xf32> to vector<8x1xf32>
      %259 = arith.mulf %252, %29 : vector<8x32xf32>
      %cst_82 = arith.constant dense<0.000000e+00> : vector<8xf32>
      %260 = vector.multi_reduction <add>, %259, %cst_82 [1] : vector<8x32xf32> to vector<8xf32>
      %261 = vector.shape_cast %260 : vector<8xf32> to vector<8x1xf32>
      %262 = arith.mulf %252, %32 : vector<8x32xf32>
      %cst_83 = arith.constant dense<0.000000e+00> : vector<8xf32>
      %263 = vector.multi_reduction <add>, %262, %cst_83 [1] : vector<8x32xf32> to vector<8xf32>
      %264 = vector.shape_cast %263 : vector<8xf32> to vector<8x1xf32>
      %265 = tpu.concatenate %255, %258, %261, %264 in 1 : vector<8x1xf32>, vector<8x1xf32>, vector<8x1xf32>, vector<8x1xf32> -> vector<8x4xf32>
      %266 = arith.addf %265, %8 : vector<8x4xf32>
      %267 = vector.broadcast %149 : f32 to vector<8x4xf32>
      %268 = arith.mulf %267, %266 : vector<8x4xf32>
      %cst_84 = arith.constant 2.95259857 : f32
      %269 = vector.broadcast %cst_84 : f32 to vector<8x4xf32>
      %270 = arith.mulf %269, %151 : vector<8x4xf32>
      %271 = arith.addf %arg8, %270 : vector<8x4xf32>
      %cst_85 = arith.constant -11.5957937 : f32
      %272 = vector.broadcast %cst_85 : f32 to vector<8x4xf32>
      %273 = arith.mulf %272, %187 : vector<8x4xf32>
      %cst_86 = arith.constant 9.82289314 : f32
      %274 = vector.broadcast %cst_86 : f32 to vector<8x4xf32>
      %275 = arith.mulf %274, %226 : vector<8x4xf32>
      %276 = arith.addf %273, %275 : vector<8x4xf32>
      %cst_87 = arith.constant -0.290809333 : f32
      %277 = vector.broadcast %cst_87 : f32 to vector<8x4xf32>
      %278 = arith.mulf %277, %268 : vector<8x4xf32>
      %279 = arith.addf %276, %278 : vector<8x4xf32>
      %280 = arith.addf %271, %279 : vector<8x4xf32>
      %281 = vector.extract_strided_slice %280 {offsets = [0, 0], sizes = [8, 1], strides = [1, 1]} : vector<8x4xf32> to vector<8x1xf32>
      %282 = vector.broadcast %281 : vector<8x1xf32> to vector<8x32xf32>
      %283 = arith.mulf %282, %11 : vector<8x32xf32>
      %284 = vector.extract_strided_slice %280 {offsets = [0, 1], sizes = [8, 1], strides = [1, 1]} : vector<8x4xf32> to vector<8x1xf32>
      %285 = vector.broadcast %284 : vector<8x1xf32> to vector<8x32xf32>
      %286 = arith.mulf %285, %14 : vector<8x32xf32>
      %287 = vector.extract_strided_slice %280 {offsets = [0, 2], sizes = [8, 1], strides = [1, 1]} : vector<8x4xf32> to vector<8x1xf32>
      %288 = vector.broadcast %287 : vector<8x1xf32> to vector<8x32xf32>
      %289 = arith.mulf %288, %17 : vector<8x32xf32>
      %290 = vector.extract_strided_slice %280 {offsets = [0, 3], sizes = [8, 1], strides = [1, 1]} : vector<8x4xf32> to vector<8x1xf32>
      %291 = vector.broadcast %290 : vector<8x1xf32> to vector<8x32xf32>
      %292 = arith.mulf %291, %20 : vector<8x32xf32>
      %293 = arith.addf %5, %283 : vector<8x32xf32>
      %294 = arith.addf %286, %289 : vector<8x32xf32>
      %295 = arith.addf %293, %294 : vector<8x32xf32>
      %296 = arith.addf %295, %292 : vector<8x32xf32>
      %297 = math.tanh %296 : vector<8x32xf32>
      %298 = arith.mulf %297, %23 : vector<8x32xf32>
      %cst_88 = arith.constant dense<0.000000e+00> : vector<8xf32>
      %299 = vector.multi_reduction <add>, %298, %cst_88 [1] : vector<8x32xf32> to vector<8xf32>
      %300 = vector.shape_cast %299 : vector<8xf32> to vector<8x1xf32>
      %301 = arith.mulf %297, %26 : vector<8x32xf32>
      %cst_89 = arith.constant dense<0.000000e+00> : vector<8xf32>
      %302 = vector.multi_reduction <add>, %301, %cst_89 [1] : vector<8x32xf32> to vector<8xf32>
      %303 = vector.shape_cast %302 : vector<8xf32> to vector<8x1xf32>
      %304 = arith.mulf %297, %29 : vector<8x32xf32>
      %cst_90 = arith.constant dense<0.000000e+00> : vector<8xf32>
      %305 = vector.multi_reduction <add>, %304, %cst_90 [1] : vector<8x32xf32> to vector<8xf32>
      %306 = vector.shape_cast %305 : vector<8xf32> to vector<8x1xf32>
      %307 = arith.mulf %297, %32 : vector<8x32xf32>
      %cst_91 = arith.constant dense<0.000000e+00> : vector<8xf32>
      %308 = vector.multi_reduction <add>, %307, %cst_91 [1] : vector<8x32xf32> to vector<8xf32>
      %309 = vector.shape_cast %308 : vector<8xf32> to vector<8x1xf32>
      %310 = tpu.concatenate %300, %303, %306, %309 in 1 : vector<8x1xf32>, vector<8x1xf32>, vector<8x1xf32>, vector<8x1xf32> -> vector<8x4xf32>
      %311 = arith.addf %310, %8 : vector<8x4xf32>
      %312 = vector.broadcast %149 : f32 to vector<8x4xf32>
      %313 = arith.mulf %312, %311 : vector<8x4xf32>
      %cst_92 = arith.constant 2.84627533 : f32
      %314 = vector.broadcast %cst_92 : f32 to vector<8x4xf32>
      %315 = arith.mulf %314, %151 : vector<8x4xf32>
      %316 = arith.addf %arg8, %315 : vector<8x4xf32>
      %cst_93 = arith.constant -10.757576 : f32
      %317 = vector.broadcast %cst_93 : f32 to vector<8x4xf32>
      %318 = arith.mulf %317, %187 : vector<8x4xf32>
      %cst_94 = arith.constant 8.90642261 : f32
      %319 = vector.broadcast %cst_94 : f32 to vector<8x4xf32>
      %320 = arith.mulf %319, %226 : vector<8x4xf32>
      %321 = arith.addf %318, %320 : vector<8x4xf32>
      %322 = arith.addf %316, %321 : vector<8x4xf32>
      %cst_95 = arith.constant 0.278409094 : f32
      %323 = vector.broadcast %cst_95 : f32 to vector<8x4xf32>
      %324 = arith.mulf %323, %268 : vector<8x4xf32>
      %cst_96 = arith.constant -0.273531318 : f32
      %325 = vector.broadcast %cst_96 : f32 to vector<8x4xf32>
      %326 = arith.mulf %325, %313 : vector<8x4xf32>
      %327 = arith.addf %324, %326 : vector<8x4xf32>
      %328 = arith.addf %322, %327 : vector<8x4xf32>
      %329 = vector.extract_strided_slice %328 {offsets = [0, 0], sizes = [8, 1], strides = [1, 1]} : vector<8x4xf32> to vector<8x1xf32>
      %330 = vector.broadcast %329 : vector<8x1xf32> to vector<8x32xf32>
      %331 = arith.mulf %330, %11 : vector<8x32xf32>
      %332 = vector.extract_strided_slice %328 {offsets = [0, 1], sizes = [8, 1], strides = [1, 1]} : vector<8x4xf32> to vector<8x1xf32>
      %333 = vector.broadcast %332 : vector<8x1xf32> to vector<8x32xf32>
      %334 = arith.mulf %333, %14 : vector<8x32xf32>
      %335 = vector.extract_strided_slice %328 {offsets = [0, 2], sizes = [8, 1], strides = [1, 1]} : vector<8x4xf32> to vector<8x1xf32>
      %336 = vector.broadcast %335 : vector<8x1xf32> to vector<8x32xf32>
      %337 = arith.mulf %336, %17 : vector<8x32xf32>
      %338 = vector.extract_strided_slice %328 {offsets = [0, 3], sizes = [8, 1], strides = [1, 1]} : vector<8x4xf32> to vector<8x1xf32>
      %339 = vector.broadcast %338 : vector<8x1xf32> to vector<8x32xf32>
      %340 = arith.mulf %339, %20 : vector<8x32xf32>
      %341 = arith.addf %5, %331 : vector<8x32xf32>
      %342 = arith.addf %334, %337 : vector<8x32xf32>
      %343 = arith.addf %341, %342 : vector<8x32xf32>
      %344 = arith.addf %343, %340 : vector<8x32xf32>
      %345 = math.tanh %344 : vector<8x32xf32>
      %346 = arith.mulf %345, %23 : vector<8x32xf32>
      %cst_97 = arith.constant dense<0.000000e+00> : vector<8xf32>
      %347 = vector.multi_reduction <add>, %346, %cst_97 [1] : vector<8x32xf32> to vector<8xf32>
      %348 = vector.shape_cast %347 : vector<8xf32> to vector<8x1xf32>
      %349 = arith.mulf %345, %26 : vector<8x32xf32>
      %cst_98 = arith.constant dense<0.000000e+00> : vector<8xf32>
      %350 = vector.multi_reduction <add>, %349, %cst_98 [1] : vector<8x32xf32> to vector<8xf32>
      %351 = vector.shape_cast %350 : vector<8xf32> to vector<8x1xf32>
      %352 = arith.mulf %345, %29 : vector<8x32xf32>
      %cst_99 = arith.constant dense<0.000000e+00> : vector<8xf32>
      %353 = vector.multi_reduction <add>, %352, %cst_99 [1] : vector<8x32xf32> to vector<8xf32>
      %354 = vector.shape_cast %353 : vector<8xf32> to vector<8x1xf32>
      %355 = arith.mulf %345, %32 : vector<8x32xf32>
      %cst_100 = arith.constant dense<0.000000e+00> : vector<8xf32>
      %356 = vector.multi_reduction <add>, %355, %cst_100 [1] : vector<8x32xf32> to vector<8xf32>
      %357 = vector.shape_cast %356 : vector<8xf32> to vector<8x1xf32>
      %358 = tpu.concatenate %348, %351, %354, %357 in 1 : vector<8x1xf32>, vector<8x1xf32>, vector<8x1xf32>, vector<8x1xf32> -> vector<8x4xf32>
      %359 = arith.addf %358, %8 : vector<8x4xf32>
      %360 = vector.broadcast %149 : f32 to vector<8x4xf32>
      %361 = arith.mulf %360, %359 : vector<8x4xf32>
      %cst_101 = arith.constant 0.0911458358 : f32
      %362 = vector.broadcast %cst_101 : f32 to vector<8x4xf32>
      %363 = arith.mulf %362, %151 : vector<8x4xf32>
      %364 = arith.addf %arg8, %363 : vector<8x4xf32>
      %cst_102 = arith.constant 0.449236304 : f32
      %365 = vector.broadcast %cst_102 : f32 to vector<8x4xf32>
      %366 = arith.mulf %365, %226 : vector<8x4xf32>
      %cst_103 = arith.constant 0.651041686 : f32
      %367 = vector.broadcast %cst_103 : f32 to vector<8x4xf32>
      %368 = arith.mulf %367, %268 : vector<8x4xf32>
      %369 = arith.addf %366, %368 : vector<8x4xf32>
      %370 = arith.addf %364, %369 : vector<8x4xf32>
      %cst_104 = arith.constant -0.322376192 : f32
      %371 = vector.broadcast %cst_104 : f32 to vector<8x4xf32>
      %372 = arith.mulf %371, %313 : vector<8x4xf32>
      %cst_105 = arith.constant 0.130952388 : f32
      %373 = vector.broadcast %cst_105 : f32 to vector<8x4xf32>
      %374 = arith.mulf %373, %361 : vector<8x4xf32>
      %375 = arith.addf %372, %374 : vector<8x4xf32>
      %376 = arith.addf %370, %375 : vector<8x4xf32>
      %377 = vector.extract_strided_slice %376 {offsets = [0, 0], sizes = [8, 1], strides = [1, 1]} : vector<8x4xf32> to vector<8x1xf32>
      %378 = vector.broadcast %377 : vector<8x1xf32> to vector<8x32xf32>
      %379 = arith.mulf %378, %11 : vector<8x32xf32>
      %380 = vector.extract_strided_slice %376 {offsets = [0, 1], sizes = [8, 1], strides = [1, 1]} : vector<8x4xf32> to vector<8x1xf32>
      %381 = vector.broadcast %380 : vector<8x1xf32> to vector<8x32xf32>
      %382 = arith.mulf %381, %14 : vector<8x32xf32>
      %383 = vector.extract_strided_slice %376 {offsets = [0, 2], sizes = [8, 1], strides = [1, 1]} : vector<8x4xf32> to vector<8x1xf32>
      %384 = vector.broadcast %383 : vector<8x1xf32> to vector<8x32xf32>
      %385 = arith.mulf %384, %17 : vector<8x32xf32>
      %386 = vector.extract_strided_slice %376 {offsets = [0, 3], sizes = [8, 1], strides = [1, 1]} : vector<8x4xf32> to vector<8x1xf32>
      %387 = vector.broadcast %386 : vector<8x1xf32> to vector<8x32xf32>
      %388 = arith.mulf %387, %20 : vector<8x32xf32>
      %389 = arith.addf %5, %379 : vector<8x32xf32>
      %390 = arith.addf %382, %385 : vector<8x32xf32>
      %391 = arith.addf %389, %390 : vector<8x32xf32>
      %392 = arith.addf %391, %388 : vector<8x32xf32>
      %393 = math.tanh %392 : vector<8x32xf32>
      %394 = arith.mulf %393, %23 : vector<8x32xf32>
      %cst_106 = arith.constant dense<0.000000e+00> : vector<8xf32>
      %395 = vector.multi_reduction <add>, %394, %cst_106 [1] : vector<8x32xf32> to vector<8xf32>
      %396 = vector.shape_cast %395 : vector<8xf32> to vector<8x1xf32>
      %397 = arith.mulf %393, %26 : vector<8x32xf32>
      %cst_107 = arith.constant dense<0.000000e+00> : vector<8xf32>
      %398 = vector.multi_reduction <add>, %397, %cst_107 [1] : vector<8x32xf32> to vector<8xf32>
      %399 = vector.shape_cast %398 : vector<8xf32> to vector<8x1xf32>
      %400 = arith.mulf %393, %29 : vector<8x32xf32>
      %cst_108 = arith.constant dense<0.000000e+00> : vector<8xf32>
      %401 = vector.multi_reduction <add>, %400, %cst_108 [1] : vector<8x32xf32> to vector<8xf32>
      %402 = vector.shape_cast %401 : vector<8xf32> to vector<8x1xf32>
      %403 = arith.mulf %393, %32 : vector<8x32xf32>
      %cst_109 = arith.constant dense<0.000000e+00> : vector<8xf32>
      %404 = vector.multi_reduction <add>, %403, %cst_109 [1] : vector<8x32xf32> to vector<8xf32>
      %405 = vector.shape_cast %404 : vector<8xf32> to vector<8x1xf32>
      %406 = tpu.concatenate %396, %399, %402, %405 in 1 : vector<8x1xf32>, vector<8x1xf32>, vector<8x1xf32>, vector<8x1xf32> -> vector<8x4xf32>
      %407 = arith.addf %406, %8 : vector<8x4xf32>
      %408 = vector.broadcast %149 : f32 to vector<8x4xf32>
      %409 = arith.mulf %408, %407 : vector<8x4xf32>
      %cst_110 = arith.constant 0.00123263884 : f32
      %410 = vector.broadcast %cst_110 : f32 to vector<8x4xf32>
      %411 = arith.mulf %410, %151 : vector<8x4xf32>
      %cst_111 = arith.constant -0.00425277045 : f32
      %412 = vector.broadcast %cst_111 : f32 to vector<8x4xf32>
      %413 = arith.mulf %412, %226 : vector<8x4xf32>
      %414 = arith.addf %411, %413 : vector<8x4xf32>
      %cst_112 = arith.constant 0.0369791649 : f32
      %415 = vector.broadcast %cst_112 : f32 to vector<8x4xf32>
      %416 = arith.mulf %415, %268 : vector<8x4xf32>
      %cst_113 = arith.constant -5.086380e-02 : f32
      %417 = vector.broadcast %cst_113 : f32 to vector<8x4xf32>
      %418 = arith.mulf %417, %313 : vector<8x4xf32>
      %419 = arith.addf %416, %418 : vector<8x4xf32>
      %420 = arith.addf %414, %419 : vector<8x4xf32>
      %cst_114 = arith.constant 0.0419047624 : f32
      %421 = vector.broadcast %cst_114 : f32 to vector<8x4xf32>
      %422 = arith.mulf %421, %361 : vector<8x4xf32>
      %cst_115 = arith.constant -2.500000e-02 : f32
      %423 = vector.broadcast %cst_115 : f32 to vector<8x4xf32>
      %424 = arith.mulf %423, %409 : vector<8x4xf32>
      %425 = arith.addf %422, %424 : vector<8x4xf32>
      %426 = arith.addf %420, %425 : vector<8x4xf32>
      %427 = math.absf %arg8 : vector<8x4xf32>
      %428 = math.absf %376 : vector<8x4xf32>
      %429 = arith.maximumf %427, %428 : vector<8x4xf32>
      %cst_116 = arith.constant 9.99999997E-7 : f32
      %430 = vector.broadcast %cst_116 : f32 to vector<8x4xf32>
      %431 = arith.mulf %430, %429 : vector<8x4xf32>
      %cst_117 = arith.constant 1.000000e-07 : f32
      %432 = vector.broadcast %cst_117 : f32 to vector<8x4xf32>
      %433 = arith.addf %432, %431 : vector<8x4xf32>
      %434 = arith.divf %426, %433 : vector<8x4xf32>
      %435 = arith.mulf %434, %434 : vector<8x4xf32>
      %436 = vector.shape_cast %435 : vector<8x4xf32> to vector<1x8x4xf32>
      %cst_118 = arith.constant dense<0.000000e+00> : vector<1xf32>
      %437 = vector.multi_reduction <add>, %436, %cst_118 [1, 2] : vector<1x8x4xf32> to vector<1xf32>
      %438 = vector.shape_cast %437 : vector<1xf32> to vector<1x1x1xf32>
      %439 = vector.extract %438[0, 0, 0] : f32 from vector<1x1x1xf32>
      %440 = vector.broadcast %439 : f32 to vector<1x1xf32>
      %cst_119 = arith.constant 3.125000e-02 : f32
      %441 = vector.broadcast %cst_119 : f32 to vector<1x1xf32>
      %442 = arith.mulf %440, %441 : vector<1x1xf32>
      %cst_120 = arith.constant 1.000000e-24 : f32
      %443 = vector.broadcast %cst_120 : f32 to vector<1x1xf32>
      %444 = arith.addf %442, %443 : vector<1x1xf32>
      %445 = math.log %444 : vector<1x1xf32>
      %cst_121 = arith.constant -1.000000e-01 : f32
      %446 = vector.broadcast %cst_121 : f32 to vector<1x1xf32>
      %447 = arith.mulf %446, %445 : vector<1x1xf32>
      %448 = math.exp %447 : vector<1x1xf32>
      %cst_122 = arith.constant 0.899999976 : f32
      %449 = vector.broadcast %cst_122 : f32 to vector<1x1xf32>
      %450 = arith.mulf %449, %448 : vector<1x1xf32>
      %451 = vector.extract %442[0, 0] : f32 from vector<1x1xf32>
      %452 = vector.extract %450[0, 0] : f32 from vector<1x1xf32>
      %cst_123 = arith.constant 2.000000e-01 : f32
      %cst_124 = arith.constant 1.000000e+01 : f32
      %453 = arith.maximumf %cst_123, %452 : f32
      %454 = arith.minimumf %cst_124, %453 : f32
      %cst_125 = arith.constant 1.000000e+00 : f32
      %455 = arith.cmpf ole, %451, %cst_125 : f32
      %456 = arith.addf %arg7, %149 : f32
      %457 = arith.select %455, %456, %arg7 : f32
      %458 = arith.select %455, %376, %arg8 : vector<8x4xf32>
      %459 = arith.select %455, %407, %arg10 : vector<8x4xf32>
      %460 = arith.mulf %149, %454 : f32
      %cst_126 = arith.constant 9.99999997E-7 : f32
      %461 = arith.mulf %cst_126, %73 : f32
      %462 = arith.maximumf %460, %461 : f32
      %c1_i32 = arith.constant 1 : i32
      %463 = arith.addi %arg11, %c1_i32 : i32
      scf.yield %457, %458, %462, %459, %463 : f32, vector<8x4xf32>, f32, vector<8x4xf32>, i32
    }
    %c1_21 = arith.constant 1 : index
    %c0_22 = arith.constant 0 : index
    %c0_23 = arith.constant 0 : index
    %79 = vector.load %arg6[%c1_21, %c0_22, %c0_23] : memref<8x8x4xf32, #tpu.memory_space<vmem>>, vector<1x8x4xf32>
    %80 = vector.shape_cast %79 : vector<1x8x4xf32> to vector<8x4xf32>
    %81 = vector.shape_cast %78#1 : vector<8x4xf32> to vector<1x8x4xf32>
    tpu.vector_store %arg6[%c1_21, %c0_22, %c0_23], %81 {strides = array<i32>} : memref<8x8x4xf32, #tpu.memory_space<vmem>>, vector<1x8x4xf32>,
    %c1_24 = arith.constant 1 : index
    %82 = memref.load %arg0[%c1_24] : memref<8xf32, #tpu.memory_space<smem>>
    %c2 = arith.constant 2 : index
    %83 = memref.load %arg0[%c2] : memref<8xf32, #tpu.memory_space<smem>>
    %84 = arith.subf %83, %82 : f32
    %85 = math.absf %83 : f32
    %cst_25 = arith.constant 1.000000e+00 : f32
    %86 = arith.maximumf %85, %cst_25 : f32
    %cst_26 = arith.constant 1.000000e-10 : f32
    %87 = arith.mulf %cst_26, %86 : f32
    %88 = arith.minimumf %78#2, %84 : f32
    %c0_i32_27 = arith.constant 0 : i32
    %89:5 = scf.while (%arg7 = %82, %arg8 = %78#1, %arg9 = %88, %arg10 = %78#3, %arg11 = %c0_i32_27) : (f32, vector<8x4xf32>, f32, vector<8x4xf32>, i32) -> (f32, vector<8x4xf32>, f32, vector<8x4xf32>, i32) {
      %148 = arith.subf %83, %arg7 : f32
      %149 = arith.cmpf ogt, %148, %87 : f32
      %c1000_i32 = arith.constant 1000 : i32
      %150 = arith.cmpi slt, %arg11, %c1000_i32 : i32
      %151 = arith.andi %149, %150 : i1
      scf.condition(%151) %arg7, %arg8, %arg9, %arg10, %arg11 : f32, vector<8x4xf32>, f32, vector<8x4xf32>, i32
    } do {
    ^bb0(%arg7: f32, %arg8: vector<8x4xf32>, %arg9: f32, %arg10: vector<8x4xf32>, %arg11: i32):
      %148 = arith.subf %83, %arg7 : f32
      %149 = arith.minimumf %arg9, %148 : f32
      %150 = vector.broadcast %149 : f32 to vector<8x4xf32>
      %151 = arith.mulf %150, %arg10 : vector<8x4xf32>
      %cst_66 = arith.constant 2.000000e-01 : f32
      %152 = vector.broadcast %cst_66 : f32 to vector<8x4xf32>
      %153 = arith.mulf %152, %151 : vector<8x4xf32>
      %154 = arith.addf %arg8, %153 : vector<8x4xf32>
      %155 = vector.extract_strided_slice %154 {offsets = [0, 0], sizes = [8, 1], strides = [1, 1]} : vector<8x4xf32> to vector<8x1xf32>
      %156 = vector.broadcast %155 : vector<8x1xf32> to vector<8x32xf32>
      %157 = arith.mulf %156, %11 : vector<8x32xf32>
      %158 = vector.extract_strided_slice %154 {offsets = [0, 1], sizes = [8, 1], strides = [1, 1]} : vector<8x4xf32> to vector<8x1xf32>
      %159 = vector.broadcast %158 : vector<8x1xf32> to vector<8x32xf32>
      %160 = arith.mulf %159, %14 : vector<8x32xf32>
      %161 = vector.extract_strided_slice %154 {offsets = [0, 2], sizes = [8, 1], strides = [1, 1]} : vector<8x4xf32> to vector<8x1xf32>
      %162 = vector.broadcast %161 : vector<8x1xf32> to vector<8x32xf32>
      %163 = arith.mulf %162, %17 : vector<8x32xf32>
      %164 = vector.extract_strided_slice %154 {offsets = [0, 3], sizes = [8, 1], strides = [1, 1]} : vector<8x4xf32> to vector<8x1xf32>
      %165 = vector.broadcast %164 : vector<8x1xf32> to vector<8x32xf32>
      %166 = arith.mulf %165, %20 : vector<8x32xf32>
      %167 = arith.addf %5, %157 : vector<8x32xf32>
      %168 = arith.addf %160, %163 : vector<8x32xf32>
      %169 = arith.addf %167, %168 : vector<8x32xf32>
      %170 = arith.addf %169, %166 : vector<8x32xf32>
      %171 = math.tanh %170 : vector<8x32xf32>
      %172 = arith.mulf %171, %23 : vector<8x32xf32>
      %cst_67 = arith.constant dense<0.000000e+00> : vector<8xf32>
      %173 = vector.multi_reduction <add>, %172, %cst_67 [1] : vector<8x32xf32> to vector<8xf32>
      %174 = vector.shape_cast %173 : vector<8xf32> to vector<8x1xf32>
      %175 = arith.mulf %171, %26 : vector<8x32xf32>
      %cst_68 = arith.constant dense<0.000000e+00> : vector<8xf32>
      %176 = vector.multi_reduction <add>, %175, %cst_68 [1] : vector<8x32xf32> to vector<8xf32>
      %177 = vector.shape_cast %176 : vector<8xf32> to vector<8x1xf32>
      %178 = arith.mulf %171, %29 : vector<8x32xf32>
      %cst_69 = arith.constant dense<0.000000e+00> : vector<8xf32>
      %179 = vector.multi_reduction <add>, %178, %cst_69 [1] : vector<8x32xf32> to vector<8xf32>
      %180 = vector.shape_cast %179 : vector<8xf32> to vector<8x1xf32>
      %181 = arith.mulf %171, %32 : vector<8x32xf32>
      %cst_70 = arith.constant dense<0.000000e+00> : vector<8xf32>
      %182 = vector.multi_reduction <add>, %181, %cst_70 [1] : vector<8x32xf32> to vector<8xf32>
      %183 = vector.shape_cast %182 : vector<8xf32> to vector<8x1xf32>
      %184 = tpu.concatenate %174, %177, %180, %183 in 1 : vector<8x1xf32>, vector<8x1xf32>, vector<8x1xf32>, vector<8x1xf32> -> vector<8x4xf32>
      %185 = arith.addf %184, %8 : vector<8x4xf32>
      %186 = vector.broadcast %149 : f32 to vector<8x4xf32>
      %187 = arith.mulf %186, %185 : vector<8x4xf32>
      %cst_71 = arith.constant 7.500000e-02 : f32
      %188 = vector.broadcast %cst_71 : f32 to vector<8x4xf32>
      %189 = arith.mulf %188, %151 : vector<8x4xf32>
      %cst_72 = arith.constant 2.250000e-01 : f32
      %190 = vector.broadcast %cst_72 : f32 to vector<8x4xf32>
      %191 = arith.mulf %190, %187 : vector<8x4xf32>
      %192 = arith.addf %189, %191 : vector<8x4xf32>
      %193 = arith.addf %arg8, %192 : vector<8x4xf32>
      %194 = vector.extract_strided_slice %193 {offsets = [0, 0], sizes = [8, 1], strides = [1, 1]} : vector<8x4xf32> to vector<8x1xf32>
      %195 = vector.broadcast %194 : vector<8x1xf32> to vector<8x32xf32>
      %196 = arith.mulf %195, %11 : vector<8x32xf32>
      %197 = vector.extract_strided_slice %193 {offsets = [0, 1], sizes = [8, 1], strides = [1, 1]} : vector<8x4xf32> to vector<8x1xf32>
      %198 = vector.broadcast %197 : vector<8x1xf32> to vector<8x32xf32>
      %199 = arith.mulf %198, %14 : vector<8x32xf32>
      %200 = vector.extract_strided_slice %193 {offsets = [0, 2], sizes = [8, 1], strides = [1, 1]} : vector<8x4xf32> to vector<8x1xf32>
      %201 = vector.broadcast %200 : vector<8x1xf32> to vector<8x32xf32>
      %202 = arith.mulf %201, %17 : vector<8x32xf32>
      %203 = vector.extract_strided_slice %193 {offsets = [0, 3], sizes = [8, 1], strides = [1, 1]} : vector<8x4xf32> to vector<8x1xf32>
      %204 = vector.broadcast %203 : vector<8x1xf32> to vector<8x32xf32>
      %205 = arith.mulf %204, %20 : vector<8x32xf32>
      %206 = arith.addf %5, %196 : vector<8x32xf32>
      %207 = arith.addf %199, %202 : vector<8x32xf32>
      %208 = arith.addf %206, %207 : vector<8x32xf32>
      %209 = arith.addf %208, %205 : vector<8x32xf32>
      %210 = math.tanh %209 : vector<8x32xf32>
      %211 = arith.mulf %210, %23 : vector<8x32xf32>
      %cst_73 = arith.constant dense<0.000000e+00> : vector<8xf32>
      %212 = vector.multi_reduction <add>, %211, %cst_73 [1] : vector<8x32xf32> to vector<8xf32>
      %213 = vector.shape_cast %212 : vector<8xf32> to vector<8x1xf32>
      %214 = arith.mulf %210, %26 : vector<8x32xf32>
      %cst_74 = arith.constant dense<0.000000e+00> : vector<8xf32>
      %215 = vector.multi_reduction <add>, %214, %cst_74 [1] : vector<8x32xf32> to vector<8xf32>
      %216 = vector.shape_cast %215 : vector<8xf32> to vector<8x1xf32>
      %217 = arith.mulf %210, %29 : vector<8x32xf32>
      %cst_75 = arith.constant dense<0.000000e+00> : vector<8xf32>
      %218 = vector.multi_reduction <add>, %217, %cst_75 [1] : vector<8x32xf32> to vector<8xf32>
      %219 = vector.shape_cast %218 : vector<8xf32> to vector<8x1xf32>
      %220 = arith.mulf %210, %32 : vector<8x32xf32>
      %cst_76 = arith.constant dense<0.000000e+00> : vector<8xf32>
      %221 = vector.multi_reduction <add>, %220, %cst_76 [1] : vector<8x32xf32> to vector<8xf32>
      %222 = vector.shape_cast %221 : vector<8xf32> to vector<8x1xf32>
      %223 = tpu.concatenate %213, %216, %219, %222 in 1 : vector<8x1xf32>, vector<8x1xf32>, vector<8x1xf32>, vector<8x1xf32> -> vector<8x4xf32>
      %224 = arith.addf %223, %8 : vector<8x4xf32>
      %225 = vector.broadcast %149 : f32 to vector<8x4xf32>
      %226 = arith.mulf %225, %224 : vector<8x4xf32>
      %cst_77 = arith.constant 0.977777779 : f32
      %227 = vector.broadcast %cst_77 : f32 to vector<8x4xf32>
      %228 = arith.mulf %227, %151 : vector<8x4xf32>
      %229 = arith.addf %arg8, %228 : vector<8x4xf32>
      %cst_78 = arith.constant -3.73333335 : f32
      %230 = vector.broadcast %cst_78 : f32 to vector<8x4xf32>
      %231 = arith.mulf %230, %187 : vector<8x4xf32>
      %cst_79 = arith.constant 3.55555558 : f32
      %232 = vector.broadcast %cst_79 : f32 to vector<8x4xf32>
      %233 = arith.mulf %232, %226 : vector<8x4xf32>
      %234 = arith.addf %231, %233 : vector<8x4xf32>
      %235 = arith.addf %229, %234 : vector<8x4xf32>
      %236 = vector.extract_strided_slice %235 {offsets = [0, 0], sizes = [8, 1], strides = [1, 1]} : vector<8x4xf32> to vector<8x1xf32>
      %237 = vector.broadcast %236 : vector<8x1xf32> to vector<8x32xf32>
      %238 = arith.mulf %237, %11 : vector<8x32xf32>
      %239 = vector.extract_strided_slice %235 {offsets = [0, 1], sizes = [8, 1], strides = [1, 1]} : vector<8x4xf32> to vector<8x1xf32>
      %240 = vector.broadcast %239 : vector<8x1xf32> to vector<8x32xf32>
      %241 = arith.mulf %240, %14 : vector<8x32xf32>
      %242 = vector.extract_strided_slice %235 {offsets = [0, 2], sizes = [8, 1], strides = [1, 1]} : vector<8x4xf32> to vector<8x1xf32>
      %243 = vector.broadcast %242 : vector<8x1xf32> to vector<8x32xf32>
      %244 = arith.mulf %243, %17 : vector<8x32xf32>
      %245 = vector.extract_strided_slice %235 {offsets = [0, 3], sizes = [8, 1], strides = [1, 1]} : vector<8x4xf32> to vector<8x1xf32>
      %246 = vector.broadcast %245 : vector<8x1xf32> to vector<8x32xf32>
      %247 = arith.mulf %246, %20 : vector<8x32xf32>
      %248 = arith.addf %5, %238 : vector<8x32xf32>
      %249 = arith.addf %241, %244 : vector<8x32xf32>
      %250 = arith.addf %248, %249 : vector<8x32xf32>
      %251 = arith.addf %250, %247 : vector<8x32xf32>
      %252 = math.tanh %251 : vector<8x32xf32>
      %253 = arith.mulf %252, %23 : vector<8x32xf32>
      %cst_80 = arith.constant dense<0.000000e+00> : vector<8xf32>
      %254 = vector.multi_reduction <add>, %253, %cst_80 [1] : vector<8x32xf32> to vector<8xf32>
      %255 = vector.shape_cast %254 : vector<8xf32> to vector<8x1xf32>
      %256 = arith.mulf %252, %26 : vector<8x32xf32>
      %cst_81 = arith.constant dense<0.000000e+00> : vector<8xf32>
      %257 = vector.multi_reduction <add>, %256, %cst_81 [1] : vector<8x32xf32> to vector<8xf32>
      %258 = vector.shape_cast %257 : vector<8xf32> to vector<8x1xf32>
      %259 = arith.mulf %252, %29 : vector<8x32xf32>
      %cst_82 = arith.constant dense<0.000000e+00> : vector<8xf32>
      %260 = vector.multi_reduction <add>, %259, %cst_82 [1] : vector<8x32xf32> to vector<8xf32>
      %261 = vector.shape_cast %260 : vector<8xf32> to vector<8x1xf32>
      %262 = arith.mulf %252, %32 : vector<8x32xf32>
      %cst_83 = arith.constant dense<0.000000e+00> : vector<8xf32>
      %263 = vector.multi_reduction <add>, %262, %cst_83 [1] : vector<8x32xf32> to vector<8xf32>
      %264 = vector.shape_cast %263 : vector<8xf32> to vector<8x1xf32>
      %265 = tpu.concatenate %255, %258, %261, %264 in 1 : vector<8x1xf32>, vector<8x1xf32>, vector<8x1xf32>, vector<8x1xf32> -> vector<8x4xf32>
      %266 = arith.addf %265, %8 : vector<8x4xf32>
      %267 = vector.broadcast %149 : f32 to vector<8x4xf32>
      %268 = arith.mulf %267, %266 : vector<8x4xf32>
      %cst_84 = arith.constant 2.95259857 : f32
      %269 = vector.broadcast %cst_84 : f32 to vector<8x4xf32>
      %270 = arith.mulf %269, %151 : vector<8x4xf32>
      %271 = arith.addf %arg8, %270 : vector<8x4xf32>
      %cst_85 = arith.constant -11.5957937 : f32
      %272 = vector.broadcast %cst_85 : f32 to vector<8x4xf32>
      %273 = arith.mulf %272, %187 : vector<8x4xf32>
      %cst_86 = arith.constant 9.82289314 : f32
      %274 = vector.broadcast %cst_86 : f32 to vector<8x4xf32>
      %275 = arith.mulf %274, %226 : vector<8x4xf32>
      %276 = arith.addf %273, %275 : vector<8x4xf32>
      %cst_87 = arith.constant -0.290809333 : f32
      %277 = vector.broadcast %cst_87 : f32 to vector<8x4xf32>
      %278 = arith.mulf %277, %268 : vector<8x4xf32>
      %279 = arith.addf %276, %278 : vector<8x4xf32>
      %280 = arith.addf %271, %279 : vector<8x4xf32>
      %281 = vector.extract_strided_slice %280 {offsets = [0, 0], sizes = [8, 1], strides = [1, 1]} : vector<8x4xf32> to vector<8x1xf32>
      %282 = vector.broadcast %281 : vector<8x1xf32> to vector<8x32xf32>
      %283 = arith.mulf %282, %11 : vector<8x32xf32>
      %284 = vector.extract_strided_slice %280 {offsets = [0, 1], sizes = [8, 1], strides = [1, 1]} : vector<8x4xf32> to vector<8x1xf32>
      %285 = vector.broadcast %284 : vector<8x1xf32> to vector<8x32xf32>
      %286 = arith.mulf %285, %14 : vector<8x32xf32>
      %287 = vector.extract_strided_slice %280 {offsets = [0, 2], sizes = [8, 1], strides = [1, 1]} : vector<8x4xf32> to vector<8x1xf32>
      %288 = vector.broadcast %287 : vector<8x1xf32> to vector<8x32xf32>
      %289 = arith.mulf %288, %17 : vector<8x32xf32>
      %290 = vector.extract_strided_slice %280 {offsets = [0, 3], sizes = [8, 1], strides = [1, 1]} : vector<8x4xf32> to vector<8x1xf32>
      %291 = vector.broadcast %290 : vector<8x1xf32> to vector<8x32xf32>
      %292 = arith.mulf %291, %20 : vector<8x32xf32>
      %293 = arith.addf %5, %283 : vector<8x32xf32>
      %294 = arith.addf %286, %289 : vector<8x32xf32>
      %295 = arith.addf %293, %294 : vector<8x32xf32>
      %296 = arith.addf %295, %292 : vector<8x32xf32>
      %297 = math.tanh %296 : vector<8x32xf32>
      %298 = arith.mulf %297, %23 : vector<8x32xf32>
      %cst_88 = arith.constant dense<0.000000e+00> : vector<8xf32>
      %299 = vector.multi_reduction <add>, %298, %cst_88 [1] : vector<8x32xf32> to vector<8xf32>
      %300 = vector.shape_cast %299 : vector<8xf32> to vector<8x1xf32>
      %301 = arith.mulf %297, %26 : vector<8x32xf32>
      %cst_89 = arith.constant dense<0.000000e+00> : vector<8xf32>
      %302 = vector.multi_reduction <add>, %301, %cst_89 [1] : vector<8x32xf32> to vector<8xf32>
      %303 = vector.shape_cast %302 : vector<8xf32> to vector<8x1xf32>
      %304 = arith.mulf %297, %29 : vector<8x32xf32>
      %cst_90 = arith.constant dense<0.000000e+00> : vector<8xf32>
      %305 = vector.multi_reduction <add>, %304, %cst_90 [1] : vector<8x32xf32> to vector<8xf32>
      %306 = vector.shape_cast %305 : vector<8xf32> to vector<8x1xf32>
      %307 = arith.mulf %297, %32 : vector<8x32xf32>
      %cst_91 = arith.constant dense<0.000000e+00> : vector<8xf32>
      %308 = vector.multi_reduction <add>, %307, %cst_91 [1] : vector<8x32xf32> to vector<8xf32>
      %309 = vector.shape_cast %308 : vector<8xf32> to vector<8x1xf32>
      %310 = tpu.concatenate %300, %303, %306, %309 in 1 : vector<8x1xf32>, vector<8x1xf32>, vector<8x1xf32>, vector<8x1xf32> -> vector<8x4xf32>
      %311 = arith.addf %310, %8 : vector<8x4xf32>
      %312 = vector.broadcast %149 : f32 to vector<8x4xf32>
      %313 = arith.mulf %312, %311 : vector<8x4xf32>
      %cst_92 = arith.constant 2.84627533 : f32
      %314 = vector.broadcast %cst_92 : f32 to vector<8x4xf32>
      %315 = arith.mulf %314, %151 : vector<8x4xf32>
      %316 = arith.addf %arg8, %315 : vector<8x4xf32>
      %cst_93 = arith.constant -10.757576 : f32
      %317 = vector.broadcast %cst_93 : f32 to vector<8x4xf32>
      %318 = arith.mulf %317, %187 : vector<8x4xf32>
      %cst_94 = arith.constant 8.90642261 : f32
      %319 = vector.broadcast %cst_94 : f32 to vector<8x4xf32>
      %320 = arith.mulf %319, %226 : vector<8x4xf32>
      %321 = arith.addf %318, %320 : vector<8x4xf32>
      %322 = arith.addf %316, %321 : vector<8x4xf32>
      %cst_95 = arith.constant 0.278409094 : f32
      %323 = vector.broadcast %cst_95 : f32 to vector<8x4xf32>
      %324 = arith.mulf %323, %268 : vector<8x4xf32>
      %cst_96 = arith.constant -0.273531318 : f32
      %325 = vector.broadcast %cst_96 : f32 to vector<8x4xf32>
      %326 = arith.mulf %325, %313 : vector<8x4xf32>
      %327 = arith.addf %324, %326 : vector<8x4xf32>
      %328 = arith.addf %322, %327 : vector<8x4xf32>
      %329 = vector.extract_strided_slice %328 {offsets = [0, 0], sizes = [8, 1], strides = [1, 1]} : vector<8x4xf32> to vector<8x1xf32>
      %330 = vector.broadcast %329 : vector<8x1xf32> to vector<8x32xf32>
      %331 = arith.mulf %330, %11 : vector<8x32xf32>
      %332 = vector.extract_strided_slice %328 {offsets = [0, 1], sizes = [8, 1], strides = [1, 1]} : vector<8x4xf32> to vector<8x1xf32>
      %333 = vector.broadcast %332 : vector<8x1xf32> to vector<8x32xf32>
      %334 = arith.mulf %333, %14 : vector<8x32xf32>
      %335 = vector.extract_strided_slice %328 {offsets = [0, 2], sizes = [8, 1], strides = [1, 1]} : vector<8x4xf32> to vector<8x1xf32>
      %336 = vector.broadcast %335 : vector<8x1xf32> to vector<8x32xf32>
      %337 = arith.mulf %336, %17 : vector<8x32xf32>
      %338 = vector.extract_strided_slice %328 {offsets = [0, 3], sizes = [8, 1], strides = [1, 1]} : vector<8x4xf32> to vector<8x1xf32>
      %339 = vector.broadcast %338 : vector<8x1xf32> to vector<8x32xf32>
      %340 = arith.mulf %339, %20 : vector<8x32xf32>
      %341 = arith.addf %5, %331 : vector<8x32xf32>
      %342 = arith.addf %334, %337 : vector<8x32xf32>
      %343 = arith.addf %341, %342 : vector<8x32xf32>
      %344 = arith.addf %343, %340 : vector<8x32xf32>
      %345 = math.tanh %344 : vector<8x32xf32>
      %346 = arith.mulf %345, %23 : vector<8x32xf32>
      %cst_97 = arith.constant dense<0.000000e+00> : vector<8xf32>
      %347 = vector.multi_reduction <add>, %346, %cst_97 [1] : vector<8x32xf32> to vector<8xf32>
      %348 = vector.shape_cast %347 : vector<8xf32> to vector<8x1xf32>
      %349 = arith.mulf %345, %26 : vector<8x32xf32>
      %cst_98 = arith.constant dense<0.000000e+00> : vector<8xf32>
      %350 = vector.multi_reduction <add>, %349, %cst_98 [1] : vector<8x32xf32> to vector<8xf32>
      %351 = vector.shape_cast %350 : vector<8xf32> to vector<8x1xf32>
      %352 = arith.mulf %345, %29 : vector<8x32xf32>
      %cst_99 = arith.constant dense<0.000000e+00> : vector<8xf32>
      %353 = vector.multi_reduction <add>, %352, %cst_99 [1] : vector<8x32xf32> to vector<8xf32>
      %354 = vector.shape_cast %353 : vector<8xf32> to vector<8x1xf32>
      %355 = arith.mulf %345, %32 : vector<8x32xf32>
      %cst_100 = arith.constant dense<0.000000e+00> : vector<8xf32>
      %356 = vector.multi_reduction <add>, %355, %cst_100 [1] : vector<8x32xf32> to vector<8xf32>
      %357 = vector.shape_cast %356 : vector<8xf32> to vector<8x1xf32>
      %358 = tpu.concatenate %348, %351, %354, %357 in 1 : vector<8x1xf32>, vector<8x1xf32>, vector<8x1xf32>, vector<8x1xf32> -> vector<8x4xf32>
      %359 = arith.addf %358, %8 : vector<8x4xf32>
      %360 = vector.broadcast %149 : f32 to vector<8x4xf32>
      %361 = arith.mulf %360, %359 : vector<8x4xf32>
      %cst_101 = arith.constant 0.0911458358 : f32
      %362 = vector.broadcast %cst_101 : f32 to vector<8x4xf32>
      %363 = arith.mulf %362, %151 : vector<8x4xf32>
      %364 = arith.addf %arg8, %363 : vector<8x4xf32>
      %cst_102 = arith.constant 0.449236304 : f32
      %365 = vector.broadcast %cst_102 : f32 to vector<8x4xf32>
      %366 = arith.mulf %365, %226 : vector<8x4xf32>
      %cst_103 = arith.constant 0.651041686 : f32
      %367 = vector.broadcast %cst_103 : f32 to vector<8x4xf32>
      %368 = arith.mulf %367, %268 : vector<8x4xf32>
      %369 = arith.addf %366, %368 : vector<8x4xf32>
      %370 = arith.addf %364, %369 : vector<8x4xf32>
      %cst_104 = arith.constant -0.322376192 : f32
      %371 = vector.broadcast %cst_104 : f32 to vector<8x4xf32>
      %372 = arith.mulf %371, %313 : vector<8x4xf32>
      %cst_105 = arith.constant 0.130952388 : f32
      %373 = vector.broadcast %cst_105 : f32 to vector<8x4xf32>
      %374 = arith.mulf %373, %361 : vector<8x4xf32>
      %375 = arith.addf %372, %374 : vector<8x4xf32>
      %376 = arith.addf %370, %375 : vector<8x4xf32>
      %377 = vector.extract_strided_slice %376 {offsets = [0, 0], sizes = [8, 1], strides = [1, 1]} : vector<8x4xf32> to vector<8x1xf32>
      %378 = vector.broadcast %377 : vector<8x1xf32> to vector<8x32xf32>
      %379 = arith.mulf %378, %11 : vector<8x32xf32>
      %380 = vector.extract_strided_slice %376 {offsets = [0, 1], sizes = [8, 1], strides = [1, 1]} : vector<8x4xf32> to vector<8x1xf32>
      %381 = vector.broadcast %380 : vector<8x1xf32> to vector<8x32xf32>
      %382 = arith.mulf %381, %14 : vector<8x32xf32>
      %383 = vector.extract_strided_slice %376 {offsets = [0, 2], sizes = [8, 1], strides = [1, 1]} : vector<8x4xf32> to vector<8x1xf32>
      %384 = vector.broadcast %383 : vector<8x1xf32> to vector<8x32xf32>
      %385 = arith.mulf %384, %17 : vector<8x32xf32>
      %386 = vector.extract_strided_slice %376 {offsets = [0, 3], sizes = [8, 1], strides = [1, 1]} : vector<8x4xf32> to vector<8x1xf32>
      %387 = vector.broadcast %386 : vector<8x1xf32> to vector<8x32xf32>
      %388 = arith.mulf %387, %20 : vector<8x32xf32>
      %389 = arith.addf %5, %379 : vector<8x32xf32>
      %390 = arith.addf %382, %385 : vector<8x32xf32>
      %391 = arith.addf %389, %390 : vector<8x32xf32>
      %392 = arith.addf %391, %388 : vector<8x32xf32>
      %393 = math.tanh %392 : vector<8x32xf32>
      %394 = arith.mulf %393, %23 : vector<8x32xf32>
      %cst_106 = arith.constant dense<0.000000e+00> : vector<8xf32>
      %395 = vector.multi_reduction <add>, %394, %cst_106 [1] : vector<8x32xf32> to vector<8xf32>
      %396 = vector.shape_cast %395 : vector<8xf32> to vector<8x1xf32>
      %397 = arith.mulf %393, %26 : vector<8x32xf32>
      %cst_107 = arith.constant dense<0.000000e+00> : vector<8xf32>
      %398 = vector.multi_reduction <add>, %397, %cst_107 [1] : vector<8x32xf32> to vector<8xf32>
      %399 = vector.shape_cast %398 : vector<8xf32> to vector<8x1xf32>
      %400 = arith.mulf %393, %29 : vector<8x32xf32>
      %cst_108 = arith.constant dense<0.000000e+00> : vector<8xf32>
      %401 = vector.multi_reduction <add>, %400, %cst_108 [1] : vector<8x32xf32> to vector<8xf32>
      %402 = vector.shape_cast %401 : vector<8xf32> to vector<8x1xf32>
      %403 = arith.mulf %393, %32 : vector<8x32xf32>
      %cst_109 = arith.constant dense<0.000000e+00> : vector<8xf32>
      %404 = vector.multi_reduction <add>, %403, %cst_109 [1] : vector<8x32xf32> to vector<8xf32>
      %405 = vector.shape_cast %404 : vector<8xf32> to vector<8x1xf32>
      %406 = tpu.concatenate %396, %399, %402, %405 in 1 : vector<8x1xf32>, vector<8x1xf32>, vector<8x1xf32>, vector<8x1xf32> -> vector<8x4xf32>
      %407 = arith.addf %406, %8 : vector<8x4xf32>
      %408 = vector.broadcast %149 : f32 to vector<8x4xf32>
      %409 = arith.mulf %408, %407 : vector<8x4xf32>
      %cst_110 = arith.constant 0.00123263884 : f32
      %410 = vector.broadcast %cst_110 : f32 to vector<8x4xf32>
      %411 = arith.mulf %410, %151 : vector<8x4xf32>
      %cst_111 = arith.constant -0.00425277045 : f32
      %412 = vector.broadcast %cst_111 : f32 to vector<8x4xf32>
      %413 = arith.mulf %412, %226 : vector<8x4xf32>
      %414 = arith.addf %411, %413 : vector<8x4xf32>
      %cst_112 = arith.constant 0.0369791649 : f32
      %415 = vector.broadcast %cst_112 : f32 to vector<8x4xf32>
      %416 = arith.mulf %415, %268 : vector<8x4xf32>
      %cst_113 = arith.constant -5.086380e-02 : f32
      %417 = vector.broadcast %cst_113 : f32 to vector<8x4xf32>
      %418 = arith.mulf %417, %313 : vector<8x4xf32>
      %419 = arith.addf %416, %418 : vector<8x4xf32>
      %420 = arith.addf %414, %419 : vector<8x4xf32>
      %cst_114 = arith.constant 0.0419047624 : f32
      %421 = vector.broadcast %cst_114 : f32 to vector<8x4xf32>
      %422 = arith.mulf %421, %361 : vector<8x4xf32>
      %cst_115 = arith.constant -2.500000e-02 : f32
      %423 = vector.broadcast %cst_115 : f32 to vector<8x4xf32>
      %424 = arith.mulf %423, %409 : vector<8x4xf32>
      %425 = arith.addf %422, %424 : vector<8x4xf32>
      %426 = arith.addf %420, %425 : vector<8x4xf32>
      %427 = math.absf %arg8 : vector<8x4xf32>
      %428 = math.absf %376 : vector<8x4xf32>
      %429 = arith.maximumf %427, %428 : vector<8x4xf32>
      %cst_116 = arith.constant 9.99999997E-7 : f32
      %430 = vector.broadcast %cst_116 : f32 to vector<8x4xf32>
      %431 = arith.mulf %430, %429 : vector<8x4xf32>
      %cst_117 = arith.constant 1.000000e-07 : f32
      %432 = vector.broadcast %cst_117 : f32 to vector<8x4xf32>
      %433 = arith.addf %432, %431 : vector<8x4xf32>
      %434 = arith.divf %426, %433 : vector<8x4xf32>
      %435 = arith.mulf %434, %434 : vector<8x4xf32>
      %436 = vector.shape_cast %435 : vector<8x4xf32> to vector<1x8x4xf32>
      %cst_118 = arith.constant dense<0.000000e+00> : vector<1xf32>
      %437 = vector.multi_reduction <add>, %436, %cst_118 [1, 2] : vector<1x8x4xf32> to vector<1xf32>
      %438 = vector.shape_cast %437 : vector<1xf32> to vector<1x1x1xf32>
      %439 = vector.extract %438[0, 0, 0] : f32 from vector<1x1x1xf32>
      %440 = vector.broadcast %439 : f32 to vector<1x1xf32>
      %cst_119 = arith.constant 3.125000e-02 : f32
      %441 = vector.broadcast %cst_119 : f32 to vector<1x1xf32>
      %442 = arith.mulf %440, %441 : vector<1x1xf32>
      %cst_120 = arith.constant 1.000000e-24 : f32
      %443 = vector.broadcast %cst_120 : f32 to vector<1x1xf32>
      %444 = arith.addf %442, %443 : vector<1x1xf32>
      %445 = math.log %444 : vector<1x1xf32>
      %cst_121 = arith.constant -1.000000e-01 : f32
      %446 = vector.broadcast %cst_121 : f32 to vector<1x1xf32>
      %447 = arith.mulf %446, %445 : vector<1x1xf32>
      %448 = math.exp %447 : vector<1x1xf32>
      %cst_122 = arith.constant 0.899999976 : f32
      %449 = vector.broadcast %cst_122 : f32 to vector<1x1xf32>
      %450 = arith.mulf %449, %448 : vector<1x1xf32>
      %451 = vector.extract %442[0, 0] : f32 from vector<1x1xf32>
      %452 = vector.extract %450[0, 0] : f32 from vector<1x1xf32>
      %cst_123 = arith.constant 2.000000e-01 : f32
      %cst_124 = arith.constant 1.000000e+01 : f32
      %453 = arith.maximumf %cst_123, %452 : f32
      %454 = arith.minimumf %cst_124, %453 : f32
      %cst_125 = arith.constant 1.000000e+00 : f32
      %455 = arith.cmpf ole, %451, %cst_125 : f32
      %456 = arith.addf %arg7, %149 : f32
      %457 = arith.select %455, %456, %arg7 : f32
      %458 = arith.select %455, %376, %arg8 : vector<8x4xf32>
      %459 = arith.select %455, %407, %arg10 : vector<8x4xf32>
      %460 = arith.mulf %149, %454 : f32
      %cst_126 = arith.constant 9.99999997E-7 : f32
      %461 = arith.mulf %cst_126, %84 : f32
      %462 = arith.maximumf %460, %461 : f32
      %c1_i32 = arith.constant 1 : i32
      %463 = arith.addi %arg11, %c1_i32 : i32
      scf.yield %457, %458, %462, %459, %463 : f32, vector<8x4xf32>, f32, vector<8x4xf32>, i32
    }
    %c2_28 = arith.constant 2 : index
    %c0_29 = arith.constant 0 : index
    %c0_30 = arith.constant 0 : index
    %90 = vector.load %arg6[%c2_28, %c0_29, %c0_30] : memref<8x8x4xf32, #tpu.memory_space<vmem>>, vector<1x8x4xf32>
    %91 = vector.shape_cast %90 : vector<1x8x4xf32> to vector<8x4xf32>
    %92 = vector.shape_cast %89#1 : vector<8x4xf32> to vector<1x8x4xf32>
    tpu.vector_store %arg6[%c2_28, %c0_29, %c0_30], %92 {strides = array<i32>} : memref<8x8x4xf32, #tpu.memory_space<vmem>>, vector<1x8x4xf32>,
    %c2_31 = arith.constant 2 : index
    %93 = memref.load %arg0[%c2_31] : memref<8xf32, #tpu.memory_space<smem>>
    %c3 = arith.constant 3 : index
    %94 = memref.load %arg0[%c3] : memref<8xf32, #tpu.memory_space<smem>>
    %95 = arith.subf %94, %93 : f32
    %96 = math.absf %94 : f32
    %cst_32 = arith.constant 1.000000e+00 : f32
    %97 = arith.maximumf %96, %cst_32 : f32
    %cst_33 = arith.constant 1.000000e-10 : f32
    %98 = arith.mulf %cst_33, %97 : f32
    %99 = arith.minimumf %89#2, %95 : f32
    %c0_i32_34 = arith.constant 0 : i32
    %100:5 = scf.while (%arg7 = %93, %arg8 = %89#1, %arg9 = %99, %arg10 = %89#3, %arg11 = %c0_i32_34) : (f32, vector<8x4xf32>, f32, vector<8x4xf32>, i32) -> (f32, vector<8x4xf32>, f32, vector<8x4xf32>, i32) {
      %148 = arith.subf %94, %arg7 : f32
      %149 = arith.cmpf ogt, %148, %98 : f32
      %c1000_i32 = arith.constant 1000 : i32
      %150 = arith.cmpi slt, %arg11, %c1000_i32 : i32
      %151 = arith.andi %149, %150 : i1
      scf.condition(%151) %arg7, %arg8, %arg9, %arg10, %arg11 : f32, vector<8x4xf32>, f32, vector<8x4xf32>, i32
    } do {
    ^bb0(%arg7: f32, %arg8: vector<8x4xf32>, %arg9: f32, %arg10: vector<8x4xf32>, %arg11: i32):
      %148 = arith.subf %94, %arg7 : f32
      %149 = arith.minimumf %arg9, %148 : f32
      %150 = vector.broadcast %149 : f32 to vector<8x4xf32>
      %151 = arith.mulf %150, %arg10 : vector<8x4xf32>
      %cst_66 = arith.constant 2.000000e-01 : f32
      %152 = vector.broadcast %cst_66 : f32 to vector<8x4xf32>
      %153 = arith.mulf %152, %151 : vector<8x4xf32>
      %154 = arith.addf %arg8, %153 : vector<8x4xf32>
      %155 = vector.extract_strided_slice %154 {offsets = [0, 0], sizes = [8, 1], strides = [1, 1]} : vector<8x4xf32> to vector<8x1xf32>
      %156 = vector.broadcast %155 : vector<8x1xf32> to vector<8x32xf32>
      %157 = arith.mulf %156, %11 : vector<8x32xf32>
      %158 = vector.extract_strided_slice %154 {offsets = [0, 1], sizes = [8, 1], strides = [1, 1]} : vector<8x4xf32> to vector<8x1xf32>
      %159 = vector.broadcast %158 : vector<8x1xf32> to vector<8x32xf32>
      %160 = arith.mulf %159, %14 : vector<8x32xf32>
      %161 = vector.extract_strided_slice %154 {offsets = [0, 2], sizes = [8, 1], strides = [1, 1]} : vector<8x4xf32> to vector<8x1xf32>
      %162 = vector.broadcast %161 : vector<8x1xf32> to vector<8x32xf32>
      %163 = arith.mulf %162, %17 : vector<8x32xf32>
      %164 = vector.extract_strided_slice %154 {offsets = [0, 3], sizes = [8, 1], strides = [1, 1]} : vector<8x4xf32> to vector<8x1xf32>
      %165 = vector.broadcast %164 : vector<8x1xf32> to vector<8x32xf32>
      %166 = arith.mulf %165, %20 : vector<8x32xf32>
      %167 = arith.addf %5, %157 : vector<8x32xf32>
      %168 = arith.addf %160, %163 : vector<8x32xf32>
      %169 = arith.addf %167, %168 : vector<8x32xf32>
      %170 = arith.addf %169, %166 : vector<8x32xf32>
      %171 = math.tanh %170 : vector<8x32xf32>
      %172 = arith.mulf %171, %23 : vector<8x32xf32>
      %cst_67 = arith.constant dense<0.000000e+00> : vector<8xf32>
      %173 = vector.multi_reduction <add>, %172, %cst_67 [1] : vector<8x32xf32> to vector<8xf32>
      %174 = vector.shape_cast %173 : vector<8xf32> to vector<8x1xf32>
      %175 = arith.mulf %171, %26 : vector<8x32xf32>
      %cst_68 = arith.constant dense<0.000000e+00> : vector<8xf32>
      %176 = vector.multi_reduction <add>, %175, %cst_68 [1] : vector<8x32xf32> to vector<8xf32>
      %177 = vector.shape_cast %176 : vector<8xf32> to vector<8x1xf32>
      %178 = arith.mulf %171, %29 : vector<8x32xf32>
      %cst_69 = arith.constant dense<0.000000e+00> : vector<8xf32>
      %179 = vector.multi_reduction <add>, %178, %cst_69 [1] : vector<8x32xf32> to vector<8xf32>
      %180 = vector.shape_cast %179 : vector<8xf32> to vector<8x1xf32>
      %181 = arith.mulf %171, %32 : vector<8x32xf32>
      %cst_70 = arith.constant dense<0.000000e+00> : vector<8xf32>
      %182 = vector.multi_reduction <add>, %181, %cst_70 [1] : vector<8x32xf32> to vector<8xf32>
      %183 = vector.shape_cast %182 : vector<8xf32> to vector<8x1xf32>
      %184 = tpu.concatenate %174, %177, %180, %183 in 1 : vector<8x1xf32>, vector<8x1xf32>, vector<8x1xf32>, vector<8x1xf32> -> vector<8x4xf32>
      %185 = arith.addf %184, %8 : vector<8x4xf32>
      %186 = vector.broadcast %149 : f32 to vector<8x4xf32>
      %187 = arith.mulf %186, %185 : vector<8x4xf32>
      %cst_71 = arith.constant 7.500000e-02 : f32
      %188 = vector.broadcast %cst_71 : f32 to vector<8x4xf32>
      %189 = arith.mulf %188, %151 : vector<8x4xf32>
      %cst_72 = arith.constant 2.250000e-01 : f32
      %190 = vector.broadcast %cst_72 : f32 to vector<8x4xf32>
      %191 = arith.mulf %190, %187 : vector<8x4xf32>
      %192 = arith.addf %189, %191 : vector<8x4xf32>
      %193 = arith.addf %arg8, %192 : vector<8x4xf32>
      %194 = vector.extract_strided_slice %193 {offsets = [0, 0], sizes = [8, 1], strides = [1, 1]} : vector<8x4xf32> to vector<8x1xf32>
      %195 = vector.broadcast %194 : vector<8x1xf32> to vector<8x32xf32>
      %196 = arith.mulf %195, %11 : vector<8x32xf32>
      %197 = vector.extract_strided_slice %193 {offsets = [0, 1], sizes = [8, 1], strides = [1, 1]} : vector<8x4xf32> to vector<8x1xf32>
      %198 = vector.broadcast %197 : vector<8x1xf32> to vector<8x32xf32>
      %199 = arith.mulf %198, %14 : vector<8x32xf32>
      %200 = vector.extract_strided_slice %193 {offsets = [0, 2], sizes = [8, 1], strides = [1, 1]} : vector<8x4xf32> to vector<8x1xf32>
      %201 = vector.broadcast %200 : vector<8x1xf32> to vector<8x32xf32>
      %202 = arith.mulf %201, %17 : vector<8x32xf32>
      %203 = vector.extract_strided_slice %193 {offsets = [0, 3], sizes = [8, 1], strides = [1, 1]} : vector<8x4xf32> to vector<8x1xf32>
      %204 = vector.broadcast %203 : vector<8x1xf32> to vector<8x32xf32>
      %205 = arith.mulf %204, %20 : vector<8x32xf32>
      %206 = arith.addf %5, %196 : vector<8x32xf32>
      %207 = arith.addf %199, %202 : vector<8x32xf32>
      %208 = arith.addf %206, %207 : vector<8x32xf32>
      %209 = arith.addf %208, %205 : vector<8x32xf32>
      %210 = math.tanh %209 : vector<8x32xf32>
      %211 = arith.mulf %210, %23 : vector<8x32xf32>
      %cst_73 = arith.constant dense<0.000000e+00> : vector<8xf32>
      %212 = vector.multi_reduction <add>, %211, %cst_73 [1] : vector<8x32xf32> to vector<8xf32>
      %213 = vector.shape_cast %212 : vector<8xf32> to vector<8x1xf32>
      %214 = arith.mulf %210, %26 : vector<8x32xf32>
      %cst_74 = arith.constant dense<0.000000e+00> : vector<8xf32>
      %215 = vector.multi_reduction <add>, %214, %cst_74 [1] : vector<8x32xf32> to vector<8xf32>
      %216 = vector.shape_cast %215 : vector<8xf32> to vector<8x1xf32>
      %217 = arith.mulf %210, %29 : vector<8x32xf32>
      %cst_75 = arith.constant dense<0.000000e+00> : vector<8xf32>
      %218 = vector.multi_reduction <add>, %217, %cst_75 [1] : vector<8x32xf32> to vector<8xf32>
      %219 = vector.shape_cast %218 : vector<8xf32> to vector<8x1xf32>
      %220 = arith.mulf %210, %32 : vector<8x32xf32>
      %cst_76 = arith.constant dense<0.000000e+00> : vector<8xf32>
      %221 = vector.multi_reduction <add>, %220, %cst_76 [1] : vector<8x32xf32> to vector<8xf32>
      %222 = vector.shape_cast %221 : vector<8xf32> to vector<8x1xf32>
      %223 = tpu.concatenate %213, %216, %219, %222 in 1 : vector<8x1xf32>, vector<8x1xf32>, vector<8x1xf32>, vector<8x1xf32> -> vector<8x4xf32>
      %224 = arith.addf %223, %8 : vector<8x4xf32>
      %225 = vector.broadcast %149 : f32 to vector<8x4xf32>
      %226 = arith.mulf %225, %224 : vector<8x4xf32>
      %cst_77 = arith.constant 0.977777779 : f32
      %227 = vector.broadcast %cst_77 : f32 to vector<8x4xf32>
      %228 = arith.mulf %227, %151 : vector<8x4xf32>
      %229 = arith.addf %arg8, %228 : vector<8x4xf32>
      %cst_78 = arith.constant -3.73333335 : f32
      %230 = vector.broadcast %cst_78 : f32 to vector<8x4xf32>
      %231 = arith.mulf %230, %187 : vector<8x4xf32>
      %cst_79 = arith.constant 3.55555558 : f32
      %232 = vector.broadcast %cst_79 : f32 to vector<8x4xf32>
      %233 = arith.mulf %232, %226 : vector<8x4xf32>
      %234 = arith.addf %231, %233 : vector<8x4xf32>
      %235 = arith.addf %229, %234 : vector<8x4xf32>
      %236 = vector.extract_strided_slice %235 {offsets = [0, 0], sizes = [8, 1], strides = [1, 1]} : vector<8x4xf32> to vector<8x1xf32>
      %237 = vector.broadcast %236 : vector<8x1xf32> to vector<8x32xf32>
      %238 = arith.mulf %237, %11 : vector<8x32xf32>
      %239 = vector.extract_strided_slice %235 {offsets = [0, 1], sizes = [8, 1], strides = [1, 1]} : vector<8x4xf32> to vector<8x1xf32>
      %240 = vector.broadcast %239 : vector<8x1xf32> to vector<8x32xf32>
      %241 = arith.mulf %240, %14 : vector<8x32xf32>
      %242 = vector.extract_strided_slice %235 {offsets = [0, 2], sizes = [8, 1], strides = [1, 1]} : vector<8x4xf32> to vector<8x1xf32>
      %243 = vector.broadcast %242 : vector<8x1xf32> to vector<8x32xf32>
      %244 = arith.mulf %243, %17 : vector<8x32xf32>
      %245 = vector.extract_strided_slice %235 {offsets = [0, 3], sizes = [8, 1], strides = [1, 1]} : vector<8x4xf32> to vector<8x1xf32>
      %246 = vector.broadcast %245 : vector<8x1xf32> to vector<8x32xf32>
      %247 = arith.mulf %246, %20 : vector<8x32xf32>
      %248 = arith.addf %5, %238 : vector<8x32xf32>
      %249 = arith.addf %241, %244 : vector<8x32xf32>
      %250 = arith.addf %248, %249 : vector<8x32xf32>
      %251 = arith.addf %250, %247 : vector<8x32xf32>
      %252 = math.tanh %251 : vector<8x32xf32>
      %253 = arith.mulf %252, %23 : vector<8x32xf32>
      %cst_80 = arith.constant dense<0.000000e+00> : vector<8xf32>
      %254 = vector.multi_reduction <add>, %253, %cst_80 [1] : vector<8x32xf32> to vector<8xf32>
      %255 = vector.shape_cast %254 : vector<8xf32> to vector<8x1xf32>
      %256 = arith.mulf %252, %26 : vector<8x32xf32>
      %cst_81 = arith.constant dense<0.000000e+00> : vector<8xf32>
      %257 = vector.multi_reduction <add>, %256, %cst_81 [1] : vector<8x32xf32> to vector<8xf32>
      %258 = vector.shape_cast %257 : vector<8xf32> to vector<8x1xf32>
      %259 = arith.mulf %252, %29 : vector<8x32xf32>
      %cst_82 = arith.constant dense<0.000000e+00> : vector<8xf32>
      %260 = vector.multi_reduction <add>, %259, %cst_82 [1] : vector<8x32xf32> to vector<8xf32>
      %261 = vector.shape_cast %260 : vector<8xf32> to vector<8x1xf32>
      %262 = arith.mulf %252, %32 : vector<8x32xf32>
      %cst_83 = arith.constant dense<0.000000e+00> : vector<8xf32>
      %263 = vector.multi_reduction <add>, %262, %cst_83 [1] : vector<8x32xf32> to vector<8xf32>
      %264 = vector.shape_cast %263 : vector<8xf32> to vector<8x1xf32>
      %265 = tpu.concatenate %255, %258, %261, %264 in 1 : vector<8x1xf32>, vector<8x1xf32>, vector<8x1xf32>, vector<8x1xf32> -> vector<8x4xf32>
      %266 = arith.addf %265, %8 : vector<8x4xf32>
      %267 = vector.broadcast %149 : f32 to vector<8x4xf32>
      %268 = arith.mulf %267, %266 : vector<8x4xf32>
      %cst_84 = arith.constant 2.95259857 : f32
      %269 = vector.broadcast %cst_84 : f32 to vector<8x4xf32>
      %270 = arith.mulf %269, %151 : vector<8x4xf32>
      %271 = arith.addf %arg8, %270 : vector<8x4xf32>
      %cst_85 = arith.constant -11.5957937 : f32
      %272 = vector.broadcast %cst_85 : f32 to vector<8x4xf32>
      %273 = arith.mulf %272, %187 : vector<8x4xf32>
      %cst_86 = arith.constant 9.82289314 : f32
      %274 = vector.broadcast %cst_86 : f32 to vector<8x4xf32>
      %275 = arith.mulf %274, %226 : vector<8x4xf32>
      %276 = arith.addf %273, %275 : vector<8x4xf32>
      %cst_87 = arith.constant -0.290809333 : f32
      %277 = vector.broadcast %cst_87 : f32 to vector<8x4xf32>
      %278 = arith.mulf %277, %268 : vector<8x4xf32>
      %279 = arith.addf %276, %278 : vector<8x4xf32>
      %280 = arith.addf %271, %279 : vector<8x4xf32>
      %281 = vector.extract_strided_slice %280 {offsets = [0, 0], sizes = [8, 1], strides = [1, 1]} : vector<8x4xf32> to vector<8x1xf32>
      %282 = vector.broadcast %281 : vector<8x1xf32> to vector<8x32xf32>
      %283 = arith.mulf %282, %11 : vector<8x32xf32>
      %284 = vector.extract_strided_slice %280 {offsets = [0, 1], sizes = [8, 1], strides = [1, 1]} : vector<8x4xf32> to vector<8x1xf32>
      %285 = vector.broadcast %284 : vector<8x1xf32> to vector<8x32xf32>
      %286 = arith.mulf %285, %14 : vector<8x32xf32>
      %287 = vector.extract_strided_slice %280 {offsets = [0, 2], sizes = [8, 1], strides = [1, 1]} : vector<8x4xf32> to vector<8x1xf32>
      %288 = vector.broadcast %287 : vector<8x1xf32> to vector<8x32xf32>
      %289 = arith.mulf %288, %17 : vector<8x32xf32>
      %290 = vector.extract_strided_slice %280 {offsets = [0, 3], sizes = [8, 1], strides = [1, 1]} : vector<8x4xf32> to vector<8x1xf32>
      %291 = vector.broadcast %290 : vector<8x1xf32> to vector<8x32xf32>
      %292 = arith.mulf %291, %20 : vector<8x32xf32>
      %293 = arith.addf %5, %283 : vector<8x32xf32>
      %294 = arith.addf %286, %289 : vector<8x32xf32>
      %295 = arith.addf %293, %294 : vector<8x32xf32>
      %296 = arith.addf %295, %292 : vector<8x32xf32>
      %297 = math.tanh %296 : vector<8x32xf32>
      %298 = arith.mulf %297, %23 : vector<8x32xf32>
      %cst_88 = arith.constant dense<0.000000e+00> : vector<8xf32>
      %299 = vector.multi_reduction <add>, %298, %cst_88 [1] : vector<8x32xf32> to vector<8xf32>
      %300 = vector.shape_cast %299 : vector<8xf32> to vector<8x1xf32>
      %301 = arith.mulf %297, %26 : vector<8x32xf32>
      %cst_89 = arith.constant dense<0.000000e+00> : vector<8xf32>
      %302 = vector.multi_reduction <add>, %301, %cst_89 [1] : vector<8x32xf32> to vector<8xf32>
      %303 = vector.shape_cast %302 : vector<8xf32> to vector<8x1xf32>
      %304 = arith.mulf %297, %29 : vector<8x32xf32>
      %cst_90 = arith.constant dense<0.000000e+00> : vector<8xf32>
      %305 = vector.multi_reduction <add>, %304, %cst_90 [1] : vector<8x32xf32> to vector<8xf32>
      %306 = vector.shape_cast %305 : vector<8xf32> to vector<8x1xf32>
      %307 = arith.mulf %297, %32 : vector<8x32xf32>
      %cst_91 = arith.constant dense<0.000000e+00> : vector<8xf32>
      %308 = vector.multi_reduction <add>, %307, %cst_91 [1] : vector<8x32xf32> to vector<8xf32>
      %309 = vector.shape_cast %308 : vector<8xf32> to vector<8x1xf32>
      %310 = tpu.concatenate %300, %303, %306, %309 in 1 : vector<8x1xf32>, vector<8x1xf32>, vector<8x1xf32>, vector<8x1xf32> -> vector<8x4xf32>
      %311 = arith.addf %310, %8 : vector<8x4xf32>
      %312 = vector.broadcast %149 : f32 to vector<8x4xf32>
      %313 = arith.mulf %312, %311 : vector<8x4xf32>
      %cst_92 = arith.constant 2.84627533 : f32
      %314 = vector.broadcast %cst_92 : f32 to vector<8x4xf32>
      %315 = arith.mulf %314, %151 : vector<8x4xf32>
      %316 = arith.addf %arg8, %315 : vector<8x4xf32>
      %cst_93 = arith.constant -10.757576 : f32
      %317 = vector.broadcast %cst_93 : f32 to vector<8x4xf32>
      %318 = arith.mulf %317, %187 : vector<8x4xf32>
      %cst_94 = arith.constant 8.90642261 : f32
      %319 = vector.broadcast %cst_94 : f32 to vector<8x4xf32>
      %320 = arith.mulf %319, %226 : vector<8x4xf32>
      %321 = arith.addf %318, %320 : vector<8x4xf32>
      %322 = arith.addf %316, %321 : vector<8x4xf32>
      %cst_95 = arith.constant 0.278409094 : f32
      %323 = vector.broadcast %cst_95 : f32 to vector<8x4xf32>
      %324 = arith.mulf %323, %268 : vector<8x4xf32>
      %cst_96 = arith.constant -0.273531318 : f32
      %325 = vector.broadcast %cst_96 : f32 to vector<8x4xf32>
      %326 = arith.mulf %325, %313 : vector<8x4xf32>
      %327 = arith.addf %324, %326 : vector<8x4xf32>
      %328 = arith.addf %322, %327 : vector<8x4xf32>
      %329 = vector.extract_strided_slice %328 {offsets = [0, 0], sizes = [8, 1], strides = [1, 1]} : vector<8x4xf32> to vector<8x1xf32>
      %330 = vector.broadcast %329 : vector<8x1xf32> to vector<8x32xf32>
      %331 = arith.mulf %330, %11 : vector<8x32xf32>
      %332 = vector.extract_strided_slice %328 {offsets = [0, 1], sizes = [8, 1], strides = [1, 1]} : vector<8x4xf32> to vector<8x1xf32>
      %333 = vector.broadcast %332 : vector<8x1xf32> to vector<8x32xf32>
      %334 = arith.mulf %333, %14 : vector<8x32xf32>
      %335 = vector.extract_strided_slice %328 {offsets = [0, 2], sizes = [8, 1], strides = [1, 1]} : vector<8x4xf32> to vector<8x1xf32>
      %336 = vector.broadcast %335 : vector<8x1xf32> to vector<8x32xf32>
      %337 = arith.mulf %336, %17 : vector<8x32xf32>
      %338 = vector.extract_strided_slice %328 {offsets = [0, 3], sizes = [8, 1], strides = [1, 1]} : vector<8x4xf32> to vector<8x1xf32>
      %339 = vector.broadcast %338 : vector<8x1xf32> to vector<8x32xf32>
      %340 = arith.mulf %339, %20 : vector<8x32xf32>
      %341 = arith.addf %5, %331 : vector<8x32xf32>
      %342 = arith.addf %334, %337 : vector<8x32xf32>
      %343 = arith.addf %341, %342 : vector<8x32xf32>
      %344 = arith.addf %343, %340 : vector<8x32xf32>
      %345 = math.tanh %344 : vector<8x32xf32>
      %346 = arith.mulf %345, %23 : vector<8x32xf32>
      %cst_97 = arith.constant dense<0.000000e+00> : vector<8xf32>
      %347 = vector.multi_reduction <add>, %346, %cst_97 [1] : vector<8x32xf32> to vector<8xf32>
      %348 = vector.shape_cast %347 : vector<8xf32> to vector<8x1xf32>
      %349 = arith.mulf %345, %26 : vector<8x32xf32>
      %cst_98 = arith.constant dense<0.000000e+00> : vector<8xf32>
      %350 = vector.multi_reduction <add>, %349, %cst_98 [1] : vector<8x32xf32> to vector<8xf32>
      %351 = vector.shape_cast %350 : vector<8xf32> to vector<8x1xf32>
      %352 = arith.mulf %345, %29 : vector<8x32xf32>
      %cst_99 = arith.constant dense<0.000000e+00> : vector<8xf32>
      %353 = vector.multi_reduction <add>, %352, %cst_99 [1] : vector<8x32xf32> to vector<8xf32>
      %354 = vector.shape_cast %353 : vector<8xf32> to vector<8x1xf32>
      %355 = arith.mulf %345, %32 : vector<8x32xf32>
      %cst_100 = arith.constant dense<0.000000e+00> : vector<8xf32>
      %356 = vector.multi_reduction <add>, %355, %cst_100 [1] : vector<8x32xf32> to vector<8xf32>
      %357 = vector.shape_cast %356 : vector<8xf32> to vector<8x1xf32>
      %358 = tpu.concatenate %348, %351, %354, %357 in 1 : vector<8x1xf32>, vector<8x1xf32>, vector<8x1xf32>, vector<8x1xf32> -> vector<8x4xf32>
      %359 = arith.addf %358, %8 : vector<8x4xf32>
      %360 = vector.broadcast %149 : f32 to vector<8x4xf32>
      %361 = arith.mulf %360, %359 : vector<8x4xf32>
      %cst_101 = arith.constant 0.0911458358 : f32
      %362 = vector.broadcast %cst_101 : f32 to vector<8x4xf32>
      %363 = arith.mulf %362, %151 : vector<8x4xf32>
      %364 = arith.addf %arg8, %363 : vector<8x4xf32>
      %cst_102 = arith.constant 0.449236304 : f32
      %365 = vector.broadcast %cst_102 : f32 to vector<8x4xf32>
      %366 = arith.mulf %365, %226 : vector<8x4xf32>
      %cst_103 = arith.constant 0.651041686 : f32
      %367 = vector.broadcast %cst_103 : f32 to vector<8x4xf32>
      %368 = arith.mulf %367, %268 : vector<8x4xf32>
      %369 = arith.addf %366, %368 : vector<8x4xf32>
      %370 = arith.addf %364, %369 : vector<8x4xf32>
      %cst_104 = arith.constant -0.322376192 : f32
      %371 = vector.broadcast %cst_104 : f32 to vector<8x4xf32>
      %372 = arith.mulf %371, %313 : vector<8x4xf32>
      %cst_105 = arith.constant 0.130952388 : f32
      %373 = vector.broadcast %cst_105 : f32 to vector<8x4xf32>
      %374 = arith.mulf %373, %361 : vector<8x4xf32>
      %375 = arith.addf %372, %374 : vector<8x4xf32>
      %376 = arith.addf %370, %375 : vector<8x4xf32>
      %377 = vector.extract_strided_slice %376 {offsets = [0, 0], sizes = [8, 1], strides = [1, 1]} : vector<8x4xf32> to vector<8x1xf32>
      %378 = vector.broadcast %377 : vector<8x1xf32> to vector<8x32xf32>
      %379 = arith.mulf %378, %11 : vector<8x32xf32>
      %380 = vector.extract_strided_slice %376 {offsets = [0, 1], sizes = [8, 1], strides = [1, 1]} : vector<8x4xf32> to vector<8x1xf32>
      %381 = vector.broadcast %380 : vector<8x1xf32> to vector<8x32xf32>
      %382 = arith.mulf %381, %14 : vector<8x32xf32>
      %383 = vector.extract_strided_slice %376 {offsets = [0, 2], sizes = [8, 1], strides = [1, 1]} : vector<8x4xf32> to vector<8x1xf32>
      %384 = vector.broadcast %383 : vector<8x1xf32> to vector<8x32xf32>
      %385 = arith.mulf %384, %17 : vector<8x32xf32>
      %386 = vector.extract_strided_slice %376 {offsets = [0, 3], sizes = [8, 1], strides = [1, 1]} : vector<8x4xf32> to vector<8x1xf32>
      %387 = vector.broadcast %386 : vector<8x1xf32> to vector<8x32xf32>
      %388 = arith.mulf %387, %20 : vector<8x32xf32>
      %389 = arith.addf %5, %379 : vector<8x32xf32>
      %390 = arith.addf %382, %385 : vector<8x32xf32>
      %391 = arith.addf %389, %390 : vector<8x32xf32>
      %392 = arith.addf %391, %388 : vector<8x32xf32>
      %393 = math.tanh %392 : vector<8x32xf32>
      %394 = arith.mulf %393, %23 : vector<8x32xf32>
      %cst_106 = arith.constant dense<0.000000e+00> : vector<8xf32>
      %395 = vector.multi_reduction <add>, %394, %cst_106 [1] : vector<8x32xf32> to vector<8xf32>
      %396 = vector.shape_cast %395 : vector<8xf32> to vector<8x1xf32>
      %397 = arith.mulf %393, %26 : vector<8x32xf32>
      %cst_107 = arith.constant dense<0.000000e+00> : vector<8xf32>
      %398 = vector.multi_reduction <add>, %397, %cst_107 [1] : vector<8x32xf32> to vector<8xf32>
      %399 = vector.shape_cast %398 : vector<8xf32> to vector<8x1xf32>
      %400 = arith.mulf %393, %29 : vector<8x32xf32>
      %cst_108 = arith.constant dense<0.000000e+00> : vector<8xf32>
      %401 = vector.multi_reduction <add>, %400, %cst_108 [1] : vector<8x32xf32> to vector<8xf32>
      %402 = vector.shape_cast %401 : vector<8xf32> to vector<8x1xf32>
      %403 = arith.mulf %393, %32 : vector<8x32xf32>
      %cst_109 = arith.constant dense<0.000000e+00> : vector<8xf32>
      %404 = vector.multi_reduction <add>, %403, %cst_109 [1] : vector<8x32xf32> to vector<8xf32>
      %405 = vector.shape_cast %404 : vector<8xf32> to vector<8x1xf32>
      %406 = tpu.concatenate %396, %399, %402, %405 in 1 : vector<8x1xf32>, vector<8x1xf32>, vector<8x1xf32>, vector<8x1xf32> -> vector<8x4xf32>
      %407 = arith.addf %406, %8 : vector<8x4xf32>
      %408 = vector.broadcast %149 : f32 to vector<8x4xf32>
      %409 = arith.mulf %408, %407 : vector<8x4xf32>
      %cst_110 = arith.constant 0.00123263884 : f32
      %410 = vector.broadcast %cst_110 : f32 to vector<8x4xf32>
      %411 = arith.mulf %410, %151 : vector<8x4xf32>
      %cst_111 = arith.constant -0.00425277045 : f32
      %412 = vector.broadcast %cst_111 : f32 to vector<8x4xf32>
      %413 = arith.mulf %412, %226 : vector<8x4xf32>
      %414 = arith.addf %411, %413 : vector<8x4xf32>
      %cst_112 = arith.constant 0.0369791649 : f32
      %415 = vector.broadcast %cst_112 : f32 to vector<8x4xf32>
      %416 = arith.mulf %415, %268 : vector<8x4xf32>
      %cst_113 = arith.constant -5.086380e-02 : f32
      %417 = vector.broadcast %cst_113 : f32 to vector<8x4xf32>
      %418 = arith.mulf %417, %313 : vector<8x4xf32>
      %419 = arith.addf %416, %418 : vector<8x4xf32>
      %420 = arith.addf %414, %419 : vector<8x4xf32>
      %cst_114 = arith.constant 0.0419047624 : f32
      %421 = vector.broadcast %cst_114 : f32 to vector<8x4xf32>
      %422 = arith.mulf %421, %361 : vector<8x4xf32>
      %cst_115 = arith.constant -2.500000e-02 : f32
      %423 = vector.broadcast %cst_115 : f32 to vector<8x4xf32>
      %424 = arith.mulf %423, %409 : vector<8x4xf32>
      %425 = arith.addf %422, %424 : vector<8x4xf32>
      %426 = arith.addf %420, %425 : vector<8x4xf32>
      %427 = math.absf %arg8 : vector<8x4xf32>
      %428 = math.absf %376 : vector<8x4xf32>
      %429 = arith.maximumf %427, %428 : vector<8x4xf32>
      %cst_116 = arith.constant 9.99999997E-7 : f32
      %430 = vector.broadcast %cst_116 : f32 to vector<8x4xf32>
      %431 = arith.mulf %430, %429 : vector<8x4xf32>
      %cst_117 = arith.constant 1.000000e-07 : f32
      %432 = vector.broadcast %cst_117 : f32 to vector<8x4xf32>
      %433 = arith.addf %432, %431 : vector<8x4xf32>
      %434 = arith.divf %426, %433 : vector<8x4xf32>
      %435 = arith.mulf %434, %434 : vector<8x4xf32>
      %436 = vector.shape_cast %435 : vector<8x4xf32> to vector<1x8x4xf32>
      %cst_118 = arith.constant dense<0.000000e+00> : vector<1xf32>
      %437 = vector.multi_reduction <add>, %436, %cst_118 [1, 2] : vector<1x8x4xf32> to vector<1xf32>
      %438 = vector.shape_cast %437 : vector<1xf32> to vector<1x1x1xf32>
      %439 = vector.extract %438[0, 0, 0] : f32 from vector<1x1x1xf32>
      %440 = vector.broadcast %439 : f32 to vector<1x1xf32>
      %cst_119 = arith.constant 3.125000e-02 : f32
      %441 = vector.broadcast %cst_119 : f32 to vector<1x1xf32>
      %442 = arith.mulf %440, %441 : vector<1x1xf32>
      %cst_120 = arith.constant 1.000000e-24 : f32
      %443 = vector.broadcast %cst_120 : f32 to vector<1x1xf32>
      %444 = arith.addf %442, %443 : vector<1x1xf32>
      %445 = math.log %444 : vector<1x1xf32>
      %cst_121 = arith.constant -1.000000e-01 : f32
      %446 = vector.broadcast %cst_121 : f32 to vector<1x1xf32>
      %447 = arith.mulf %446, %445 : vector<1x1xf32>
      %448 = math.exp %447 : vector<1x1xf32>
      %cst_122 = arith.constant 0.899999976 : f32
      %449 = vector.broadcast %cst_122 : f32 to vector<1x1xf32>
      %450 = arith.mulf %449, %448 : vector<1x1xf32>
      %451 = vector.extract %442[0, 0] : f32 from vector<1x1xf32>
      %452 = vector.extract %450[0, 0] : f32 from vector<1x1xf32>
      %cst_123 = arith.constant 2.000000e-01 : f32
      %cst_124 = arith.constant 1.000000e+01 : f32
      %453 = arith.maximumf %cst_123, %452 : f32
      %454 = arith.minimumf %cst_124, %453 : f32
      %cst_125 = arith.constant 1.000000e+00 : f32
      %455 = arith.cmpf ole, %451, %cst_125 : f32
      %456 = arith.addf %arg7, %149 : f32
      %457 = arith.select %455, %456, %arg7 : f32
      %458 = arith.select %455, %376, %arg8 : vector<8x4xf32>
      %459 = arith.select %455, %407, %arg10 : vector<8x4xf32>
      %460 = arith.mulf %149, %454 : f32
      %cst_126 = arith.constant 9.99999997E-7 : f32
      %461 = arith.mulf %cst_126, %95 : f32
      %462 = arith.maximumf %460, %461 : f32
      %c1_i32 = arith.constant 1 : i32
      %463 = arith.addi %arg11, %c1_i32 : i32
      scf.yield %457, %458, %462, %459, %463 : f32, vector<8x4xf32>, f32, vector<8x4xf32>, i32
    }
    %c3_35 = arith.constant 3 : index
    %c0_36 = arith.constant 0 : index
    %c0_37 = arith.constant 0 : index
    %101 = vector.load %arg6[%c3_35, %c0_36, %c0_37] : memref<8x8x4xf32, #tpu.memory_space<vmem>>, vector<1x8x4xf32>
    %102 = vector.shape_cast %101 : vector<1x8x4xf32> to vector<8x4xf32>
    %103 = vector.shape_cast %100#1 : vector<8x4xf32> to vector<1x8x4xf32>
    tpu.vector_store %arg6[%c3_35, %c0_36, %c0_37], %103 {strides = array<i32>} : memref<8x8x4xf32, #tpu.memory_space<vmem>>, vector<1x8x4xf32>,
    %c3_38 = arith.constant 3 : index
    %104 = memref.load %arg0[%c3_38] : memref<8xf32, #tpu.memory_space<smem>>
    %c4 = arith.constant 4 : index
    %105 = memref.load %arg0[%c4] : memref<8xf32, #tpu.memory_space<smem>>
    %106 = arith.subf %105, %104 : f32
    %107 = math.absf %105 : f32
    %cst_39 = arith.constant 1.000000e+00 : f32
    %108 = arith.maximumf %107, %cst_39 : f32
    %cst_40 = arith.constant 1.000000e-10 : f32
    %109 = arith.mulf %cst_40, %108 : f32
    %110 = arith.minimumf %100#2, %106 : f32
    %c0_i32_41 = arith.constant 0 : i32
    %111:5 = scf.while (%arg7 = %104, %arg8 = %100#1, %arg9 = %110, %arg10 = %100#3, %arg11 = %c0_i32_41) : (f32, vector<8x4xf32>, f32, vector<8x4xf32>, i32) -> (f32, vector<8x4xf32>, f32, vector<8x4xf32>, i32) {
      %148 = arith.subf %105, %arg7 : f32
      %149 = arith.cmpf ogt, %148, %109 : f32
      %c1000_i32 = arith.constant 1000 : i32
      %150 = arith.cmpi slt, %arg11, %c1000_i32 : i32
      %151 = arith.andi %149, %150 : i1
      scf.condition(%151) %arg7, %arg8, %arg9, %arg10, %arg11 : f32, vector<8x4xf32>, f32, vector<8x4xf32>, i32
    } do {
    ^bb0(%arg7: f32, %arg8: vector<8x4xf32>, %arg9: f32, %arg10: vector<8x4xf32>, %arg11: i32):
      %148 = arith.subf %105, %arg7 : f32
      %149 = arith.minimumf %arg9, %148 : f32
      %150 = vector.broadcast %149 : f32 to vector<8x4xf32>
      %151 = arith.mulf %150, %arg10 : vector<8x4xf32>
      %cst_66 = arith.constant 2.000000e-01 : f32
      %152 = vector.broadcast %cst_66 : f32 to vector<8x4xf32>
      %153 = arith.mulf %152, %151 : vector<8x4xf32>
      %154 = arith.addf %arg8, %153 : vector<8x4xf32>
      %155 = vector.extract_strided_slice %154 {offsets = [0, 0], sizes = [8, 1], strides = [1, 1]} : vector<8x4xf32> to vector<8x1xf32>
      %156 = vector.broadcast %155 : vector<8x1xf32> to vector<8x32xf32>
      %157 = arith.mulf %156, %11 : vector<8x32xf32>
      %158 = vector.extract_strided_slice %154 {offsets = [0, 1], sizes = [8, 1], strides = [1, 1]} : vector<8x4xf32> to vector<8x1xf32>
      %159 = vector.broadcast %158 : vector<8x1xf32> to vector<8x32xf32>
      %160 = arith.mulf %159, %14 : vector<8x32xf32>
      %161 = vector.extract_strided_slice %154 {offsets = [0, 2], sizes = [8, 1], strides = [1, 1]} : vector<8x4xf32> to vector<8x1xf32>
      %162 = vector.broadcast %161 : vector<8x1xf32> to vector<8x32xf32>
      %163 = arith.mulf %162, %17 : vector<8x32xf32>
      %164 = vector.extract_strided_slice %154 {offsets = [0, 3], sizes = [8, 1], strides = [1, 1]} : vector<8x4xf32> to vector<8x1xf32>
      %165 = vector.broadcast %164 : vector<8x1xf32> to vector<8x32xf32>
      %166 = arith.mulf %165, %20 : vector<8x32xf32>
      %167 = arith.addf %5, %157 : vector<8x32xf32>
      %168 = arith.addf %160, %163 : vector<8x32xf32>
      %169 = arith.addf %167, %168 : vector<8x32xf32>
      %170 = arith.addf %169, %166 : vector<8x32xf32>
      %171 = math.tanh %170 : vector<8x32xf32>
      %172 = arith.mulf %171, %23 : vector<8x32xf32>
      %cst_67 = arith.constant dense<0.000000e+00> : vector<8xf32>
      %173 = vector.multi_reduction <add>, %172, %cst_67 [1] : vector<8x32xf32> to vector<8xf32>
      %174 = vector.shape_cast %173 : vector<8xf32> to vector<8x1xf32>
      %175 = arith.mulf %171, %26 : vector<8x32xf32>
      %cst_68 = arith.constant dense<0.000000e+00> : vector<8xf32>
      %176 = vector.multi_reduction <add>, %175, %cst_68 [1] : vector<8x32xf32> to vector<8xf32>
      %177 = vector.shape_cast %176 : vector<8xf32> to vector<8x1xf32>
      %178 = arith.mulf %171, %29 : vector<8x32xf32>
      %cst_69 = arith.constant dense<0.000000e+00> : vector<8xf32>
      %179 = vector.multi_reduction <add>, %178, %cst_69 [1] : vector<8x32xf32> to vector<8xf32>
      %180 = vector.shape_cast %179 : vector<8xf32> to vector<8x1xf32>
      %181 = arith.mulf %171, %32 : vector<8x32xf32>
      %cst_70 = arith.constant dense<0.000000e+00> : vector<8xf32>
      %182 = vector.multi_reduction <add>, %181, %cst_70 [1] : vector<8x32xf32> to vector<8xf32>
      %183 = vector.shape_cast %182 : vector<8xf32> to vector<8x1xf32>
      %184 = tpu.concatenate %174, %177, %180, %183 in 1 : vector<8x1xf32>, vector<8x1xf32>, vector<8x1xf32>, vector<8x1xf32> -> vector<8x4xf32>
      %185 = arith.addf %184, %8 : vector<8x4xf32>
      %186 = vector.broadcast %149 : f32 to vector<8x4xf32>
      %187 = arith.mulf %186, %185 : vector<8x4xf32>
      %cst_71 = arith.constant 7.500000e-02 : f32
      %188 = vector.broadcast %cst_71 : f32 to vector<8x4xf32>
      %189 = arith.mulf %188, %151 : vector<8x4xf32>
      %cst_72 = arith.constant 2.250000e-01 : f32
      %190 = vector.broadcast %cst_72 : f32 to vector<8x4xf32>
      %191 = arith.mulf %190, %187 : vector<8x4xf32>
      %192 = arith.addf %189, %191 : vector<8x4xf32>
      %193 = arith.addf %arg8, %192 : vector<8x4xf32>
      %194 = vector.extract_strided_slice %193 {offsets = [0, 0], sizes = [8, 1], strides = [1, 1]} : vector<8x4xf32> to vector<8x1xf32>
      %195 = vector.broadcast %194 : vector<8x1xf32> to vector<8x32xf32>
      %196 = arith.mulf %195, %11 : vector<8x32xf32>
      %197 = vector.extract_strided_slice %193 {offsets = [0, 1], sizes = [8, 1], strides = [1, 1]} : vector<8x4xf32> to vector<8x1xf32>
      %198 = vector.broadcast %197 : vector<8x1xf32> to vector<8x32xf32>
      %199 = arith.mulf %198, %14 : vector<8x32xf32>
      %200 = vector.extract_strided_slice %193 {offsets = [0, 2], sizes = [8, 1], strides = [1, 1]} : vector<8x4xf32> to vector<8x1xf32>
      %201 = vector.broadcast %200 : vector<8x1xf32> to vector<8x32xf32>
      %202 = arith.mulf %201, %17 : vector<8x32xf32>
      %203 = vector.extract_strided_slice %193 {offsets = [0, 3], sizes = [8, 1], strides = [1, 1]} : vector<8x4xf32> to vector<8x1xf32>
      %204 = vector.broadcast %203 : vector<8x1xf32> to vector<8x32xf32>
      %205 = arith.mulf %204, %20 : vector<8x32xf32>
      %206 = arith.addf %5, %196 : vector<8x32xf32>
      %207 = arith.addf %199, %202 : vector<8x32xf32>
      %208 = arith.addf %206, %207 : vector<8x32xf32>
      %209 = arith.addf %208, %205 : vector<8x32xf32>
      %210 = math.tanh %209 : vector<8x32xf32>
      %211 = arith.mulf %210, %23 : vector<8x32xf32>
      %cst_73 = arith.constant dense<0.000000e+00> : vector<8xf32>
      %212 = vector.multi_reduction <add>, %211, %cst_73 [1] : vector<8x32xf32> to vector<8xf32>
      %213 = vector.shape_cast %212 : vector<8xf32> to vector<8x1xf32>
      %214 = arith.mulf %210, %26 : vector<8x32xf32>
      %cst_74 = arith.constant dense<0.000000e+00> : vector<8xf32>
      %215 = vector.multi_reduction <add>, %214, %cst_74 [1] : vector<8x32xf32> to vector<8xf32>
      %216 = vector.shape_cast %215 : vector<8xf32> to vector<8x1xf32>
      %217 = arith.mulf %210, %29 : vector<8x32xf32>
      %cst_75 = arith.constant dense<0.000000e+00> : vector<8xf32>
      %218 = vector.multi_reduction <add>, %217, %cst_75 [1] : vector<8x32xf32> to vector<8xf32>
      %219 = vector.shape_cast %218 : vector<8xf32> to vector<8x1xf32>
      %220 = arith.mulf %210, %32 : vector<8x32xf32>
      %cst_76 = arith.constant dense<0.000000e+00> : vector<8xf32>
      %221 = vector.multi_reduction <add>, %220, %cst_76 [1] : vector<8x32xf32> to vector<8xf32>
      %222 = vector.shape_cast %221 : vector<8xf32> to vector<8x1xf32>
      %223 = tpu.concatenate %213, %216, %219, %222 in 1 : vector<8x1xf32>, vector<8x1xf32>, vector<8x1xf32>, vector<8x1xf32> -> vector<8x4xf32>
      %224 = arith.addf %223, %8 : vector<8x4xf32>
      %225 = vector.broadcast %149 : f32 to vector<8x4xf32>
      %226 = arith.mulf %225, %224 : vector<8x4xf32>
      %cst_77 = arith.constant 0.977777779 : f32
      %227 = vector.broadcast %cst_77 : f32 to vector<8x4xf32>
      %228 = arith.mulf %227, %151 : vector<8x4xf32>
      %229 = arith.addf %arg8, %228 : vector<8x4xf32>
      %cst_78 = arith.constant -3.73333335 : f32
      %230 = vector.broadcast %cst_78 : f32 to vector<8x4xf32>
      %231 = arith.mulf %230, %187 : vector<8x4xf32>
      %cst_79 = arith.constant 3.55555558 : f32
      %232 = vector.broadcast %cst_79 : f32 to vector<8x4xf32>
      %233 = arith.mulf %232, %226 : vector<8x4xf32>
      %234 = arith.addf %231, %233 : vector<8x4xf32>
      %235 = arith.addf %229, %234 : vector<8x4xf32>
      %236 = vector.extract_strided_slice %235 {offsets = [0, 0], sizes = [8, 1], strides = [1, 1]} : vector<8x4xf32> to vector<8x1xf32>
      %237 = vector.broadcast %236 : vector<8x1xf32> to vector<8x32xf32>
      %238 = arith.mulf %237, %11 : vector<8x32xf32>
      %239 = vector.extract_strided_slice %235 {offsets = [0, 1], sizes = [8, 1], strides = [1, 1]} : vector<8x4xf32> to vector<8x1xf32>
      %240 = vector.broadcast %239 : vector<8x1xf32> to vector<8x32xf32>
      %241 = arith.mulf %240, %14 : vector<8x32xf32>
      %242 = vector.extract_strided_slice %235 {offsets = [0, 2], sizes = [8, 1], strides = [1, 1]} : vector<8x4xf32> to vector<8x1xf32>
      %243 = vector.broadcast %242 : vector<8x1xf32> to vector<8x32xf32>
      %244 = arith.mulf %243, %17 : vector<8x32xf32>
      %245 = vector.extract_strided_slice %235 {offsets = [0, 3], sizes = [8, 1], strides = [1, 1]} : vector<8x4xf32> to vector<8x1xf32>
      %246 = vector.broadcast %245 : vector<8x1xf32> to vector<8x32xf32>
      %247 = arith.mulf %246, %20 : vector<8x32xf32>
      %248 = arith.addf %5, %238 : vector<8x32xf32>
      %249 = arith.addf %241, %244 : vector<8x32xf32>
      %250 = arith.addf %248, %249 : vector<8x32xf32>
      %251 = arith.addf %250, %247 : vector<8x32xf32>
      %252 = math.tanh %251 : vector<8x32xf32>
      %253 = arith.mulf %252, %23 : vector<8x32xf32>
      %cst_80 = arith.constant dense<0.000000e+00> : vector<8xf32>
      %254 = vector.multi_reduction <add>, %253, %cst_80 [1] : vector<8x32xf32> to vector<8xf32>
      %255 = vector.shape_cast %254 : vector<8xf32> to vector<8x1xf32>
      %256 = arith.mulf %252, %26 : vector<8x32xf32>
      %cst_81 = arith.constant dense<0.000000e+00> : vector<8xf32>
      %257 = vector.multi_reduction <add>, %256, %cst_81 [1] : vector<8x32xf32> to vector<8xf32>
      %258 = vector.shape_cast %257 : vector<8xf32> to vector<8x1xf32>
      %259 = arith.mulf %252, %29 : vector<8x32xf32>
      %cst_82 = arith.constant dense<0.000000e+00> : vector<8xf32>
      %260 = vector.multi_reduction <add>, %259, %cst_82 [1] : vector<8x32xf32> to vector<8xf32>
      %261 = vector.shape_cast %260 : vector<8xf32> to vector<8x1xf32>
      %262 = arith.mulf %252, %32 : vector<8x32xf32>
      %cst_83 = arith.constant dense<0.000000e+00> : vector<8xf32>
      %263 = vector.multi_reduction <add>, %262, %cst_83 [1] : vector<8x32xf32> to vector<8xf32>
      %264 = vector.shape_cast %263 : vector<8xf32> to vector<8x1xf32>
      %265 = tpu.concatenate %255, %258, %261, %264 in 1 : vector<8x1xf32>, vector<8x1xf32>, vector<8x1xf32>, vector<8x1xf32> -> vector<8x4xf32>
      %266 = arith.addf %265, %8 : vector<8x4xf32>
      %267 = vector.broadcast %149 : f32 to vector<8x4xf32>
      %268 = arith.mulf %267, %266 : vector<8x4xf32>
      %cst_84 = arith.constant 2.95259857 : f32
      %269 = vector.broadcast %cst_84 : f32 to vector<8x4xf32>
      %270 = arith.mulf %269, %151 : vector<8x4xf32>
      %271 = arith.addf %arg8, %270 : vector<8x4xf32>
      %cst_85 = arith.constant -11.5957937 : f32
      %272 = vector.broadcast %cst_85 : f32 to vector<8x4xf32>
      %273 = arith.mulf %272, %187 : vector<8x4xf32>
      %cst_86 = arith.constant 9.82289314 : f32
      %274 = vector.broadcast %cst_86 : f32 to vector<8x4xf32>
      %275 = arith.mulf %274, %226 : vector<8x4xf32>
      %276 = arith.addf %273, %275 : vector<8x4xf32>
      %cst_87 = arith.constant -0.290809333 : f32
      %277 = vector.broadcast %cst_87 : f32 to vector<8x4xf32>
      %278 = arith.mulf %277, %268 : vector<8x4xf32>
      %279 = arith.addf %276, %278 : vector<8x4xf32>
      %280 = arith.addf %271, %279 : vector<8x4xf32>
      %281 = vector.extract_strided_slice %280 {offsets = [0, 0], sizes = [8, 1], strides = [1, 1]} : vector<8x4xf32> to vector<8x1xf32>
      %282 = vector.broadcast %281 : vector<8x1xf32> to vector<8x32xf32>
      %283 = arith.mulf %282, %11 : vector<8x32xf32>
      %284 = vector.extract_strided_slice %280 {offsets = [0, 1], sizes = [8, 1], strides = [1, 1]} : vector<8x4xf32> to vector<8x1xf32>
      %285 = vector.broadcast %284 : vector<8x1xf32> to vector<8x32xf32>
      %286 = arith.mulf %285, %14 : vector<8x32xf32>
      %287 = vector.extract_strided_slice %280 {offsets = [0, 2], sizes = [8, 1], strides = [1, 1]} : vector<8x4xf32> to vector<8x1xf32>
      %288 = vector.broadcast %287 : vector<8x1xf32> to vector<8x32xf32>
      %289 = arith.mulf %288, %17 : vector<8x32xf32>
      %290 = vector.extract_strided_slice %280 {offsets = [0, 3], sizes = [8, 1], strides = [1, 1]} : vector<8x4xf32> to vector<8x1xf32>
      %291 = vector.broadcast %290 : vector<8x1xf32> to vector<8x32xf32>
      %292 = arith.mulf %291, %20 : vector<8x32xf32>
      %293 = arith.addf %5, %283 : vector<8x32xf32>
      %294 = arith.addf %286, %289 : vector<8x32xf32>
      %295 = arith.addf %293, %294 : vector<8x32xf32>
      %296 = arith.addf %295, %292 : vector<8x32xf32>
      %297 = math.tanh %296 : vector<8x32xf32>
      %298 = arith.mulf %297, %23 : vector<8x32xf32>
      %cst_88 = arith.constant dense<0.000000e+00> : vector<8xf32>
      %299 = vector.multi_reduction <add>, %298, %cst_88 [1] : vector<8x32xf32> to vector<8xf32>
      %300 = vector.shape_cast %299 : vector<8xf32> to vector<8x1xf32>
      %301 = arith.mulf %297, %26 : vector<8x32xf32>
      %cst_89 = arith.constant dense<0.000000e+00> : vector<8xf32>
      %302 = vector.multi_reduction <add>, %301, %cst_89 [1] : vector<8x32xf32> to vector<8xf32>
      %303 = vector.shape_cast %302 : vector<8xf32> to vector<8x1xf32>
      %304 = arith.mulf %297, %29 : vector<8x32xf32>
      %cst_90 = arith.constant dense<0.000000e+00> : vector<8xf32>
      %305 = vector.multi_reduction <add>, %304, %cst_90 [1] : vector<8x32xf32> to vector<8xf32>
      %306 = vector.shape_cast %305 : vector<8xf32> to vector<8x1xf32>
      %307 = arith.mulf %297, %32 : vector<8x32xf32>
      %cst_91 = arith.constant dense<0.000000e+00> : vector<8xf32>
      %308 = vector.multi_reduction <add>, %307, %cst_91 [1] : vector<8x32xf32> to vector<8xf32>
      %309 = vector.shape_cast %308 : vector<8xf32> to vector<8x1xf32>
      %310 = tpu.concatenate %300, %303, %306, %309 in 1 : vector<8x1xf32>, vector<8x1xf32>, vector<8x1xf32>, vector<8x1xf32> -> vector<8x4xf32>
      %311 = arith.addf %310, %8 : vector<8x4xf32>
      %312 = vector.broadcast %149 : f32 to vector<8x4xf32>
      %313 = arith.mulf %312, %311 : vector<8x4xf32>
      %cst_92 = arith.constant 2.84627533 : f32
      %314 = vector.broadcast %cst_92 : f32 to vector<8x4xf32>
      %315 = arith.mulf %314, %151 : vector<8x4xf32>
      %316 = arith.addf %arg8, %315 : vector<8x4xf32>
      %cst_93 = arith.constant -10.757576 : f32
      %317 = vector.broadcast %cst_93 : f32 to vector<8x4xf32>
      %318 = arith.mulf %317, %187 : vector<8x4xf32>
      %cst_94 = arith.constant 8.90642261 : f32
      %319 = vector.broadcast %cst_94 : f32 to vector<8x4xf32>
      %320 = arith.mulf %319, %226 : vector<8x4xf32>
      %321 = arith.addf %318, %320 : vector<8x4xf32>
      %322 = arith.addf %316, %321 : vector<8x4xf32>
      %cst_95 = arith.constant 0.278409094 : f32
      %323 = vector.broadcast %cst_95 : f32 to vector<8x4xf32>
      %324 = arith.mulf %323, %268 : vector<8x4xf32>
      %cst_96 = arith.constant -0.273531318 : f32
      %325 = vector.broadcast %cst_96 : f32 to vector<8x4xf32>
      %326 = arith.mulf %325, %313 : vector<8x4xf32>
      %327 = arith.addf %324, %326 : vector<8x4xf32>
      %328 = arith.addf %322, %327 : vector<8x4xf32>
      %329 = vector.extract_strided_slice %328 {offsets = [0, 0], sizes = [8, 1], strides = [1, 1]} : vector<8x4xf32> to vector<8x1xf32>
      %330 = vector.broadcast %329 : vector<8x1xf32> to vector<8x32xf32>
      %331 = arith.mulf %330, %11 : vector<8x32xf32>
      %332 = vector.extract_strided_slice %328 {offsets = [0, 1], sizes = [8, 1], strides = [1, 1]} : vector<8x4xf32> to vector<8x1xf32>
      %333 = vector.broadcast %332 : vector<8x1xf32> to vector<8x32xf32>
      %334 = arith.mulf %333, %14 : vector<8x32xf32>
      %335 = vector.extract_strided_slice %328 {offsets = [0, 2], sizes = [8, 1], strides = [1, 1]} : vector<8x4xf32> to vector<8x1xf32>
      %336 = vector.broadcast %335 : vector<8x1xf32> to vector<8x32xf32>
      %337 = arith.mulf %336, %17 : vector<8x32xf32>
      %338 = vector.extract_strided_slice %328 {offsets = [0, 3], sizes = [8, 1], strides = [1, 1]} : vector<8x4xf32> to vector<8x1xf32>
      %339 = vector.broadcast %338 : vector<8x1xf32> to vector<8x32xf32>
      %340 = arith.mulf %339, %20 : vector<8x32xf32>
      %341 = arith.addf %5, %331 : vector<8x32xf32>
      %342 = arith.addf %334, %337 : vector<8x32xf32>
      %343 = arith.addf %341, %342 : vector<8x32xf32>
      %344 = arith.addf %343, %340 : vector<8x32xf32>
      %345 = math.tanh %344 : vector<8x32xf32>
      %346 = arith.mulf %345, %23 : vector<8x32xf32>
      %cst_97 = arith.constant dense<0.000000e+00> : vector<8xf32>
      %347 = vector.multi_reduction <add>, %346, %cst_97 [1] : vector<8x32xf32> to vector<8xf32>
      %348 = vector.shape_cast %347 : vector<8xf32> to vector<8x1xf32>
      %349 = arith.mulf %345, %26 : vector<8x32xf32>
      %cst_98 = arith.constant dense<0.000000e+00> : vector<8xf32>
      %350 = vector.multi_reduction <add>, %349, %cst_98 [1] : vector<8x32xf32> to vector<8xf32>
      %351 = vector.shape_cast %350 : vector<8xf32> to vector<8x1xf32>
      %352 = arith.mulf %345, %29 : vector<8x32xf32>
      %cst_99 = arith.constant dense<0.000000e+00> : vector<8xf32>
      %353 = vector.multi_reduction <add>, %352, %cst_99 [1] : vector<8x32xf32> to vector<8xf32>
      %354 = vector.shape_cast %353 : vector<8xf32> to vector<8x1xf32>
      %355 = arith.mulf %345, %32 : vector<8x32xf32>
      %cst_100 = arith.constant dense<0.000000e+00> : vector<8xf32>
      %356 = vector.multi_reduction <add>, %355, %cst_100 [1] : vector<8x32xf32> to vector<8xf32>
      %357 = vector.shape_cast %356 : vector<8xf32> to vector<8x1xf32>
      %358 = tpu.concatenate %348, %351, %354, %357 in 1 : vector<8x1xf32>, vector<8x1xf32>, vector<8x1xf32>, vector<8x1xf32> -> vector<8x4xf32>
      %359 = arith.addf %358, %8 : vector<8x4xf32>
      %360 = vector.broadcast %149 : f32 to vector<8x4xf32>
      %361 = arith.mulf %360, %359 : vector<8x4xf32>
      %cst_101 = arith.constant 0.0911458358 : f32
      %362 = vector.broadcast %cst_101 : f32 to vector<8x4xf32>
      %363 = arith.mulf %362, %151 : vector<8x4xf32>
      %364 = arith.addf %arg8, %363 : vector<8x4xf32>
      %cst_102 = arith.constant 0.449236304 : f32
      %365 = vector.broadcast %cst_102 : f32 to vector<8x4xf32>
      %366 = arith.mulf %365, %226 : vector<8x4xf32>
      %cst_103 = arith.constant 0.651041686 : f32
      %367 = vector.broadcast %cst_103 : f32 to vector<8x4xf32>
      %368 = arith.mulf %367, %268 : vector<8x4xf32>
      %369 = arith.addf %366, %368 : vector<8x4xf32>
      %370 = arith.addf %364, %369 : vector<8x4xf32>
      %cst_104 = arith.constant -0.322376192 : f32
      %371 = vector.broadcast %cst_104 : f32 to vector<8x4xf32>
      %372 = arith.mulf %371, %313 : vector<8x4xf32>
      %cst_105 = arith.constant 0.130952388 : f32
      %373 = vector.broadcast %cst_105 : f32 to vector<8x4xf32>
      %374 = arith.mulf %373, %361 : vector<8x4xf32>
      %375 = arith.addf %372, %374 : vector<8x4xf32>
      %376 = arith.addf %370, %375 : vector<8x4xf32>
      %377 = vector.extract_strided_slice %376 {offsets = [0, 0], sizes = [8, 1], strides = [1, 1]} : vector<8x4xf32> to vector<8x1xf32>
      %378 = vector.broadcast %377 : vector<8x1xf32> to vector<8x32xf32>
      %379 = arith.mulf %378, %11 : vector<8x32xf32>
      %380 = vector.extract_strided_slice %376 {offsets = [0, 1], sizes = [8, 1], strides = [1, 1]} : vector<8x4xf32> to vector<8x1xf32>
      %381 = vector.broadcast %380 : vector<8x1xf32> to vector<8x32xf32>
      %382 = arith.mulf %381, %14 : vector<8x32xf32>
      %383 = vector.extract_strided_slice %376 {offsets = [0, 2], sizes = [8, 1], strides = [1, 1]} : vector<8x4xf32> to vector<8x1xf32>
      %384 = vector.broadcast %383 : vector<8x1xf32> to vector<8x32xf32>
      %385 = arith.mulf %384, %17 : vector<8x32xf32>
      %386 = vector.extract_strided_slice %376 {offsets = [0, 3], sizes = [8, 1], strides = [1, 1]} : vector<8x4xf32> to vector<8x1xf32>
      %387 = vector.broadcast %386 : vector<8x1xf32> to vector<8x32xf32>
      %388 = arith.mulf %387, %20 : vector<8x32xf32>
      %389 = arith.addf %5, %379 : vector<8x32xf32>
      %390 = arith.addf %382, %385 : vector<8x32xf32>
      %391 = arith.addf %389, %390 : vector<8x32xf32>
      %392 = arith.addf %391, %388 : vector<8x32xf32>
      %393 = math.tanh %392 : vector<8x32xf32>
      %394 = arith.mulf %393, %23 : vector<8x32xf32>
      %cst_106 = arith.constant dense<0.000000e+00> : vector<8xf32>
      %395 = vector.multi_reduction <add>, %394, %cst_106 [1] : vector<8x32xf32> to vector<8xf32>
      %396 = vector.shape_cast %395 : vector<8xf32> to vector<8x1xf32>
      %397 = arith.mulf %393, %26 : vector<8x32xf32>
      %cst_107 = arith.constant dense<0.000000e+00> : vector<8xf32>
      %398 = vector.multi_reduction <add>, %397, %cst_107 [1] : vector<8x32xf32> to vector<8xf32>
      %399 = vector.shape_cast %398 : vector<8xf32> to vector<8x1xf32>
      %400 = arith.mulf %393, %29 : vector<8x32xf32>
      %cst_108 = arith.constant dense<0.000000e+00> : vector<8xf32>
      %401 = vector.multi_reduction <add>, %400, %cst_108 [1] : vector<8x32xf32> to vector<8xf32>
      %402 = vector.shape_cast %401 : vector<8xf32> to vector<8x1xf32>
      %403 = arith.mulf %393, %32 : vector<8x32xf32>
      %cst_109 = arith.constant dense<0.000000e+00> : vector<8xf32>
      %404 = vector.multi_reduction <add>, %403, %cst_109 [1] : vector<8x32xf32> to vector<8xf32>
      %405 = vector.shape_cast %404 : vector<8xf32> to vector<8x1xf32>
      %406 = tpu.concatenate %396, %399, %402, %405 in 1 : vector<8x1xf32>, vector<8x1xf32>, vector<8x1xf32>, vector<8x1xf32> -> vector<8x4xf32>
      %407 = arith.addf %406, %8 : vector<8x4xf32>
      %408 = vector.broadcast %149 : f32 to vector<8x4xf32>
      %409 = arith.mulf %408, %407 : vector<8x4xf32>
      %cst_110 = arith.constant 0.00123263884 : f32
      %410 = vector.broadcast %cst_110 : f32 to vector<8x4xf32>
      %411 = arith.mulf %410, %151 : vector<8x4xf32>
      %cst_111 = arith.constant -0.00425277045 : f32
      %412 = vector.broadcast %cst_111 : f32 to vector<8x4xf32>
      %413 = arith.mulf %412, %226 : vector<8x4xf32>
      %414 = arith.addf %411, %413 : vector<8x4xf32>
      %cst_112 = arith.constant 0.0369791649 : f32
      %415 = vector.broadcast %cst_112 : f32 to vector<8x4xf32>
      %416 = arith.mulf %415, %268 : vector<8x4xf32>
      %cst_113 = arith.constant -5.086380e-02 : f32
      %417 = vector.broadcast %cst_113 : f32 to vector<8x4xf32>
      %418 = arith.mulf %417, %313 : vector<8x4xf32>
      %419 = arith.addf %416, %418 : vector<8x4xf32>
      %420 = arith.addf %414, %419 : vector<8x4xf32>
      %cst_114 = arith.constant 0.0419047624 : f32
      %421 = vector.broadcast %cst_114 : f32 to vector<8x4xf32>
      %422 = arith.mulf %421, %361 : vector<8x4xf32>
      %cst_115 = arith.constant -2.500000e-02 : f32
      %423 = vector.broadcast %cst_115 : f32 to vector<8x4xf32>
      %424 = arith.mulf %423, %409 : vector<8x4xf32>
      %425 = arith.addf %422, %424 : vector<8x4xf32>
      %426 = arith.addf %420, %425 : vector<8x4xf32>
      %427 = math.absf %arg8 : vector<8x4xf32>
      %428 = math.absf %376 : vector<8x4xf32>
      %429 = arith.maximumf %427, %428 : vector<8x4xf32>
      %cst_116 = arith.constant 9.99999997E-7 : f32
      %430 = vector.broadcast %cst_116 : f32 to vector<8x4xf32>
      %431 = arith.mulf %430, %429 : vector<8x4xf32>
      %cst_117 = arith.constant 1.000000e-07 : f32
      %432 = vector.broadcast %cst_117 : f32 to vector<8x4xf32>
      %433 = arith.addf %432, %431 : vector<8x4xf32>
      %434 = arith.divf %426, %433 : vector<8x4xf32>
      %435 = arith.mulf %434, %434 : vector<8x4xf32>
      %436 = vector.shape_cast %435 : vector<8x4xf32> to vector<1x8x4xf32>
      %cst_118 = arith.constant dense<0.000000e+00> : vector<1xf32>
      %437 = vector.multi_reduction <add>, %436, %cst_118 [1, 2] : vector<1x8x4xf32> to vector<1xf32>
      %438 = vector.shape_cast %437 : vector<1xf32> to vector<1x1x1xf32>
      %439 = vector.extract %438[0, 0, 0] : f32 from vector<1x1x1xf32>
      %440 = vector.broadcast %439 : f32 to vector<1x1xf32>
      %cst_119 = arith.constant 3.125000e-02 : f32
      %441 = vector.broadcast %cst_119 : f32 to vector<1x1xf32>
      %442 = arith.mulf %440, %441 : vector<1x1xf32>
      %cst_120 = arith.constant 1.000000e-24 : f32
      %443 = vector.broadcast %cst_120 : f32 to vector<1x1xf32>
      %444 = arith.addf %442, %443 : vector<1x1xf32>
      %445 = math.log %444 : vector<1x1xf32>
      %cst_121 = arith.constant -1.000000e-01 : f32
      %446 = vector.broadcast %cst_121 : f32 to vector<1x1xf32>
      %447 = arith.mulf %446, %445 : vector<1x1xf32>
      %448 = math.exp %447 : vector<1x1xf32>
      %cst_122 = arith.constant 0.899999976 : f32
      %449 = vector.broadcast %cst_122 : f32 to vector<1x1xf32>
      %450 = arith.mulf %449, %448 : vector<1x1xf32>
      %451 = vector.extract %442[0, 0] : f32 from vector<1x1xf32>
      %452 = vector.extract %450[0, 0] : f32 from vector<1x1xf32>
      %cst_123 = arith.constant 2.000000e-01 : f32
      %cst_124 = arith.constant 1.000000e+01 : f32
      %453 = arith.maximumf %cst_123, %452 : f32
      %454 = arith.minimumf %cst_124, %453 : f32
      %cst_125 = arith.constant 1.000000e+00 : f32
      %455 = arith.cmpf ole, %451, %cst_125 : f32
      %456 = arith.addf %arg7, %149 : f32
      %457 = arith.select %455, %456, %arg7 : f32
      %458 = arith.select %455, %376, %arg8 : vector<8x4xf32>
      %459 = arith.select %455, %407, %arg10 : vector<8x4xf32>
      %460 = arith.mulf %149, %454 : f32
      %cst_126 = arith.constant 9.99999997E-7 : f32
      %461 = arith.mulf %cst_126, %106 : f32
      %462 = arith.maximumf %460, %461 : f32
      %c1_i32 = arith.constant 1 : i32
      %463 = arith.addi %arg11, %c1_i32 : i32
      scf.yield %457, %458, %462, %459, %463 : f32, vector<8x4xf32>, f32, vector<8x4xf32>, i32
    }
    %c4_42 = arith.constant 4 : index
    %c0_43 = arith.constant 0 : index
    %c0_44 = arith.constant 0 : index
    %112 = vector.load %arg6[%c4_42, %c0_43, %c0_44] : memref<8x8x4xf32, #tpu.memory_space<vmem>>, vector<1x8x4xf32>
    %113 = vector.shape_cast %112 : vector<1x8x4xf32> to vector<8x4xf32>
    %114 = vector.shape_cast %111#1 : vector<8x4xf32> to vector<1x8x4xf32>
    tpu.vector_store %arg6[%c4_42, %c0_43, %c0_44], %114 {strides = array<i32>} : memref<8x8x4xf32, #tpu.memory_space<vmem>>, vector<1x8x4xf32>,
    %c4_45 = arith.constant 4 : index
    %115 = memref.load %arg0[%c4_45] : memref<8xf32, #tpu.memory_space<smem>>
    %c5 = arith.constant 5 : index
    %116 = memref.load %arg0[%c5] : memref<8xf32, #tpu.memory_space<smem>>
    %117 = arith.subf %116, %115 : f32
    %118 = math.absf %116 : f32
    %cst_46 = arith.constant 1.000000e+00 : f32
    %119 = arith.maximumf %118, %cst_46 : f32
    %cst_47 = arith.constant 1.000000e-10 : f32
    %120 = arith.mulf %cst_47, %119 : f32
    %121 = arith.minimumf %111#2, %117 : f32
    %c0_i32_48 = arith.constant 0 : i32
    %122:5 = scf.while (%arg7 = %115, %arg8 = %111#1, %arg9 = %121, %arg10 = %111#3, %arg11 = %c0_i32_48) : (f32, vector<8x4xf32>, f32, vector<8x4xf32>, i32) -> (f32, vector<8x4xf32>, f32, vector<8x4xf32>, i32) {
      %148 = arith.subf %116, %arg7 : f32
      %149 = arith.cmpf ogt, %148, %120 : f32
      %c1000_i32 = arith.constant 1000 : i32
      %150 = arith.cmpi slt, %arg11, %c1000_i32 : i32
      %151 = arith.andi %149, %150 : i1
      scf.condition(%151) %arg7, %arg8, %arg9, %arg10, %arg11 : f32, vector<8x4xf32>, f32, vector<8x4xf32>, i32
    } do {
    ^bb0(%arg7: f32, %arg8: vector<8x4xf32>, %arg9: f32, %arg10: vector<8x4xf32>, %arg11: i32):
      %148 = arith.subf %116, %arg7 : f32
      %149 = arith.minimumf %arg9, %148 : f32
      %150 = vector.broadcast %149 : f32 to vector<8x4xf32>
      %151 = arith.mulf %150, %arg10 : vector<8x4xf32>
      %cst_66 = arith.constant 2.000000e-01 : f32
      %152 = vector.broadcast %cst_66 : f32 to vector<8x4xf32>
      %153 = arith.mulf %152, %151 : vector<8x4xf32>
      %154 = arith.addf %arg8, %153 : vector<8x4xf32>
      %155 = vector.extract_strided_slice %154 {offsets = [0, 0], sizes = [8, 1], strides = [1, 1]} : vector<8x4xf32> to vector<8x1xf32>
      %156 = vector.broadcast %155 : vector<8x1xf32> to vector<8x32xf32>
      %157 = arith.mulf %156, %11 : vector<8x32xf32>
      %158 = vector.extract_strided_slice %154 {offsets = [0, 1], sizes = [8, 1], strides = [1, 1]} : vector<8x4xf32> to vector<8x1xf32>
      %159 = vector.broadcast %158 : vector<8x1xf32> to vector<8x32xf32>
      %160 = arith.mulf %159, %14 : vector<8x32xf32>
      %161 = vector.extract_strided_slice %154 {offsets = [0, 2], sizes = [8, 1], strides = [1, 1]} : vector<8x4xf32> to vector<8x1xf32>
      %162 = vector.broadcast %161 : vector<8x1xf32> to vector<8x32xf32>
      %163 = arith.mulf %162, %17 : vector<8x32xf32>
      %164 = vector.extract_strided_slice %154 {offsets = [0, 3], sizes = [8, 1], strides = [1, 1]} : vector<8x4xf32> to vector<8x1xf32>
      %165 = vector.broadcast %164 : vector<8x1xf32> to vector<8x32xf32>
      %166 = arith.mulf %165, %20 : vector<8x32xf32>
      %167 = arith.addf %5, %157 : vector<8x32xf32>
      %168 = arith.addf %160, %163 : vector<8x32xf32>
      %169 = arith.addf %167, %168 : vector<8x32xf32>
      %170 = arith.addf %169, %166 : vector<8x32xf32>
      %171 = math.tanh %170 : vector<8x32xf32>
      %172 = arith.mulf %171, %23 : vector<8x32xf32>
      %cst_67 = arith.constant dense<0.000000e+00> : vector<8xf32>
      %173 = vector.multi_reduction <add>, %172, %cst_67 [1] : vector<8x32xf32> to vector<8xf32>
      %174 = vector.shape_cast %173 : vector<8xf32> to vector<8x1xf32>
      %175 = arith.mulf %171, %26 : vector<8x32xf32>
      %cst_68 = arith.constant dense<0.000000e+00> : vector<8xf32>
      %176 = vector.multi_reduction <add>, %175, %cst_68 [1] : vector<8x32xf32> to vector<8xf32>
      %177 = vector.shape_cast %176 : vector<8xf32> to vector<8x1xf32>
      %178 = arith.mulf %171, %29 : vector<8x32xf32>
      %cst_69 = arith.constant dense<0.000000e+00> : vector<8xf32>
      %179 = vector.multi_reduction <add>, %178, %cst_69 [1] : vector<8x32xf32> to vector<8xf32>
      %180 = vector.shape_cast %179 : vector<8xf32> to vector<8x1xf32>
      %181 = arith.mulf %171, %32 : vector<8x32xf32>
      %cst_70 = arith.constant dense<0.000000e+00> : vector<8xf32>
      %182 = vector.multi_reduction <add>, %181, %cst_70 [1] : vector<8x32xf32> to vector<8xf32>
      %183 = vector.shape_cast %182 : vector<8xf32> to vector<8x1xf32>
      %184 = tpu.concatenate %174, %177, %180, %183 in 1 : vector<8x1xf32>, vector<8x1xf32>, vector<8x1xf32>, vector<8x1xf32> -> vector<8x4xf32>
      %185 = arith.addf %184, %8 : vector<8x4xf32>
      %186 = vector.broadcast %149 : f32 to vector<8x4xf32>
      %187 = arith.mulf %186, %185 : vector<8x4xf32>
      %cst_71 = arith.constant 7.500000e-02 : f32
      %188 = vector.broadcast %cst_71 : f32 to vector<8x4xf32>
      %189 = arith.mulf %188, %151 : vector<8x4xf32>
      %cst_72 = arith.constant 2.250000e-01 : f32
      %190 = vector.broadcast %cst_72 : f32 to vector<8x4xf32>
      %191 = arith.mulf %190, %187 : vector<8x4xf32>
      %192 = arith.addf %189, %191 : vector<8x4xf32>
      %193 = arith.addf %arg8, %192 : vector<8x4xf32>
      %194 = vector.extract_strided_slice %193 {offsets = [0, 0], sizes = [8, 1], strides = [1, 1]} : vector<8x4xf32> to vector<8x1xf32>
      %195 = vector.broadcast %194 : vector<8x1xf32> to vector<8x32xf32>
      %196 = arith.mulf %195, %11 : vector<8x32xf32>
      %197 = vector.extract_strided_slice %193 {offsets = [0, 1], sizes = [8, 1], strides = [1, 1]} : vector<8x4xf32> to vector<8x1xf32>
      %198 = vector.broadcast %197 : vector<8x1xf32> to vector<8x32xf32>
      %199 = arith.mulf %198, %14 : vector<8x32xf32>
      %200 = vector.extract_strided_slice %193 {offsets = [0, 2], sizes = [8, 1], strides = [1, 1]} : vector<8x4xf32> to vector<8x1xf32>
      %201 = vector.broadcast %200 : vector<8x1xf32> to vector<8x32xf32>
      %202 = arith.mulf %201, %17 : vector<8x32xf32>
      %203 = vector.extract_strided_slice %193 {offsets = [0, 3], sizes = [8, 1], strides = [1, 1]} : vector<8x4xf32> to vector<8x1xf32>
      %204 = vector.broadcast %203 : vector<8x1xf32> to vector<8x32xf32>
      %205 = arith.mulf %204, %20 : vector<8x32xf32>
      %206 = arith.addf %5, %196 : vector<8x32xf32>
      %207 = arith.addf %199, %202 : vector<8x32xf32>
      %208 = arith.addf %206, %207 : vector<8x32xf32>
      %209 = arith.addf %208, %205 : vector<8x32xf32>
      %210 = math.tanh %209 : vector<8x32xf32>
      %211 = arith.mulf %210, %23 : vector<8x32xf32>
      %cst_73 = arith.constant dense<0.000000e+00> : vector<8xf32>
      %212 = vector.multi_reduction <add>, %211, %cst_73 [1] : vector<8x32xf32> to vector<8xf32>
      %213 = vector.shape_cast %212 : vector<8xf32> to vector<8x1xf32>
      %214 = arith.mulf %210, %26 : vector<8x32xf32>
      %cst_74 = arith.constant dense<0.000000e+00> : vector<8xf32>
      %215 = vector.multi_reduction <add>, %214, %cst_74 [1] : vector<8x32xf32> to vector<8xf32>
      %216 = vector.shape_cast %215 : vector<8xf32> to vector<8x1xf32>
      %217 = arith.mulf %210, %29 : vector<8x32xf32>
      %cst_75 = arith.constant dense<0.000000e+00> : vector<8xf32>
      %218 = vector.multi_reduction <add>, %217, %cst_75 [1] : vector<8x32xf32> to vector<8xf32>
      %219 = vector.shape_cast %218 : vector<8xf32> to vector<8x1xf32>
      %220 = arith.mulf %210, %32 : vector<8x32xf32>
      %cst_76 = arith.constant dense<0.000000e+00> : vector<8xf32>
      %221 = vector.multi_reduction <add>, %220, %cst_76 [1] : vector<8x32xf32> to vector<8xf32>
      %222 = vector.shape_cast %221 : vector<8xf32> to vector<8x1xf32>
      %223 = tpu.concatenate %213, %216, %219, %222 in 1 : vector<8x1xf32>, vector<8x1xf32>, vector<8x1xf32>, vector<8x1xf32> -> vector<8x4xf32>
      %224 = arith.addf %223, %8 : vector<8x4xf32>
      %225 = vector.broadcast %149 : f32 to vector<8x4xf32>
      %226 = arith.mulf %225, %224 : vector<8x4xf32>
      %cst_77 = arith.constant 0.977777779 : f32
      %227 = vector.broadcast %cst_77 : f32 to vector<8x4xf32>
      %228 = arith.mulf %227, %151 : vector<8x4xf32>
      %229 = arith.addf %arg8, %228 : vector<8x4xf32>
      %cst_78 = arith.constant -3.73333335 : f32
      %230 = vector.broadcast %cst_78 : f32 to vector<8x4xf32>
      %231 = arith.mulf %230, %187 : vector<8x4xf32>
      %cst_79 = arith.constant 3.55555558 : f32
      %232 = vector.broadcast %cst_79 : f32 to vector<8x4xf32>
      %233 = arith.mulf %232, %226 : vector<8x4xf32>
      %234 = arith.addf %231, %233 : vector<8x4xf32>
      %235 = arith.addf %229, %234 : vector<8x4xf32>
      %236 = vector.extract_strided_slice %235 {offsets = [0, 0], sizes = [8, 1], strides = [1, 1]} : vector<8x4xf32> to vector<8x1xf32>
      %237 = vector.broadcast %236 : vector<8x1xf32> to vector<8x32xf32>
      %238 = arith.mulf %237, %11 : vector<8x32xf32>
      %239 = vector.extract_strided_slice %235 {offsets = [0, 1], sizes = [8, 1], strides = [1, 1]} : vector<8x4xf32> to vector<8x1xf32>
      %240 = vector.broadcast %239 : vector<8x1xf32> to vector<8x32xf32>
      %241 = arith.mulf %240, %14 : vector<8x32xf32>
      %242 = vector.extract_strided_slice %235 {offsets = [0, 2], sizes = [8, 1], strides = [1, 1]} : vector<8x4xf32> to vector<8x1xf32>
      %243 = vector.broadcast %242 : vector<8x1xf32> to vector<8x32xf32>
      %244 = arith.mulf %243, %17 : vector<8x32xf32>
      %245 = vector.extract_strided_slice %235 {offsets = [0, 3], sizes = [8, 1], strides = [1, 1]} : vector<8x4xf32> to vector<8x1xf32>
      %246 = vector.broadcast %245 : vector<8x1xf32> to vector<8x32xf32>
      %247 = arith.mulf %246, %20 : vector<8x32xf32>
      %248 = arith.addf %5, %238 : vector<8x32xf32>
      %249 = arith.addf %241, %244 : vector<8x32xf32>
      %250 = arith.addf %248, %249 : vector<8x32xf32>
      %251 = arith.addf %250, %247 : vector<8x32xf32>
      %252 = math.tanh %251 : vector<8x32xf32>
      %253 = arith.mulf %252, %23 : vector<8x32xf32>
      %cst_80 = arith.constant dense<0.000000e+00> : vector<8xf32>
      %254 = vector.multi_reduction <add>, %253, %cst_80 [1] : vector<8x32xf32> to vector<8xf32>
      %255 = vector.shape_cast %254 : vector<8xf32> to vector<8x1xf32>
      %256 = arith.mulf %252, %26 : vector<8x32xf32>
      %cst_81 = arith.constant dense<0.000000e+00> : vector<8xf32>
      %257 = vector.multi_reduction <add>, %256, %cst_81 [1] : vector<8x32xf32> to vector<8xf32>
      %258 = vector.shape_cast %257 : vector<8xf32> to vector<8x1xf32>
      %259 = arith.mulf %252, %29 : vector<8x32xf32>
      %cst_82 = arith.constant dense<0.000000e+00> : vector<8xf32>
      %260 = vector.multi_reduction <add>, %259, %cst_82 [1] : vector<8x32xf32> to vector<8xf32>
      %261 = vector.shape_cast %260 : vector<8xf32> to vector<8x1xf32>
      %262 = arith.mulf %252, %32 : vector<8x32xf32>
      %cst_83 = arith.constant dense<0.000000e+00> : vector<8xf32>
      %263 = vector.multi_reduction <add>, %262, %cst_83 [1] : vector<8x32xf32> to vector<8xf32>
      %264 = vector.shape_cast %263 : vector<8xf32> to vector<8x1xf32>
      %265 = tpu.concatenate %255, %258, %261, %264 in 1 : vector<8x1xf32>, vector<8x1xf32>, vector<8x1xf32>, vector<8x1xf32> -> vector<8x4xf32>
      %266 = arith.addf %265, %8 : vector<8x4xf32>
      %267 = vector.broadcast %149 : f32 to vector<8x4xf32>
      %268 = arith.mulf %267, %266 : vector<8x4xf32>
      %cst_84 = arith.constant 2.95259857 : f32
      %269 = vector.broadcast %cst_84 : f32 to vector<8x4xf32>
      %270 = arith.mulf %269, %151 : vector<8x4xf32>
      %271 = arith.addf %arg8, %270 : vector<8x4xf32>
      %cst_85 = arith.constant -11.5957937 : f32
      %272 = vector.broadcast %cst_85 : f32 to vector<8x4xf32>
      %273 = arith.mulf %272, %187 : vector<8x4xf32>
      %cst_86 = arith.constant 9.82289314 : f32
      %274 = vector.broadcast %cst_86 : f32 to vector<8x4xf32>
      %275 = arith.mulf %274, %226 : vector<8x4xf32>
      %276 = arith.addf %273, %275 : vector<8x4xf32>
      %cst_87 = arith.constant -0.290809333 : f32
      %277 = vector.broadcast %cst_87 : f32 to vector<8x4xf32>
      %278 = arith.mulf %277, %268 : vector<8x4xf32>
      %279 = arith.addf %276, %278 : vector<8x4xf32>
      %280 = arith.addf %271, %279 : vector<8x4xf32>
      %281 = vector.extract_strided_slice %280 {offsets = [0, 0], sizes = [8, 1], strides = [1, 1]} : vector<8x4xf32> to vector<8x1xf32>
      %282 = vector.broadcast %281 : vector<8x1xf32> to vector<8x32xf32>
      %283 = arith.mulf %282, %11 : vector<8x32xf32>
      %284 = vector.extract_strided_slice %280 {offsets = [0, 1], sizes = [8, 1], strides = [1, 1]} : vector<8x4xf32> to vector<8x1xf32>
      %285 = vector.broadcast %284 : vector<8x1xf32> to vector<8x32xf32>
      %286 = arith.mulf %285, %14 : vector<8x32xf32>
      %287 = vector.extract_strided_slice %280 {offsets = [0, 2], sizes = [8, 1], strides = [1, 1]} : vector<8x4xf32> to vector<8x1xf32>
      %288 = vector.broadcast %287 : vector<8x1xf32> to vector<8x32xf32>
      %289 = arith.mulf %288, %17 : vector<8x32xf32>
      %290 = vector.extract_strided_slice %280 {offsets = [0, 3], sizes = [8, 1], strides = [1, 1]} : vector<8x4xf32> to vector<8x1xf32>
      %291 = vector.broadcast %290 : vector<8x1xf32> to vector<8x32xf32>
      %292 = arith.mulf %291, %20 : vector<8x32xf32>
      %293 = arith.addf %5, %283 : vector<8x32xf32>
      %294 = arith.addf %286, %289 : vector<8x32xf32>
      %295 = arith.addf %293, %294 : vector<8x32xf32>
      %296 = arith.addf %295, %292 : vector<8x32xf32>
      %297 = math.tanh %296 : vector<8x32xf32>
      %298 = arith.mulf %297, %23 : vector<8x32xf32>
      %cst_88 = arith.constant dense<0.000000e+00> : vector<8xf32>
      %299 = vector.multi_reduction <add>, %298, %cst_88 [1] : vector<8x32xf32> to vector<8xf32>
      %300 = vector.shape_cast %299 : vector<8xf32> to vector<8x1xf32>
      %301 = arith.mulf %297, %26 : vector<8x32xf32>
      %cst_89 = arith.constant dense<0.000000e+00> : vector<8xf32>
      %302 = vector.multi_reduction <add>, %301, %cst_89 [1] : vector<8x32xf32> to vector<8xf32>
      %303 = vector.shape_cast %302 : vector<8xf32> to vector<8x1xf32>
      %304 = arith.mulf %297, %29 : vector<8x32xf32>
      %cst_90 = arith.constant dense<0.000000e+00> : vector<8xf32>
      %305 = vector.multi_reduction <add>, %304, %cst_90 [1] : vector<8x32xf32> to vector<8xf32>
      %306 = vector.shape_cast %305 : vector<8xf32> to vector<8x1xf32>
      %307 = arith.mulf %297, %32 : vector<8x32xf32>
      %cst_91 = arith.constant dense<0.000000e+00> : vector<8xf32>
      %308 = vector.multi_reduction <add>, %307, %cst_91 [1] : vector<8x32xf32> to vector<8xf32>
      %309 = vector.shape_cast %308 : vector<8xf32> to vector<8x1xf32>
      %310 = tpu.concatenate %300, %303, %306, %309 in 1 : vector<8x1xf32>, vector<8x1xf32>, vector<8x1xf32>, vector<8x1xf32> -> vector<8x4xf32>
      %311 = arith.addf %310, %8 : vector<8x4xf32>
      %312 = vector.broadcast %149 : f32 to vector<8x4xf32>
      %313 = arith.mulf %312, %311 : vector<8x4xf32>
      %cst_92 = arith.constant 2.84627533 : f32
      %314 = vector.broadcast %cst_92 : f32 to vector<8x4xf32>
      %315 = arith.mulf %314, %151 : vector<8x4xf32>
      %316 = arith.addf %arg8, %315 : vector<8x4xf32>
      %cst_93 = arith.constant -10.757576 : f32
      %317 = vector.broadcast %cst_93 : f32 to vector<8x4xf32>
      %318 = arith.mulf %317, %187 : vector<8x4xf32>
      %cst_94 = arith.constant 8.90642261 : f32
      %319 = vector.broadcast %cst_94 : f32 to vector<8x4xf32>
      %320 = arith.mulf %319, %226 : vector<8x4xf32>
      %321 = arith.addf %318, %320 : vector<8x4xf32>
      %322 = arith.addf %316, %321 : vector<8x4xf32>
      %cst_95 = arith.constant 0.278409094 : f32
      %323 = vector.broadcast %cst_95 : f32 to vector<8x4xf32>
      %324 = arith.mulf %323, %268 : vector<8x4xf32>
      %cst_96 = arith.constant -0.273531318 : f32
      %325 = vector.broadcast %cst_96 : f32 to vector<8x4xf32>
      %326 = arith.mulf %325, %313 : vector<8x4xf32>
      %327 = arith.addf %324, %326 : vector<8x4xf32>
      %328 = arith.addf %322, %327 : vector<8x4xf32>
      %329 = vector.extract_strided_slice %328 {offsets = [0, 0], sizes = [8, 1], strides = [1, 1]} : vector<8x4xf32> to vector<8x1xf32>
      %330 = vector.broadcast %329 : vector<8x1xf32> to vector<8x32xf32>
      %331 = arith.mulf %330, %11 : vector<8x32xf32>
      %332 = vector.extract_strided_slice %328 {offsets = [0, 1], sizes = [8, 1], strides = [1, 1]} : vector<8x4xf32> to vector<8x1xf32>
      %333 = vector.broadcast %332 : vector<8x1xf32> to vector<8x32xf32>
      %334 = arith.mulf %333, %14 : vector<8x32xf32>
      %335 = vector.extract_strided_slice %328 {offsets = [0, 2], sizes = [8, 1], strides = [1, 1]} : vector<8x4xf32> to vector<8x1xf32>
      %336 = vector.broadcast %335 : vector<8x1xf32> to vector<8x32xf32>
      %337 = arith.mulf %336, %17 : vector<8x32xf32>
      %338 = vector.extract_strided_slice %328 {offsets = [0, 3], sizes = [8, 1], strides = [1, 1]} : vector<8x4xf32> to vector<8x1xf32>
      %339 = vector.broadcast %338 : vector<8x1xf32> to vector<8x32xf32>
      %340 = arith.mulf %339, %20 : vector<8x32xf32>
      %341 = arith.addf %5, %331 : vector<8x32xf32>
      %342 = arith.addf %334, %337 : vector<8x32xf32>
      %343 = arith.addf %341, %342 : vector<8x32xf32>
      %344 = arith.addf %343, %340 : vector<8x32xf32>
      %345 = math.tanh %344 : vector<8x32xf32>
      %346 = arith.mulf %345, %23 : vector<8x32xf32>
      %cst_97 = arith.constant dense<0.000000e+00> : vector<8xf32>
      %347 = vector.multi_reduction <add>, %346, %cst_97 [1] : vector<8x32xf32> to vector<8xf32>
      %348 = vector.shape_cast %347 : vector<8xf32> to vector<8x1xf32>
      %349 = arith.mulf %345, %26 : vector<8x32xf32>
      %cst_98 = arith.constant dense<0.000000e+00> : vector<8xf32>
      %350 = vector.multi_reduction <add>, %349, %cst_98 [1] : vector<8x32xf32> to vector<8xf32>
      %351 = vector.shape_cast %350 : vector<8xf32> to vector<8x1xf32>
      %352 = arith.mulf %345, %29 : vector<8x32xf32>
      %cst_99 = arith.constant dense<0.000000e+00> : vector<8xf32>
      %353 = vector.multi_reduction <add>, %352, %cst_99 [1] : vector<8x32xf32> to vector<8xf32>
      %354 = vector.shape_cast %353 : vector<8xf32> to vector<8x1xf32>
      %355 = arith.mulf %345, %32 : vector<8x32xf32>
      %cst_100 = arith.constant dense<0.000000e+00> : vector<8xf32>
      %356 = vector.multi_reduction <add>, %355, %cst_100 [1] : vector<8x32xf32> to vector<8xf32>
      %357 = vector.shape_cast %356 : vector<8xf32> to vector<8x1xf32>
      %358 = tpu.concatenate %348, %351, %354, %357 in 1 : vector<8x1xf32>, vector<8x1xf32>, vector<8x1xf32>, vector<8x1xf32> -> vector<8x4xf32>
      %359 = arith.addf %358, %8 : vector<8x4xf32>
      %360 = vector.broadcast %149 : f32 to vector<8x4xf32>
      %361 = arith.mulf %360, %359 : vector<8x4xf32>
      %cst_101 = arith.constant 0.0911458358 : f32
      %362 = vector.broadcast %cst_101 : f32 to vector<8x4xf32>
      %363 = arith.mulf %362, %151 : vector<8x4xf32>
      %364 = arith.addf %arg8, %363 : vector<8x4xf32>
      %cst_102 = arith.constant 0.449236304 : f32
      %365 = vector.broadcast %cst_102 : f32 to vector<8x4xf32>
      %366 = arith.mulf %365, %226 : vector<8x4xf32>
      %cst_103 = arith.constant 0.651041686 : f32
      %367 = vector.broadcast %cst_103 : f32 to vector<8x4xf32>
      %368 = arith.mulf %367, %268 : vector<8x4xf32>
      %369 = arith.addf %366, %368 : vector<8x4xf32>
      %370 = arith.addf %364, %369 : vector<8x4xf32>
      %cst_104 = arith.constant -0.322376192 : f32
      %371 = vector.broadcast %cst_104 : f32 to vector<8x4xf32>
      %372 = arith.mulf %371, %313 : vector<8x4xf32>
      %cst_105 = arith.constant 0.130952388 : f32
      %373 = vector.broadcast %cst_105 : f32 to vector<8x4xf32>
      %374 = arith.mulf %373, %361 : vector<8x4xf32>
      %375 = arith.addf %372, %374 : vector<8x4xf32>
      %376 = arith.addf %370, %375 : vector<8x4xf32>
      %377 = vector.extract_strided_slice %376 {offsets = [0, 0], sizes = [8, 1], strides = [1, 1]} : vector<8x4xf32> to vector<8x1xf32>
      %378 = vector.broadcast %377 : vector<8x1xf32> to vector<8x32xf32>
      %379 = arith.mulf %378, %11 : vector<8x32xf32>
      %380 = vector.extract_strided_slice %376 {offsets = [0, 1], sizes = [8, 1], strides = [1, 1]} : vector<8x4xf32> to vector<8x1xf32>
      %381 = vector.broadcast %380 : vector<8x1xf32> to vector<8x32xf32>
      %382 = arith.mulf %381, %14 : vector<8x32xf32>
      %383 = vector.extract_strided_slice %376 {offsets = [0, 2], sizes = [8, 1], strides = [1, 1]} : vector<8x4xf32> to vector<8x1xf32>
      %384 = vector.broadcast %383 : vector<8x1xf32> to vector<8x32xf32>
      %385 = arith.mulf %384, %17 : vector<8x32xf32>
      %386 = vector.extract_strided_slice %376 {offsets = [0, 3], sizes = [8, 1], strides = [1, 1]} : vector<8x4xf32> to vector<8x1xf32>
      %387 = vector.broadcast %386 : vector<8x1xf32> to vector<8x32xf32>
      %388 = arith.mulf %387, %20 : vector<8x32xf32>
      %389 = arith.addf %5, %379 : vector<8x32xf32>
      %390 = arith.addf %382, %385 : vector<8x32xf32>
      %391 = arith.addf %389, %390 : vector<8x32xf32>
      %392 = arith.addf %391, %388 : vector<8x32xf32>
      %393 = math.tanh %392 : vector<8x32xf32>
      %394 = arith.mulf %393, %23 : vector<8x32xf32>
      %cst_106 = arith.constant dense<0.000000e+00> : vector<8xf32>
      %395 = vector.multi_reduction <add>, %394, %cst_106 [1] : vector<8x32xf32> to vector<8xf32>
      %396 = vector.shape_cast %395 : vector<8xf32> to vector<8x1xf32>
      %397 = arith.mulf %393, %26 : vector<8x32xf32>
      %cst_107 = arith.constant dense<0.000000e+00> : vector<8xf32>
      %398 = vector.multi_reduction <add>, %397, %cst_107 [1] : vector<8x32xf32> to vector<8xf32>
      %399 = vector.shape_cast %398 : vector<8xf32> to vector<8x1xf32>
      %400 = arith.mulf %393, %29 : vector<8x32xf32>
      %cst_108 = arith.constant dense<0.000000e+00> : vector<8xf32>
      %401 = vector.multi_reduction <add>, %400, %cst_108 [1] : vector<8x32xf32> to vector<8xf32>
      %402 = vector.shape_cast %401 : vector<8xf32> to vector<8x1xf32>
      %403 = arith.mulf %393, %32 : vector<8x32xf32>
      %cst_109 = arith.constant dense<0.000000e+00> : vector<8xf32>
      %404 = vector.multi_reduction <add>, %403, %cst_109 [1] : vector<8x32xf32> to vector<8xf32>
      %405 = vector.shape_cast %404 : vector<8xf32> to vector<8x1xf32>
      %406 = tpu.concatenate %396, %399, %402, %405 in 1 : vector<8x1xf32>, vector<8x1xf32>, vector<8x1xf32>, vector<8x1xf32> -> vector<8x4xf32>
      %407 = arith.addf %406, %8 : vector<8x4xf32>
      %408 = vector.broadcast %149 : f32 to vector<8x4xf32>
      %409 = arith.mulf %408, %407 : vector<8x4xf32>
      %cst_110 = arith.constant 0.00123263884 : f32
      %410 = vector.broadcast %cst_110 : f32 to vector<8x4xf32>
      %411 = arith.mulf %410, %151 : vector<8x4xf32>
      %cst_111 = arith.constant -0.00425277045 : f32
      %412 = vector.broadcast %cst_111 : f32 to vector<8x4xf32>
      %413 = arith.mulf %412, %226 : vector<8x4xf32>
      %414 = arith.addf %411, %413 : vector<8x4xf32>
      %cst_112 = arith.constant 0.0369791649 : f32
      %415 = vector.broadcast %cst_112 : f32 to vector<8x4xf32>
      %416 = arith.mulf %415, %268 : vector<8x4xf32>
      %cst_113 = arith.constant -5.086380e-02 : f32
      %417 = vector.broadcast %cst_113 : f32 to vector<8x4xf32>
      %418 = arith.mulf %417, %313 : vector<8x4xf32>
      %419 = arith.addf %416, %418 : vector<8x4xf32>
      %420 = arith.addf %414, %419 : vector<8x4xf32>
      %cst_114 = arith.constant 0.0419047624 : f32
      %421 = vector.broadcast %cst_114 : f32 to vector<8x4xf32>
      %422 = arith.mulf %421, %361 : vector<8x4xf32>
      %cst_115 = arith.constant -2.500000e-02 : f32
      %423 = vector.broadcast %cst_115 : f32 to vector<8x4xf32>
      %424 = arith.mulf %423, %409 : vector<8x4xf32>
      %425 = arith.addf %422, %424 : vector<8x4xf32>
      %426 = arith.addf %420, %425 : vector<8x4xf32>
      %427 = math.absf %arg8 : vector<8x4xf32>
      %428 = math.absf %376 : vector<8x4xf32>
      %429 = arith.maximumf %427, %428 : vector<8x4xf32>
      %cst_116 = arith.constant 9.99999997E-7 : f32
      %430 = vector.broadcast %cst_116 : f32 to vector<8x4xf32>
      %431 = arith.mulf %430, %429 : vector<8x4xf32>
      %cst_117 = arith.constant 1.000000e-07 : f32
      %432 = vector.broadcast %cst_117 : f32 to vector<8x4xf32>
      %433 = arith.addf %432, %431 : vector<8x4xf32>
      %434 = arith.divf %426, %433 : vector<8x4xf32>
      %435 = arith.mulf %434, %434 : vector<8x4xf32>
      %436 = vector.shape_cast %435 : vector<8x4xf32> to vector<1x8x4xf32>
      %cst_118 = arith.constant dense<0.000000e+00> : vector<1xf32>
      %437 = vector.multi_reduction <add>, %436, %cst_118 [1, 2] : vector<1x8x4xf32> to vector<1xf32>
      %438 = vector.shape_cast %437 : vector<1xf32> to vector<1x1x1xf32>
      %439 = vector.extract %438[0, 0, 0] : f32 from vector<1x1x1xf32>
      %440 = vector.broadcast %439 : f32 to vector<1x1xf32>
      %cst_119 = arith.constant 3.125000e-02 : f32
      %441 = vector.broadcast %cst_119 : f32 to vector<1x1xf32>
      %442 = arith.mulf %440, %441 : vector<1x1xf32>
      %cst_120 = arith.constant 1.000000e-24 : f32
      %443 = vector.broadcast %cst_120 : f32 to vector<1x1xf32>
      %444 = arith.addf %442, %443 : vector<1x1xf32>
      %445 = math.log %444 : vector<1x1xf32>
      %cst_121 = arith.constant -1.000000e-01 : f32
      %446 = vector.broadcast %cst_121 : f32 to vector<1x1xf32>
      %447 = arith.mulf %446, %445 : vector<1x1xf32>
      %448 = math.exp %447 : vector<1x1xf32>
      %cst_122 = arith.constant 0.899999976 : f32
      %449 = vector.broadcast %cst_122 : f32 to vector<1x1xf32>
      %450 = arith.mulf %449, %448 : vector<1x1xf32>
      %451 = vector.extract %442[0, 0] : f32 from vector<1x1xf32>
      %452 = vector.extract %450[0, 0] : f32 from vector<1x1xf32>
      %cst_123 = arith.constant 2.000000e-01 : f32
      %cst_124 = arith.constant 1.000000e+01 : f32
      %453 = arith.maximumf %cst_123, %452 : f32
      %454 = arith.minimumf %cst_124, %453 : f32
      %cst_125 = arith.constant 1.000000e+00 : f32
      %455 = arith.cmpf ole, %451, %cst_125 : f32
      %456 = arith.addf %arg7, %149 : f32
      %457 = arith.select %455, %456, %arg7 : f32
      %458 = arith.select %455, %376, %arg8 : vector<8x4xf32>
      %459 = arith.select %455, %407, %arg10 : vector<8x4xf32>
      %460 = arith.mulf %149, %454 : f32
      %cst_126 = arith.constant 9.99999997E-7 : f32
      %461 = arith.mulf %cst_126, %117 : f32
      %462 = arith.maximumf %460, %461 : f32
      %c1_i32 = arith.constant 1 : i32
      %463 = arith.addi %arg11, %c1_i32 : i32
      scf.yield %457, %458, %462, %459, %463 : f32, vector<8x4xf32>, f32, vector<8x4xf32>, i32
    }
    %c5_49 = arith.constant 5 : index
    %c0_50 = arith.constant 0 : index
    %c0_51 = arith.constant 0 : index
    %123 = vector.load %arg6[%c5_49, %c0_50, %c0_51] : memref<8x8x4xf32, #tpu.memory_space<vmem>>, vector<1x8x4xf32>
    %124 = vector.shape_cast %123 : vector<1x8x4xf32> to vector<8x4xf32>
    %125 = vector.shape_cast %122#1 : vector<8x4xf32> to vector<1x8x4xf32>
    tpu.vector_store %arg6[%c5_49, %c0_50, %c0_51], %125 {strides = array<i32>} : memref<8x8x4xf32, #tpu.memory_space<vmem>>, vector<1x8x4xf32>,
    %c5_52 = arith.constant 5 : index
    %126 = memref.load %arg0[%c5_52] : memref<8xf32, #tpu.memory_space<smem>>
    %c6 = arith.constant 6 : index
    %127 = memref.load %arg0[%c6] : memref<8xf32, #tpu.memory_space<smem>>
    %128 = arith.subf %127, %126 : f32
    %129 = math.absf %127 : f32
    %cst_53 = arith.constant 1.000000e+00 : f32
    %130 = arith.maximumf %129, %cst_53 : f32
    %cst_54 = arith.constant 1.000000e-10 : f32
    %131 = arith.mulf %cst_54, %130 : f32
    %132 = arith.minimumf %122#2, %128 : f32
    %c0_i32_55 = arith.constant 0 : i32
    %133:5 = scf.while (%arg7 = %126, %arg8 = %122#1, %arg9 = %132, %arg10 = %122#3, %arg11 = %c0_i32_55) : (f32, vector<8x4xf32>, f32, vector<8x4xf32>, i32) -> (f32, vector<8x4xf32>, f32, vector<8x4xf32>, i32) {
      %148 = arith.subf %127, %arg7 : f32
      %149 = arith.cmpf ogt, %148, %131 : f32
      %c1000_i32 = arith.constant 1000 : i32
      %150 = arith.cmpi slt, %arg11, %c1000_i32 : i32
      %151 = arith.andi %149, %150 : i1
      scf.condition(%151) %arg7, %arg8, %arg9, %arg10, %arg11 : f32, vector<8x4xf32>, f32, vector<8x4xf32>, i32
    } do {
    ^bb0(%arg7: f32, %arg8: vector<8x4xf32>, %arg9: f32, %arg10: vector<8x4xf32>, %arg11: i32):
      %148 = arith.subf %127, %arg7 : f32
      %149 = arith.minimumf %arg9, %148 : f32
      %150 = vector.broadcast %149 : f32 to vector<8x4xf32>
      %151 = arith.mulf %150, %arg10 : vector<8x4xf32>
      %cst_66 = arith.constant 2.000000e-01 : f32
      %152 = vector.broadcast %cst_66 : f32 to vector<8x4xf32>
      %153 = arith.mulf %152, %151 : vector<8x4xf32>
      %154 = arith.addf %arg8, %153 : vector<8x4xf32>
      %155 = vector.extract_strided_slice %154 {offsets = [0, 0], sizes = [8, 1], strides = [1, 1]} : vector<8x4xf32> to vector<8x1xf32>
      %156 = vector.broadcast %155 : vector<8x1xf32> to vector<8x32xf32>
      %157 = arith.mulf %156, %11 : vector<8x32xf32>
      %158 = vector.extract_strided_slice %154 {offsets = [0, 1], sizes = [8, 1], strides = [1, 1]} : vector<8x4xf32> to vector<8x1xf32>
      %159 = vector.broadcast %158 : vector<8x1xf32> to vector<8x32xf32>
      %160 = arith.mulf %159, %14 : vector<8x32xf32>
      %161 = vector.extract_strided_slice %154 {offsets = [0, 2], sizes = [8, 1], strides = [1, 1]} : vector<8x4xf32> to vector<8x1xf32>
      %162 = vector.broadcast %161 : vector<8x1xf32> to vector<8x32xf32>
      %163 = arith.mulf %162, %17 : vector<8x32xf32>
      %164 = vector.extract_strided_slice %154 {offsets = [0, 3], sizes = [8, 1], strides = [1, 1]} : vector<8x4xf32> to vector<8x1xf32>
      %165 = vector.broadcast %164 : vector<8x1xf32> to vector<8x32xf32>
      %166 = arith.mulf %165, %20 : vector<8x32xf32>
      %167 = arith.addf %5, %157 : vector<8x32xf32>
      %168 = arith.addf %160, %163 : vector<8x32xf32>
      %169 = arith.addf %167, %168 : vector<8x32xf32>
      %170 = arith.addf %169, %166 : vector<8x32xf32>
      %171 = math.tanh %170 : vector<8x32xf32>
      %172 = arith.mulf %171, %23 : vector<8x32xf32>
      %cst_67 = arith.constant dense<0.000000e+00> : vector<8xf32>
      %173 = vector.multi_reduction <add>, %172, %cst_67 [1] : vector<8x32xf32> to vector<8xf32>
      %174 = vector.shape_cast %173 : vector<8xf32> to vector<8x1xf32>
      %175 = arith.mulf %171, %26 : vector<8x32xf32>
      %cst_68 = arith.constant dense<0.000000e+00> : vector<8xf32>
      %176 = vector.multi_reduction <add>, %175, %cst_68 [1] : vector<8x32xf32> to vector<8xf32>
      %177 = vector.shape_cast %176 : vector<8xf32> to vector<8x1xf32>
      %178 = arith.mulf %171, %29 : vector<8x32xf32>
      %cst_69 = arith.constant dense<0.000000e+00> : vector<8xf32>
      %179 = vector.multi_reduction <add>, %178, %cst_69 [1] : vector<8x32xf32> to vector<8xf32>
      %180 = vector.shape_cast %179 : vector<8xf32> to vector<8x1xf32>
      %181 = arith.mulf %171, %32 : vector<8x32xf32>
      %cst_70 = arith.constant dense<0.000000e+00> : vector<8xf32>
      %182 = vector.multi_reduction <add>, %181, %cst_70 [1] : vector<8x32xf32> to vector<8xf32>
      %183 = vector.shape_cast %182 : vector<8xf32> to vector<8x1xf32>
      %184 = tpu.concatenate %174, %177, %180, %183 in 1 : vector<8x1xf32>, vector<8x1xf32>, vector<8x1xf32>, vector<8x1xf32> -> vector<8x4xf32>
      %185 = arith.addf %184, %8 : vector<8x4xf32>
      %186 = vector.broadcast %149 : f32 to vector<8x4xf32>
      %187 = arith.mulf %186, %185 : vector<8x4xf32>
      %cst_71 = arith.constant 7.500000e-02 : f32
      %188 = vector.broadcast %cst_71 : f32 to vector<8x4xf32>
      %189 = arith.mulf %188, %151 : vector<8x4xf32>
      %cst_72 = arith.constant 2.250000e-01 : f32
      %190 = vector.broadcast %cst_72 : f32 to vector<8x4xf32>
      %191 = arith.mulf %190, %187 : vector<8x4xf32>
      %192 = arith.addf %189, %191 : vector<8x4xf32>
      %193 = arith.addf %arg8, %192 : vector<8x4xf32>
      %194 = vector.extract_strided_slice %193 {offsets = [0, 0], sizes = [8, 1], strides = [1, 1]} : vector<8x4xf32> to vector<8x1xf32>
      %195 = vector.broadcast %194 : vector<8x1xf32> to vector<8x32xf32>
      %196 = arith.mulf %195, %11 : vector<8x32xf32>
      %197 = vector.extract_strided_slice %193 {offsets = [0, 1], sizes = [8, 1], strides = [1, 1]} : vector<8x4xf32> to vector<8x1xf32>
      %198 = vector.broadcast %197 : vector<8x1xf32> to vector<8x32xf32>
      %199 = arith.mulf %198, %14 : vector<8x32xf32>
      %200 = vector.extract_strided_slice %193 {offsets = [0, 2], sizes = [8, 1], strides = [1, 1]} : vector<8x4xf32> to vector<8x1xf32>
      %201 = vector.broadcast %200 : vector<8x1xf32> to vector<8x32xf32>
      %202 = arith.mulf %201, %17 : vector<8x32xf32>
      %203 = vector.extract_strided_slice %193 {offsets = [0, 3], sizes = [8, 1], strides = [1, 1]} : vector<8x4xf32> to vector<8x1xf32>
      %204 = vector.broadcast %203 : vector<8x1xf32> to vector<8x32xf32>
      %205 = arith.mulf %204, %20 : vector<8x32xf32>
      %206 = arith.addf %5, %196 : vector<8x32xf32>
      %207 = arith.addf %199, %202 : vector<8x32xf32>
      %208 = arith.addf %206, %207 : vector<8x32xf32>
      %209 = arith.addf %208, %205 : vector<8x32xf32>
      %210 = math.tanh %209 : vector<8x32xf32>
      %211 = arith.mulf %210, %23 : vector<8x32xf32>
      %cst_73 = arith.constant dense<0.000000e+00> : vector<8xf32>
      %212 = vector.multi_reduction <add>, %211, %cst_73 [1] : vector<8x32xf32> to vector<8xf32>
      %213 = vector.shape_cast %212 : vector<8xf32> to vector<8x1xf32>
      %214 = arith.mulf %210, %26 : vector<8x32xf32>
      %cst_74 = arith.constant dense<0.000000e+00> : vector<8xf32>
      %215 = vector.multi_reduction <add>, %214, %cst_74 [1] : vector<8x32xf32> to vector<8xf32>
      %216 = vector.shape_cast %215 : vector<8xf32> to vector<8x1xf32>
      %217 = arith.mulf %210, %29 : vector<8x32xf32>
      %cst_75 = arith.constant dense<0.000000e+00> : vector<8xf32>
      %218 = vector.multi_reduction <add>, %217, %cst_75 [1] : vector<8x32xf32> to vector<8xf32>
      %219 = vector.shape_cast %218 : vector<8xf32> to vector<8x1xf32>
      %220 = arith.mulf %210, %32 : vector<8x32xf32>
      %cst_76 = arith.constant dense<0.000000e+00> : vector<8xf32>
      %221 = vector.multi_reduction <add>, %220, %cst_76 [1] : vector<8x32xf32> to vector<8xf32>
      %222 = vector.shape_cast %221 : vector<8xf32> to vector<8x1xf32>
      %223 = tpu.concatenate %213, %216, %219, %222 in 1 : vector<8x1xf32>, vector<8x1xf32>, vector<8x1xf32>, vector<8x1xf32> -> vector<8x4xf32>
      %224 = arith.addf %223, %8 : vector<8x4xf32>
      %225 = vector.broadcast %149 : f32 to vector<8x4xf32>
      %226 = arith.mulf %225, %224 : vector<8x4xf32>
      %cst_77 = arith.constant 0.977777779 : f32
      %227 = vector.broadcast %cst_77 : f32 to vector<8x4xf32>
      %228 = arith.mulf %227, %151 : vector<8x4xf32>
      %229 = arith.addf %arg8, %228 : vector<8x4xf32>
      %cst_78 = arith.constant -3.73333335 : f32
      %230 = vector.broadcast %cst_78 : f32 to vector<8x4xf32>
      %231 = arith.mulf %230, %187 : vector<8x4xf32>
      %cst_79 = arith.constant 3.55555558 : f32
      %232 = vector.broadcast %cst_79 : f32 to vector<8x4xf32>
      %233 = arith.mulf %232, %226 : vector<8x4xf32>
      %234 = arith.addf %231, %233 : vector<8x4xf32>
      %235 = arith.addf %229, %234 : vector<8x4xf32>
      %236 = vector.extract_strided_slice %235 {offsets = [0, 0], sizes = [8, 1], strides = [1, 1]} : vector<8x4xf32> to vector<8x1xf32>
      %237 = vector.broadcast %236 : vector<8x1xf32> to vector<8x32xf32>
      %238 = arith.mulf %237, %11 : vector<8x32xf32>
      %239 = vector.extract_strided_slice %235 {offsets = [0, 1], sizes = [8, 1], strides = [1, 1]} : vector<8x4xf32> to vector<8x1xf32>
      %240 = vector.broadcast %239 : vector<8x1xf32> to vector<8x32xf32>
      %241 = arith.mulf %240, %14 : vector<8x32xf32>
      %242 = vector.extract_strided_slice %235 {offsets = [0, 2], sizes = [8, 1], strides = [1, 1]} : vector<8x4xf32> to vector<8x1xf32>
      %243 = vector.broadcast %242 : vector<8x1xf32> to vector<8x32xf32>
      %244 = arith.mulf %243, %17 : vector<8x32xf32>
      %245 = vector.extract_strided_slice %235 {offsets = [0, 3], sizes = [8, 1], strides = [1, 1]} : vector<8x4xf32> to vector<8x1xf32>
      %246 = vector.broadcast %245 : vector<8x1xf32> to vector<8x32xf32>
      %247 = arith.mulf %246, %20 : vector<8x32xf32>
      %248 = arith.addf %5, %238 : vector<8x32xf32>
      %249 = arith.addf %241, %244 : vector<8x32xf32>
      %250 = arith.addf %248, %249 : vector<8x32xf32>
      %251 = arith.addf %250, %247 : vector<8x32xf32>
      %252 = math.tanh %251 : vector<8x32xf32>
      %253 = arith.mulf %252, %23 : vector<8x32xf32>
      %cst_80 = arith.constant dense<0.000000e+00> : vector<8xf32>
      %254 = vector.multi_reduction <add>, %253, %cst_80 [1] : vector<8x32xf32> to vector<8xf32>
      %255 = vector.shape_cast %254 : vector<8xf32> to vector<8x1xf32>
      %256 = arith.mulf %252, %26 : vector<8x32xf32>
      %cst_81 = arith.constant dense<0.000000e+00> : vector<8xf32>
      %257 = vector.multi_reduction <add>, %256, %cst_81 [1] : vector<8x32xf32> to vector<8xf32>
      %258 = vector.shape_cast %257 : vector<8xf32> to vector<8x1xf32>
      %259 = arith.mulf %252, %29 : vector<8x32xf32>
      %cst_82 = arith.constant dense<0.000000e+00> : vector<8xf32>
      %260 = vector.multi_reduction <add>, %259, %cst_82 [1] : vector<8x32xf32> to vector<8xf32>
      %261 = vector.shape_cast %260 : vector<8xf32> to vector<8x1xf32>
      %262 = arith.mulf %252, %32 : vector<8x32xf32>
      %cst_83 = arith.constant dense<0.000000e+00> : vector<8xf32>
      %263 = vector.multi_reduction <add>, %262, %cst_83 [1] : vector<8x32xf32> to vector<8xf32>
      %264 = vector.shape_cast %263 : vector<8xf32> to vector<8x1xf32>
      %265 = tpu.concatenate %255, %258, %261, %264 in 1 : vector<8x1xf32>, vector<8x1xf32>, vector<8x1xf32>, vector<8x1xf32> -> vector<8x4xf32>
      %266 = arith.addf %265, %8 : vector<8x4xf32>
      %267 = vector.broadcast %149 : f32 to vector<8x4xf32>
      %268 = arith.mulf %267, %266 : vector<8x4xf32>
      %cst_84 = arith.constant 2.95259857 : f32
      %269 = vector.broadcast %cst_84 : f32 to vector<8x4xf32>
      %270 = arith.mulf %269, %151 : vector<8x4xf32>
      %271 = arith.addf %arg8, %270 : vector<8x4xf32>
      %cst_85 = arith.constant -11.5957937 : f32
      %272 = vector.broadcast %cst_85 : f32 to vector<8x4xf32>
      %273 = arith.mulf %272, %187 : vector<8x4xf32>
      %cst_86 = arith.constant 9.82289314 : f32
      %274 = vector.broadcast %cst_86 : f32 to vector<8x4xf32>
      %275 = arith.mulf %274, %226 : vector<8x4xf32>
      %276 = arith.addf %273, %275 : vector<8x4xf32>
      %cst_87 = arith.constant -0.290809333 : f32
      %277 = vector.broadcast %cst_87 : f32 to vector<8x4xf32>
      %278 = arith.mulf %277, %268 : vector<8x4xf32>
      %279 = arith.addf %276, %278 : vector<8x4xf32>
      %280 = arith.addf %271, %279 : vector<8x4xf32>
      %281 = vector.extract_strided_slice %280 {offsets = [0, 0], sizes = [8, 1], strides = [1, 1]} : vector<8x4xf32> to vector<8x1xf32>
      %282 = vector.broadcast %281 : vector<8x1xf32> to vector<8x32xf32>
      %283 = arith.mulf %282, %11 : vector<8x32xf32>
      %284 = vector.extract_strided_slice %280 {offsets = [0, 1], sizes = [8, 1], strides = [1, 1]} : vector<8x4xf32> to vector<8x1xf32>
      %285 = vector.broadcast %284 : vector<8x1xf32> to vector<8x32xf32>
      %286 = arith.mulf %285, %14 : vector<8x32xf32>
      %287 = vector.extract_strided_slice %280 {offsets = [0, 2], sizes = [8, 1], strides = [1, 1]} : vector<8x4xf32> to vector<8x1xf32>
      %288 = vector.broadcast %287 : vector<8x1xf32> to vector<8x32xf32>
      %289 = arith.mulf %288, %17 : vector<8x32xf32>
      %290 = vector.extract_strided_slice %280 {offsets = [0, 3], sizes = [8, 1], strides = [1, 1]} : vector<8x4xf32> to vector<8x1xf32>
      %291 = vector.broadcast %290 : vector<8x1xf32> to vector<8x32xf32>
      %292 = arith.mulf %291, %20 : vector<8x32xf32>
      %293 = arith.addf %5, %283 : vector<8x32xf32>
      %294 = arith.addf %286, %289 : vector<8x32xf32>
      %295 = arith.addf %293, %294 : vector<8x32xf32>
      %296 = arith.addf %295, %292 : vector<8x32xf32>
      %297 = math.tanh %296 : vector<8x32xf32>
      %298 = arith.mulf %297, %23 : vector<8x32xf32>
      %cst_88 = arith.constant dense<0.000000e+00> : vector<8xf32>
      %299 = vector.multi_reduction <add>, %298, %cst_88 [1] : vector<8x32xf32> to vector<8xf32>
      %300 = vector.shape_cast %299 : vector<8xf32> to vector<8x1xf32>
      %301 = arith.mulf %297, %26 : vector<8x32xf32>
      %cst_89 = arith.constant dense<0.000000e+00> : vector<8xf32>
      %302 = vector.multi_reduction <add>, %301, %cst_89 [1] : vector<8x32xf32> to vector<8xf32>
      %303 = vector.shape_cast %302 : vector<8xf32> to vector<8x1xf32>
      %304 = arith.mulf %297, %29 : vector<8x32xf32>
      %cst_90 = arith.constant dense<0.000000e+00> : vector<8xf32>
      %305 = vector.multi_reduction <add>, %304, %cst_90 [1] : vector<8x32xf32> to vector<8xf32>
      %306 = vector.shape_cast %305 : vector<8xf32> to vector<8x1xf32>
      %307 = arith.mulf %297, %32 : vector<8x32xf32>
      %cst_91 = arith.constant dense<0.000000e+00> : vector<8xf32>
      %308 = vector.multi_reduction <add>, %307, %cst_91 [1] : vector<8x32xf32> to vector<8xf32>
      %309 = vector.shape_cast %308 : vector<8xf32> to vector<8x1xf32>
      %310 = tpu.concatenate %300, %303, %306, %309 in 1 : vector<8x1xf32>, vector<8x1xf32>, vector<8x1xf32>, vector<8x1xf32> -> vector<8x4xf32>
      %311 = arith.addf %310, %8 : vector<8x4xf32>
      %312 = vector.broadcast %149 : f32 to vector<8x4xf32>
      %313 = arith.mulf %312, %311 : vector<8x4xf32>
      %cst_92 = arith.constant 2.84627533 : f32
      %314 = vector.broadcast %cst_92 : f32 to vector<8x4xf32>
      %315 = arith.mulf %314, %151 : vector<8x4xf32>
      %316 = arith.addf %arg8, %315 : vector<8x4xf32>
      %cst_93 = arith.constant -10.757576 : f32
      %317 = vector.broadcast %cst_93 : f32 to vector<8x4xf32>
      %318 = arith.mulf %317, %187 : vector<8x4xf32>
      %cst_94 = arith.constant 8.90642261 : f32
      %319 = vector.broadcast %cst_94 : f32 to vector<8x4xf32>
      %320 = arith.mulf %319, %226 : vector<8x4xf32>
      %321 = arith.addf %318, %320 : vector<8x4xf32>
      %322 = arith.addf %316, %321 : vector<8x4xf32>
      %cst_95 = arith.constant 0.278409094 : f32
      %323 = vector.broadcast %cst_95 : f32 to vector<8x4xf32>
      %324 = arith.mulf %323, %268 : vector<8x4xf32>
      %cst_96 = arith.constant -0.273531318 : f32
      %325 = vector.broadcast %cst_96 : f32 to vector<8x4xf32>
      %326 = arith.mulf %325, %313 : vector<8x4xf32>
      %327 = arith.addf %324, %326 : vector<8x4xf32>
      %328 = arith.addf %322, %327 : vector<8x4xf32>
      %329 = vector.extract_strided_slice %328 {offsets = [0, 0], sizes = [8, 1], strides = [1, 1]} : vector<8x4xf32> to vector<8x1xf32>
      %330 = vector.broadcast %329 : vector<8x1xf32> to vector<8x32xf32>
      %331 = arith.mulf %330, %11 : vector<8x32xf32>
      %332 = vector.extract_strided_slice %328 {offsets = [0, 1], sizes = [8, 1], strides = [1, 1]} : vector<8x4xf32> to vector<8x1xf32>
      %333 = vector.broadcast %332 : vector<8x1xf32> to vector<8x32xf32>
      %334 = arith.mulf %333, %14 : vector<8x32xf32>
      %335 = vector.extract_strided_slice %328 {offsets = [0, 2], sizes = [8, 1], strides = [1, 1]} : vector<8x4xf32> to vector<8x1xf32>
      %336 = vector.broadcast %335 : vector<8x1xf32> to vector<8x32xf32>
      %337 = arith.mulf %336, %17 : vector<8x32xf32>
      %338 = vector.extract_strided_slice %328 {offsets = [0, 3], sizes = [8, 1], strides = [1, 1]} : vector<8x4xf32> to vector<8x1xf32>
      %339 = vector.broadcast %338 : vector<8x1xf32> to vector<8x32xf32>
      %340 = arith.mulf %339, %20 : vector<8x32xf32>
      %341 = arith.addf %5, %331 : vector<8x32xf32>
      %342 = arith.addf %334, %337 : vector<8x32xf32>
      %343 = arith.addf %341, %342 : vector<8x32xf32>
      %344 = arith.addf %343, %340 : vector<8x32xf32>
      %345 = math.tanh %344 : vector<8x32xf32>
      %346 = arith.mulf %345, %23 : vector<8x32xf32>
      %cst_97 = arith.constant dense<0.000000e+00> : vector<8xf32>
      %347 = vector.multi_reduction <add>, %346, %cst_97 [1] : vector<8x32xf32> to vector<8xf32>
      %348 = vector.shape_cast %347 : vector<8xf32> to vector<8x1xf32>
      %349 = arith.mulf %345, %26 : vector<8x32xf32>
      %cst_98 = arith.constant dense<0.000000e+00> : vector<8xf32>
      %350 = vector.multi_reduction <add>, %349, %cst_98 [1] : vector<8x32xf32> to vector<8xf32>
      %351 = vector.shape_cast %350 : vector<8xf32> to vector<8x1xf32>
      %352 = arith.mulf %345, %29 : vector<8x32xf32>
      %cst_99 = arith.constant dense<0.000000e+00> : vector<8xf32>
      %353 = vector.multi_reduction <add>, %352, %cst_99 [1] : vector<8x32xf32> to vector<8xf32>
      %354 = vector.shape_cast %353 : vector<8xf32> to vector<8x1xf32>
      %355 = arith.mulf %345, %32 : vector<8x32xf32>
      %cst_100 = arith.constant dense<0.000000e+00> : vector<8xf32>
      %356 = vector.multi_reduction <add>, %355, %cst_100 [1] : vector<8x32xf32> to vector<8xf32>
      %357 = vector.shape_cast %356 : vector<8xf32> to vector<8x1xf32>
      %358 = tpu.concatenate %348, %351, %354, %357 in 1 : vector<8x1xf32>, vector<8x1xf32>, vector<8x1xf32>, vector<8x1xf32> -> vector<8x4xf32>
      %359 = arith.addf %358, %8 : vector<8x4xf32>
      %360 = vector.broadcast %149 : f32 to vector<8x4xf32>
      %361 = arith.mulf %360, %359 : vector<8x4xf32>
      %cst_101 = arith.constant 0.0911458358 : f32
      %362 = vector.broadcast %cst_101 : f32 to vector<8x4xf32>
      %363 = arith.mulf %362, %151 : vector<8x4xf32>
      %364 = arith.addf %arg8, %363 : vector<8x4xf32>
      %cst_102 = arith.constant 0.449236304 : f32
      %365 = vector.broadcast %cst_102 : f32 to vector<8x4xf32>
      %366 = arith.mulf %365, %226 : vector<8x4xf32>
      %cst_103 = arith.constant 0.651041686 : f32
      %367 = vector.broadcast %cst_103 : f32 to vector<8x4xf32>
      %368 = arith.mulf %367, %268 : vector<8x4xf32>
      %369 = arith.addf %366, %368 : vector<8x4xf32>
      %370 = arith.addf %364, %369 : vector<8x4xf32>
      %cst_104 = arith.constant -0.322376192 : f32
      %371 = vector.broadcast %cst_104 : f32 to vector<8x4xf32>
      %372 = arith.mulf %371, %313 : vector<8x4xf32>
      %cst_105 = arith.constant 0.130952388 : f32
      %373 = vector.broadcast %cst_105 : f32 to vector<8x4xf32>
      %374 = arith.mulf %373, %361 : vector<8x4xf32>
      %375 = arith.addf %372, %374 : vector<8x4xf32>
      %376 = arith.addf %370, %375 : vector<8x4xf32>
      %377 = vector.extract_strided_slice %376 {offsets = [0, 0], sizes = [8, 1], strides = [1, 1]} : vector<8x4xf32> to vector<8x1xf32>
      %378 = vector.broadcast %377 : vector<8x1xf32> to vector<8x32xf32>
      %379 = arith.mulf %378, %11 : vector<8x32xf32>
      %380 = vector.extract_strided_slice %376 {offsets = [0, 1], sizes = [8, 1], strides = [1, 1]} : vector<8x4xf32> to vector<8x1xf32>
      %381 = vector.broadcast %380 : vector<8x1xf32> to vector<8x32xf32>
      %382 = arith.mulf %381, %14 : vector<8x32xf32>
      %383 = vector.extract_strided_slice %376 {offsets = [0, 2], sizes = [8, 1], strides = [1, 1]} : vector<8x4xf32> to vector<8x1xf32>
      %384 = vector.broadcast %383 : vector<8x1xf32> to vector<8x32xf32>
      %385 = arith.mulf %384, %17 : vector<8x32xf32>
      %386 = vector.extract_strided_slice %376 {offsets = [0, 3], sizes = [8, 1], strides = [1, 1]} : vector<8x4xf32> to vector<8x1xf32>
      %387 = vector.broadcast %386 : vector<8x1xf32> to vector<8x32xf32>
      %388 = arith.mulf %387, %20 : vector<8x32xf32>
      %389 = arith.addf %5, %379 : vector<8x32xf32>
      %390 = arith.addf %382, %385 : vector<8x32xf32>
      %391 = arith.addf %389, %390 : vector<8x32xf32>
      %392 = arith.addf %391, %388 : vector<8x32xf32>
      %393 = math.tanh %392 : vector<8x32xf32>
      %394 = arith.mulf %393, %23 : vector<8x32xf32>
      %cst_106 = arith.constant dense<0.000000e+00> : vector<8xf32>
      %395 = vector.multi_reduction <add>, %394, %cst_106 [1] : vector<8x32xf32> to vector<8xf32>
      %396 = vector.shape_cast %395 : vector<8xf32> to vector<8x1xf32>
      %397 = arith.mulf %393, %26 : vector<8x32xf32>
      %cst_107 = arith.constant dense<0.000000e+00> : vector<8xf32>
      %398 = vector.multi_reduction <add>, %397, %cst_107 [1] : vector<8x32xf32> to vector<8xf32>
      %399 = vector.shape_cast %398 : vector<8xf32> to vector<8x1xf32>
      %400 = arith.mulf %393, %29 : vector<8x32xf32>
      %cst_108 = arith.constant dense<0.000000e+00> : vector<8xf32>
      %401 = vector.multi_reduction <add>, %400, %cst_108 [1] : vector<8x32xf32> to vector<8xf32>
      %402 = vector.shape_cast %401 : vector<8xf32> to vector<8x1xf32>
      %403 = arith.mulf %393, %32 : vector<8x32xf32>
      %cst_109 = arith.constant dense<0.000000e+00> : vector<8xf32>
      %404 = vector.multi_reduction <add>, %403, %cst_109 [1] : vector<8x32xf32> to vector<8xf32>
      %405 = vector.shape_cast %404 : vector<8xf32> to vector<8x1xf32>
      %406 = tpu.concatenate %396, %399, %402, %405 in 1 : vector<8x1xf32>, vector<8x1xf32>, vector<8x1xf32>, vector<8x1xf32> -> vector<8x4xf32>
      %407 = arith.addf %406, %8 : vector<8x4xf32>
      %408 = vector.broadcast %149 : f32 to vector<8x4xf32>
      %409 = arith.mulf %408, %407 : vector<8x4xf32>
      %cst_110 = arith.constant 0.00123263884 : f32
      %410 = vector.broadcast %cst_110 : f32 to vector<8x4xf32>
      %411 = arith.mulf %410, %151 : vector<8x4xf32>
      %cst_111 = arith.constant -0.00425277045 : f32
      %412 = vector.broadcast %cst_111 : f32 to vector<8x4xf32>
      %413 = arith.mulf %412, %226 : vector<8x4xf32>
      %414 = arith.addf %411, %413 : vector<8x4xf32>
      %cst_112 = arith.constant 0.0369791649 : f32
      %415 = vector.broadcast %cst_112 : f32 to vector<8x4xf32>
      %416 = arith.mulf %415, %268 : vector<8x4xf32>
      %cst_113 = arith.constant -5.086380e-02 : f32
      %417 = vector.broadcast %cst_113 : f32 to vector<8x4xf32>
      %418 = arith.mulf %417, %313 : vector<8x4xf32>
      %419 = arith.addf %416, %418 : vector<8x4xf32>
      %420 = arith.addf %414, %419 : vector<8x4xf32>
      %cst_114 = arith.constant 0.0419047624 : f32
      %421 = vector.broadcast %cst_114 : f32 to vector<8x4xf32>
      %422 = arith.mulf %421, %361 : vector<8x4xf32>
      %cst_115 = arith.constant -2.500000e-02 : f32
      %423 = vector.broadcast %cst_115 : f32 to vector<8x4xf32>
      %424 = arith.mulf %423, %409 : vector<8x4xf32>
      %425 = arith.addf %422, %424 : vector<8x4xf32>
      %426 = arith.addf %420, %425 : vector<8x4xf32>
      %427 = math.absf %arg8 : vector<8x4xf32>
      %428 = math.absf %376 : vector<8x4xf32>
      %429 = arith.maximumf %427, %428 : vector<8x4xf32>
      %cst_116 = arith.constant 9.99999997E-7 : f32
      %430 = vector.broadcast %cst_116 : f32 to vector<8x4xf32>
      %431 = arith.mulf %430, %429 : vector<8x4xf32>
      %cst_117 = arith.constant 1.000000e-07 : f32
      %432 = vector.broadcast %cst_117 : f32 to vector<8x4xf32>
      %433 = arith.addf %432, %431 : vector<8x4xf32>
      %434 = arith.divf %426, %433 : vector<8x4xf32>
      %435 = arith.mulf %434, %434 : vector<8x4xf32>
      %436 = vector.shape_cast %435 : vector<8x4xf32> to vector<1x8x4xf32>
      %cst_118 = arith.constant dense<0.000000e+00> : vector<1xf32>
      %437 = vector.multi_reduction <add>, %436, %cst_118 [1, 2] : vector<1x8x4xf32> to vector<1xf32>
      %438 = vector.shape_cast %437 : vector<1xf32> to vector<1x1x1xf32>
      %439 = vector.extract %438[0, 0, 0] : f32 from vector<1x1x1xf32>
      %440 = vector.broadcast %439 : f32 to vector<1x1xf32>
      %cst_119 = arith.constant 3.125000e-02 : f32
      %441 = vector.broadcast %cst_119 : f32 to vector<1x1xf32>
      %442 = arith.mulf %440, %441 : vector<1x1xf32>
      %cst_120 = arith.constant 1.000000e-24 : f32
      %443 = vector.broadcast %cst_120 : f32 to vector<1x1xf32>
      %444 = arith.addf %442, %443 : vector<1x1xf32>
      %445 = math.log %444 : vector<1x1xf32>
      %cst_121 = arith.constant -1.000000e-01 : f32
      %446 = vector.broadcast %cst_121 : f32 to vector<1x1xf32>
      %447 = arith.mulf %446, %445 : vector<1x1xf32>
      %448 = math.exp %447 : vector<1x1xf32>
      %cst_122 = arith.constant 0.899999976 : f32
      %449 = vector.broadcast %cst_122 : f32 to vector<1x1xf32>
      %450 = arith.mulf %449, %448 : vector<1x1xf32>
      %451 = vector.extract %442[0, 0] : f32 from vector<1x1xf32>
      %452 = vector.extract %450[0, 0] : f32 from vector<1x1xf32>
      %cst_123 = arith.constant 2.000000e-01 : f32
      %cst_124 = arith.constant 1.000000e+01 : f32
      %453 = arith.maximumf %cst_123, %452 : f32
      %454 = arith.minimumf %cst_124, %453 : f32
      %cst_125 = arith.constant 1.000000e+00 : f32
      %455 = arith.cmpf ole, %451, %cst_125 : f32
      %456 = arith.addf %arg7, %149 : f32
      %457 = arith.select %455, %456, %arg7 : f32
      %458 = arith.select %455, %376, %arg8 : vector<8x4xf32>
      %459 = arith.select %455, %407, %arg10 : vector<8x4xf32>
      %460 = arith.mulf %149, %454 : f32
      %cst_126 = arith.constant 9.99999997E-7 : f32
      %461 = arith.mulf %cst_126, %128 : f32
      %462 = arith.maximumf %460, %461 : f32
      %c1_i32 = arith.constant 1 : i32
      %463 = arith.addi %arg11, %c1_i32 : i32
      scf.yield %457, %458, %462, %459, %463 : f32, vector<8x4xf32>, f32, vector<8x4xf32>, i32
    }
    %c6_56 = arith.constant 6 : index
    %c0_57 = arith.constant 0 : index
    %c0_58 = arith.constant 0 : index
    %134 = vector.load %arg6[%c6_56, %c0_57, %c0_58] : memref<8x8x4xf32, #tpu.memory_space<vmem>>, vector<1x8x4xf32>
    %135 = vector.shape_cast %134 : vector<1x8x4xf32> to vector<8x4xf32>
    %136 = vector.shape_cast %133#1 : vector<8x4xf32> to vector<1x8x4xf32>
    tpu.vector_store %arg6[%c6_56, %c0_57, %c0_58], %136 {strides = array<i32>} : memref<8x8x4xf32, #tpu.memory_space<vmem>>, vector<1x8x4xf32>,
    %c6_59 = arith.constant 6 : index
    %137 = memref.load %arg0[%c6_59] : memref<8xf32, #tpu.memory_space<smem>>
    %c7 = arith.constant 7 : index
    %138 = memref.load %arg0[%c7] : memref<8xf32, #tpu.memory_space<smem>>
    %139 = arith.subf %138, %137 : f32
    %140 = math.absf %138 : f32
    %cst_60 = arith.constant 1.000000e+00 : f32
    %141 = arith.maximumf %140, %cst_60 : f32
    %cst_61 = arith.constant 1.000000e-10 : f32
    %142 = arith.mulf %cst_61, %141 : f32
    %143 = arith.minimumf %133#2, %139 : f32
    %c0_i32_62 = arith.constant 0 : i32
    %144:5 = scf.while (%arg7 = %137, %arg8 = %133#1, %arg9 = %143, %arg10 = %133#3, %arg11 = %c0_i32_62) : (f32, vector<8x4xf32>, f32, vector<8x4xf32>, i32) -> (f32, vector<8x4xf32>, f32, vector<8x4xf32>, i32) {
      %148 = arith.subf %138, %arg7 : f32
      %149 = arith.cmpf ogt, %148, %142 : f32
      %c1000_i32 = arith.constant 1000 : i32
      %150 = arith.cmpi slt, %arg11, %c1000_i32 : i32
      %151 = arith.andi %149, %150 : i1
      scf.condition(%151) %arg7, %arg8, %arg9, %arg10, %arg11 : f32, vector<8x4xf32>, f32, vector<8x4xf32>, i32
    } do {
    ^bb0(%arg7: f32, %arg8: vector<8x4xf32>, %arg9: f32, %arg10: vector<8x4xf32>, %arg11: i32):
      %148 = arith.subf %138, %arg7 : f32
      %149 = arith.minimumf %arg9, %148 : f32
      %150 = vector.broadcast %149 : f32 to vector<8x4xf32>
      %151 = arith.mulf %150, %arg10 : vector<8x4xf32>
      %cst_66 = arith.constant 2.000000e-01 : f32
      %152 = vector.broadcast %cst_66 : f32 to vector<8x4xf32>
      %153 = arith.mulf %152, %151 : vector<8x4xf32>
      %154 = arith.addf %arg8, %153 : vector<8x4xf32>
      %155 = vector.extract_strided_slice %154 {offsets = [0, 0], sizes = [8, 1], strides = [1, 1]} : vector<8x4xf32> to vector<8x1xf32>
      %156 = vector.broadcast %155 : vector<8x1xf32> to vector<8x32xf32>
      %157 = arith.mulf %156, %11 : vector<8x32xf32>
      %158 = vector.extract_strided_slice %154 {offsets = [0, 1], sizes = [8, 1], strides = [1, 1]} : vector<8x4xf32> to vector<8x1xf32>
      %159 = vector.broadcast %158 : vector<8x1xf32> to vector<8x32xf32>
      %160 = arith.mulf %159, %14 : vector<8x32xf32>
      %161 = vector.extract_strided_slice %154 {offsets = [0, 2], sizes = [8, 1], strides = [1, 1]} : vector<8x4xf32> to vector<8x1xf32>
      %162 = vector.broadcast %161 : vector<8x1xf32> to vector<8x32xf32>
      %163 = arith.mulf %162, %17 : vector<8x32xf32>
      %164 = vector.extract_strided_slice %154 {offsets = [0, 3], sizes = [8, 1], strides = [1, 1]} : vector<8x4xf32> to vector<8x1xf32>
      %165 = vector.broadcast %164 : vector<8x1xf32> to vector<8x32xf32>
      %166 = arith.mulf %165, %20 : vector<8x32xf32>
      %167 = arith.addf %5, %157 : vector<8x32xf32>
      %168 = arith.addf %160, %163 : vector<8x32xf32>
      %169 = arith.addf %167, %168 : vector<8x32xf32>
      %170 = arith.addf %169, %166 : vector<8x32xf32>
      %171 = math.tanh %170 : vector<8x32xf32>
      %172 = arith.mulf %171, %23 : vector<8x32xf32>
      %cst_67 = arith.constant dense<0.000000e+00> : vector<8xf32>
      %173 = vector.multi_reduction <add>, %172, %cst_67 [1] : vector<8x32xf32> to vector<8xf32>
      %174 = vector.shape_cast %173 : vector<8xf32> to vector<8x1xf32>
      %175 = arith.mulf %171, %26 : vector<8x32xf32>
      %cst_68 = arith.constant dense<0.000000e+00> : vector<8xf32>
      %176 = vector.multi_reduction <add>, %175, %cst_68 [1] : vector<8x32xf32> to vector<8xf32>
      %177 = vector.shape_cast %176 : vector<8xf32> to vector<8x1xf32>
      %178 = arith.mulf %171, %29 : vector<8x32xf32>
      %cst_69 = arith.constant dense<0.000000e+00> : vector<8xf32>
      %179 = vector.multi_reduction <add>, %178, %cst_69 [1] : vector<8x32xf32> to vector<8xf32>
      %180 = vector.shape_cast %179 : vector<8xf32> to vector<8x1xf32>
      %181 = arith.mulf %171, %32 : vector<8x32xf32>
      %cst_70 = arith.constant dense<0.000000e+00> : vector<8xf32>
      %182 = vector.multi_reduction <add>, %181, %cst_70 [1] : vector<8x32xf32> to vector<8xf32>
      %183 = vector.shape_cast %182 : vector<8xf32> to vector<8x1xf32>
      %184 = tpu.concatenate %174, %177, %180, %183 in 1 : vector<8x1xf32>, vector<8x1xf32>, vector<8x1xf32>, vector<8x1xf32> -> vector<8x4xf32>
      %185 = arith.addf %184, %8 : vector<8x4xf32>
      %186 = vector.broadcast %149 : f32 to vector<8x4xf32>
      %187 = arith.mulf %186, %185 : vector<8x4xf32>
      %cst_71 = arith.constant 7.500000e-02 : f32
      %188 = vector.broadcast %cst_71 : f32 to vector<8x4xf32>
      %189 = arith.mulf %188, %151 : vector<8x4xf32>
      %cst_72 = arith.constant 2.250000e-01 : f32
      %190 = vector.broadcast %cst_72 : f32 to vector<8x4xf32>
      %191 = arith.mulf %190, %187 : vector<8x4xf32>
      %192 = arith.addf %189, %191 : vector<8x4xf32>
      %193 = arith.addf %arg8, %192 : vector<8x4xf32>
      %194 = vector.extract_strided_slice %193 {offsets = [0, 0], sizes = [8, 1], strides = [1, 1]} : vector<8x4xf32> to vector<8x1xf32>
      %195 = vector.broadcast %194 : vector<8x1xf32> to vector<8x32xf32>
      %196 = arith.mulf %195, %11 : vector<8x32xf32>
      %197 = vector.extract_strided_slice %193 {offsets = [0, 1], sizes = [8, 1], strides = [1, 1]} : vector<8x4xf32> to vector<8x1xf32>
      %198 = vector.broadcast %197 : vector<8x1xf32> to vector<8x32xf32>
      %199 = arith.mulf %198, %14 : vector<8x32xf32>
      %200 = vector.extract_strided_slice %193 {offsets = [0, 2], sizes = [8, 1], strides = [1, 1]} : vector<8x4xf32> to vector<8x1xf32>
      %201 = vector.broadcast %200 : vector<8x1xf32> to vector<8x32xf32>
      %202 = arith.mulf %201, %17 : vector<8x32xf32>
      %203 = vector.extract_strided_slice %193 {offsets = [0, 3], sizes = [8, 1], strides = [1, 1]} : vector<8x4xf32> to vector<8x1xf32>
      %204 = vector.broadcast %203 : vector<8x1xf32> to vector<8x32xf32>
      %205 = arith.mulf %204, %20 : vector<8x32xf32>
      %206 = arith.addf %5, %196 : vector<8x32xf32>
      %207 = arith.addf %199, %202 : vector<8x32xf32>
      %208 = arith.addf %206, %207 : vector<8x32xf32>
      %209 = arith.addf %208, %205 : vector<8x32xf32>
      %210 = math.tanh %209 : vector<8x32xf32>
      %211 = arith.mulf %210, %23 : vector<8x32xf32>
      %cst_73 = arith.constant dense<0.000000e+00> : vector<8xf32>
      %212 = vector.multi_reduction <add>, %211, %cst_73 [1] : vector<8x32xf32> to vector<8xf32>
      %213 = vector.shape_cast %212 : vector<8xf32> to vector<8x1xf32>
      %214 = arith.mulf %210, %26 : vector<8x32xf32>
      %cst_74 = arith.constant dense<0.000000e+00> : vector<8xf32>
      %215 = vector.multi_reduction <add>, %214, %cst_74 [1] : vector<8x32xf32> to vector<8xf32>
      %216 = vector.shape_cast %215 : vector<8xf32> to vector<8x1xf32>
      %217 = arith.mulf %210, %29 : vector<8x32xf32>
      %cst_75 = arith.constant dense<0.000000e+00> : vector<8xf32>
      %218 = vector.multi_reduction <add>, %217, %cst_75 [1] : vector<8x32xf32> to vector<8xf32>
      %219 = vector.shape_cast %218 : vector<8xf32> to vector<8x1xf32>
      %220 = arith.mulf %210, %32 : vector<8x32xf32>
      %cst_76 = arith.constant dense<0.000000e+00> : vector<8xf32>
      %221 = vector.multi_reduction <add>, %220, %cst_76 [1] : vector<8x32xf32> to vector<8xf32>
      %222 = vector.shape_cast %221 : vector<8xf32> to vector<8x1xf32>
      %223 = tpu.concatenate %213, %216, %219, %222 in 1 : vector<8x1xf32>, vector<8x1xf32>, vector<8x1xf32>, vector<8x1xf32> -> vector<8x4xf32>
      %224 = arith.addf %223, %8 : vector<8x4xf32>
      %225 = vector.broadcast %149 : f32 to vector<8x4xf32>
      %226 = arith.mulf %225, %224 : vector<8x4xf32>
      %cst_77 = arith.constant 0.977777779 : f32
      %227 = vector.broadcast %cst_77 : f32 to vector<8x4xf32>
      %228 = arith.mulf %227, %151 : vector<8x4xf32>
      %229 = arith.addf %arg8, %228 : vector<8x4xf32>
      %cst_78 = arith.constant -3.73333335 : f32
      %230 = vector.broadcast %cst_78 : f32 to vector<8x4xf32>
      %231 = arith.mulf %230, %187 : vector<8x4xf32>
      %cst_79 = arith.constant 3.55555558 : f32
      %232 = vector.broadcast %cst_79 : f32 to vector<8x4xf32>
      %233 = arith.mulf %232, %226 : vector<8x4xf32>
      %234 = arith.addf %231, %233 : vector<8x4xf32>
      %235 = arith.addf %229, %234 : vector<8x4xf32>
      %236 = vector.extract_strided_slice %235 {offsets = [0, 0], sizes = [8, 1], strides = [1, 1]} : vector<8x4xf32> to vector<8x1xf32>
      %237 = vector.broadcast %236 : vector<8x1xf32> to vector<8x32xf32>
      %238 = arith.mulf %237, %11 : vector<8x32xf32>
      %239 = vector.extract_strided_slice %235 {offsets = [0, 1], sizes = [8, 1], strides = [1, 1]} : vector<8x4xf32> to vector<8x1xf32>
      %240 = vector.broadcast %239 : vector<8x1xf32> to vector<8x32xf32>
      %241 = arith.mulf %240, %14 : vector<8x32xf32>
      %242 = vector.extract_strided_slice %235 {offsets = [0, 2], sizes = [8, 1], strides = [1, 1]} : vector<8x4xf32> to vector<8x1xf32>
      %243 = vector.broadcast %242 : vector<8x1xf32> to vector<8x32xf32>
      %244 = arith.mulf %243, %17 : vector<8x32xf32>
      %245 = vector.extract_strided_slice %235 {offsets = [0, 3], sizes = [8, 1], strides = [1, 1]} : vector<8x4xf32> to vector<8x1xf32>
      %246 = vector.broadcast %245 : vector<8x1xf32> to vector<8x32xf32>
      %247 = arith.mulf %246, %20 : vector<8x32xf32>
      %248 = arith.addf %5, %238 : vector<8x32xf32>
      %249 = arith.addf %241, %244 : vector<8x32xf32>
      %250 = arith.addf %248, %249 : vector<8x32xf32>
      %251 = arith.addf %250, %247 : vector<8x32xf32>
      %252 = math.tanh %251 : vector<8x32xf32>
      %253 = arith.mulf %252, %23 : vector<8x32xf32>
      %cst_80 = arith.constant dense<0.000000e+00> : vector<8xf32>
      %254 = vector.multi_reduction <add>, %253, %cst_80 [1] : vector<8x32xf32> to vector<8xf32>
      %255 = vector.shape_cast %254 : vector<8xf32> to vector<8x1xf32>
      %256 = arith.mulf %252, %26 : vector<8x32xf32>
      %cst_81 = arith.constant dense<0.000000e+00> : vector<8xf32>
      %257 = vector.multi_reduction <add>, %256, %cst_81 [1] : vector<8x32xf32> to vector<8xf32>
      %258 = vector.shape_cast %257 : vector<8xf32> to vector<8x1xf32>
      %259 = arith.mulf %252, %29 : vector<8x32xf32>
      %cst_82 = arith.constant dense<0.000000e+00> : vector<8xf32>
      %260 = vector.multi_reduction <add>, %259, %cst_82 [1] : vector<8x32xf32> to vector<8xf32>
      %261 = vector.shape_cast %260 : vector<8xf32> to vector<8x1xf32>
      %262 = arith.mulf %252, %32 : vector<8x32xf32>
      %cst_83 = arith.constant dense<0.000000e+00> : vector<8xf32>
      %263 = vector.multi_reduction <add>, %262, %cst_83 [1] : vector<8x32xf32> to vector<8xf32>
      %264 = vector.shape_cast %263 : vector<8xf32> to vector<8x1xf32>
      %265 = tpu.concatenate %255, %258, %261, %264 in 1 : vector<8x1xf32>, vector<8x1xf32>, vector<8x1xf32>, vector<8x1xf32> -> vector<8x4xf32>
      %266 = arith.addf %265, %8 : vector<8x4xf32>
      %267 = vector.broadcast %149 : f32 to vector<8x4xf32>
      %268 = arith.mulf %267, %266 : vector<8x4xf32>
      %cst_84 = arith.constant 2.95259857 : f32
      %269 = vector.broadcast %cst_84 : f32 to vector<8x4xf32>
      %270 = arith.mulf %269, %151 : vector<8x4xf32>
      %271 = arith.addf %arg8, %270 : vector<8x4xf32>
      %cst_85 = arith.constant -11.5957937 : f32
      %272 = vector.broadcast %cst_85 : f32 to vector<8x4xf32>
      %273 = arith.mulf %272, %187 : vector<8x4xf32>
      %cst_86 = arith.constant 9.82289314 : f32
      %274 = vector.broadcast %cst_86 : f32 to vector<8x4xf32>
      %275 = arith.mulf %274, %226 : vector<8x4xf32>
      %276 = arith.addf %273, %275 : vector<8x4xf32>
      %cst_87 = arith.constant -0.290809333 : f32
      %277 = vector.broadcast %cst_87 : f32 to vector<8x4xf32>
      %278 = arith.mulf %277, %268 : vector<8x4xf32>
      %279 = arith.addf %276, %278 : vector<8x4xf32>
      %280 = arith.addf %271, %279 : vector<8x4xf32>
      %281 = vector.extract_strided_slice %280 {offsets = [0, 0], sizes = [8, 1], strides = [1, 1]} : vector<8x4xf32> to vector<8x1xf32>
      %282 = vector.broadcast %281 : vector<8x1xf32> to vector<8x32xf32>
      %283 = arith.mulf %282, %11 : vector<8x32xf32>
      %284 = vector.extract_strided_slice %280 {offsets = [0, 1], sizes = [8, 1], strides = [1, 1]} : vector<8x4xf32> to vector<8x1xf32>
      %285 = vector.broadcast %284 : vector<8x1xf32> to vector<8x32xf32>
      %286 = arith.mulf %285, %14 : vector<8x32xf32>
      %287 = vector.extract_strided_slice %280 {offsets = [0, 2], sizes = [8, 1], strides = [1, 1]} : vector<8x4xf32> to vector<8x1xf32>
      %288 = vector.broadcast %287 : vector<8x1xf32> to vector<8x32xf32>
      %289 = arith.mulf %288, %17 : vector<8x32xf32>
      %290 = vector.extract_strided_slice %280 {offsets = [0, 3], sizes = [8, 1], strides = [1, 1]} : vector<8x4xf32> to vector<8x1xf32>
      %291 = vector.broadcast %290 : vector<8x1xf32> to vector<8x32xf32>
      %292 = arith.mulf %291, %20 : vector<8x32xf32>
      %293 = arith.addf %5, %283 : vector<8x32xf32>
      %294 = arith.addf %286, %289 : vector<8x32xf32>
      %295 = arith.addf %293, %294 : vector<8x32xf32>
      %296 = arith.addf %295, %292 : vector<8x32xf32>
      %297 = math.tanh %296 : vector<8x32xf32>
      %298 = arith.mulf %297, %23 : vector<8x32xf32>
      %cst_88 = arith.constant dense<0.000000e+00> : vector<8xf32>
      %299 = vector.multi_reduction <add>, %298, %cst_88 [1] : vector<8x32xf32> to vector<8xf32>
      %300 = vector.shape_cast %299 : vector<8xf32> to vector<8x1xf32>
      %301 = arith.mulf %297, %26 : vector<8x32xf32>
      %cst_89 = arith.constant dense<0.000000e+00> : vector<8xf32>
      %302 = vector.multi_reduction <add>, %301, %cst_89 [1] : vector<8x32xf32> to vector<8xf32>
      %303 = vector.shape_cast %302 : vector<8xf32> to vector<8x1xf32>
      %304 = arith.mulf %297, %29 : vector<8x32xf32>
      %cst_90 = arith.constant dense<0.000000e+00> : vector<8xf32>
      %305 = vector.multi_reduction <add>, %304, %cst_90 [1] : vector<8x32xf32> to vector<8xf32>
      %306 = vector.shape_cast %305 : vector<8xf32> to vector<8x1xf32>
      %307 = arith.mulf %297, %32 : vector<8x32xf32>
      %cst_91 = arith.constant dense<0.000000e+00> : vector<8xf32>
      %308 = vector.multi_reduction <add>, %307, %cst_91 [1] : vector<8x32xf32> to vector<8xf32>
      %309 = vector.shape_cast %308 : vector<8xf32> to vector<8x1xf32>
      %310 = tpu.concatenate %300, %303, %306, %309 in 1 : vector<8x1xf32>, vector<8x1xf32>, vector<8x1xf32>, vector<8x1xf32> -> vector<8x4xf32>
      %311 = arith.addf %310, %8 : vector<8x4xf32>
      %312 = vector.broadcast %149 : f32 to vector<8x4xf32>
      %313 = arith.mulf %312, %311 : vector<8x4xf32>
      %cst_92 = arith.constant 2.84627533 : f32
      %314 = vector.broadcast %cst_92 : f32 to vector<8x4xf32>
      %315 = arith.mulf %314, %151 : vector<8x4xf32>
      %316 = arith.addf %arg8, %315 : vector<8x4xf32>
      %cst_93 = arith.constant -10.757576 : f32
      %317 = vector.broadcast %cst_93 : f32 to vector<8x4xf32>
      %318 = arith.mulf %317, %187 : vector<8x4xf32>
      %cst_94 = arith.constant 8.90642261 : f32
      %319 = vector.broadcast %cst_94 : f32 to vector<8x4xf32>
      %320 = arith.mulf %319, %226 : vector<8x4xf32>
      %321 = arith.addf %318, %320 : vector<8x4xf32>
      %322 = arith.addf %316, %321 : vector<8x4xf32>
      %cst_95 = arith.constant 0.278409094 : f32
      %323 = vector.broadcast %cst_95 : f32 to vector<8x4xf32>
      %324 = arith.mulf %323, %268 : vector<8x4xf32>
      %cst_96 = arith.constant -0.273531318 : f32
      %325 = vector.broadcast %cst_96 : f32 to vector<8x4xf32>
      %326 = arith.mulf %325, %313 : vector<8x4xf32>
      %327 = arith.addf %324, %326 : vector<8x4xf32>
      %328 = arith.addf %322, %327 : vector<8x4xf32>
      %329 = vector.extract_strided_slice %328 {offsets = [0, 0], sizes = [8, 1], strides = [1, 1]} : vector<8x4xf32> to vector<8x1xf32>
      %330 = vector.broadcast %329 : vector<8x1xf32> to vector<8x32xf32>
      %331 = arith.mulf %330, %11 : vector<8x32xf32>
      %332 = vector.extract_strided_slice %328 {offsets = [0, 1], sizes = [8, 1], strides = [1, 1]} : vector<8x4xf32> to vector<8x1xf32>
      %333 = vector.broadcast %332 : vector<8x1xf32> to vector<8x32xf32>
      %334 = arith.mulf %333, %14 : vector<8x32xf32>
      %335 = vector.extract_strided_slice %328 {offsets = [0, 2], sizes = [8, 1], strides = [1, 1]} : vector<8x4xf32> to vector<8x1xf32>
      %336 = vector.broadcast %335 : vector<8x1xf32> to vector<8x32xf32>
      %337 = arith.mulf %336, %17 : vector<8x32xf32>
      %338 = vector.extract_strided_slice %328 {offsets = [0, 3], sizes = [8, 1], strides = [1, 1]} : vector<8x4xf32> to vector<8x1xf32>
      %339 = vector.broadcast %338 : vector<8x1xf32> to vector<8x32xf32>
      %340 = arith.mulf %339, %20 : vector<8x32xf32>
      %341 = arith.addf %5, %331 : vector<8x32xf32>
      %342 = arith.addf %334, %337 : vector<8x32xf32>
      %343 = arith.addf %341, %342 : vector<8x32xf32>
      %344 = arith.addf %343, %340 : vector<8x32xf32>
      %345 = math.tanh %344 : vector<8x32xf32>
      %346 = arith.mulf %345, %23 : vector<8x32xf32>
      %cst_97 = arith.constant dense<0.000000e+00> : vector<8xf32>
      %347 = vector.multi_reduction <add>, %346, %cst_97 [1] : vector<8x32xf32> to vector<8xf32>
      %348 = vector.shape_cast %347 : vector<8xf32> to vector<8x1xf32>
      %349 = arith.mulf %345, %26 : vector<8x32xf32>
      %cst_98 = arith.constant dense<0.000000e+00> : vector<8xf32>
      %350 = vector.multi_reduction <add>, %349, %cst_98 [1] : vector<8x32xf32> to vector<8xf32>
      %351 = vector.shape_cast %350 : vector<8xf32> to vector<8x1xf32>
      %352 = arith.mulf %345, %29 : vector<8x32xf32>
      %cst_99 = arith.constant dense<0.000000e+00> : vector<8xf32>
      %353 = vector.multi_reduction <add>, %352, %cst_99 [1] : vector<8x32xf32> to vector<8xf32>
      %354 = vector.shape_cast %353 : vector<8xf32> to vector<8x1xf32>
      %355 = arith.mulf %345, %32 : vector<8x32xf32>
      %cst_100 = arith.constant dense<0.000000e+00> : vector<8xf32>
      %356 = vector.multi_reduction <add>, %355, %cst_100 [1] : vector<8x32xf32> to vector<8xf32>
      %357 = vector.shape_cast %356 : vector<8xf32> to vector<8x1xf32>
      %358 = tpu.concatenate %348, %351, %354, %357 in 1 : vector<8x1xf32>, vector<8x1xf32>, vector<8x1xf32>, vector<8x1xf32> -> vector<8x4xf32>
      %359 = arith.addf %358, %8 : vector<8x4xf32>
      %360 = vector.broadcast %149 : f32 to vector<8x4xf32>
      %361 = arith.mulf %360, %359 : vector<8x4xf32>
      %cst_101 = arith.constant 0.0911458358 : f32
      %362 = vector.broadcast %cst_101 : f32 to vector<8x4xf32>
      %363 = arith.mulf %362, %151 : vector<8x4xf32>
      %364 = arith.addf %arg8, %363 : vector<8x4xf32>
      %cst_102 = arith.constant 0.449236304 : f32
      %365 = vector.broadcast %cst_102 : f32 to vector<8x4xf32>
      %366 = arith.mulf %365, %226 : vector<8x4xf32>
      %cst_103 = arith.constant 0.651041686 : f32
      %367 = vector.broadcast %cst_103 : f32 to vector<8x4xf32>
      %368 = arith.mulf %367, %268 : vector<8x4xf32>
      %369 = arith.addf %366, %368 : vector<8x4xf32>
      %370 = arith.addf %364, %369 : vector<8x4xf32>
      %cst_104 = arith.constant -0.322376192 : f32
      %371 = vector.broadcast %cst_104 : f32 to vector<8x4xf32>
      %372 = arith.mulf %371, %313 : vector<8x4xf32>
      %cst_105 = arith.constant 0.130952388 : f32
      %373 = vector.broadcast %cst_105 : f32 to vector<8x4xf32>
      %374 = arith.mulf %373, %361 : vector<8x4xf32>
      %375 = arith.addf %372, %374 : vector<8x4xf32>
      %376 = arith.addf %370, %375 : vector<8x4xf32>
      %377 = vector.extract_strided_slice %376 {offsets = [0, 0], sizes = [8, 1], strides = [1, 1]} : vector<8x4xf32> to vector<8x1xf32>
      %378 = vector.broadcast %377 : vector<8x1xf32> to vector<8x32xf32>
      %379 = arith.mulf %378, %11 : vector<8x32xf32>
      %380 = vector.extract_strided_slice %376 {offsets = [0, 1], sizes = [8, 1], strides = [1, 1]} : vector<8x4xf32> to vector<8x1xf32>
      %381 = vector.broadcast %380 : vector<8x1xf32> to vector<8x32xf32>
      %382 = arith.mulf %381, %14 : vector<8x32xf32>
      %383 = vector.extract_strided_slice %376 {offsets = [0, 2], sizes = [8, 1], strides = [1, 1]} : vector<8x4xf32> to vector<8x1xf32>
      %384 = vector.broadcast %383 : vector<8x1xf32> to vector<8x32xf32>
      %385 = arith.mulf %384, %17 : vector<8x32xf32>
      %386 = vector.extract_strided_slice %376 {offsets = [0, 3], sizes = [8, 1], strides = [1, 1]} : vector<8x4xf32> to vector<8x1xf32>
      %387 = vector.broadcast %386 : vector<8x1xf32> to vector<8x32xf32>
      %388 = arith.mulf %387, %20 : vector<8x32xf32>
      %389 = arith.addf %5, %379 : vector<8x32xf32>
      %390 = arith.addf %382, %385 : vector<8x32xf32>
      %391 = arith.addf %389, %390 : vector<8x32xf32>
      %392 = arith.addf %391, %388 : vector<8x32xf32>
      %393 = math.tanh %392 : vector<8x32xf32>
      %394 = arith.mulf %393, %23 : vector<8x32xf32>
      %cst_106 = arith.constant dense<0.000000e+00> : vector<8xf32>
      %395 = vector.multi_reduction <add>, %394, %cst_106 [1] : vector<8x32xf32> to vector<8xf32>
      %396 = vector.shape_cast %395 : vector<8xf32> to vector<8x1xf32>
      %397 = arith.mulf %393, %26 : vector<8x32xf32>
      %cst_107 = arith.constant dense<0.000000e+00> : vector<8xf32>
      %398 = vector.multi_reduction <add>, %397, %cst_107 [1] : vector<8x32xf32> to vector<8xf32>
      %399 = vector.shape_cast %398 : vector<8xf32> to vector<8x1xf32>
      %400 = arith.mulf %393, %29 : vector<8x32xf32>
      %cst_108 = arith.constant dense<0.000000e+00> : vector<8xf32>
      %401 = vector.multi_reduction <add>, %400, %cst_108 [1] : vector<8x32xf32> to vector<8xf32>
      %402 = vector.shape_cast %401 : vector<8xf32> to vector<8x1xf32>
      %403 = arith.mulf %393, %32 : vector<8x32xf32>
      %cst_109 = arith.constant dense<0.000000e+00> : vector<8xf32>
      %404 = vector.multi_reduction <add>, %403, %cst_109 [1] : vector<8x32xf32> to vector<8xf32>
      %405 = vector.shape_cast %404 : vector<8xf32> to vector<8x1xf32>
      %406 = tpu.concatenate %396, %399, %402, %405 in 1 : vector<8x1xf32>, vector<8x1xf32>, vector<8x1xf32>, vector<8x1xf32> -> vector<8x4xf32>
      %407 = arith.addf %406, %8 : vector<8x4xf32>
      %408 = vector.broadcast %149 : f32 to vector<8x4xf32>
      %409 = arith.mulf %408, %407 : vector<8x4xf32>
      %cst_110 = arith.constant 0.00123263884 : f32
      %410 = vector.broadcast %cst_110 : f32 to vector<8x4xf32>
      %411 = arith.mulf %410, %151 : vector<8x4xf32>
      %cst_111 = arith.constant -0.00425277045 : f32
      %412 = vector.broadcast %cst_111 : f32 to vector<8x4xf32>
      %413 = arith.mulf %412, %226 : vector<8x4xf32>
      %414 = arith.addf %411, %413 : vector<8x4xf32>
      %cst_112 = arith.constant 0.0369791649 : f32
      %415 = vector.broadcast %cst_112 : f32 to vector<8x4xf32>
      %416 = arith.mulf %415, %268 : vector<8x4xf32>
      %cst_113 = arith.constant -5.086380e-02 : f32
      %417 = vector.broadcast %cst_113 : f32 to vector<8x4xf32>
      %418 = arith.mulf %417, %313 : vector<8x4xf32>
      %419 = arith.addf %416, %418 : vector<8x4xf32>
      %420 = arith.addf %414, %419 : vector<8x4xf32>
      %cst_114 = arith.constant 0.0419047624 : f32
      %421 = vector.broadcast %cst_114 : f32 to vector<8x4xf32>
      %422 = arith.mulf %421, %361 : vector<8x4xf32>
      %cst_115 = arith.constant -2.500000e-02 : f32
      %423 = vector.broadcast %cst_115 : f32 to vector<8x4xf32>
      %424 = arith.mulf %423, %409 : vector<8x4xf32>
      %425 = arith.addf %422, %424 : vector<8x4xf32>
      %426 = arith.addf %420, %425 : vector<8x4xf32>
      %427 = math.absf %arg8 : vector<8x4xf32>
      %428 = math.absf %376 : vector<8x4xf32>
      %429 = arith.maximumf %427, %428 : vector<8x4xf32>
      %cst_116 = arith.constant 9.99999997E-7 : f32
      %430 = vector.broadcast %cst_116 : f32 to vector<8x4xf32>
      %431 = arith.mulf %430, %429 : vector<8x4xf32>
      %cst_117 = arith.constant 1.000000e-07 : f32
      %432 = vector.broadcast %cst_117 : f32 to vector<8x4xf32>
      %433 = arith.addf %432, %431 : vector<8x4xf32>
      %434 = arith.divf %426, %433 : vector<8x4xf32>
      %435 = arith.mulf %434, %434 : vector<8x4xf32>
      %436 = vector.shape_cast %435 : vector<8x4xf32> to vector<1x8x4xf32>
      %cst_118 = arith.constant dense<0.000000e+00> : vector<1xf32>
      %437 = vector.multi_reduction <add>, %436, %cst_118 [1, 2] : vector<1x8x4xf32> to vector<1xf32>
      %438 = vector.shape_cast %437 : vector<1xf32> to vector<1x1x1xf32>
      %439 = vector.extract %438[0, 0, 0] : f32 from vector<1x1x1xf32>
      %440 = vector.broadcast %439 : f32 to vector<1x1xf32>
      %cst_119 = arith.constant 3.125000e-02 : f32
      %441 = vector.broadcast %cst_119 : f32 to vector<1x1xf32>
      %442 = arith.mulf %440, %441 : vector<1x1xf32>
      %cst_120 = arith.constant 1.000000e-24 : f32
      %443 = vector.broadcast %cst_120 : f32 to vector<1x1xf32>
      %444 = arith.addf %442, %443 : vector<1x1xf32>
      %445 = math.log %444 : vector<1x1xf32>
      %cst_121 = arith.constant -1.000000e-01 : f32
      %446 = vector.broadcast %cst_121 : f32 to vector<1x1xf32>
      %447 = arith.mulf %446, %445 : vector<1x1xf32>
      %448 = math.exp %447 : vector<1x1xf32>
      %cst_122 = arith.constant 0.899999976 : f32
      %449 = vector.broadcast %cst_122 : f32 to vector<1x1xf32>
      %450 = arith.mulf %449, %448 : vector<1x1xf32>
      %451 = vector.extract %442[0, 0] : f32 from vector<1x1xf32>
      %452 = vector.extract %450[0, 0] : f32 from vector<1x1xf32>
      %cst_123 = arith.constant 2.000000e-01 : f32
      %cst_124 = arith.constant 1.000000e+01 : f32
      %453 = arith.maximumf %cst_123, %452 : f32
      %454 = arith.minimumf %cst_124, %453 : f32
      %cst_125 = arith.constant 1.000000e+00 : f32
      %455 = arith.cmpf ole, %451, %cst_125 : f32
      %456 = arith.addf %arg7, %149 : f32
      %457 = arith.select %455, %456, %arg7 : f32
      %458 = arith.select %455, %376, %arg8 : vector<8x4xf32>
      %459 = arith.select %455, %407, %arg10 : vector<8x4xf32>
      %460 = arith.mulf %149, %454 : f32
      %cst_126 = arith.constant 9.99999997E-7 : f32
      %461 = arith.mulf %cst_126, %139 : f32
      %462 = arith.maximumf %460, %461 : f32
      %c1_i32 = arith.constant 1 : i32
      %463 = arith.addi %arg11, %c1_i32 : i32
      scf.yield %457, %458, %462, %459, %463 : f32, vector<8x4xf32>, f32, vector<8x4xf32>, i32
    }
    %c7_63 = arith.constant 7 : index
    %c0_64 = arith.constant 0 : index
    %c0_65 = arith.constant 0 : index
    %145 = vector.load %arg6[%c7_63, %c0_64, %c0_65] : memref<8x8x4xf32, #tpu.memory_space<vmem>>, vector<1x8x4xf32>
    %146 = vector.shape_cast %145 : vector<1x8x4xf32> to vector<8x4xf32>
    %147 = vector.shape_cast %144#1 : vector<8x4xf32> to vector<1x8x4xf32>
    tpu.vector_store %arg6[%c7_63, %c0_64, %c0_65], %147 {strides = array<i32>} : memref<8x8x4xf32, #tpu.memory_space<vmem>>, vector<1x8x4xf32>,
    return
  }
}

</mosaic_0001>

<bundles_post_ra>
// kernel: node_forward.1
= control target key start
LH: loop header
LB: loop body
LE: loop exit
PB: predicated region body
PF: predicated region fallthrough
CT: control target
= control target key end

     0   :  { %11 = vsyncpa [#allocation3], 0  ;;  %s4442_s24 = smov [#allocation2]   ;;  %s6427_s0 = inlined_call_operand.vmem [shape: f32[8], index: 0, kind: input, shape index: {}]   ;;  %s6428_s1 = inlined_call_operand.vmem [shape: f32[8,4], index: 1, kind: input, shape index: {}]   ;;  %s6429_s2 = inlined_call_operand.vmem [shape: f32[4,32], index: 2, kind: input, shape index: {}]   ;;  %s6430_s3 = inlined_call_operand.vmem [shape: f32[1,32], index: 3, kind: input, shape index: {}]   ;;  %s6431_s4 = inlined_call_operand.vmem [shape: f32[4,32], index: 4, kind: input, shape index: {}]   ;;  %s6432_s5 = inlined_call_operand.vmem [shape: f32[1,4], index: 5, kind: input, shape index: {}]   ;;  %s6433_s6 = inlined_call_operand.vmem [shape: f32[8,8,4], index: 6, kind: output, shape index: {}]  }
   0x1   :  { %s17_s23 = sshll.u32 %s6427_s0, 4  ;;  %s18_s23 = int_to_ptr.vmem [resolvable:$true] %s17_s23 }
   0x2   :  { %20 = dma.vmem_to_smem %s18_s23, 16, %s4442_s24, [#allocation3]  }
   0x3   :  { %4224 = dma.done.wait [#allocation3], 16  }
   0x4   :  { %4225 = vsyncadd [#allocation3], 4294967280 }
   0x5   :  { %35 = sfence }
   0x6   :  { %v4531_v0 = vld [vmem:[%s6428_s1] sm:$0xff]   ;;  %vm55_vm0 = vcmask 31744   ;;  %v4443_v1 = vmov 0   ;;  %v4444_v2 = vmov 2   ;;  %v4445_v3 = vmov 1   ;;  %s4570_s7 = sld [smem:[#allocation2 + $0x1]] }
   0x7   :  { %3707 = vset.pattern.permute.xlu0 %v4443_v1  ;;  %56 = vst.msk [vmem:[%s6433_s6] sm:$0xff] %vm55_vm0, %v4531_v0  ;;  %3709 = vset.pattern.permute.xlu1 %v4444_v2  ;;  %v4446_v4 = vmov 3   ;;  %v37_v7 = vld [vmem:[%s6429_s2] sm:$0xf]  ;;  %vm88_vm1 = vcmask 261120   ;;  %s4572_s8 = sld [smem:[#allocation2]]   ;;  %v6436_v47 = vmov %v4531_v0 }
   0x8   :  { %63 = vperm.xlu0 %3707, %v4531_v0   ;;  %73 = vperm.xlu1 %3709, %v4531_v0   ;;  %v4545_v8 = vperm.slane %v37_v7, 0  ;;  %v4547_v9 = vperm.slane %v37_v7, 2  ;;  %v4549_v10 = vperm.slane %v37_v7, 1  ;;  %v4554_v11 = vld [vmem:[%s6430_s3] ss:$0 sm:$0xff]  ;;  %v4557_v13 = vperm.slane %v37_v7, 3 }
   0x9   :  { %v38_v23 = vld [vmem:[%s6431_s4] sm:$0xf]  ;;  %s4447_s11 = smov 1.0   ;;  %vm104_vm2 = vcmask 7168   ;;  %vm106_vm3 = vcmask 15360   ;;  %vm108_vm4 = vcmask 23552  }
   0xa   :  { %v4566_v24 = vperm.slane %v38_v23, 2  ;;  %v4568_v25 = vperm.slane %v38_v23, 0  ;;  %v4578_v31 = vperm.slane %v38_v23, 1  ;;  %v4593_v34 = vperm.slane %v38_v23, 3  ;;  %v4601_v40 = vld [vmem:[%s6432_s5] ss:$0 sm:$0xff] }
   0xc   :  { %s111_s9 = sand.u32 2147483647, %s4570_s7 }
   0xd   :  { %s4582_s4 = ssub.f32 %s4570_s7, %s4572_s8  ;;  %s4588_s12 = smax.f32 %s4447_s11, %s111_s9 }
   0xe   :  { %s113_s13 = smul.f32 1e-10, %s4588_s12 }
   0xf   :  { %s60_s10 = smul.f32 0.1, %s4582_s4 }
  0x10   :  { %3708 = vset.pattern.permute.xlu0 %v4445_v3  ;;  %3710 = vset.pattern.permute.xlu1 %v4446_v4  ;;  %p3024_p0 = scmp.gt.f32.partialorder %s4582_s4, %s113_s13 }
  0x11   :  { %68 = vperm.xlu0 %3708, %v4531_v0   ;;  %78 = vperm.xlu1 %3710, %v4531_v0   ;;  %s114_s14 = smin.f32 %s60_s10, %s4582_s4   ;;  %s4616_s5 = smov (%p3024_p0), 0  }
  0x12   :  { %s6435_s17 = smov %s114_s14 }
  0x19   :  { %3711 = vset.pattern.permute.xlu0 %v4446_v4 }
  0x7a   :  { %v64_v5 = vpop.permute.xlu0 %63  ;;  %v74_v6 = vpop.permute.xlu1 %73 }
  0x7b   :  { %v66_v12 = vmul.f32 %v64_v5, %v4545_v8  ;;  %v76_v16 = vmul.f32 %v74_v6, %v4547_v9 }
  0x7d   :  { %v82_v18 = vadd.f32 %v4554_v11, %v66_v12 }
  0x83   :  { %v69_v14 = vpop.permute.xlu0 %68  ;;  %v79_v15 = vpop.permute.xlu1 %78 }
  0x84   :  { %v71_v17 = vmul.f32 %v69_v14, %v4549_v10  ;;  %v81_v20 = vmul.f32 %v79_v15, %v4557_v13 }
  0x86   :  { %v83_v19 = vadd.f32 %v76_v16, %v71_v17 }
  0x88   :  { %v84_v21 = vadd.f32 %v83_v19, %v82_v18 }
  0x8a   :  { %v85_v22 = vadd.f32 %v84_v21, %v81_v20 }
  0x8c   :  { %3714 = vtanh.f32 %v85_v22 }
  0x92   :  { %v3715_v26 = vpop.eup %3714 }
  0x93   :  { %v96_v27 = vmul.f32 %v3715_v26, %v4566_v24  ;;  %v87_v28 = vmul.f32 %v3715_v26, %v4568_v25  ;;  %v92_v32 = vmul.f32 %v3715_v26, %v4578_v31  ;;  %v100_v35 = vmul.f32 %v3715_v26, %v4593_v34 }
  0x95   :  { %v97_v29 = vsel %vm88_vm1, %v96_v27, 0.0  ;;  %v89_v30 = vsel %vm88_vm1, %v87_v28, 0.0  ;;  %v93_v33 = vsel %vm88_vm1, %v92_v32, 0.0  ;;  %v101_v36 = vsel %vm88_vm1, %v100_v35, 0.0 }
  0x96   :  { %98 = vadd.xlane.f32.xlu1 %v97_v29  ;;  %90 = vadd.xlane.f32.xlu2 %v89_v30 }
  0x9e   :  { %94 = vadd.xlane.f32.xlu2 %v93_v33 }
  0xa6   :  { %102 = vadd.xlane.f32.xlu2 %v101_v36 }
 0x109   :  { %v91_v37 = vpop.xlane.xlu2 %90  ;;  %v99_v41 = vpop.xlane.xlu1 %98 }
 0x111   :  { %v95_v38 = vpop.xlane.xlu2 %94 }
 0x112   :  { %v105_v39 = vsel %vm104_vm2, %v91_v37, %v95_v38 }
 0x113   :  { %v107_v42 = vsel %vm106_vm3, %v105_v39, %v99_v41 }
 0x119   :  { %v103_v43 = vpop.xlane.xlu2 %102  ;;  %3027 = sbr.rel (!%p3024_p0) target bundleno = 2224 (0x8b0), region = 98 }
 0x11a   :  { %v109_v44 = vsel %vm108_vm4, %v107_v42, %v103_v43 }
 0x11b   :  { %v110_v45 = vadd.f32 %v4601_v40, %v109_v44  }
 0x11d   :  { %v6434_v46 = vmov %v110_v45 }
 0x11e LB: > { %v4448_v48 = vmov 0   ;;  %v4449_v49 = vmov 2   ;;  %s128_s18 = ssub.f32 %s4570_s7, %s4244_s8  ;;  %v4450_v50 = vmov 1   ;;  %v4451_v55 = vmov 3   ;;  %s520_s20 = sadd.s32 1, %s4228_s5   ;;  %s4244_s8 = sphi %s4572_s8, %s6441_s8   ;;  %v4240_v0 = vphi %v4531_v0, %v6440_v0   ;;  %s4236_s14 = sphi %s114_s14, %s6439_s14   ;;  %v4232_v45 = vphi %v110_v45, %v6438_v45   ;;  %s4228_s5 = sphi %s4616_s5, %s6437_s5  }
 0x11f   : > { %3716 = vset.pattern.permute.xlu0 %v4448_v48  ;;  %3718 = vset.pattern.permute.xlu1 %v4449_v49  ;;  %s4452_s26 = smov 0.2   ;;  %s518_s28 = smul.f32 1e-06, %s4582_s4 }
 0x120   : > { %3721 = vset.pattern.permute.xlu2 %v4450_v50  ;;  %s4646_s19 = smin.f32 %s4236_s14, %s128_s18  ;;  %s4453_s0 = smov 10.0  }
 0x121   : > { %v4649_v51 = vstv %s4646_s19  ;;  %s510_s22 = sadd.f32 %s4244_s8, %s4646_s19  ;;  %p123_p2 = scmp.lt.s32.totalorder %s520_s20, 1000 }
 0x122   : > { %v4653_v52 = vmul.f32 %v4232_v45, %v4649_v51  ;;  %s6437_s5 = smov %s520_s20 }
 0x124   : > { %v132_v53 = vmul.f32 0.2, %v4653_v52  ;;  %v181_v30 = vmul.f32 0.075, %v4653_v52 }
 0x126   : > { %v133_v54 = vadd.f32 %v4240_v0, %v132_v53 }
 0x128   : > { %136 = vperm.xlu0 %3716, %v133_v54   ;;  %146 = vperm.xlu1 %3718, %v133_v54  }
 0x130   : > { %3717 = vset.pattern.permute.xlu0 %v4450_v50  ;;  %3719 = vset.pattern.permute.xlu1 %v4451_v55 }
 0x131   : > { %141 = vperm.xlu0 %3717, %v133_v54   ;;  %151 = vperm.xlu1 %3719, %v133_v54  }
 0x139   : > { %3720 = vset.pattern.permute.xlu0 %v4448_v48  ;;  %3724 = vset.pattern.permute.xlu1 %v4448_v48 }
 0x19a   : > { %v137_v56 = vpop.permute.xlu0 %136  ;;  %v147_v57 = vpop.permute.xlu1 %146 }
 0x19b   : > { %v139_v58 = vmul.f32 %v137_v56, %v4545_v8  ;;  %v149_v61 = vmul.f32 %v147_v57, %v4547_v9 }
 0x19d   : > { %v155_v63 = vadd.f32 %v4554_v11, %v139_v58 }
 0x1a3   : > { %v142_v59 = vpop.permute.xlu0 %141  ;;  %v152_v60 = vpop.permute.xlu1 %151 }
 0x1a4   : > { %v144_v62 = vmul.f32 %v142_v59, %v4549_v10  ;;  %v154_v2 = vmul.f32 %v152_v60, %v4557_v13 }
 0x1a6   : > { %v156_v1 = vadd.f32 %v149_v61, %v144_v62 }
 0x1a8   : > { %v157_v3 = vadd.f32 %v156_v1, %v155_v63 }
 0x1aa   : > { %v158_v4 = vadd.f32 %v157_v3, %v154_v2 }
 0x1ac   : > { %3738 = vtanh.f32 %v158_v4 }
 0x1b2   : > { %v3739_v5 = vpop.eup %3738 }
 0x1b3   : > { %v168_v6 = vmul.f32 %v3739_v5, %v4566_v24  ;;  %v160_v7 = vmul.f32 %v3739_v5, %v4568_v25  ;;  %v164_v15 = vmul.f32 %v3739_v5, %v4578_v31  ;;  %v172_v17 = vmul.f32 %v3739_v5, %v4593_v34 }
 0x1b5   : > { %v169_v12 = vsel %vm88_vm1, %v168_v6, 0.0  ;;  %v161_v14 = vsel %vm88_vm1, %v160_v7, 0.0  ;;  %v165_v16 = vsel %vm88_vm1, %v164_v15, 0.0  ;;  %v173_v18 = vsel %vm88_vm1, %v172_v17, 0.0 }
 0x1b6   : > { %170 = vadd.xlane.f32.xlu1 %v169_v12  ;;  %162 = vadd.xlane.f32.xlu2 %v161_v14  ;;  %v232_v15 = vmul.f32 0.9777778, %v4653_v52 }
 0x1be   : > { %166 = vadd.xlane.f32.xlu2 %v165_v16 }
 0x1c6   : > { %174 = vadd.xlane.f32.xlu2 %v173_v18 }
 0x229   : > { %v163_v19 = vpop.xlane.xlu2 %162  ;;  %v171_v22 = vpop.xlane.xlu1 %170 }
 0x231   : > { %v167_v20 = vpop.xlane.xlu2 %166 }
 0x232   : > { %v176_v21 = vsel %vm104_vm2, %v163_v19, %v167_v20  ;;  %v233_v20 = vadd.f32 %v4240_v0, %v232_v15 }
 0x233   : > { %v177_v23 = vsel %vm106_vm3, %v176_v21, %v171_v22 }
 0x239   : > { %v175_v26 = vpop.xlane.xlu2 %174 }
 0x23a   : > { %v178_v27 = vsel %vm108_vm4, %v177_v23, %v175_v26 }
 0x23b   : > { %v179_v28 = vadd.f32 %v4601_v40, %v178_v27 }
 0x23d   : > { %v180_v29 = vmul.f32 %v179_v28, %v4649_v51 }
 0x23f   : > { %v182_v32 = vmul.f32 0.225, %v180_v29  ;;  %v234_v17 = vmul.f32 -3.7333333, %v180_v29  ;;  %v287_v18 = vmul.f32 -11.595794, %v180_v29 }
 0x240   : > { %v342_v19 = vmul.f32 -10.757576, %v180_v29 }
 0x241   : > { %v183_v33 = vadd.f32 %v182_v32, %v181_v30 }
 0x243   : > { %v184_v35 = vadd.f32 %v4240_v0, %v183_v33 }
 0x245   : > { %192 = vperm.xlu2 %3721, %v184_v35   ;;  %187 = vperm.xlu0 %3720, %v184_v35  }
 0x24d   : > { %3723 = vset.pattern.permute.xlu2 %v4451_v55  ;;  %3722 = vset.pattern.permute.xlu0 %v4449_v49 }
 0x24e   : > { %202 = vperm.xlu2 %3723, %v184_v35   ;;  %197 = vperm.xlu0 %3722, %v184_v35  }
 0x256   : > { %3725 = vset.pattern.permute.xlu2 %v4450_v50 }
 0x29f   : > { %v193_v37 = vpop.permute.xlu2 %192 }
 0x2a0   : > { %v195_v41 = vmul.f32 %v193_v37, %v4549_v10 }
 0x2a8   : > { %v203_v43 = vpop.permute.xlu2 %202 }
 0x2a9   : > { %v205_v47 = vmul.f32 %v203_v43, %v4557_v13 }
 0x2b7   : > { %v188_v36 = vpop.permute.xlu0 %187 }
 0x2b8   : > { %v190_v38 = vmul.f32 %v188_v36, %v4545_v8 }
 0x2ba   : > { %v206_v44 = vadd.f32 %v4554_v11, %v190_v38 }
 0x2c0   : > { %v198_v39 = vpop.permute.xlu0 %197 }
 0x2c1   : > { %v200_v42 = vmul.f32 %v198_v39, %v4547_v9 }
 0x2c3   : > { %v207_v46 = vadd.f32 %v200_v42, %v195_v41 }
 0x2c5   : > { %v208_v53 = vadd.f32 %v207_v46, %v206_v44 }
 0x2c7   : > { %v209_v54 = vadd.f32 %v208_v53, %v205_v47 }
 0x2c9   : > { %3740 = vtanh.f32 %v209_v54 }
 0x2cf   : > { %v3741_v56 = vpop.eup %3740 }
 0x2d0   : > { %v219_v57 = vmul.f32 %v3741_v56, %v4566_v24  ;;  %v215_v58 = vmul.f32 %v3741_v56, %v4578_v31  ;;  %v211_v59 = vmul.f32 %v3741_v56, %v4568_v25  ;;  %v223_v63 = vmul.f32 %v3741_v56, %v4593_v34 }
 0x2d2   : > { %v220_v60 = vsel %vm88_vm1, %v219_v57, 0.0  ;;  %v216_v61 = vsel %vm88_vm1, %v215_v58, 0.0  ;;  %v212_v62 = vsel %vm88_vm1, %v211_v59, 0.0  ;;  %v224_v1 = vsel %vm88_vm1, %v223_v63, 0.0 }
 0x2d3   : > { %221 = vadd.xlane.f32.xlu1 %v220_v60  ;;  %217 = vadd.xlane.f32.xlu2 %v216_v61 }
 0x2d4   : > { %213 = vadd.xlane.f32.xlu0 %v212_v62 }
 0x2db   : > { %225 = vadd.xlane.f32.xlu1 %v224_v1 }
 0x346   : > { %v222_v2 = vpop.xlane.xlu1 %221  ;;  %v218_v3 = vpop.xlane.xlu2 %217 }
 0x347   : > { %v214_v4 = vpop.xlane.xlu0 %213 }
 0x348   : > { %v227_v5 = vsel %vm104_vm2, %v214_v4, %v218_v3 }
 0x349   : > { %v228_v7 = vsel %vm106_vm3, %v227_v5, %v222_v2 }
 0x34e   : > { %v226_v6 = vpop.xlane.xlu1 %225 }
 0x34f   : > { %v229_v12 = vsel %vm108_vm4, %v228_v7, %v226_v6  ;;  %v285_v6 = vmul.f32 2.9525986, %v4653_v52 }
 0x350   : > { %v230_v14 = vadd.f32 %v4601_v40, %v229_v12 }
 0x351   : > { %v286_v15 = vadd.f32 %v4240_v0, %v285_v6 }
 0x352   : > { %v4703_v16 = vmul.f32 %v230_v14, %v4649_v51 }
 0x354   : > { %v235_v21 = vmul.f32 3.5555556, %v4703_v16  ;;  %v288_v22 = vmul.f32 9.822893, %v4703_v16  ;;  %v343_v23 = vmul.f32 8.906423, %v4703_v16 }
 0x356   : > { %v236_v26 = vadd.f32 %v235_v21, %v234_v17  ;;  %v289_v27 = vadd.f32 %v288_v22, %v287_v18  ;;  %v4709_v28 = vadd.f32 %v343_v23, %v342_v19  ;;  %v399_v17 = vmul.f32 0.4492363, %v4703_v16 }
 0x358   : > { %v237_v30 = vadd.f32 %v236_v26, %v233_v20 }
 0x35a   : > { %250 = vperm.xlu0 %3722, %v237_v30   ;;  %245 = vperm.xlu2 %3725, %v237_v30  }
 0x35b   : > { %240 = vperm.xlu1 %3724, %v237_v30  }
 0x362   : > { %3728 = vset.pattern.permute.xlu0 %v4450_v50  ;;  %3729 = vset.pattern.permute.xlu2 %v4449_v49 }
 0x363   : > { %3726 = vset.pattern.permute.xlu1 %v4451_v55 }
 0x364   : > { %255 = vperm.xlu1 %3726, %v237_v30  }
 0x36c   : > { %3727 = vset.pattern.permute.xlu1 %v4448_v48 }
 0x3b4   : > { %v246_v33 = vpop.permute.xlu2 %245 }
 0x3b5   : > { %v248_v37 = vmul.f32 %v246_v33, %v4549_v10 }
 0x3cc   : > { %v251_v29 = vpop.permute.xlu0 %250 }
 0x3cd   : > { %v241_v32 = vpop.permute.xlu1 %240  ;;  %v253_v35 = vmul.f32 %v251_v29, %v4547_v9 }
 0x3ce   : > { %v243_v36 = vmul.f32 %v241_v32, %v4545_v8 }
 0x3cf   : > { %v260_v38 = vadd.f32 %v253_v35, %v248_v37 }
 0x3d0   : > { %v259_v39 = vadd.f32 %v4554_v11, %v243_v36 }
 0x3d2   : > { %v261_v42 = vadd.f32 %v260_v38, %v259_v39 }
 0x3d6   : > { %v256_v41 = vpop.permute.xlu1 %255 }
 0x3d7   : > { %v258_v43 = vmul.f32 %v256_v41, %v4557_v13 }
 0x3d9   : > { %v262_v44 = vadd.f32 %v261_v42, %v258_v43 }
 0x3db   : > { %3742 = vtanh.f32 %v262_v44 }
 0x3e1   : > { %v3743_v46 = vpop.eup %3742 }
 0x3e2   : > { %v272_v47 = vmul.f32 %v3743_v46, %v4566_v24  ;;  %v268_v53 = vmul.f32 %v3743_v46, %v4578_v31  ;;  %v264_v54 = vmul.f32 %v3743_v46, %v4568_v25  ;;  %v276_v59 = vmul.f32 %v3743_v46, %v4593_v34 }
 0x3e4   : > { %v273_v56 = vsel %vm88_vm1, %v272_v47, 0.0  ;;  %v269_v57 = vsel %vm88_vm1, %v268_v53, 0.0  ;;  %v265_v58 = vsel %vm88_vm1, %v264_v54, 0.0  ;;  %v277_v60 = vsel %vm88_vm1, %v276_v59, 0.0 }
 0x3e5   : > { %274 = vadd.xlane.f32.xlu2 %v273_v56  ;;  %270 = vadd.xlane.f32.xlu0 %v269_v57  ;;  %v340_v59 = vmul.f32 2.8462753, %v4653_v52 }
 0x3e6   : > { %266 = vadd.xlane.f32.xlu1 %v265_v58 }
 0x3ee   : > { %278 = vadd.xlane.f32.xlu1 %v277_v60 }
 0x458   : > { %v271_v62 = vpop.xlane.xlu0 %270  ;;  %v275_v63 = vpop.xlane.xlu2 %274 }
 0x459   : > { %v267_v61 = vpop.xlane.xlu1 %266 }
 0x45a   : > { %v280_v1 = vsel %vm104_vm2, %v267_v61, %v271_v62 }
 0x45b   : > { %v281_v2 = vsel %vm106_vm3, %v280_v1, %v275_v63  ;;  %v341_v63 = vadd.f32 %v4240_v0, %v340_v59  ;;  %v454_v1 = vmul.f32 0.0012326388, %v4653_v52 }
 0x461   : > { %v279_v3 = vpop.xlane.xlu1 %278 }
 0x462   : > { %v282_v4 = vsel %vm108_vm4, %v281_v2, %v279_v3  ;;  %v455_v2 = vmul.f32 -0.0042527704, %v4703_v16 }
 0x463   : > { %v283_v5 = vadd.f32 %v4601_v40, %v282_v4 }
 0x465   : > { %v284_v7 = vmul.f32 %v283_v5, %v4649_v51 }
 0x467   : > { %v290_v12 = vmul.f32 -0.29080933, %v284_v7  ;;  %v400_v14 = vmul.f32 0.6510417, %v284_v7  ;;  %v346_v3 = vmul.f32 0.2784091, %v284_v7 }
 0x468   : > { %v457_v6 = vmul.f32 0.036979165, %v284_v7 }
 0x469   : > { %v291_v18 = vadd.f32 %v290_v12, %v289_v27  ;;  %v4736_v19 = vadd.f32 %v400_v14, %v399_v17  ;;  %v345_v14 = vadd.f32 %v4709_v28, %v341_v63 }
 0x46b   : > { %v292_v20 = vadd.f32 %v291_v18, %v286_v15  ;;  %v456_v15 = vadd.f32 %v455_v2, %v454_v1 }
 0x46d   : > { %305 = vperm.xlu2 %3729, %v292_v20   ;;  %300 = vperm.xlu0 %3728, %v292_v20  }
 0x46e   : > { %295 = vperm.xlu1 %3727, %v292_v20  }
 0x475   : > { %3732 = vset.pattern.permute.xlu2 %v4450_v50  ;;  %3733 = vset.pattern.permute.xlu0 %v4449_v49 }
 0x476   : > { %3730 = vset.pattern.permute.xlu1 %v4451_v55 }
 0x477   : > { %310 = vperm.xlu1 %3730, %v292_v20  }
 0x47f   : > { %3731 = vset.pattern.permute.xlu1 %v4448_v48 }
 0x4c7   : > { %v306_v23 = vpop.permute.xlu2 %305 }
 0x4c8   : > { %v308_v30 = vmul.f32 %v306_v23, %v4547_v9 }
 0x4df   : > { %v301_v21 = vpop.permute.xlu0 %300 }
 0x4e0   : > { %v296_v22 = vpop.permute.xlu1 %295  ;;  %v303_v26 = vmul.f32 %v301_v21, %v4549_v10 }
 0x4e1   : > { %v298_v27 = vmul.f32 %v296_v22, %v4545_v8 }
 0x4e2   : > { %v315_v29 = vadd.f32 %v308_v30, %v303_v26 }
 0x4e3   : > { %v314_v32 = vadd.f32 %v4554_v11, %v298_v27 }
 0x4e5   : > { %v316_v33 = vadd.f32 %v315_v29, %v314_v32 }
 0x4e9   : > { %v311_v50 = vpop.permute.xlu1 %310 }
 0x4ea   : > { %v313_v49 = vmul.f32 %v311_v50, %v4557_v13 }
 0x4ec   : > { %v317_v35 = vadd.f32 %v316_v33, %v313_v49 }
 0x4ee   : > { %3744 = vtanh.f32 %v317_v35 }
 0x4f4   : > { %v3745_v36 = vpop.eup %3744 }
 0x4f5   : > { %v327_v37 = vmul.f32 %v3745_v36, %v4566_v24  ;;  %v323_v38 = vmul.f32 %v3745_v36, %v4578_v31  ;;  %v319_v39 = vmul.f32 %v3745_v36, %v4568_v25  ;;  %v331_v44 = vmul.f32 %v3745_v36, %v4593_v34 }
 0x4f7   : > { %v328_v41 = vsel %vm88_vm1, %v327_v37, 0.0  ;;  %v324_v42 = vsel %vm88_vm1, %v323_v38, 0.0  ;;  %v320_v43 = vsel %vm88_vm1, %v319_v39, 0.0  ;;  %v332_v46 = vsel %vm88_vm1, %v331_v44, 0.0 }
 0x4f8   : > { %329 = vadd.xlane.f32.xlu0 %v328_v41  ;;  %325 = vadd.xlane.f32.xlu1 %v324_v42 }
 0x4f9   : > { %321 = vadd.xlane.f32.xlu2 %v320_v43 }
 0x501   : > { %333 = vadd.xlane.f32.xlu2 %v332_v46 }
 0x56b   : > { %v326_v53 = vpop.xlane.xlu1 %325  ;;  %v330_v54 = vpop.xlane.xlu0 %329 }
 0x56c   : > { %v322_v47 = vpop.xlane.xlu2 %321 }
 0x56d   : > { %v335_v56 = vsel %vm104_vm2, %v322_v47, %v326_v53  ;;  %v397_v53 = vmul.f32 0.091145836, %v4653_v52 }
 0x56e   : > { %v336_v57 = vsel %vm106_vm3, %v335_v56, %v330_v54 }
 0x574   : > { %v334_v58 = vpop.xlane.xlu2 %333 }
 0x575   : > { %v337_v60 = vsel %vm108_vm4, %v336_v57, %v334_v58  ;;  %v398_v58 = vadd.f32 %v4240_v0, %v397_v53 }
 0x576   : > { %v338_v61 = vadd.f32 %v4601_v40, %v337_v60 }
 0x577   : > { %v402_v63 = vadd.f32 %v4736_v19, %v398_v58 }
 0x578   : > { %v339_v62 = vmul.f32 %v338_v61, %v4649_v51 }
 0x57a   : > { %v347_v4 = vmul.f32 -0.27353132, %v339_v62  ;;  %v458_v5 = vmul.f32 -0.0508638, %v339_v62  ;;  %v403_v60 = vmul.f32 -0.3223762, %v339_v62 }
 0x57c   : > { %v348_v12 = vadd.f32 %v347_v4, %v346_v3  ;;  %v459_v17 = vadd.f32 %v458_v5, %v457_v6 }
 0x57e   : > { %v349_v18 = vadd.f32 %v348_v12, %v345_v14  ;;  %v4765_v20 = vadd.f32 %v459_v17, %v456_v15 }
 0x580   : > { %362 = vperm.xlu0 %3733, %v349_v18   ;;  %357 = vperm.xlu2 %3732, %v349_v18  }
 0x581   : > { %352 = vperm.xlu1 %3731, %v349_v18  }
 0x589   : > { %3734 = vset.pattern.permute.xlu1 %v4451_v55 }
 0x58a   : > { %367 = vperm.xlu1 %3734, %v349_v18  }
 0x592   : > { %3735 = vset.pattern.permute.xlu1 %v4448_v48 }
 0x5da   : > { %v358_v22 = vpop.permute.xlu2 %357 }
 0x5db   : > { %v360_v23 = vmul.f32 %v358_v22, %v4549_v10 }
 0x5f2   : > { %v363_v16 = vpop.permute.xlu0 %362 }
 0x5f3   : > { %v353_v21 = vpop.permute.xlu1 %352  ;;  %v365_v7 = vmul.f32 %v363_v16, %v4547_v9 }
 0x5f4   : > { %v355_v28 = vmul.f32 %v353_v21, %v4545_v8 }
 0x5f5   : > { %v372_v26 = vadd.f32 %v365_v7, %v360_v23 }
 0x5f6   : > { %v371_v27 = vadd.f32 %v4554_v11, %v355_v28 }
 0x5f8   : > { %v373_v29 = vadd.f32 %v372_v26, %v371_v27 }
 0x5fc   : > { %v368_v30 = vpop.permute.xlu1 %367 }
 0x5fd   : > { %v370_v32 = vmul.f32 %v368_v30, %v4557_v13  ;;  %v465_v30 = vand.u32 2147483647, %v4240_v0 }
 0x5ff   : > { %v374_v50 = vadd.f32 %v373_v29, %v370_v32 }
 0x601   : > { %3746 = vtanh.f32 %v374_v50 }
 0x607   : > { %v3747_v33 = vpop.eup %3746 }
 0x608   : > { %v384_v48 = vmul.f32 %v3747_v33, %v4566_v24  ;;  %v380_v49 = vmul.f32 %v3747_v33, %v4578_v31  ;;  %v376_v35 = vmul.f32 %v3747_v33, %v4568_v25  ;;  %v388_v39 = vmul.f32 %v3747_v33, %v4593_v34 }
 0x60a   : > { %v385_v36 = vsel %vm88_vm1, %v384_v48, 0.0  ;;  %v381_v37 = vsel %vm88_vm1, %v380_v49, 0.0  ;;  %v377_v38 = vsel %vm88_vm1, %v376_v35, 0.0  ;;  %v389_v41 = vsel %vm88_vm1, %v388_v39, 0.0 }
 0x60b   : > { %386 = vadd.xlane.f32.xlu0 %v385_v36  ;;  %382 = vadd.xlane.f32.xlu1 %v381_v37 }
 0x60c   : > { %378 = vadd.xlane.f32.xlu2 %v377_v38 }
 0x614   : > { %390 = vadd.xlane.f32.xlu2 %v389_v41 }
 0x67e   : > { %v383_v43 = vpop.xlane.xlu1 %382  ;;  %v387_v44 = vpop.xlane.xlu0 %386 }
 0x67f   : > { %v379_v42 = vpop.xlane.xlu2 %378 }
 0x680   : > { %v392_v46 = vsel %vm104_vm2, %v379_v42, %v383_v43 }
 0x681   : > { %v393_v47 = vsel %vm106_vm3, %v392_v46, %v387_v44 }
 0x687   : > { %v391_v54 = vpop.xlane.xlu2 %390 }
 0x688   : > { %v394_v56 = vsel %vm108_vm4, %v393_v47, %v391_v54 }
 0x689   : > { %v395_v57 = vadd.f32 %v4601_v40, %v394_v56 }
 0x68b   : > { %v396_v59 = vmul.f32 %v395_v57, %v4649_v51 }
 0x68d   : > { %v404_v61 = vmul.f32 0.13095239, %v396_v59  ;;  %v461_v56 = vmul.f32 0.041904762, %v396_v59 }
 0x68f   : > { %v405_v1 = vadd.f32 %v404_v61, %v403_v60 }
 0x691   : > { %v4790_v2 = vadd.f32 %v405_v1, %v402_v63 }
 0x693   : > { %419 = vperm.xlu0 %3733, %v4790_v2   ;;  %414 = vperm.xlu2 %3732, %v4790_v2   ;;  %v466_v29 = vand.u32 2147483647, %v4790_v2 }
 0x694   : > { %409 = vperm.xlu1 %3735, %v4790_v2  }
 0x695   : > { %v467_v32 = vmax.f32 %v465_v30, %v466_v29 }
 0x697   : > { %v468_v50 = vmul.f32 1e-06, %v467_v32 }
 0x699   : > { %v469_v33 = vadd.f32 1e-07, %v468_v50 }
 0x69b   : > { %3737 = vset.pattern.permute.xlu0 %v4451_v55  ;;  %v481_v54 = vand.u32 2147483648, %v469_v33  ;;  %vm475_vm6 = vweird.f32 %v469_v33  ;;  %v479_v58 = vand.u32 2147483647, %v469_v33 }
 0x69c   : > { %3736 = vset.pattern.permute.xlu1 %v4451_v55 }
 0x69d   : > { %424 = vperm.xlu1 %3736, %v4790_v2   ;;  %v482_v63 = vor.u32 1.1754944e-38, %v481_v54  ;;  %vm480_vm8 = vcmp.eq.f32.partialorder %v479_v58, 8.507059e+37 }
 0x6ed   : > { %v415_v3 = vpop.permute.xlu2 %414 }
 0x6ee   : > { %v417_v5 = vmul.f32 %v415_v3, %v4549_v10 }
 0x705   : > { %v420_v52 = vpop.permute.xlu0 %419 }
 0x706   : > { %v410_v62 = vpop.permute.xlu1 %409  ;;  %v422_v19 = vmul.f32 %v420_v52, %v4547_v9 }
 0x707   : > { %v412_v4 = vmul.f32 %v410_v62, %v4545_v8 }
 0x708   : > { %v429_v6 = vadd.f32 %v422_v19, %v417_v5 }
 0x709   : > { %v428_v12 = vadd.f32 %v4554_v11, %v412_v4 }
 0x70b   : > { %v430_v15 = vadd.f32 %v429_v6, %v428_v12 }
 0x70f   : > { %v425_v14 = vpop.permute.xlu1 %424 }
 0x710   : > { %v427_v17 = vmul.f32 %v425_v14, %v4557_v13 }
 0x712   : > { %v431_v18 = vadd.f32 %v430_v15, %v427_v17 }
 0x714   : > { %3748 = vtanh.f32 %v431_v18 }
 0x715   : > { %3750 = vrcp.f32 %v469_v33 }
 0x71a   : > { %v3749_v55 = vpop.eup %3748 }
 0x71b   : > { %v441_v16 = vmul.f32 %v3749_v55, %v4566_v24  ;;  %v437_v21 = vmul.f32 %v3749_v55, %v4578_v31  ;;  %v433_v22 = vmul.f32 %v3749_v55, %v4568_v25  ;;  %v445_v26 = vmul.f32 %v3749_v55, %v4593_v34  ;;  %v3751_v48 = vpop.eup %3750 }
 0x71c   : > { %v471_v35 = vmul.f32 %v3751_v48, %v469_v33  ;;  %vm476_vm5 = vweird.f32 %v3751_v48 }
 0x71d   : > { %v442_v7 = vsel %vm88_vm1, %v441_v16, 0.0  ;;  %v438_v28 = vsel %vm88_vm1, %v437_v21, 0.0  ;;  %v434_v23 = vsel %vm88_vm1, %v433_v22, 0.0  ;;  %v446_v27 = vsel %vm88_vm1, %v445_v26, 0.0  ;;  %vm477_vm7 = vmor %vm475_vm6, %vm476_vm5 }
 0x71e   : > { %443 = vadd.xlane.f32.xlu0 %v442_v7  ;;  %439 = vadd.xlane.f32.xlu1 %v438_v28  ;;  %v472_v37 = vsub.f32 1.0, %v471_v35 }
 0x71f   : > { %435 = vadd.xlane.f32.xlu2 %v434_v23 }
 0x720   : > { %v473_v43 = vmul.f32 %v3751_v48, %v472_v37 }
 0x722   : > { %v474_v53 = vadd.f32 %v3751_v48, %v473_v43 }
 0x724   : > { %v478_v61 = vsel %vm477_vm7, %v3751_v48, %v474_v53 }
 0x725   : > { %v483_v52 = vsel %vm480_vm8, %v482_v63, %v478_v61 }
 0x727   : > { %447 = vadd.xlane.f32.xlu2 %v446_v27 }
 0x791   : > { %v440_v36 = vpop.xlane.xlu1 %439  ;;  %v444_v38 = vpop.xlane.xlu0 %443 }
 0x792   : > { %v436_v49 = vpop.xlane.xlu2 %435 }
 0x793   : > { %v449_v39 = vsel %vm104_vm2, %v436_v49, %v440_v36 }
 0x794   : > { %v450_v41 = vsel %vm106_vm3, %v449_v39, %v444_v38 }
 0x79a   : > { %v448_v42 = vpop.xlane.xlu2 %447 }
 0x79b   : > { %v451_v44 = vsel %vm108_vm4, %v450_v41, %v448_v42 }
 0x79c   : > { %v452_v46 = vadd.f32 %v4601_v40, %v451_v44 }
 0x79e   : > { %v453_v47 = vmul.f32 %v452_v46, %v4649_v51 }
 0x7a0   : > { %v462_v57 = vmul.f32 -0.025, %v453_v47 }
 0x7a2   : > { %v463_v60 = vadd.f32 %v462_v57, %v461_v56 }
 0x7a4   : > { %v464_v1 = vadd.f32 %v463_v60, %v4765_v20 }
 0x7a6   : > { %v484_v62 = vmul.f32 %v483_v52, %v464_v1 }
 0x7a8   : > { %v485_v3 = vmul.f32 %v484_v62, %v484_v62 }
 0x7aa   : > { %v486_v51 = vsel %vm55_vm0, %v485_v3, 0.0 }
 0x7ab   : > { %487 = vadd.xlane.f32.xlu2 %v486_v51 }
 0x81e   : > { %v488_v19 = vpop.xlane.xlu2 %487 }
 0x81f   : > { %v489_v4 = vrot.slane %v488_v19, 4 }
 0x821   : > { %v490_v59 = vadd.f32 %v489_v4, %v488_v19 }
 0x823   : > { %v491_v5 = vrot.slane %v490_v59, 2 }
 0x825   : > { %v492_v6 = vadd.f32 %v491_v5, %v490_v59 }
 0x827   : > { %v493_v12 = vrot.slane %v492_v6, 1 }
 0x829   : > { %v494_v14 = vadd.f32 %v493_v12, %v492_v6 }
 0x82b   : > { %3185 = vpush %v494_v14 }
 0x85c   : > { %s3186_s21 = spop %3185 }
 0x85d   : > { %v496_v20 = vstv %s3186_s21 }
 0x85e   : > { %v497_v15 = vmul.f32 0.03125, %v496_v20 }
 0x860   : > { %v498_v17 = vadd.f32 1e-24, %v497_v15  ;;  %3187 = vpush %v497_v15 }
 0x862   : > { %3752 = vlog2.f32 %v498_v17 }
 0x868   : > { %v3753_v18 = vpop.eup %3752 }
 0x869   : > { %v500_v55 = vmul.f32 0.6931472, %v3753_v18 }
 0x86b   : > { %v501_v16 = vmul.f32 -0.1, %v500_v55 }
 0x86d   : > { %v502_v21 = vmul.f32 1.442695, %v501_v16 }
 0x86f   : > { %3754 = vpow2.f32 %v502_v21 }
 0x875   : > { %v3755_v22 = vpop.eup %3754 }
 0x876   : > { %v504_v7 = vmul.f32 0.9, %v3755_v22 }
 0x878   : > { %3189 = vpush %v504_v7 }
 0x891   : > { %s3188_s23 = spop %3187 }
 0x892   : > { %p509_p1 = scmp.le.f32.partialorder %s3188_s23, 1.0 }
 0x894   : > { %s6508_s22 = smov (!%p509_p1, %s510_s22), %s4244_s8 }
 0x895   : > { %s512_s24 = scalar_select %p509_p1, 1, 0 }
 0x896   : > { %s121_s2 = ssub.f32 %s4570_s7, %s6508_s22  ;;  %s6441_s8 = smov %s6508_s22 }
 0x897   : > { %v513_v28 = vstv %s512_s24 }
 0x898   : > { %vm514_vm9 = vcmp.eq.s32.totalorder %v513_v28, 1  ;;  %p122_p3 = scmp.gt.f32.partialorder %s121_s2, %s113_s13 }
 0x899   : > { %v515_v23 = vsel %vm514_vm9, %v4790_v2, %v4240_v0   ;;  %v516_v26 = vsel %vm514_vm9, %v452_v46, %v4232_v45  }
 0x89a   : > { %p124_p4 = pnand %p123_p2, %p122_p3  ;;  %v6438_v45 = vmov %v516_v26  ;;  %v6440_v0 = vmov %v515_v23 }
 0x89b   :  { %v6442_v46 = vmov (%p124_p4), %v516_v26  ;;  %v6444_v47 = vmov (%p124_p4), %v515_v23 }
 0x8a9   : > { %s3190_s25 = spop %3189 }
 0x8aa   : > { %s507_s27 = smax.f32 %s4452_s26, %s3190_s25 }
 0x8ab   : > { %s508_s1 = smin.f32 %s4453_s0, %s507_s27  ;;  %127 = sbr.rel (!%p124_p4) target bundleno = 286 (0x11e), region = 104 }
 0x8ac   : > { %s517_s29 = smul.f32 %s508_s1, %s4646_s19 }
 0x8ae   : > { %s519_s30 = smax.f32 %s518_s28, %s517_s29  }
 0x8af   : > { %s6439_s14 = smov %s519_s30  ;;  %s6443_s17 = smov (%p124_p4), %s519_s30 }
 0x8b0 PF:  { %3160 = vst.msk [vmem:[%s6433_s6 + $0x8] sm:$0xff] %vm55_vm0, %v4256_v47  ;;  %s3161_s9 = sld [smem:[#allocation2 + $0x1]]   ;;  %v6445_v0 = vmov %v4248_v46  ;;  %v6447_v45 = vmov %v4256_v47  ;;  %v4256_v47 = vphi %v6436_v47, %v6444_v47   ;;  %s4252_s17 = sphi %s6435_s17, %s6443_s17   ;;  %v4248_v46 = vphi %v6434_v46, %v6442_v46  }
 0x8b1   :  { %s4859_s7 = sld [smem:[#allocation2 + $0x2]] }
 0x8b7   :  { %s4862_s4 = ssub.f32 %s4859_s7, %s3161_s9  ;;  %s526_s10 = sand.u32 2147483647, %s4859_s7 }
 0x8b8   :  { %s4866_s12 = smax.f32 %s4447_s11, %s526_s10 }
 0x8b9   :  { %s528_s13 = smul.f32 1e-10, %s4866_s12  ;;  %s529_s14 = smin.f32 %s4252_s17, %s4862_s4  }
 0x8ba   :  { %s6446_s15 = smov %s529_s14 }
 0x8bb   :  { %p3044_p5 = scmp.gt.f32.partialorder %s4862_s4, %s528_s13 }
 0x8bc   :  { %s4879_s16 = smov (%p3044_p5), 0  }
 0x8bd   :  { %3047 = sbr.rel (!%p3044_p5) target bundleno = 4180 (0x1054), region = 109 }
 0x8c2 LB: > { %v4454_v2 = vmov 0   ;;  %v4455_v27 = vmov 2   ;;  %s543_s17 = ssub.f32 %s4859_s7, %s4276_s9  ;;  %v4456_v30 = vmov 1   ;;  %v4457_v48 = vmov 3   ;;  %s935_s18 = sadd.s32 1, %s4260_s16   ;;  %s4276_s9 = sphi %s3161_s9, %s6452_s9   ;;  %v4272_v47 = vphi %v4256_v47, %v6451_v47   ;;  %s4268_s14 = sphi %s529_s14, %s6450_s14   ;;  %v4264_v46 = vphi %v4248_v46, %v6449_v46   ;;  %s4260_s16 = sphi %s4879_s16, %s6448_s16  }
 0x8c3   : > { %3756 = vset.pattern.permute.xlu0 %v4454_v2  ;;  %3758 = vset.pattern.permute.xlu1 %v4455_v27  ;;  %s4458_s24 = smov 0.2   ;;  %s933_s26 = smul.f32 1e-06, %s4862_s4 }
 0x8c4   : > { %3761 = vset.pattern.permute.xlu2 %v4456_v30  ;;  %s4907_s5 = smin.f32 %s4268_s14, %s543_s17  ;;  %s4459_s27 = smov 10.0  }
 0x8c5   : > { %v4910_v29 = vstv %s4907_s5  ;;  %s925_s20 = sadd.f32 %s4276_s9, %s4907_s5  ;;  %p538_p7 = scmp.lt.s32.totalorder %s935_s18, 1000 }
 0x8c6   : > { %v4914_v32 = vmul.f32 %v4264_v46, %v4910_v29  ;;  %s6448_s16 = smov %s935_s18 }
 0x8c8   : > { %v547_v50 = vmul.f32 0.2, %v4914_v32  ;;  %v596_v20 = vmul.f32 0.075, %v4914_v32 }
 0x8ca   : > { %v548_v33 = vadd.f32 %v4272_v47, %v547_v50 }
 0x8cc   : > { %551 = vperm.xlu0 %3756, %v548_v33   ;;  %561 = vperm.xlu1 %3758, %v548_v33  }
 0x8d4   : > { %3757 = vset.pattern.permute.xlu0 %v4456_v30  ;;  %3759 = vset.pattern.permute.xlu1 %v4457_v48 }
 0x8d5   : > { %556 = vperm.xlu0 %3757, %v548_v33   ;;  %566 = vperm.xlu1 %3759, %v548_v33  }
 0x8dd   : > { %3760 = vset.pattern.permute.xlu0 %v4454_v2  ;;  %3764 = vset.pattern.permute.xlu1 %v4454_v2 }
 0x93e   : > { %v552_v49 = vpop.permute.xlu0 %551  ;;  %v562_v35 = vpop.permute.xlu1 %561 }
 0x93f   : > { %v554_v36 = vmul.f32 %v552_v49, %v4545_v8  ;;  %v564_v39 = vmul.f32 %v562_v35, %v4547_v9 }
 0x941   : > { %v570_v42 = vadd.f32 %v4554_v11, %v554_v36 }
 0x947   : > { %v557_v37 = vpop.permute.xlu0 %556  ;;  %v567_v38 = vpop.permute.xlu1 %566 }
 0x948   : > { %v559_v41 = vmul.f32 %v557_v37, %v4549_v10  ;;  %v569_v44 = vmul.f32 %v567_v38, %v4557_v13 }
 0x94a   : > { %v571_v43 = vadd.f32 %v564_v39, %v559_v41 }
 0x94c   : > { %v572_v53 = vadd.f32 %v571_v43, %v570_v42 }
 0x94e   : > { %v573_v54 = vadd.f32 %v572_v53, %v569_v44 }
 0x950   : > { %3778 = vtanh.f32 %v573_v54 }
 0x956   : > { %v3779_v56 = vpop.eup %3778 }
 0x957   : > { %v583_v57 = vmul.f32 %v3779_v56, %v4566_v24  ;;  %v575_v58 = vmul.f32 %v3779_v56, %v4568_v25  ;;  %v579_v63 = vmul.f32 %v3779_v56, %v4578_v31  ;;  %v587_v52 = vmul.f32 %v3779_v56, %v4593_v34 }
 0x959   : > { %v584_v60 = vsel %vm88_vm1, %v583_v57, 0.0  ;;  %v576_v61 = vsel %vm88_vm1, %v575_v58, 0.0  ;;  %v580_v1 = vsel %vm88_vm1, %v579_v63, 0.0  ;;  %v588_v62 = vsel %vm88_vm1, %v587_v52, 0.0 }
 0x95a   : > { %585 = vadd.xlane.f32.xlu1 %v584_v60  ;;  %577 = vadd.xlane.f32.xlu2 %v576_v61  ;;  %v647_v63 = vmul.f32 0.9777778, %v4914_v32 }
 0x962   : > { %581 = vadd.xlane.f32.xlu2 %v580_v1 }
 0x96a   : > { %589 = vadd.xlane.f32.xlu2 %v588_v62 }
 0x9cd   : > { %v578_v3 = vpop.xlane.xlu2 %577  ;;  %v586_v4 = vpop.xlane.xlu1 %585 }
 0x9d5   : > { %v582_v51 = vpop.xlane.xlu2 %581 }
 0x9d6   : > { %v591_v19 = vsel %vm104_vm2, %v578_v3, %v582_v51  ;;  %v648_v51 = vadd.f32 %v4272_v47, %v647_v63 }
 0x9d7   : > { %v592_v59 = vsel %vm106_vm3, %v591_v19, %v586_v4 }
 0x9dd   : > { %v590_v5 = vpop.xlane.xlu2 %589 }
 0x9de   : > { %v593_v6 = vsel %vm108_vm4, %v592_v59, %v590_v5 }
 0x9df   : > { %v594_v12 = vadd.f32 %v4601_v40, %v593_v6 }
 0x9e1   : > { %v595_v14 = vmul.f32 %v594_v12, %v4910_v29 }
 0x9e3   : > { %v597_v15 = vmul.f32 0.225, %v595_v14  ;;  %v649_v52 = vmul.f32 -3.7333333, %v595_v14  ;;  %v702_v62 = vmul.f32 -11.595794, %v595_v14 }
 0x9e4   : > { %v757_v3 = vmul.f32 -10.757576, %v595_v14 }
 0x9e5   : > { %v598_v17 = vadd.f32 %v597_v15, %v596_v20 }
 0x9e7   : > { %v599_v18 = vadd.f32 %v4272_v47, %v598_v17 }
 0x9e9   : > { %607 = vperm.xlu2 %3761, %v599_v18   ;;  %602 = vperm.xlu0 %3760, %v599_v18  }
 0x9f1   : > { %3763 = vset.pattern.permute.xlu2 %v4457_v48  ;;  %3762 = vset.pattern.permute.xlu0 %v4455_v27 }
 0x9f2   : > { %617 = vperm.xlu2 %3763, %v599_v18   ;;  %612 = vperm.xlu0 %3762, %v599_v18  }
 0x9fa   : > { %3765 = vset.pattern.permute.xlu2 %v4456_v30 }
 0xa43   : > { %v608_v16 = vpop.permute.xlu2 %607 }
 0xa44   : > { %v610_v7 = vmul.f32 %v608_v16, %v4549_v10 }
 0xa4c   : > { %v618_v23 = vpop.permute.xlu2 %617 }
 0xa4d   : > { %v620_v45 = vmul.f32 %v618_v23, %v4557_v13 }
 0xa5b   : > { %v603_v55 = vpop.permute.xlu0 %602 }
 0xa5c   : > { %v605_v21 = vmul.f32 %v603_v55, %v4545_v8 }
 0xa5e   : > { %v621_v26 = vadd.f32 %v4554_v11, %v605_v21 }
 0xa64   : > { %v613_v22 = vpop.permute.xlu0 %612 }
 0xa65   : > { %v615_v28 = vmul.f32 %v613_v22, %v4547_v9 }
 0xa67   : > { %v622_v0 = vadd.f32 %v615_v28, %v610_v7 }
 0xa69   : > { %v623_v50 = vadd.f32 %v622_v0, %v621_v26 }
 0xa6b   : > { %v624_v33 = vadd.f32 %v623_v50, %v620_v45 }
 0xa6d   : > { %3780 = vtanh.f32 %v624_v33 }
 0xa73   : > { %v3781_v49 = vpop.eup %3780 }
 0xa74   : > { %v634_v35 = vmul.f32 %v3781_v49, %v4566_v24  ;;  %v630_v36 = vmul.f32 %v3781_v49, %v4578_v31  ;;  %v626_v37 = vmul.f32 %v3781_v49, %v4568_v25  ;;  %v638_v42 = vmul.f32 %v3781_v49, %v4593_v34 }
 0xa76   : > { %v635_v38 = vsel %vm88_vm1, %v634_v35, 0.0  ;;  %v631_v39 = vsel %vm88_vm1, %v630_v36, 0.0  ;;  %v627_v41 = vsel %vm88_vm1, %v626_v37, 0.0  ;;  %v639_v43 = vsel %vm88_vm1, %v638_v42, 0.0 }
 0xa77   : > { %636 = vadd.xlane.f32.xlu1 %v635_v38  ;;  %632 = vadd.xlane.f32.xlu2 %v631_v39 }
 0xa78   : > { %628 = vadd.xlane.f32.xlu0 %v627_v41 }
 0xa7f   : > { %640 = vadd.xlane.f32.xlu1 %v639_v43 }
 0xaea   : > { %v637_v44 = vpop.xlane.xlu1 %636  ;;  %v633_v53 = vpop.xlane.xlu2 %632 }
 0xaeb   : > { %v629_v54 = vpop.xlane.xlu0 %628 }
 0xaec   : > { %v642_v56 = vsel %vm104_vm2, %v629_v54, %v633_v53 }
 0xaed   : > { %v643_v58 = vsel %vm106_vm3, %v642_v56, %v637_v44 }
 0xaf2   : > { %v641_v57 = vpop.xlane.xlu1 %640 }
 0xaf3   : > { %v644_v60 = vsel %vm108_vm4, %v643_v58, %v641_v57  ;;  %v700_v57 = vmul.f32 2.9525986, %v4914_v32 }
 0xaf4   : > { %v645_v61 = vadd.f32 %v4601_v40, %v644_v60 }
 0xaf5   : > { %v701_v63 = vadd.f32 %v4272_v47, %v700_v57 }
 0xaf6   : > { %v4964_v1 = vmul.f32 %v645_v61, %v4910_v29 }
 0xaf8   : > { %v650_v19 = vmul.f32 3.5555556, %v4964_v1  ;;  %v703_v4 = vmul.f32 9.822893, %v4964_v1  ;;  %v758_v59 = vmul.f32 8.906423, %v4964_v1 }
 0xafa   : > { %v651_v5 = vadd.f32 %v650_v19, %v649_v52  ;;  %v704_v6 = vadd.f32 %v703_v4, %v702_v62  ;;  %v4970_v12 = vadd.f32 %v758_v59, %v757_v3  ;;  %v814_v52 = vmul.f32 0.4492363, %v4964_v1 }
 0xafc   : > { %v652_v20 = vadd.f32 %v651_v5, %v648_v51 }
 0xafe   : > { %665 = vperm.xlu0 %3762, %v652_v20   ;;  %660 = vperm.xlu2 %3765, %v652_v20  }
 0xaff   : > { %655 = vperm.xlu1 %3764, %v652_v20  }
 0xb06   : > { %3768 = vset.pattern.permute.xlu0 %v4456_v30  ;;  %3769 = vset.pattern.permute.xlu2 %v4455_v27 }
 0xb07   : > { %3766 = vset.pattern.permute.xlu1 %v4457_v48 }
 0xb08   : > { %670 = vperm.xlu1 %3766, %v652_v20  }
 0xb10   : > { %3767 = vset.pattern.permute.xlu1 %v4454_v2 }
 0xb58   : > { %v661_v17 = vpop.permute.xlu2 %660 }
 0xb59   : > { %v663_v16 = vmul.f32 %v661_v17, %v4549_v10 }
 0xb70   : > { %v666_v14 = vpop.permute.xlu0 %665 }
 0xb71   : > { %v656_v15 = vpop.permute.xlu1 %655  ;;  %v668_v18 = vmul.f32 %v666_v14, %v4547_v9 }
 0xb72   : > { %v658_v55 = vmul.f32 %v656_v15, %v4545_v8 }
 0xb73   : > { %v675_v21 = vadd.f32 %v668_v18, %v663_v16 }
 0xb74   : > { %v674_v22 = vadd.f32 %v4554_v11, %v658_v55 }
 0xb76   : > { %v676_v28 = vadd.f32 %v675_v21, %v674_v22 }
 0xb7a   : > { %v671_v7 = vpop.permute.xlu1 %670 }
 0xb7b   : > { %v673_v23 = vmul.f32 %v671_v7, %v4557_v13 }
 0xb7d   : > { %v677_v26 = vadd.f32 %v676_v28, %v673_v23 }
 0xb7f   : > { %3782 = vtanh.f32 %v677_v26 }
 0xb85   : > { %v3783_v0 = vpop.eup %3782 }
 0xb86   : > { %v687_v45 = vmul.f32 %v3783_v0, %v4566_v24  ;;  %v683_v50 = vmul.f32 %v3783_v0, %v4578_v31  ;;  %v679_v33 = vmul.f32 %v3783_v0, %v4568_v25  ;;  %v691_v37 = vmul.f32 %v3783_v0, %v4593_v34 }
 0xb88   : > { %v688_v49 = vsel %vm88_vm1, %v687_v45, 0.0  ;;  %v684_v35 = vsel %vm88_vm1, %v683_v50, 0.0  ;;  %v680_v36 = vsel %vm88_vm1, %v679_v33, 0.0  ;;  %v692_v38 = vsel %vm88_vm1, %v691_v37, 0.0 }
 0xb89   : > { %689 = vadd.xlane.f32.xlu2 %v688_v49  ;;  %685 = vadd.xlane.f32.xlu0 %v684_v35  ;;  %v755_v37 = vmul.f32 2.8462753, %v4914_v32 }
 0xb8a   : > { %681 = vadd.xlane.f32.xlu1 %v680_v36 }
 0xb92   : > { %693 = vadd.xlane.f32.xlu1 %v692_v38 }
 0xbfc   : > { %v686_v41 = vpop.xlane.xlu0 %685  ;;  %v690_v42 = vpop.xlane.xlu2 %689 }
 0xbfd   : > { %v682_v39 = vpop.xlane.xlu1 %681 }
 0xbfe   : > { %v695_v43 = vsel %vm104_vm2, %v682_v39, %v686_v41 }
 0xbff   : > { %v696_v44 = vsel %vm106_vm3, %v695_v43, %v690_v42  ;;  %v756_v42 = vadd.f32 %v4272_v47, %v755_v37  ;;  %v869_v43 = vmul.f32 0.0012326388, %v4914_v32 }
 0xc05   : > { %v694_v53 = vpop.xlane.xlu1 %693 }
 0xc06   : > { %v697_v54 = vsel %vm108_vm4, %v696_v44, %v694_v53  ;;  %v870_v44 = vmul.f32 -0.0042527704, %v4964_v1 }
 0xc07   : > { %v698_v56 = vadd.f32 %v4601_v40, %v697_v54 }
 0xc09   : > { %v699_v58 = vmul.f32 %v698_v56, %v4910_v29 }
 0xc0b   : > { %v705_v60 = vmul.f32 -0.29080933, %v699_v58  ;;  %v815_v61 = vmul.f32 0.6510417, %v699_v58  ;;  %v761_v53 = vmul.f32 0.2784091, %v699_v58 }
 0xc0c   : > { %v872_v57 = vmul.f32 0.036979165, %v699_v58 }
 0xc0d   : > { %v706_v62 = vadd.f32 %v705_v60, %v704_v6  ;;  %v4997_v3 = vadd.f32 %v815_v61, %v814_v52  ;;  %v760_v61 = vadd.f32 %v4970_v12, %v756_v42 }
 0xc0f   : > { %v707_v51 = vadd.f32 %v706_v62, %v701_v63  ;;  %v871_v63 = vadd.f32 %v870_v44, %v869_v43 }
 0xc11   : > { %720 = vperm.xlu2 %3769, %v707_v51   ;;  %715 = vperm.xlu0 %3768, %v707_v51  }
 0xc12   : > { %710 = vperm.xlu1 %3767, %v707_v51  }
 0xc19   : > { %3772 = vset.pattern.permute.xlu2 %v4456_v30  ;;  %3773 = vset.pattern.permute.xlu0 %v4455_v27 }
 0xc1a   : > { %3770 = vset.pattern.permute.xlu1 %v4457_v48 }
 0xc1b   : > { %725 = vperm.xlu1 %3770, %v707_v51  }
 0xc23   : > { %3771 = vset.pattern.permute.xlu1 %v4454_v2 }
 0xc6b   : > { %v721_v59 = vpop.permute.xlu2 %720 }
 0xc6c   : > { %v723_v20 = vmul.f32 %v721_v59, %v4547_v9 }
 0xc83   : > { %v716_v19 = vpop.permute.xlu0 %715 }
 0xc84   : > { %v711_v4 = vpop.permute.xlu1 %710  ;;  %v718_v5 = vmul.f32 %v716_v19, %v4549_v10 }
 0xc85   : > { %v713_v6 = vmul.f32 %v711_v4, %v4545_v8 }
 0xc86   : > { %v730_v14 = vadd.f32 %v723_v20, %v718_v5 }
 0xc87   : > { %v729_v15 = vadd.f32 %v4554_v11, %v713_v6 }
 0xc89   : > { %v731_v17 = vadd.f32 %v730_v14, %v729_v15 }
 0xc8d   : > { %v726_v30 = vpop.permute.xlu1 %725 }
 0xc8e   : > { %v728_v27 = vmul.f32 %v726_v30, %v4557_v13 }
 0xc90   : > { %v732_v18 = vadd.f32 %v731_v17, %v728_v27 }
 0xc92   : > { %3784 = vtanh.f32 %v732_v18 }
 0xc98   : > { %v3785_v55 = vpop.eup %3784 }
 0xc99   : > { %v742_v16 = vmul.f32 %v3785_v55, %v4566_v24  ;;  %v738_v21 = vmul.f32 %v3785_v55, %v4578_v31  ;;  %v734_v22 = vmul.f32 %v3785_v55, %v4568_v25  ;;  %v746_v26 = vmul.f32 %v3785_v55, %v4593_v34 }
 0xc9b   : > { %v743_v7 = vsel %vm88_vm1, %v742_v16, 0.0  ;;  %v739_v28 = vsel %vm88_vm1, %v738_v21, 0.0  ;;  %v735_v23 = vsel %vm88_vm1, %v734_v22, 0.0  ;;  %v747_v0 = vsel %vm88_vm1, %v746_v26, 0.0 }
 0xc9c   : > { %744 = vadd.xlane.f32.xlu0 %v743_v7  ;;  %740 = vadd.xlane.f32.xlu1 %v739_v28 }
 0xc9d   : > { %736 = vadd.xlane.f32.xlu2 %v735_v23 }
 0xca5   : > { %748 = vadd.xlane.f32.xlu2 %v747_v0 }
 0xd0f   : > { %v741_v50 = vpop.xlane.xlu1 %740  ;;  %v745_v33 = vpop.xlane.xlu0 %744 }
 0xd10   : > { %v737_v45 = vpop.xlane.xlu2 %736 }
 0xd11   : > { %v750_v49 = vsel %vm104_vm2, %v737_v45, %v741_v50  ;;  %v812_v50 = vmul.f32 0.091145836, %v4914_v32 }
 0xd12   : > { %v751_v35 = vsel %vm106_vm3, %v750_v49, %v745_v33 }
 0xd18   : > { %v749_v36 = vpop.xlane.xlu2 %748 }
 0xd19   : > { %v752_v38 = vsel %vm108_vm4, %v751_v35, %v749_v36  ;;  %v813_v36 = vadd.f32 %v4272_v47, %v812_v50 }
 0xd1a   : > { %v753_v39 = vadd.f32 %v4601_v40, %v752_v38 }
 0xd1b   : > { %v817_v42 = vadd.f32 %v4997_v3, %v813_v36 }
 0xd1c   : > { %v754_v41 = vmul.f32 %v753_v39, %v4910_v29 }
 0xd1e   : > { %v762_v54 = vmul.f32 -0.27353132, %v754_v41  ;;  %v873_v56 = vmul.f32 -0.0508638, %v754_v41  ;;  %v818_v38 = vmul.f32 -0.3223762, %v754_v41 }
 0xd20   : > { %v763_v60 = vadd.f32 %v762_v54, %v761_v53  ;;  %v874_v52 = vadd.f32 %v873_v56, %v872_v57 }
 0xd22   : > { %v764_v62 = vadd.f32 %v763_v60, %v760_v61  ;;  %v5026_v51 = vadd.f32 %v874_v52, %v871_v63 }
 0xd24   : > { %777 = vperm.xlu0 %3773, %v764_v62   ;;  %772 = vperm.xlu2 %3772, %v764_v62  }
 0xd25   : > { %767 = vperm.xlu1 %3771, %v764_v62  }
 0xd2d   : > { %3774 = vset.pattern.permute.xlu1 %v4457_v48 }
 0xd2e   : > { %782 = vperm.xlu1 %3774, %v764_v62  }
 0xd36   : > { %3775 = vset.pattern.permute.xlu1 %v4454_v2 }
 0xd7e   : > { %v773_v4 = vpop.permute.xlu2 %772 }
 0xd7f   : > { %v775_v59 = vmul.f32 %v773_v4, %v4549_v10 }
 0xd96   : > { %v778_v1 = vpop.permute.xlu0 %777 }
 0xd97   : > { %v768_v19 = vpop.permute.xlu1 %767  ;;  %v780_v58 = vmul.f32 %v778_v1, %v4547_v9 }
 0xd98   : > { %v770_v12 = vmul.f32 %v768_v19, %v4545_v8 }
 0xd99   : > { %v787_v5 = vadd.f32 %v780_v58, %v775_v59 }
 0xd9a   : > { %v786_v6 = vadd.f32 %v4554_v11, %v770_v12 }
 0xd9c   : > { %v788_v14 = vadd.f32 %v787_v5, %v786_v6 }
 0xda0   : > { %v783_v20 = vpop.permute.xlu1 %782 }
 0xda1   : > { %v785_v15 = vmul.f32 %v783_v20, %v4557_v13  ;;  %v880_v20 = vand.u32 2147483647, %v4272_v47 }
 0xda3   : > { %v789_v30 = vadd.f32 %v788_v14, %v785_v15 }
 0xda5   : > { %3786 = vtanh.f32 %v789_v30 }
 0xdab   : > { %v3787_v17 = vpop.eup %3786 }
 0xdac   : > { %v799_v2 = vmul.f32 %v3787_v17, %v4566_v24  ;;  %v795_v27 = vmul.f32 %v3787_v17, %v4578_v31  ;;  %v791_v18 = vmul.f32 %v3787_v17, %v4568_v25  ;;  %v803_v22 = vmul.f32 %v3787_v17, %v4593_v34 }
 0xdae   : > { %v800_v55 = vsel %vm88_vm1, %v799_v2, 0.0  ;;  %v796_v16 = vsel %vm88_vm1, %v795_v27, 0.0  ;;  %v792_v21 = vsel %vm88_vm1, %v791_v18, 0.0  ;;  %v804_v7 = vsel %vm88_vm1, %v803_v22, 0.0 }
 0xdaf   : > { %801 = vadd.xlane.f32.xlu0 %v800_v55  ;;  %797 = vadd.xlane.f32.xlu1 %v796_v16 }
 0xdb0   : > { %793 = vadd.xlane.f32.xlu2 %v792_v21 }
 0xdb8   : > { %805 = vadd.xlane.f32.xlu2 %v804_v7 }
 0xe22   : > { %v798_v23 = vpop.xlane.xlu1 %797  ;;  %v802_v26 = vpop.xlane.xlu0 %801 }
 0xe23   : > { %v794_v28 = vpop.xlane.xlu2 %793 }
 0xe24   : > { %v807_v0 = vsel %vm104_vm2, %v794_v28, %v798_v23 }
 0xe25   : > { %v808_v45 = vsel %vm106_vm3, %v807_v0, %v802_v26 }
 0xe2b   : > { %v806_v33 = vpop.xlane.xlu2 %805 }
 0xe2c   : > { %v809_v49 = vsel %vm108_vm4, %v808_v45, %v806_v33 }
 0xe2d   : > { %v810_v35 = vadd.f32 %v4601_v40, %v809_v49 }
 0xe2f   : > { %v811_v37 = vmul.f32 %v810_v35, %v4910_v29 }
 0xe31   : > { %v819_v39 = vmul.f32 0.13095239, %v811_v37  ;;  %v876_v49 = vmul.f32 0.041904762, %v811_v37 }
 0xe33   : > { %v820_v43 = vadd.f32 %v819_v39, %v818_v38 }
 0xe35   : > { %v5051_v44 = vadd.f32 %v820_v43, %v817_v42 }
 0xe37   : > { %834 = vperm.xlu0 %3773, %v5051_v44   ;;  %829 = vperm.xlu2 %3772, %v5051_v44   ;;  %v881_v14 = vand.u32 2147483647, %v5051_v44 }
 0xe38   : > { %824 = vperm.xlu1 %3775, %v5051_v44  }
 0xe39   : > { %v882_v15 = vmax.f32 %v880_v20, %v881_v14 }
 0xe3b   : > { %v883_v30 = vmul.f32 1e-06, %v882_v15 }
 0xe3d   : > { %v884_v17 = vadd.f32 1e-07, %v883_v30 }
 0xe3f   : > { %3777 = vset.pattern.permute.xlu0 %v4457_v48  ;;  %v896_v33 = vand.u32 2147483648, %v884_v17  ;;  %vm890_vm11 = vweird.f32 %v884_v17  ;;  %v894_v36 = vand.u32 2147483647, %v884_v17 }
 0xe40   : > { %3776 = vset.pattern.permute.xlu1 %v4457_v48 }
 0xe41   : > { %839 = vperm.xlu1 %3776, %v5051_v44   ;;  %v897_v42 = vor.u32 1.1754944e-38, %v896_v33  ;;  %vm895_vm13 = vcmp.eq.f32.partialorder %v894_v36, 8.507059e+37 }
 0xe91   : > { %v830_v53 = vpop.permute.xlu2 %829 }
 0xe92   : > { %v832_v56 = vmul.f32 %v830_v53, %v4549_v10 }
 0xea9   : > { %v835_v32 = vpop.permute.xlu0 %834 }
 0xeaa   : > { %v825_v41 = vpop.permute.xlu1 %824  ;;  %v837_v3 = vmul.f32 %v835_v32, %v4547_v9 }
 0xeab   : > { %v827_v54 = vmul.f32 %v825_v41, %v4545_v8 }
 0xeac   : > { %v844_v57 = vadd.f32 %v837_v3, %v832_v56 }
 0xead   : > { %v843_v60 = vadd.f32 %v4554_v11, %v827_v54 }
 0xeaf   : > { %v845_v63 = vadd.f32 %v844_v57, %v843_v60 }
 0xeb3   : > { %v840_v61 = vpop.permute.xlu1 %839 }
 0xeb4   : > { %v842_v52 = vmul.f32 %v840_v61, %v4557_v13 }
 0xeb6   : > { %v846_v62 = vadd.f32 %v845_v63, %v842_v52 }
 0xeb8   : > { %3788 = vtanh.f32 %v846_v62 }
 0xeb9   : > { %3790 = vrcp.f32 %v884_v17 }
 0xebe   : > { %v3789_v48 = vpop.eup %3788 }
 0xebf   : > { %v856_v1 = vmul.f32 %v3789_v48, %v4566_v24  ;;  %v852_v19 = vmul.f32 %v3789_v48, %v4578_v31  ;;  %v848_v4 = vmul.f32 %v3789_v48, %v4568_v25  ;;  %v860_v5 = vmul.f32 %v3789_v48, %v4593_v34  ;;  %v3791_v2 = vpop.eup %3790 }
 0xec0   : > { %v886_v18 = vmul.f32 %v3791_v2, %v884_v17  ;;  %vm891_vm10 = vweird.f32 %v3791_v2 }
 0xec1   : > { %v857_v58 = vsel %vm88_vm1, %v856_v1, 0.0  ;;  %v853_v12 = vsel %vm88_vm1, %v852_v19, 0.0  ;;  %v849_v59 = vsel %vm88_vm1, %v848_v4, 0.0  ;;  %v861_v6 = vsel %vm88_vm1, %v860_v5, 0.0  ;;  %vm892_vm12 = vmor %vm890_vm11, %vm891_vm10 }
 0xec2   : > { %858 = vadd.xlane.f32.xlu0 %v857_v58  ;;  %854 = vadd.xlane.f32.xlu1 %v853_v12  ;;  %v887_v16 = vsub.f32 1.0, %v886_v18 }
 0xec3   : > { %850 = vadd.xlane.f32.xlu2 %v849_v59 }
 0xec4   : > { %v888_v23 = vmul.f32 %v3791_v2, %v887_v16 }
 0xec6   : > { %v889_v50 = vadd.f32 %v3791_v2, %v888_v23 }
 0xec8   : > { %v893_v39 = vsel %vm892_vm12, %v3791_v2, %v889_v50 }
 0xec9   : > { %v898_v32 = vsel %vm895_vm13, %v897_v42, %v893_v39 }
 0xecb   : > { %862 = vadd.xlane.f32.xlu2 %v861_v6 }
 0xf35   : > { %v855_v55 = vpop.xlane.xlu1 %854  ;;  %v859_v21 = vpop.xlane.xlu0 %858 }
 0xf36   : > { %v851_v27 = vpop.xlane.xlu2 %850 }
 0xf37   : > { %v864_v22 = vsel %vm104_vm2, %v851_v27, %v855_v55 }
 0xf38   : > { %v865_v7 = vsel %vm106_vm3, %v864_v22, %v859_v21 }
 0xf3e   : > { %v863_v28 = vpop.xlane.xlu2 %862 }
 0xf3f   : > { %v866_v26 = vsel %vm108_vm4, %v865_v7, %v863_v28 }
 0xf40   : > { %v867_v0 = vadd.f32 %v4601_v40, %v866_v26 }
 0xf42   : > { %v868_v45 = vmul.f32 %v867_v0, %v4910_v29 }
 0xf44   : > { %v877_v35 = vmul.f32 -0.025, %v868_v45 }
 0xf46   : > { %v878_v38 = vadd.f32 %v877_v35, %v876_v49 }
 0xf48   : > { %v879_v43 = vadd.f32 %v878_v38, %v5026_v51 }
 0xf4a   : > { %v899_v41 = vmul.f32 %v898_v32, %v879_v43 }
 0xf4c   : > { %v900_v53 = vmul.f32 %v899_v41, %v899_v41 }
 0xf4e   : > { %v901_v29 = vsel %vm55_vm0, %v900_v53, 0.0 }
 0xf4f   : > { %902 = vadd.xlane.f32.xlu2 %v901_v29 }
 0xfc2   : > { %v903_v3 = vpop.xlane.xlu2 %902 }
 0xfc3   : > { %v904_v54 = vrot.slane %v903_v3, 4 }
 0xfc5   : > { %v905_v37 = vadd.f32 %v904_v54, %v903_v3 }
 0xfc7   : > { %v906_v56 = vrot.slane %v905_v37, 2 }
 0xfc9   : > { %v907_v57 = vadd.f32 %v906_v56, %v905_v37 }
 0xfcb   : > { %v908_v60 = vrot.slane %v907_v57, 1 }
 0xfcd   : > { %v909_v61 = vadd.f32 %v908_v60, %v907_v57 }
 0xfcf   : > { %3191 = vpush %v909_v61 }
0x1000   : > { %s3192_s19 = spop %3191 }
0x1001   : > { %v911_v51 = vstv %s3192_s19 }
0x1002   : > { %v912_v63 = vmul.f32 0.03125, %v911_v51 }
0x1004   : > { %v913_v52 = vadd.f32 1e-24, %v912_v63  ;;  %3193 = vpush %v912_v63 }
0x1006   : > { %3792 = vlog2.f32 %v913_v52 }
0x100c   : > { %v3793_v62 = vpop.eup %3792 }
0x100d   : > { %v915_v48 = vmul.f32 0.6931472, %v3793_v62 }
0x100f   : > { %v916_v1 = vmul.f32 -0.1, %v915_v48 }
0x1011   : > { %v917_v19 = vmul.f32 1.442695, %v916_v1 }
0x1013   : > { %3794 = vpow2.f32 %v917_v19 }
0x1019   : > { %v3795_v4 = vpop.eup %3794 }
0x101a   : > { %v919_v58 = vmul.f32 0.9, %v3795_v4 }
0x101c   : > { %3195 = vpush %v919_v58 }
0x1035   : > { %s3194_s21 = spop %3193 }
0x1036   : > { %p924_p6 = scmp.le.f32.partialorder %s3194_s21, 1.0 }
0x1038   : > { %s6510_s20 = smov (!%p924_p6, %s925_s20), %s4276_s9 }
0x1039   : > { %s927_s22 = scalar_select %p924_p6, 1, 0 }
0x103a   : > { %s536_s29 = ssub.f32 %s4859_s7, %s6510_s20  ;;  %s6452_s9 = smov %s6510_s20 }
0x103b   : > { %v928_v12 = vstv %s927_s22 }
0x103c   : > { %vm929_vm14 = vcmp.eq.s32.totalorder %v928_v12, 1  ;;  %p537_p8 = scmp.gt.f32.partialorder %s536_s29, %s528_s13 }
0x103d   : > { %v930_v59 = vsel %vm929_vm14, %v5051_v44, %v4272_v47   ;;  %v931_v5 = vsel %vm929_vm14, %v867_v0, %v4264_v46  }
0x103e   : > { %p539_p9 = pnand %p538_p7, %p537_p8  ;;  %v6449_v46 = vmov %v931_v5  ;;  %v6451_v47 = vmov %v930_v59 }
0x103f   :  { %v6453_v0 = vmov (%p539_p9), %v931_v5  ;;  %v6455_v45 = vmov (%p539_p9), %v930_v59 }
0x104d   : > { %s3196_s23 = spop %3195 }
0x104e   : > { %s922_s25 = smax.f32 %s4458_s24, %s3196_s23 }
0x104f   : > { %s923_s28 = smin.f32 %s4459_s27, %s922_s25  ;;  %542 = sbr.rel (!%p539_p9) target bundleno = 2242 (0x8c2), region = 115 }
0x1050   : > { %s932_s0 = smul.f32 %s923_s28, %s4907_s5 }
0x1052   : > { %s934_s1 = smax.f32 %s933_s26, %s932_s0  }
0x1053   : > { %s6450_s14 = smov %s934_s1  ;;  %s6454_s15 = smov (%p539_p9), %s934_s1 }
0x1054 PF:  { %3164 = vst.msk [vmem:[%s6433_s6 + $0x10] sm:$0xff] %vm55_vm0, %v4288_v45  ;;  %s3165_s3 = sld [smem:[#allocation2 + $0x2]]   ;;  %v6456_v46 = vmov %v4280_v0  ;;  %v6458_v47 = vmov %v4288_v45  ;;  %v4288_v45 = vphi %v6447_v45, %v6455_v45   ;;  %s4284_s15 = sphi %s6446_s15, %s6454_s15   ;;  %v4280_v0 = vphi %v6445_v0, %v6453_v0  }
0x1055   :  { %s5120_s8 = sld [smem:[#allocation2 + $0x3]] }
0x105b   :  { %s5123_s9 = ssub.f32 %s5120_s8, %s3165_s3  ;;  %s941_s7 = sand.u32 2147483647, %s5120_s8 }
0x105c   :  { %s5127_s4 = smax.f32 %s4447_s11, %s941_s7 }
0x105d   :  { %s943_s10 = smul.f32 1e-10, %s5127_s4  ;;  %s944_s12 = smin.f32 %s4284_s15, %s5123_s9  }
0x105e   :  { %s6457_s13 = smov %s944_s12 }
0x105f   :  { %p3064_p10 = scmp.gt.f32.partialorder %s5123_s9, %s943_s10 }
0x1060   :  { %s5140_s14 = smov (%p3064_p10), 0  }
0x1061   :  { %3067 = sbr.rel (!%p3064_p10) target bundleno = 6136 (0x17f8), region = 120 }
0x1066 LB: > { %v4460_v44 = vmov 0   ;;  %v4461_v6 = vmov 2   ;;  %s958_s15 = ssub.f32 %s5120_s8, %s4308_s3  ;;  %v4462_v20 = vmov 1   ;;  %v4463_v2 = vmov 3   ;;  %s1350_s17 = sadd.s32 1, %s4292_s14   ;;  %s4308_s3 = sphi %s3165_s3, %s6463_s3   ;;  %v4304_v45 = vphi %v4288_v45, %v6462_v45   ;;  %s4300_s12 = sphi %s944_s12, %s6461_s12   ;;  %v4296_v0 = vphi %v4280_v0, %v6460_v0   ;;  %s4292_s14 = sphi %s5140_s14, %s6459_s14  }
0x1067   : > { %3796 = vset.pattern.permute.xlu0 %v4460_v44  ;;  %3798 = vset.pattern.permute.xlu1 %v4461_v6  ;;  %s4464_s22 = smov 0.2   ;;  %s1348_s24 = smul.f32 1e-06, %s5123_s9 }
0x1068   : > { %3801 = vset.pattern.permute.xlu2 %v4462_v20  ;;  %s5168_s16 = smin.f32 %s4300_s12, %s958_s15  ;;  %s4465_s25 = smov 10.0  }
0x1069   : > { %v5171_v14 = vstv %s5168_s16  ;;  %s1340_s18 = sadd.f32 %s4308_s3, %s5168_s16  ;;  %p953_p12 = scmp.lt.s32.totalorder %s1350_s17, 1000 }
0x106a   : > { %v5175_v15 = vmul.f32 %v4296_v0, %v5171_v14  ;;  %s6459_s14 = smov %s1350_s17 }
0x106c   : > { %v962_v30 = vmul.f32 0.2, %v5175_v15  ;;  %v1011_v51 = vmul.f32 0.075, %v5175_v15 }
0x106e   : > { %v963_v17 = vadd.f32 %v4304_v45, %v962_v30 }
0x1070   : > { %966 = vperm.xlu0 %3796, %v963_v17   ;;  %976 = vperm.xlu1 %3798, %v963_v17  }
0x1078   : > { %3797 = vset.pattern.permute.xlu0 %v4462_v20  ;;  %3799 = vset.pattern.permute.xlu1 %v4463_v2 }
0x1079   : > { %971 = vperm.xlu0 %3797, %v963_v17   ;;  %981 = vperm.xlu1 %3799, %v963_v17  }
0x1081   : > { %3800 = vset.pattern.permute.xlu0 %v4460_v44  ;;  %3804 = vset.pattern.permute.xlu1 %v4460_v44 }
0x10e2   : > { %v967_v27 = vpop.permute.xlu0 %966  ;;  %v977_v18 = vpop.permute.xlu1 %976 }
0x10e3   : > { %v969_v55 = vmul.f32 %v967_v27, %v4545_v8  ;;  %v979_v22 = vmul.f32 %v977_v18, %v4547_v9 }
0x10e5   : > { %v985_v28 = vadd.f32 %v4554_v11, %v969_v55 }
0x10eb   : > { %v972_v16 = vpop.permute.xlu0 %971  ;;  %v982_v21 = vpop.permute.xlu1 %981 }
0x10ec   : > { %v974_v7 = vmul.f32 %v972_v16, %v4549_v10  ;;  %v984_v26 = vmul.f32 %v982_v21, %v4557_v13 }
0x10ee   : > { %v986_v23 = vadd.f32 %v979_v22, %v974_v7 }
0x10f0   : > { %v987_v50 = vadd.f32 %v986_v23, %v985_v28 }
0x10f2   : > { %v988_v33 = vadd.f32 %v987_v50, %v984_v26 }
0x10f4   : > { %3818 = vtanh.f32 %v988_v33 }
0x10fa   : > { %v3819_v49 = vpop.eup %3818 }
0x10fb   : > { %v998_v35 = vmul.f32 %v3819_v49, %v4566_v24  ;;  %v990_v36 = vmul.f32 %v3819_v49, %v4568_v25  ;;  %v994_v42 = vmul.f32 %v3819_v49, %v4578_v31  ;;  %v1002_v32 = vmul.f32 %v3819_v49, %v4593_v34 }
0x10fd   : > { %v999_v38 = vsel %vm88_vm1, %v998_v35, 0.0  ;;  %v991_v39 = vsel %vm88_vm1, %v990_v36, 0.0  ;;  %v995_v43 = vsel %vm88_vm1, %v994_v42, 0.0  ;;  %v1003_v41 = vsel %vm88_vm1, %v1002_v32, 0.0 }
0x10fe   : > { %1000 = vadd.xlane.f32.xlu1 %v999_v38  ;;  %992 = vadd.xlane.f32.xlu2 %v991_v39  ;;  %v1062_v42 = vmul.f32 0.9777778, %v5175_v15 }
0x1106   : > { %996 = vadd.xlane.f32.xlu2 %v995_v43 }
0x110e   : > { %1004 = vadd.xlane.f32.xlu2 %v1003_v41 }
0x1171   : > { %v993_v53 = vpop.xlane.xlu2 %992  ;;  %v1001_v54 = vpop.xlane.xlu1 %1000 }
0x1179   : > { %v997_v29 = vpop.xlane.xlu2 %996 }
0x117a   : > { %v1006_v3 = vsel %vm104_vm2, %v993_v53, %v997_v29  ;;  %v1063_v29 = vadd.f32 %v4304_v45, %v1062_v42 }
0x117b   : > { %v1007_v37 = vsel %vm106_vm3, %v1006_v3, %v1001_v54 }
0x1181   : > { %v1005_v56 = vpop.xlane.xlu2 %1004 }
0x1182   : > { %v1008_v57 = vsel %vm108_vm4, %v1007_v37, %v1005_v56 }
0x1183   : > { %v1009_v60 = vadd.f32 %v4601_v40, %v1008_v57 }
0x1185   : > { %v1010_v61 = vmul.f32 %v1009_v60, %v5171_v14 }
0x1187   : > { %v1012_v63 = vmul.f32 0.225, %v1010_v61  ;;  %v1064_v32 = vmul.f32 -3.7333333, %v1010_v61  ;;  %v1117_v41 = vmul.f32 -11.595794, %v1010_v61 }
0x1188   : > { %v1172_v53 = vmul.f32 -10.757576, %v1010_v61 }
0x1189   : > { %v1013_v52 = vadd.f32 %v1012_v63, %v1011_v51 }
0x118b   : > { %v1014_v62 = vadd.f32 %v4304_v45, %v1013_v52 }
0x118d   : > { %1022 = vperm.xlu2 %3801, %v1014_v62   ;;  %1017 = vperm.xlu0 %3800, %v1014_v62  }
0x1195   : > { %3803 = vset.pattern.permute.xlu2 %v4463_v2  ;;  %3802 = vset.pattern.permute.xlu0 %v4461_v6 }
0x1196   : > { %1032 = vperm.xlu2 %3803, %v1014_v62   ;;  %1027 = vperm.xlu0 %3802, %v1014_v62  }
0x119e   : > { %3805 = vset.pattern.permute.xlu2 %v4462_v20 }
0x11e7   : > { %v1023_v1 = vpop.permute.xlu2 %1022 }
0x11e8   : > { %v1025_v58 = vmul.f32 %v1023_v1, %v4549_v10 }
0x11f0   : > { %v1033_v59 = vpop.permute.xlu2 %1032 }
0x11f1   : > { %v1035_v47 = vmul.f32 %v1033_v59, %v4557_v13 }
0x11ff   : > { %v1018_v48 = vpop.permute.xlu0 %1017 }
0x1200   : > { %v1020_v19 = vmul.f32 %v1018_v48, %v4545_v8 }
0x1202   : > { %v1036_v5 = vadd.f32 %v4554_v11, %v1020_v19 }
0x1208   : > { %v1028_v4 = vpop.permute.xlu0 %1027 }
0x1209   : > { %v1030_v12 = vmul.f32 %v1028_v4, %v4547_v9 }
0x120b   : > { %v1037_v46 = vadd.f32 %v1030_v12, %v1025_v58 }
0x120d   : > { %v1038_v30 = vadd.f32 %v1037_v46, %v1036_v5 }
0x120f   : > { %v1039_v17 = vadd.f32 %v1038_v30, %v1035_v47 }
0x1211   : > { %3820 = vtanh.f32 %v1039_v17 }
0x1217   : > { %v3821_v27 = vpop.eup %3820 }
0x1218   : > { %v1049_v18 = vmul.f32 %v3821_v27, %v4566_v24  ;;  %v1045_v55 = vmul.f32 %v3821_v27, %v4578_v31  ;;  %v1041_v16 = vmul.f32 %v3821_v27, %v4568_v25  ;;  %v1053_v28 = vmul.f32 %v3821_v27, %v4593_v34 }
0x121a   : > { %v1050_v21 = vsel %vm88_vm1, %v1049_v18, 0.0  ;;  %v1046_v22 = vsel %vm88_vm1, %v1045_v55, 0.0  ;;  %v1042_v7 = vsel %vm88_vm1, %v1041_v16, 0.0  ;;  %v1054_v23 = vsel %vm88_vm1, %v1053_v28, 0.0 }
0x121b   : > { %1051 = vadd.xlane.f32.xlu1 %v1050_v21  ;;  %1047 = vadd.xlane.f32.xlu2 %v1046_v22 }
0x121c   : > { %1043 = vadd.xlane.f32.xlu0 %v1042_v7 }
0x1223   : > { %1055 = vadd.xlane.f32.xlu1 %v1054_v23 }
0x128e   : > { %v1052_v26 = vpop.xlane.xlu1 %1051  ;;  %v1048_v50 = vpop.xlane.xlu2 %1047 }
0x128f   : > { %v1044_v33 = vpop.xlane.xlu0 %1043 }
0x1290   : > { %v1057_v49 = vsel %vm104_vm2, %v1044_v33, %v1048_v50 }
0x1291   : > { %v1058_v36 = vsel %vm106_vm3, %v1057_v49, %v1052_v26 }
0x1296   : > { %v1056_v35 = vpop.xlane.xlu1 %1055 }
0x1297   : > { %v1059_v38 = vsel %vm108_vm4, %v1058_v36, %v1056_v35  ;;  %v1115_v35 = vmul.f32 2.9525986, %v5175_v15 }
0x1298   : > { %v1060_v39 = vadd.f32 %v4601_v40, %v1059_v38 }
0x1299   : > { %v1116_v42 = vadd.f32 %v4304_v45, %v1115_v35 }
0x129a   : > { %v5225_v43 = vmul.f32 %v1060_v39, %v5171_v14 }
0x129c   : > { %v1065_v3 = vmul.f32 3.5555556, %v5225_v43  ;;  %v1118_v54 = vmul.f32 9.822893, %v5225_v43  ;;  %v1173_v37 = vmul.f32 8.906423, %v5225_v43 }
0x129e   : > { %v1066_v56 = vadd.f32 %v1065_v3, %v1064_v32  ;;  %v1119_v57 = vadd.f32 %v1118_v54, %v1117_v41  ;;  %v5231_v60 = vadd.f32 %v1173_v37, %v1172_v53  ;;  %v1229_v32 = vmul.f32 0.4492363, %v5225_v43 }
0x12a0   : > { %v1067_v51 = vadd.f32 %v1066_v56, %v1063_v29 }
0x12a2   : > { %1080 = vperm.xlu0 %3802, %v1067_v51   ;;  %1075 = vperm.xlu2 %3805, %v1067_v51  }
0x12a3   : > { %1070 = vperm.xlu1 %3804, %v1067_v51  }
0x12aa   : > { %3808 = vset.pattern.permute.xlu0 %v4462_v20  ;;  %3809 = vset.pattern.permute.xlu2 %v4461_v6 }
0x12ab   : > { %3806 = vset.pattern.permute.xlu1 %v4463_v2 }
0x12ac   : > { %1085 = vperm.xlu1 %3806, %v1067_v51  }
0x12b4   : > { %3807 = vset.pattern.permute.xlu1 %v4460_v44 }
0x12fc   : > { %v1076_v52 = vpop.permute.xlu2 %1075 }
0x12fd   : > { %v1078_v1 = vmul.f32 %v1076_v52, %v4549_v10 }
0x1314   : > { %v1081_v61 = vpop.permute.xlu0 %1080 }
0x1315   : > { %v1071_v63 = vpop.permute.xlu1 %1070  ;;  %v1083_v62 = vmul.f32 %v1081_v61, %v4547_v9 }
0x1316   : > { %v1073_v48 = vmul.f32 %v1071_v63, %v4545_v8 }
0x1317   : > { %v1090_v19 = vadd.f32 %v1083_v62, %v1078_v1 }
0x1318   : > { %v1089_v4 = vadd.f32 %v4554_v11, %v1073_v48 }
0x131a   : > { %v1091_v12 = vadd.f32 %v1090_v19, %v1089_v4 }
0x131e   : > { %v1086_v58 = vpop.permute.xlu1 %1085 }
0x131f   : > { %v1088_v59 = vmul.f32 %v1086_v58, %v4557_v13 }
0x1321   : > { %v1092_v5 = vadd.f32 %v1091_v12, %v1088_v59 }
0x1323   : > { %3822 = vtanh.f32 %v1092_v5 }
0x1329   : > { %v3823_v46 = vpop.eup %3822 }
0x132a   : > { %v1102_v47 = vmul.f32 %v3823_v46, %v4566_v24  ;;  %v1098_v30 = vmul.f32 %v3823_v46, %v4578_v31  ;;  %v1094_v17 = vmul.f32 %v3823_v46, %v4568_v25  ;;  %v1106_v16 = vmul.f32 %v3823_v46, %v4593_v34 }
0x132c   : > { %v1103_v27 = vsel %vm88_vm1, %v1102_v47, 0.0  ;;  %v1099_v18 = vsel %vm88_vm1, %v1098_v30, 0.0  ;;  %v1095_v55 = vsel %vm88_vm1, %v1094_v17, 0.0  ;;  %v1107_v21 = vsel %vm88_vm1, %v1106_v16, 0.0 }
0x132d   : > { %1104 = vadd.xlane.f32.xlu2 %v1103_v27  ;;  %1100 = vadd.xlane.f32.xlu0 %v1099_v18  ;;  %v1170_v16 = vmul.f32 2.8462753, %v5175_v15 }
0x132e   : > { %1096 = vadd.xlane.f32.xlu1 %v1095_v55 }
0x1336   : > { %1108 = vadd.xlane.f32.xlu1 %v1107_v21 }
0x13a0   : > { %v1101_v7 = vpop.xlane.xlu0 %1100  ;;  %v1105_v28 = vpop.xlane.xlu2 %1104 }
0x13a1   : > { %v1097_v22 = vpop.xlane.xlu1 %1096 }
0x13a2   : > { %v1110_v23 = vsel %vm104_vm2, %v1097_v22, %v1101_v7 }
0x13a3   : > { %v1111_v26 = vsel %vm106_vm3, %v1110_v23, %v1105_v28  ;;  %v1171_v28 = vadd.f32 %v4304_v45, %v1170_v16  ;;  %v1284_v23 = vmul.f32 0.0012326388, %v5175_v15 }
0x13a9   : > { %v1109_v50 = vpop.xlane.xlu1 %1108 }
0x13aa   : > { %v1112_v33 = vsel %vm108_vm4, %v1111_v26, %v1109_v50  ;;  %v1285_v26 = vmul.f32 -0.0042527704, %v5225_v43 }
0x13ab   : > { %v1113_v49 = vadd.f32 %v4601_v40, %v1112_v33 }
0x13ad   : > { %v1114_v36 = vmul.f32 %v1113_v49, %v5171_v14 }
0x13af   : > { %v1120_v38 = vmul.f32 -0.29080933, %v1114_v36  ;;  %v1230_v39 = vmul.f32 0.6510417, %v1114_v36  ;;  %v1176_v50 = vmul.f32 0.2784091, %v1114_v36 }
0x13b0   : > { %v1287_v35 = vmul.f32 0.036979165, %v1114_v36 }
0x13b1   : > { %v1121_v41 = vadd.f32 %v1120_v38, %v1119_v57  ;;  %v5258_v53 = vadd.f32 %v1230_v39, %v1229_v32  ;;  %v1175_v39 = vadd.f32 %v5231_v60, %v1171_v28 }
0x13b3   : > { %v1122_v29 = vadd.f32 %v1121_v41, %v1116_v42  ;;  %v1286_v42 = vadd.f32 %v1285_v26, %v1284_v23 }
0x13b5   : > { %1135 = vperm.xlu2 %3809, %v1122_v29   ;;  %1130 = vperm.xlu0 %3808, %v1122_v29  }
0x13b6   : > { %1125 = vperm.xlu1 %3807, %v1122_v29  }
0x13bd   : > { %3812 = vset.pattern.permute.xlu2 %v4462_v20  ;;  %3813 = vset.pattern.permute.xlu0 %v4461_v6 }
0x13be   : > { %3810 = vset.pattern.permute.xlu1 %v4463_v2 }
0x13bf   : > { %1140 = vperm.xlu1 %3810, %v1122_v29  }
0x13c7   : > { %3811 = vset.pattern.permute.xlu1 %v4460_v44 }
0x140f   : > { %v1136_v37 = vpop.permute.xlu2 %1135 }
0x1410   : > { %v1138_v51 = vmul.f32 %v1136_v37, %v4547_v9 }
0x1427   : > { %v1131_v3 = vpop.permute.xlu0 %1130 }
0x1428   : > { %v1126_v54 = vpop.permute.xlu1 %1125  ;;  %v1133_v56 = vmul.f32 %v1131_v3, %v4549_v10 }
0x1429   : > { %v1128_v57 = vmul.f32 %v1126_v54, %v4545_v8 }
0x142a   : > { %v1145_v61 = vadd.f32 %v1138_v51, %v1133_v56 }
0x142b   : > { %v1144_v63 = vadd.f32 %v4554_v11, %v1128_v57 }
0x142d   : > { %v1146_v52 = vadd.f32 %v1145_v61, %v1144_v63 }
0x1431   : > { %v1141_v20 = vpop.permute.xlu1 %1140 }
0x1432   : > { %v1143_v6 = vmul.f32 %v1141_v20, %v4557_v13 }
0x1434   : > { %v1147_v62 = vadd.f32 %v1146_v52, %v1143_v6 }
0x1436   : > { %3824 = vtanh.f32 %v1147_v62 }
0x143c   : > { %v3825_v48 = vpop.eup %3824 }
0x143d   : > { %v1157_v1 = vmul.f32 %v3825_v48, %v4566_v24  ;;  %v1153_v19 = vmul.f32 %v3825_v48, %v4578_v31  ;;  %v1149_v4 = vmul.f32 %v3825_v48, %v4568_v25  ;;  %v1161_v5 = vmul.f32 %v3825_v48, %v4593_v34 }
0x143f   : > { %v1158_v58 = vsel %vm88_vm1, %v1157_v1, 0.0  ;;  %v1154_v12 = vsel %vm88_vm1, %v1153_v19, 0.0  ;;  %v1150_v59 = vsel %vm88_vm1, %v1149_v4, 0.0  ;;  %v1162_v46 = vsel %vm88_vm1, %v1161_v5, 0.0 }
0x1440   : > { %1159 = vadd.xlane.f32.xlu0 %v1158_v58  ;;  %1155 = vadd.xlane.f32.xlu1 %v1154_v12 }
0x1441   : > { %1151 = vadd.xlane.f32.xlu2 %v1150_v59 }
0x1449   : > { %1163 = vadd.xlane.f32.xlu2 %v1162_v46 }
0x14b3   : > { %v1156_v30 = vpop.xlane.xlu1 %1155  ;;  %v1160_v17 = vpop.xlane.xlu0 %1159 }
0x14b4   : > { %v1152_v47 = vpop.xlane.xlu2 %1151 }
0x14b5   : > { %v1165_v27 = vsel %vm104_vm2, %v1152_v47, %v1156_v30  ;;  %v1227_v30 = vmul.f32 0.091145836, %v5175_v15 }
0x14b6   : > { %v1166_v18 = vsel %vm106_vm3, %v1165_v27, %v1160_v17 }
0x14bc   : > { %v1164_v55 = vpop.xlane.xlu2 %1163 }
0x14bd   : > { %v1167_v21 = vsel %vm108_vm4, %v1166_v18, %v1164_v55  ;;  %v1228_v55 = vadd.f32 %v4304_v45, %v1227_v30 }
0x14be   : > { %v1168_v22 = vadd.f32 %v4601_v40, %v1167_v21 }
0x14bf   : > { %v1232_v28 = vadd.f32 %v5258_v53, %v1228_v55 }
0x14c0   : > { %v1169_v7 = vmul.f32 %v1168_v22, %v5171_v14 }
0x14c2   : > { %v1177_v33 = vmul.f32 -0.27353132, %v1169_v7  ;;  %v1288_v49 = vmul.f32 -0.0508638, %v1169_v7  ;;  %v1233_v21 = vmul.f32 -0.3223762, %v1169_v7 }
0x14c4   : > { %v1178_v38 = vadd.f32 %v1177_v33, %v1176_v50  ;;  %v1289_v32 = vadd.f32 %v1288_v49, %v1287_v35 }
0x14c6   : > { %v1179_v41 = vadd.f32 %v1178_v38, %v1175_v39  ;;  %v5287_v29 = vadd.f32 %v1289_v32, %v1286_v42 }
0x14c8   : > { %1192 = vperm.xlu0 %3813, %v1179_v41   ;;  %1187 = vperm.xlu2 %3812, %v1179_v41  }
0x14c9   : > { %1182 = vperm.xlu1 %3811, %v1179_v41  }
0x14d1   : > { %3814 = vset.pattern.permute.xlu1 %v4463_v2 }
0x14d2   : > { %1197 = vperm.xlu1 %3814, %v1179_v41  }
0x14da   : > { %3815 = vset.pattern.permute.xlu1 %v4460_v44 }
0x1522   : > { %v1188_v54 = vpop.permute.xlu2 %1187 }
0x1523   : > { %v1190_v37 = vmul.f32 %v1188_v54, %v4549_v10 }
0x153a   : > { %v1193_v43 = vpop.permute.xlu0 %1192 }
0x153b   : > { %v1183_v3 = vpop.permute.xlu1 %1182  ;;  %v1195_v36 = vmul.f32 %v1193_v43, %v4547_v9 }
0x153c   : > { %v1185_v60 = vmul.f32 %v1183_v3, %v4545_v8 }
0x153d   : > { %v1202_v56 = vadd.f32 %v1195_v36, %v1190_v37 }
0x153e   : > { %v1201_v57 = vadd.f32 %v4554_v11, %v1185_v60 }
0x1540   : > { %v1203_v61 = vadd.f32 %v1202_v56, %v1201_v57 }
0x1544   : > { %v1198_v51 = vpop.permute.xlu1 %1197 }
0x1545   : > { %v1200_v63 = vmul.f32 %v1198_v51, %v4557_v13  ;;  %v1295_v51 = vand.u32 2147483647, %v4304_v45 }
0x1547   : > { %v1204_v20 = vadd.f32 %v1203_v61, %v1200_v63 }
0x1549   : > { %3826 = vtanh.f32 %v1204_v20 }
0x154f   : > { %v3827_v52 = vpop.eup %3826 }
0x1550   : > { %v1214_v44 = vmul.f32 %v3827_v52, %v4566_v24  ;;  %v1210_v6 = vmul.f32 %v3827_v52, %v4578_v31  ;;  %v1206_v62 = vmul.f32 %v3827_v52, %v4568_v25  ;;  %v1218_v4 = vmul.f32 %v3827_v52, %v4593_v34 }
0x1552   : > { %v1215_v48 = vsel %vm88_vm1, %v1214_v44, 0.0  ;;  %v1211_v1 = vsel %vm88_vm1, %v1210_v6, 0.0  ;;  %v1207_v19 = vsel %vm88_vm1, %v1206_v62, 0.0  ;;  %v1219_v58 = vsel %vm88_vm1, %v1218_v4, 0.0 }
0x1553   : > { %1216 = vadd.xlane.f32.xlu0 %v1215_v48  ;;  %1212 = vadd.xlane.f32.xlu1 %v1211_v1 }
0x1554   : > { %1208 = vadd.xlane.f32.xlu2 %v1207_v19 }
0x155c   : > { %1220 = vadd.xlane.f32.xlu2 %v1219_v58 }
0x15c6   : > { %v1213_v59 = vpop.xlane.xlu1 %1212  ;;  %v1217_v5 = vpop.xlane.xlu0 %1216 }
0x15c7   : > { %v1209_v12 = vpop.xlane.xlu2 %1208 }
0x15c8   : > { %v1222_v46 = vsel %vm104_vm2, %v1209_v12, %v1213_v59 }
0x15c9   : > { %v1223_v47 = vsel %vm106_vm3, %v1222_v46, %v1217_v5 }
0x15cf   : > { %v1221_v17 = vpop.xlane.xlu2 %1220 }
0x15d0   : > { %v1224_v27 = vsel %vm108_vm4, %v1223_v47, %v1221_v17 }
0x15d1   : > { %v1225_v18 = vadd.f32 %v4601_v40, %v1224_v27 }
0x15d3   : > { %v1226_v16 = vmul.f32 %v1225_v18, %v5171_v14 }
0x15d5   : > { %v1234_v22 = vmul.f32 0.13095239, %v1226_v16  ;;  %v1291_v27 = vmul.f32 0.041904762, %v1226_v16 }
0x15d7   : > { %v1235_v23 = vadd.f32 %v1234_v22, %v1233_v21 }
0x15d9   : > { %v5312_v26 = vadd.f32 %v1235_v23, %v1232_v28 }
0x15db   : > { %1249 = vperm.xlu0 %3813, %v5312_v26   ;;  %1244 = vperm.xlu2 %3812, %v5312_v26   ;;  %v1296_v61 = vand.u32 2147483647, %v5312_v26 }
0x15dc   : > { %1239 = vperm.xlu1 %3815, %v5312_v26  }
0x15dd   : > { %v1297_v63 = vmax.f32 %v1295_v51, %v1296_v61 }
0x15df   : > { %v1298_v20 = vmul.f32 1e-06, %v1297_v63 }
0x15e1   : > { %v1299_v52 = vadd.f32 1e-07, %v1298_v20 }
0x15e3   : > { %3817 = vset.pattern.permute.xlu0 %v4463_v2  ;;  %v1311_v17 = vand.u32 2147483648, %v1299_v52  ;;  %vm1305_vm5 = vweird.f32 %v1299_v52  ;;  %v1309_v55 = vand.u32 2147483647, %v1299_v52 }
0x15e4   : > { %3816 = vset.pattern.permute.xlu1 %v4463_v2 }
0x15e5   : > { %1254 = vperm.xlu1 %3816, %v5312_v26   ;;  %v1312_v28 = vor.u32 1.1754944e-38, %v1311_v17  ;;  %vm1310_vm7 = vcmp.eq.f32.partialorder %v1309_v55, 8.507059e+37 }
0x1635   : > { %v1245_v50 = vpop.permute.xlu2 %1244 }
0x1636   : > { %v1247_v49 = vmul.f32 %v1245_v50, %v4549_v10 }
0x164d   : > { %v1250_v15 = vpop.permute.xlu0 %1249 }
0x164e   : > { %v1240_v7 = vpop.permute.xlu1 %1239  ;;  %v1252_v53 = vmul.f32 %v1250_v15, %v4547_v9 }
0x164f   : > { %v1242_v33 = vmul.f32 %v1240_v7, %v4545_v8 }
0x1650   : > { %v1259_v35 = vadd.f32 %v1252_v53, %v1247_v49 }
0x1651   : > { %v1258_v38 = vadd.f32 %v4554_v11, %v1242_v33 }
0x1653   : > { %v1260_v42 = vadd.f32 %v1259_v35, %v1258_v38 }
0x1657   : > { %v1255_v39 = vpop.permute.xlu1 %1254 }
0x1658   : > { %v1257_v32 = vmul.f32 %v1255_v39, %v4557_v13 }
0x165a   : > { %v1261_v41 = vadd.f32 %v1260_v42, %v1257_v32 }
0x165c   : > { %3828 = vtanh.f32 %v1261_v41 }
0x165d   : > { %3830 = vrcp.f32 %v1299_v52 }
0x1662   : > { %v3829_v2 = vpop.eup %3828 }
0x1663   : > { %v1271_v43 = vmul.f32 %v3829_v2, %v4566_v24  ;;  %v1267_v3 = vmul.f32 %v3829_v2, %v4578_v31  ;;  %v1263_v54 = vmul.f32 %v3829_v2, %v4568_v25  ;;  %v1275_v56 = vmul.f32 %v3829_v2, %v4593_v34  ;;  %v3831_v44 = vpop.eup %3830 }
0x1664   : > { %v1301_v62 = vmul.f32 %v3831_v44, %v1299_v52  ;;  %vm1306_vm15 = vweird.f32 %v3831_v44 }
0x1665   : > { %v1272_v36 = vsel %vm88_vm1, %v1271_v43, 0.0  ;;  %v1268_v60 = vsel %vm88_vm1, %v1267_v3, 0.0  ;;  %v1264_v37 = vsel %vm88_vm1, %v1263_v54, 0.0  ;;  %v1276_v57 = vsel %vm88_vm1, %v1275_v56, 0.0  ;;  %vm1307_vm6 = vmor %vm1305_vm5, %vm1306_vm15 }
0x1666   : > { %1273 = vadd.xlane.f32.xlu0 %v1272_v36  ;;  %1269 = vadd.xlane.f32.xlu1 %v1268_v60  ;;  %v1302_v1 = vsub.f32 1.0, %v1301_v62 }
0x1667   : > { %1265 = vadd.xlane.f32.xlu2 %v1264_v37 }
0x1668   : > { %v1303_v59 = vmul.f32 %v3831_v44, %v1302_v1 }
0x166a   : > { %v1304_v30 = vadd.f32 %v3831_v44, %v1303_v59 }
0x166c   : > { %v1308_v22 = vsel %vm1307_vm6, %v3831_v44, %v1304_v30 }
0x166d   : > { %v1313_v15 = vsel %vm1310_vm7, %v1312_v28, %v1308_v22 }
0x166f   : > { %1277 = vadd.xlane.f32.xlu2 %v1276_v57 }
0x16d9   : > { %v1270_v48 = vpop.xlane.xlu1 %1269  ;;  %v1274_v19 = vpop.xlane.xlu0 %1273 }
0x16da   : > { %v1266_v6 = vpop.xlane.xlu2 %1265 }
0x16db   : > { %v1279_v4 = vsel %vm104_vm2, %v1266_v6, %v1270_v48 }
0x16dc   : > { %v1280_v58 = vsel %vm106_vm3, %v1279_v4, %v1274_v19 }
0x16e2   : > { %v1278_v12 = vpop.xlane.xlu2 %1277 }
0x16e3   : > { %v1281_v5 = vsel %vm108_vm4, %v1280_v58, %v1278_v12 }
0x16e4   : > { %v1282_v46 = vadd.f32 %v4601_v40, %v1281_v5 }
0x16e6   : > { %v1283_v47 = vmul.f32 %v1282_v46, %v5171_v14 }
0x16e8   : > { %v1292_v18 = vmul.f32 -0.025, %v1283_v47 }
0x16ea   : > { %v1293_v21 = vadd.f32 %v1292_v18, %v1291_v27 }
0x16ec   : > { %v1294_v23 = vadd.f32 %v1293_v21, %v5287_v29 }
0x16ee   : > { %v1314_v7 = vmul.f32 %v1313_v15, %v1294_v23 }
0x16f0   : > { %v1315_v50 = vmul.f32 %v1314_v7, %v1314_v7 }
0x16f2   : > { %v1316_v14 = vsel %vm55_vm0, %v1315_v50, 0.0 }
0x16f3   : > { %1317 = vadd.xlane.f32.xlu2 %v1316_v14 }
0x1766   : > { %v1318_v53 = vpop.xlane.xlu2 %1317 }
0x1767   : > { %v1319_v33 = vrot.slane %v1318_v53, 4 }
0x1769   : > { %v1320_v16 = vadd.f32 %v1319_v33, %v1318_v53 }
0x176b   : > { %v1321_v49 = vrot.slane %v1320_v16, 2 }
0x176d   : > { %v1322_v35 = vadd.f32 %v1321_v49, %v1320_v16 }
0x176f   : > { %v1323_v38 = vrot.slane %v1322_v35, 1 }
0x1771   : > { %v1324_v39 = vadd.f32 %v1323_v38, %v1322_v35 }
0x1773   : > { %3197 = vpush %v1324_v39 }
0x17a4   : > { %s3198_s5 = spop %3197 }
0x17a5   : > { %v1326_v29 = vstv %s3198_s5 }
0x17a6   : > { %v1327_v42 = vmul.f32 0.03125, %v1326_v29 }
0x17a8   : > { %v1328_v32 = vadd.f32 1e-24, %v1327_v42  ;;  %3199 = vpush %v1327_v42 }
0x17aa   : > { %3832 = vlog2.f32 %v1328_v32 }
0x17b0   : > { %v3833_v41 = vpop.eup %3832 }
0x17b1   : > { %v1330_v2 = vmul.f32 0.6931472, %v3833_v41 }
0x17b3   : > { %v1331_v43 = vmul.f32 -0.1, %v1330_v2 }
0x17b5   : > { %v1332_v3 = vmul.f32 1.442695, %v1331_v43 }
0x17b7   : > { %3834 = vpow2.f32 %v1332_v3 }
0x17bd   : > { %v3835_v54 = vpop.eup %3834 }
0x17be   : > { %v1334_v36 = vmul.f32 0.9, %v3835_v54 }
0x17c0   : > { %3201 = vpush %v1334_v36 }
0x17d9   : > { %s3200_s19 = spop %3199 }
0x17da   : > { %p1339_p11 = scmp.le.f32.partialorder %s3200_s19, 1.0 }
0x17dc   : > { %s6512_s18 = smov (!%p1339_p11, %s1340_s18), %s4308_s3 }
0x17dd   : > { %s1342_s20 = scalar_select %p1339_p11, 1, 0 }
0x17de   : > { %s951_s0 = ssub.f32 %s5120_s8, %s6512_s18  ;;  %s6463_s3 = smov %s6512_s18 }
0x17df   : > { %v1343_v60 = vstv %s1342_s20 }
0x17e0   : > { %vm1344_vm8 = vcmp.eq.s32.totalorder %v1343_v60, 1  ;;  %p952_p13 = scmp.gt.f32.partialorder %s951_s0, %s943_s10 }
0x17e1   : > { %v1345_v37 = vsel %vm1344_vm8, %v5312_v26, %v4304_v45   ;;  %v1346_v56 = vsel %vm1344_vm8, %v1282_v46, %v4296_v0  }
0x17e2   : > { %p954_p0 = pnand %p953_p12, %p952_p13  ;;  %v6460_v0 = vmov %v1346_v56  ;;  %v6462_v45 = vmov %v1345_v37 }
0x17e3   :  { %v6464_v46 = vmov (%p954_p0), %v1346_v56  ;;  %v6466_v47 = vmov (%p954_p0), %v1345_v37 }
0x17f1   : > { %s3202_s21 = spop %3201 }
0x17f2   : > { %s1337_s23 = smax.f32 %s4464_s22, %s3202_s21 }
0x17f3   : > { %s1338_s26 = smin.f32 %s4465_s25, %s1337_s23  ;;  %957 = sbr.rel (!%p954_p0) target bundleno = 4198 (0x1066), region = 126 }
0x17f4   : > { %s1347_s27 = smul.f32 %s1338_s26, %s5168_s16 }
0x17f6   : > { %s1349_s28 = smax.f32 %s1348_s24, %s1347_s27  }
0x17f7   : > { %s6461_s12 = smov %s1349_s28  ;;  %s6465_s13 = smov (%p954_p0), %s1349_s28 }
0x17f8 PF:  { %3168 = vst.msk [vmem:[%s6433_s6 + $0x18] sm:$0xff] %vm55_vm0, %v4320_v47  ;;  %s3169_s30 = sld [smem:[#allocation2 + $0x3]]   ;;  %v6467_v0 = vmov %v4312_v46  ;;  %v6469_v45 = vmov %v4320_v47  ;;  %v4320_v47 = vphi %v6458_v47, %v6466_v47   ;;  %s4316_s13 = sphi %s6457_s13, %s6465_s13   ;;  %v4312_v46 = vphi %v6456_v46, %v6464_v46  }
0x17f9   :  { %s5381_s2 = sld [smem:[#allocation2 + $0x4]] }
0x17ff   :  { %s5384_s3 = ssub.f32 %s5381_s2, %s3169_s30  ;;  %s1356_s8 = sand.u32 2147483647, %s5381_s2 }
0x1800   :  { %s5388_s9 = smax.f32 %s4447_s11, %s1356_s8 }
0x1801   :  { %s1358_s7 = smul.f32 1e-10, %s5388_s9  ;;  %s1359_s4 = smin.f32 %s4316_s13, %s5384_s3  }
0x1802   :  { %s6468_s10 = smov %s1359_s4 }
0x1803   :  { %p3084_p1 = scmp.gt.f32.partialorder %s5384_s3, %s1358_s7 }
0x1804   :  { %s5401_s12 = smov (%p3084_p1), 0  }
0x1805   :  { %3087 = sbr.rel (!%p3084_p1) target bundleno = 8092 (0x1f9c), region = 131 }
0x180a LB: > { %v4466_v26 = vmov 0   ;;  %v4467_v57 = vmov 2   ;;  %s1373_s13 = ssub.f32 %s5381_s2, %s4340_s30  ;;  %v4468_v51 = vmov 1   ;;  %v4469_v44 = vmov 3   ;;  %s1765_s15 = sadd.s32 1, %s4324_s12   ;;  %s4340_s30 = sphi %s3169_s30, %s6474_s30   ;;  %v4336_v47 = vphi %v4320_v47, %v6473_v47   ;;  %s4332_s4 = sphi %s1359_s4, %s6472_s4   ;;  %v4328_v46 = vphi %v4312_v46, %v6471_v46   ;;  %s4324_s12 = sphi %s5401_s12, %s6470_s12  }
0x180b   : > { %3836 = vset.pattern.permute.xlu0 %v4466_v26  ;;  %3838 = vset.pattern.permute.xlu1 %v4467_v57  ;;  %s4470_s20 = smov 0.2   ;;  %s1763_s22 = smul.f32 1e-06, %s5384_s3 }
0x180c   : > { %3841 = vset.pattern.permute.xlu2 %v4468_v51  ;;  %s5429_s14 = smin.f32 %s4332_s4, %s1373_s13  ;;  %s4471_s23 = smov 10.0  }
0x180d   : > { %v5432_v61 = vstv %s5429_s14  ;;  %s1755_s17 = sadd.f32 %s4340_s30, %s5429_s14  ;;  %p1368_p3 = scmp.lt.s32.totalorder %s1765_s15, 1000 }
0x180e   : > { %v5436_v63 = vmul.f32 %v4328_v46, %v5432_v61  ;;  %s6470_s12 = smov %s1765_s15 }
0x1810   : > { %v1377_v20 = vmul.f32 0.2, %v5436_v63  ;;  %v1426_v29 = vmul.f32 0.075, %v5436_v63 }
0x1812   : > { %v1378_v52 = vadd.f32 %v4336_v47, %v1377_v20 }
0x1814   : > { %1381 = vperm.xlu0 %3836, %v1378_v52   ;;  %1391 = vperm.xlu1 %3838, %v1378_v52  }
0x181c   : > { %3837 = vset.pattern.permute.xlu0 %v4468_v51  ;;  %3839 = vset.pattern.permute.xlu1 %v4469_v44 }
0x181d   : > { %1386 = vperm.xlu0 %3837, %v1378_v52   ;;  %1396 = vperm.xlu1 %3839, %v1378_v52  }
0x1825   : > { %3840 = vset.pattern.permute.xlu0 %v4466_v26  ;;  %3844 = vset.pattern.permute.xlu1 %v4466_v26 }
0x1886   : > { %v1382_v6 = vpop.permute.xlu0 %1381  ;;  %v1392_v62 = vpop.permute.xlu1 %1391 }
0x1887   : > { %v1384_v48 = vmul.f32 %v1382_v6, %v4545_v8  ;;  %v1394_v4 = vmul.f32 %v1392_v62, %v4547_v9 }
0x1889   : > { %v1400_v12 = vadd.f32 %v4554_v11, %v1384_v48 }
0x188f   : > { %v1387_v1 = vpop.permute.xlu0 %1386  ;;  %v1397_v19 = vpop.permute.xlu1 %1396 }
0x1890   : > { %v1389_v58 = vmul.f32 %v1387_v1, %v4549_v10  ;;  %v1399_v5 = vmul.f32 %v1397_v19, %v4557_v13 }
0x1892   : > { %v1401_v59 = vadd.f32 %v1394_v4, %v1389_v58 }
0x1894   : > { %v1402_v30 = vadd.f32 %v1401_v59, %v1400_v12 }
0x1896   : > { %v1403_v17 = vadd.f32 %v1402_v30, %v1399_v5 }
0x1898   : > { %3858 = vtanh.f32 %v1403_v17 }
0x189e   : > { %v3859_v27 = vpop.eup %3858 }
0x189f   : > { %v1413_v18 = vmul.f32 %v3859_v27, %v4566_v24  ;;  %v1405_v55 = vmul.f32 %v3859_v27, %v4568_v25  ;;  %v1409_v28 = vmul.f32 %v3859_v27, %v4578_v31  ;;  %v1417_v15 = vmul.f32 %v3859_v27, %v4593_v34 }
0x18a1   : > { %v1414_v21 = vsel %vm88_vm1, %v1413_v18, 0.0  ;;  %v1406_v22 = vsel %vm88_vm1, %v1405_v55, 0.0  ;;  %v1410_v23 = vsel %vm88_vm1, %v1409_v28, 0.0  ;;  %v1418_v7 = vsel %vm88_vm1, %v1417_v15, 0.0 }
0x18a2   : > { %1415 = vadd.xlane.f32.xlu1 %v1414_v21  ;;  %1407 = vadd.xlane.f32.xlu2 %v1406_v22  ;;  %v1477_v28 = vmul.f32 0.9777778, %v5436_v63 }
0x18aa   : > { %1411 = vadd.xlane.f32.xlu2 %v1410_v23 }
0x18b2   : > { %1419 = vadd.xlane.f32.xlu2 %v1418_v7 }
0x1915   : > { %v1408_v50 = vpop.xlane.xlu2 %1407  ;;  %v1416_v33 = vpop.xlane.xlu1 %1415 }
0x191d   : > { %v1412_v14 = vpop.xlane.xlu2 %1411 }
0x191e   : > { %v1421_v53 = vsel %vm104_vm2, %v1408_v50, %v1412_v14  ;;  %v1478_v14 = vadd.f32 %v4336_v47, %v1477_v28 }
0x191f   : > { %v1422_v16 = vsel %vm106_vm3, %v1421_v53, %v1416_v33 }
0x1925   : > { %v1420_v49 = vpop.xlane.xlu2 %1419 }
0x1926   : > { %v1423_v35 = vsel %vm108_vm4, %v1422_v16, %v1420_v49 }
0x1927   : > { %v1424_v38 = vadd.f32 %v4601_v40, %v1423_v35 }
0x1929   : > { %v1425_v39 = vmul.f32 %v1424_v38, %v5432_v61 }
0x192b   : > { %v1427_v42 = vmul.f32 0.225, %v1425_v39  ;;  %v1479_v15 = vmul.f32 -3.7333333, %v1425_v39  ;;  %v1532_v7 = vmul.f32 -11.595794, %v1425_v39 }
0x192c   : > { %v1587_v50 = vmul.f32 -10.757576, %v1425_v39 }
0x192d   : > { %v1428_v32 = vadd.f32 %v1427_v42, %v1426_v29 }
0x192f   : > { %v1429_v41 = vadd.f32 %v4336_v47, %v1428_v32 }
0x1931   : > { %1437 = vperm.xlu2 %3841, %v1429_v41   ;;  %1432 = vperm.xlu0 %3840, %v1429_v41  }
0x1939   : > { %3843 = vset.pattern.permute.xlu2 %v4469_v44  ;;  %3842 = vset.pattern.permute.xlu0 %v4467_v57 }
0x193a   : > { %1447 = vperm.xlu2 %3843, %v1429_v41   ;;  %1442 = vperm.xlu0 %3842, %v1429_v41  }
0x1942   : > { %3845 = vset.pattern.permute.xlu2 %v4468_v51 }
0x198b   : > { %v1438_v43 = vpop.permute.xlu2 %1437 }
0x198c   : > { %v1440_v36 = vmul.f32 %v1438_v43, %v4549_v10 }
0x1994   : > { %v1448_v37 = vpop.permute.xlu2 %1447 }
0x1995   : > { %v1450_v45 = vmul.f32 %v1448_v37, %v4557_v13 }
0x19a3   : > { %v1433_v2 = vpop.permute.xlu0 %1432 }
0x19a4   : > { %v1435_v3 = vmul.f32 %v1433_v2, %v4545_v8 }
0x19a6   : > { %v1451_v56 = vadd.f32 %v4554_v11, %v1435_v3 }
0x19ac   : > { %v1443_v54 = vpop.permute.xlu0 %1442 }
0x19ad   : > { %v1445_v60 = vmul.f32 %v1443_v54, %v4547_v9 }
0x19af   : > { %v1452_v0 = vadd.f32 %v1445_v60, %v1440_v36 }
0x19b1   : > { %v1453_v20 = vadd.f32 %v1452_v0, %v1451_v56 }
0x19b3   : > { %v1454_v52 = vadd.f32 %v1453_v20, %v1450_v45 }
0x19b5   : > { %3860 = vtanh.f32 %v1454_v52 }
0x19bb   : > { %v3861_v6 = vpop.eup %3860 }
0x19bc   : > { %v1464_v62 = vmul.f32 %v3861_v6, %v4566_v24  ;;  %v1460_v48 = vmul.f32 %v3861_v6, %v4578_v31  ;;  %v1456_v1 = vmul.f32 %v3861_v6, %v4568_v25  ;;  %v1468_v12 = vmul.f32 %v3861_v6, %v4593_v34 }
0x19be   : > { %v1465_v19 = vsel %vm88_vm1, %v1464_v62, 0.0  ;;  %v1461_v4 = vsel %vm88_vm1, %v1460_v48, 0.0  ;;  %v1457_v58 = vsel %vm88_vm1, %v1456_v1, 0.0  ;;  %v1469_v59 = vsel %vm88_vm1, %v1468_v12, 0.0 }
0x19bf   : > { %1466 = vadd.xlane.f32.xlu1 %v1465_v19  ;;  %1462 = vadd.xlane.f32.xlu2 %v1461_v4 }
0x19c0   : > { %1458 = vadd.xlane.f32.xlu0 %v1457_v58 }
0x19c7   : > { %1470 = vadd.xlane.f32.xlu1 %v1469_v59 }
0x1a32   : > { %v1467_v5 = vpop.xlane.xlu1 %1466  ;;  %v1463_v30 = vpop.xlane.xlu2 %1462 }
0x1a33   : > { %v1459_v17 = vpop.xlane.xlu0 %1458 }
0x1a34   : > { %v1472_v27 = vsel %vm104_vm2, %v1459_v17, %v1463_v30 }
0x1a35   : > { %v1473_v55 = vsel %vm106_vm3, %v1472_v27, %v1467_v5 }
0x1a3a   : > { %v1471_v18 = vpop.xlane.xlu1 %1470 }
0x1a3b   : > { %v1474_v21 = vsel %vm108_vm4, %v1473_v55, %v1471_v18  ;;  %v1530_v18 = vmul.f32 2.9525986, %v5436_v63 }
0x1a3c   : > { %v1475_v22 = vadd.f32 %v4601_v40, %v1474_v21 }
0x1a3d   : > { %v1531_v28 = vadd.f32 %v4336_v47, %v1530_v18 }
0x1a3e   : > { %v5486_v23 = vmul.f32 %v1475_v22, %v5432_v61 }
0x1a40   : > { %v1480_v53 = vmul.f32 3.5555556, %v5486_v23  ;;  %v1533_v33 = vmul.f32 9.822893, %v5486_v23  ;;  %v1588_v16 = vmul.f32 8.906423, %v5486_v23 }
0x1a42   : > { %v1481_v49 = vadd.f32 %v1480_v53, %v1479_v15  ;;  %v1534_v35 = vadd.f32 %v1533_v33, %v1532_v7  ;;  %v5492_v38 = vadd.f32 %v1588_v16, %v1587_v50  ;;  %v1644_v15 = vmul.f32 0.4492363, %v5486_v23 }
0x1a44   : > { %v1482_v29 = vadd.f32 %v1481_v49, %v1478_v14 }
0x1a46   : > { %1495 = vperm.xlu0 %3842, %v1482_v29   ;;  %1490 = vperm.xlu2 %3845, %v1482_v29  }
0x1a47   : > { %1485 = vperm.xlu1 %3844, %v1482_v29  }
0x1a4e   : > { %3848 = vset.pattern.permute.xlu0 %v4468_v51  ;;  %3849 = vset.pattern.permute.xlu2 %v4467_v57 }
0x1a4f   : > { %3846 = vset.pattern.permute.xlu1 %v4469_v44 }
0x1a50   : > { %1500 = vperm.xlu1 %3846, %v1482_v29  }
0x1a58   : > { %3847 = vset.pattern.permute.xlu1 %v4466_v26 }
0x1aa0   : > { %v1491_v32 = vpop.permute.xlu2 %1490 }
0x1aa1   : > { %v1493_v43 = vmul.f32 %v1491_v32, %v4549_v10 }
0x1ab8   : > { %v1496_v39 = vpop.permute.xlu0 %1495 }
0x1ab9   : > { %v1486_v42 = vpop.permute.xlu1 %1485  ;;  %v1498_v41 = vmul.f32 %v1496_v39, %v4547_v9 }
0x1aba   : > { %v1488_v2 = vmul.f32 %v1486_v42, %v4545_v8 }
0x1abb   : > { %v1505_v3 = vadd.f32 %v1498_v41, %v1493_v43 }
0x1abc   : > { %v1504_v54 = vadd.f32 %v4554_v11, %v1488_v2 }
0x1abe   : > { %v1506_v60 = vadd.f32 %v1505_v3, %v1504_v54 }
0x1ac2   : > { %v1501_v36 = vpop.permute.xlu1 %1500 }
0x1ac3   : > { %v1503_v37 = vmul.f32 %v1501_v36, %v4557_v13 }
0x1ac5   : > { %v1507_v56 = vadd.f32 %v1506_v60, %v1503_v37 }
0x1ac7   : > { %3862 = vtanh.f32 %v1507_v56 }
0x1acd   : > { %v3863_v0 = vpop.eup %3862 }
0x1ace   : > { %v1517_v45 = vmul.f32 %v3863_v0, %v4566_v24  ;;  %v1513_v20 = vmul.f32 %v3863_v0, %v4578_v31  ;;  %v1509_v52 = vmul.f32 %v3863_v0, %v4568_v25  ;;  %v1521_v1 = vmul.f32 %v3863_v0, %v4593_v34 }
0x1ad0   : > { %v1518_v6 = vsel %vm88_vm1, %v1517_v45, 0.0  ;;  %v1514_v62 = vsel %vm88_vm1, %v1513_v20, 0.0  ;;  %v1510_v48 = vsel %vm88_vm1, %v1509_v52, 0.0  ;;  %v1522_v19 = vsel %vm88_vm1, %v1521_v1, 0.0 }
0x1ad1   : > { %1519 = vadd.xlane.f32.xlu2 %v1518_v6  ;;  %1515 = vadd.xlane.f32.xlu0 %v1514_v62  ;;  %v1585_v1 = vmul.f32 2.8462753, %v5436_v63 }
0x1ad2   : > { %1511 = vadd.xlane.f32.xlu1 %v1510_v48 }
0x1ada   : > { %1523 = vadd.xlane.f32.xlu1 %v1522_v19 }
0x1b44   : > { %v1516_v58 = vpop.xlane.xlu0 %1515  ;;  %v1520_v12 = vpop.xlane.xlu2 %1519 }
0x1b45   : > { %v1512_v4 = vpop.xlane.xlu1 %1511 }
0x1b46   : > { %v1525_v59 = vsel %vm104_vm2, %v1512_v4, %v1516_v58 }
0x1b47   : > { %v1526_v5 = vsel %vm106_vm3, %v1525_v59, %v1520_v12  ;;  %v1586_v12 = vadd.f32 %v4336_v47, %v1585_v1  ;;  %v1699_v59 = vmul.f32 0.0012326388, %v5436_v63 }
0x1b4d   : > { %v1524_v30 = vpop.xlane.xlu1 %1523 }
0x1b4e   : > { %v1527_v17 = vsel %vm108_vm4, %v1526_v5, %v1524_v30  ;;  %v1700_v5 = vmul.f32 -0.0042527704, %v5486_v23 }
0x1b4f   : > { %v1528_v27 = vadd.f32 %v4601_v40, %v1527_v17 }
0x1b51   : > { %v1529_v55 = vmul.f32 %v1528_v27, %v5432_v61 }
0x1b53   : > { %v1535_v21 = vmul.f32 -0.29080933, %v1529_v55  ;;  %v1645_v22 = vmul.f32 0.6510417, %v1529_v55  ;;  %v1591_v30 = vmul.f32 0.2784091, %v1529_v55 }
0x1b54   : > { %v1702_v18 = vmul.f32 0.036979165, %v1529_v55 }
0x1b55   : > { %v1536_v7 = vadd.f32 %v1535_v21, %v1534_v35  ;;  %v5519_v50 = vadd.f32 %v1645_v22, %v1644_v15  ;;  %v1590_v22 = vadd.f32 %v5492_v38, %v1586_v12 }
0x1b57   : > { %v1537_v14 = vadd.f32 %v1536_v7, %v1531_v28  ;;  %v1701_v28 = vadd.f32 %v1700_v5, %v1699_v59 }
0x1b59   : > { %1550 = vperm.xlu2 %3849, %v1537_v14   ;;  %1545 = vperm.xlu0 %3848, %v1537_v14  }
0x1b5a   : > { %1540 = vperm.xlu1 %3847, %v1537_v14  }
0x1b61   : > { %3852 = vset.pattern.permute.xlu2 %v4468_v51  ;;  %3853 = vset.pattern.permute.xlu0 %v4467_v57 }
0x1b62   : > { %3850 = vset.pattern.permute.xlu1 %v4469_v44 }
0x1b63   : > { %1555 = vperm.xlu1 %3850, %v1537_v14  }
0x1b6b   : > { %3851 = vset.pattern.permute.xlu1 %v4466_v26 }
0x1bb3   : > { %v1551_v16 = vpop.permute.xlu2 %1550 }
0x1bb4   : > { %v1553_v29 = vmul.f32 %v1551_v16, %v4547_v9 }
0x1bcb   : > { %v1546_v53 = vpop.permute.xlu0 %1545 }
0x1bcc   : > { %v1541_v33 = vpop.permute.xlu1 %1540  ;;  %v1548_v49 = vmul.f32 %v1546_v53, %v4549_v10 }
0x1bcd   : > { %v1543_v35 = vmul.f32 %v1541_v33, %v4545_v8 }
0x1bce   : > { %v1560_v39 = vadd.f32 %v1553_v29, %v1548_v49 }
0x1bcf   : > { %v1559_v42 = vadd.f32 %v4554_v11, %v1543_v35 }
0x1bd1   : > { %v1561_v32 = vadd.f32 %v1560_v39, %v1559_v42 }
0x1bd5   : > { %v1556_v51 = vpop.permute.xlu1 %1555 }
0x1bd6   : > { %v1558_v57 = vmul.f32 %v1556_v51, %v4557_v13 }
0x1bd8   : > { %v1562_v41 = vadd.f32 %v1561_v32, %v1558_v57 }
0x1bda   : > { %3864 = vtanh.f32 %v1562_v41 }
0x1be0   : > { %v3865_v2 = vpop.eup %3864 }
0x1be1   : > { %v1572_v43 = vmul.f32 %v3865_v2, %v4566_v24  ;;  %v1568_v3 = vmul.f32 %v3865_v2, %v4578_v31  ;;  %v1564_v54 = vmul.f32 %v3865_v2, %v4568_v25  ;;  %v1576_v56 = vmul.f32 %v3865_v2, %v4593_v34 }
0x1be3   : > { %v1573_v36 = vsel %vm88_vm1, %v1572_v43, 0.0  ;;  %v1569_v60 = vsel %vm88_vm1, %v1568_v3, 0.0  ;;  %v1565_v37 = vsel %vm88_vm1, %v1564_v54, 0.0  ;;  %v1577_v0 = vsel %vm88_vm1, %v1576_v56, 0.0 }
0x1be4   : > { %1574 = vadd.xlane.f32.xlu0 %v1573_v36  ;;  %1570 = vadd.xlane.f32.xlu1 %v1569_v60 }
0x1be5   : > { %1566 = vadd.xlane.f32.xlu2 %v1565_v37 }
0x1bed   : > { %1578 = vadd.xlane.f32.xlu2 %v1577_v0 }
0x1c57   : > { %v1571_v20 = vpop.xlane.xlu1 %1570  ;;  %v1575_v52 = vpop.xlane.xlu0 %1574 }
0x1c58   : > { %v1567_v45 = vpop.xlane.xlu2 %1566 }
0x1c59   : > { %v1580_v6 = vsel %vm104_vm2, %v1567_v45, %v1571_v20  ;;  %v1642_v20 = vmul.f32 0.091145836, %v5436_v63 }
0x1c5a   : > { %v1581_v62 = vsel %vm106_vm3, %v1580_v6, %v1575_v52 }
0x1c60   : > { %v1579_v48 = vpop.xlane.xlu2 %1578 }
0x1c61   : > { %v1582_v19 = vsel %vm108_vm4, %v1581_v62, %v1579_v48  ;;  %v1643_v48 = vadd.f32 %v4336_v47, %v1642_v20 }
0x1c62   : > { %v1583_v4 = vadd.f32 %v4601_v40, %v1582_v19 }
0x1c63   : > { %v1647_v12 = vadd.f32 %v5519_v50, %v1643_v48 }
0x1c64   : > { %v1584_v58 = vmul.f32 %v1583_v4, %v5432_v61 }
0x1c66   : > { %v1592_v17 = vmul.f32 -0.27353132, %v1584_v58  ;;  %v1703_v27 = vmul.f32 -0.0508638, %v1584_v58  ;;  %v1648_v19 = vmul.f32 -0.3223762, %v1584_v58 }
0x1c68   : > { %v1593_v21 = vadd.f32 %v1592_v17, %v1591_v30  ;;  %v1704_v15 = vadd.f32 %v1703_v27, %v1702_v18 }
0x1c6a   : > { %v1594_v7 = vadd.f32 %v1593_v21, %v1590_v22  ;;  %v5548_v14 = vadd.f32 %v1704_v15, %v1701_v28 }
0x1c6c   : > { %1607 = vperm.xlu0 %3853, %v1594_v7   ;;  %1602 = vperm.xlu2 %3852, %v1594_v7  }
0x1c6d   : > { %1597 = vperm.xlu1 %3851, %v1594_v7  }
0x1c75   : > { %3854 = vset.pattern.permute.xlu1 %v4469_v44 }
0x1c76   : > { %1612 = vperm.xlu1 %3854, %v1594_v7  }
0x1c7e   : > { %3855 = vset.pattern.permute.xlu1 %v4466_v26 }
0x1cc6   : > { %v1603_v33 = vpop.permute.xlu2 %1602 }
0x1cc7   : > { %v1605_v16 = vmul.f32 %v1603_v33, %v4549_v10 }
0x1cde   : > { %v1608_v23 = vpop.permute.xlu0 %1607 }
0x1cdf   : > { %v1598_v53 = vpop.permute.xlu1 %1597  ;;  %v1610_v55 = vmul.f32 %v1608_v23, %v4547_v9 }
0x1ce0   : > { %v1600_v38 = vmul.f32 %v1598_v53, %v4545_v8 }
0x1ce1   : > { %v1617_v49 = vadd.f32 %v1610_v55, %v1605_v16 }
0x1ce2   : > { %v1616_v35 = vadd.f32 %v4554_v11, %v1600_v38 }
0x1ce4   : > { %v1618_v39 = vadd.f32 %v1617_v49, %v1616_v35 }
0x1ce8   : > { %v1613_v29 = vpop.permute.xlu1 %1612 }
0x1ce9   : > { %v1615_v42 = vmul.f32 %v1613_v29, %v4557_v13  ;;  %v1710_v29 = vand.u32 2147483647, %v4336_v47 }
0x1ceb   : > { %v1619_v51 = vadd.f32 %v1618_v39, %v1615_v42 }
0x1ced   : > { %3866 = vtanh.f32 %v1619_v51 }
0x1cf3   : > { %v3867_v32 = vpop.eup %3866 }
0x1cf4   : > { %v1629_v26 = vmul.f32 %v3867_v32, %v4566_v24  ;;  %v1625_v57 = vmul.f32 %v3867_v32, %v4578_v31  ;;  %v1621_v41 = vmul.f32 %v3867_v32, %v4568_v25  ;;  %v1633_v54 = vmul.f32 %v3867_v32, %v4593_v34 }
0x1cf6   : > { %v1630_v2 = vsel %vm88_vm1, %v1629_v26, 0.0  ;;  %v1626_v43 = vsel %vm88_vm1, %v1625_v57, 0.0  ;;  %v1622_v3 = vsel %vm88_vm1, %v1621_v41, 0.0  ;;  %v1634_v36 = vsel %vm88_vm1, %v1633_v54, 0.0 }
0x1cf7   : > { %1631 = vadd.xlane.f32.xlu0 %v1630_v2  ;;  %1627 = vadd.xlane.f32.xlu1 %v1626_v43 }
0x1cf8   : > { %1623 = vadd.xlane.f32.xlu2 %v1622_v3 }
0x1d00   : > { %1635 = vadd.xlane.f32.xlu2 %v1634_v36 }
0x1d6a   : > { %v1628_v37 = vpop.xlane.xlu1 %1627  ;;  %v1632_v56 = vpop.xlane.xlu0 %1631 }
0x1d6b   : > { %v1624_v60 = vpop.xlane.xlu2 %1623 }
0x1d6c   : > { %v1637_v0 = vsel %vm104_vm2, %v1624_v60, %v1628_v37 }
0x1d6d   : > { %v1638_v45 = vsel %vm106_vm3, %v1637_v0, %v1632_v56 }
0x1d73   : > { %v1636_v52 = vpop.xlane.xlu2 %1635 }
0x1d74   : > { %v1639_v6 = vsel %vm108_vm4, %v1638_v45, %v1636_v52 }
0x1d75   : > { %v1640_v62 = vadd.f32 %v4601_v40, %v1639_v6 }
0x1d77   : > { %v1641_v1 = vmul.f32 %v1640_v62, %v5432_v61 }
0x1d79   : > { %v1649_v4 = vmul.f32 0.13095239, %v1641_v1  ;;  %v1706_v6 = vmul.f32 0.041904762, %v1641_v1 }
0x1d7b   : > { %v1650_v59 = vadd.f32 %v1649_v4, %v1648_v19 }
0x1d7d   : > { %v5573_v5 = vadd.f32 %v1650_v59, %v1647_v12 }
0x1d7f   : > { %1664 = vperm.xlu0 %3853, %v5573_v5   ;;  %1659 = vperm.xlu2 %3852, %v5573_v5   ;;  %v1711_v39 = vand.u32 2147483647, %v5573_v5 }
0x1d80   : > { %1654 = vperm.xlu1 %3855, %v5573_v5  }
0x1d81   : > { %v1712_v42 = vmax.f32 %v1710_v29, %v1711_v39 }
0x1d83   : > { %v1713_v51 = vmul.f32 1e-06, %v1712_v42 }
0x1d85   : > { %v1714_v32 = vadd.f32 1e-07, %v1713_v51 }
0x1d87   : > { %3857 = vset.pattern.permute.xlu0 %v4469_v44  ;;  %v1726_v52 = vand.u32 2147483648, %v1714_v32  ;;  %vm1720_vm10 = vweird.f32 %v1714_v32  ;;  %v1724_v48 = vand.u32 2147483647, %v1714_v32 }
0x1d88   : > { %3856 = vset.pattern.permute.xlu1 %v4469_v44 }
0x1d89   : > { %1669 = vperm.xlu1 %3856, %v5573_v5   ;;  %v1727_v12 = vor.u32 1.1754944e-38, %v1726_v52  ;;  %vm1725_vm12 = vcmp.eq.f32.partialorder %v1724_v48, 8.507059e+37 }
0x1dd9   : > { %v1660_v30 = vpop.permute.xlu2 %1659 }
0x1dda   : > { %v1662_v27 = vmul.f32 %v1660_v30, %v4549_v10 }
0x1df1   : > { %v1665_v63 = vpop.permute.xlu0 %1664 }
0x1df2   : > { %v1655_v58 = vpop.permute.xlu1 %1654  ;;  %v1667_v50 = vmul.f32 %v1665_v63, %v4547_v9 }
0x1df3   : > { %v1657_v17 = vmul.f32 %v1655_v58, %v4545_v8 }
0x1df4   : > { %v1674_v18 = vadd.f32 %v1667_v50, %v1662_v27 }
0x1df5   : > { %v1673_v21 = vadd.f32 %v4554_v11, %v1657_v17 }
0x1df7   : > { %v1675_v28 = vadd.f32 %v1674_v18, %v1673_v21 }
0x1dfb   : > { %v1670_v22 = vpop.permute.xlu1 %1669 }
0x1dfc   : > { %v1672_v15 = vmul.f32 %v1670_v22, %v4557_v13 }
0x1dfe   : > { %v1676_v7 = vadd.f32 %v1675_v28, %v1672_v15 }
0x1e00   : > { %3868 = vtanh.f32 %v1676_v7 }
0x1e01   : > { %3870 = vrcp.f32 %v1714_v32 }
0x1e06   : > { %v3869_v44 = vpop.eup %3868 }
0x1e07   : > { %v1686_v23 = vmul.f32 %v3869_v44, %v4566_v24  ;;  %v1682_v53 = vmul.f32 %v3869_v44, %v4578_v31  ;;  %v1678_v33 = vmul.f32 %v3869_v44, %v4568_v25  ;;  %v1690_v49 = vmul.f32 %v3869_v44, %v4593_v34  ;;  %v3871_v26 = vpop.eup %3870 }
0x1e08   : > { %v1716_v41 = vmul.f32 %v3871_v26, %v1714_v32  ;;  %vm1721_vm9 = vweird.f32 %v3871_v26 }
0x1e09   : > { %v1687_v55 = vsel %vm88_vm1, %v1686_v23, 0.0  ;;  %v1683_v38 = vsel %vm88_vm1, %v1682_v53, 0.0  ;;  %v1679_v16 = vsel %vm88_vm1, %v1678_v33, 0.0  ;;  %v1691_v35 = vsel %vm88_vm1, %v1690_v49, 0.0  ;;  %vm1722_vm11 = vmor %vm1720_vm10, %vm1721_vm9 }
0x1e0a   : > { %1688 = vadd.xlane.f32.xlu0 %v1687_v55  ;;  %1684 = vadd.xlane.f32.xlu1 %v1683_v38  ;;  %v1717_v43 = vsub.f32 1.0, %v1716_v41 }
0x1e0b   : > { %1680 = vadd.xlane.f32.xlu2 %v1679_v16 }
0x1e0c   : > { %v1718_v37 = vmul.f32 %v3871_v26, %v1717_v43 }
0x1e0e   : > { %v1719_v20 = vadd.f32 %v3871_v26, %v1718_v37 }
0x1e10   : > { %v1723_v4 = vsel %vm1722_vm11, %v3871_v26, %v1719_v20 }
0x1e11   : > { %v1728_v63 = vsel %vm1725_vm12, %v1727_v12, %v1723_v4 }
0x1e13   : > { %1692 = vadd.xlane.f32.xlu2 %v1691_v35 }
0x1e7d   : > { %v1685_v2 = vpop.xlane.xlu1 %1684  ;;  %v1689_v3 = vpop.xlane.xlu0 %1688 }
0x1e7e   : > { %v1681_v57 = vpop.xlane.xlu2 %1680 }
0x1e7f   : > { %v1694_v54 = vsel %vm104_vm2, %v1681_v57, %v1685_v2 }
0x1e80   : > { %v1695_v36 = vsel %vm106_vm3, %v1694_v54, %v1689_v3 }
0x1e86   : > { %v1693_v60 = vpop.xlane.xlu2 %1692 }
0x1e87   : > { %v1696_v56 = vsel %vm108_vm4, %v1695_v36, %v1693_v60 }
0x1e88   : > { %v1697_v0 = vadd.f32 %v4601_v40, %v1696_v56 }
0x1e8a   : > { %v1698_v45 = vmul.f32 %v1697_v0, %v5432_v61 }
0x1e8c   : > { %v1707_v62 = vmul.f32 -0.025, %v1698_v45 }
0x1e8e   : > { %v1708_v19 = vadd.f32 %v1707_v62, %v1706_v6 }
0x1e90   : > { %v1709_v59 = vadd.f32 %v1708_v19, %v5548_v14 }
0x1e92   : > { %v1729_v58 = vmul.f32 %v1728_v63, %v1709_v59 }
0x1e94   : > { %v1730_v30 = vmul.f32 %v1729_v58, %v1729_v58 }
0x1e96   : > { %v1731_v61 = vsel %vm55_vm0, %v1730_v30, 0.0 }
0x1e97   : > { %1732 = vadd.xlane.f32.xlu2 %v1731_v61 }
0x1f0a   : > { %v1733_v50 = vpop.xlane.xlu2 %1732 }
0x1f0b   : > { %v1734_v17 = vrot.slane %v1733_v50, 4 }
0x1f0d   : > { %v1735_v1 = vadd.f32 %v1734_v17, %v1733_v50 }
0x1f0f   : > { %v1736_v27 = vrot.slane %v1735_v1, 2 }
0x1f11   : > { %v1737_v18 = vadd.f32 %v1736_v27, %v1735_v1 }
0x1f13   : > { %v1738_v21 = vrot.slane %v1737_v18, 1 }
0x1f15   : > { %v1739_v22 = vadd.f32 %v1738_v21, %v1737_v18 }
0x1f17   : > { %3203 = vpush %v1739_v22 }
0x1f48   : > { %s3204_s16 = spop %3203 }
0x1f49   : > { %v1741_v14 = vstv %s3204_s16 }
0x1f4a   : > { %v1742_v28 = vmul.f32 0.03125, %v1741_v14 }
0x1f4c   : > { %v1743_v15 = vadd.f32 1e-24, %v1742_v28  ;;  %3205 = vpush %v1742_v28 }
0x1f4e   : > { %3872 = vlog2.f32 %v1743_v15 }
0x1f54   : > { %v3873_v7 = vpop.eup %3872 }
0x1f55   : > { %v1745_v44 = vmul.f32 0.6931472, %v3873_v7 }
0x1f57   : > { %v1746_v23 = vmul.f32 -0.1, %v1745_v44 }
0x1f59   : > { %v1747_v53 = vmul.f32 1.442695, %v1746_v23 }
0x1f5b   : > { %3874 = vpow2.f32 %v1747_v53 }
0x1f61   : > { %v3875_v33 = vpop.eup %3874 }
0x1f62   : > { %v1749_v55 = vmul.f32 0.9, %v3875_v33 }
0x1f64   : > { %3207 = vpush %v1749_v55 }
0x1f7d   : > { %s3206_s5 = spop %3205 }
0x1f7e   : > { %p1754_p2 = scmp.le.f32.partialorder %s3206_s5, 1.0 }
0x1f80   : > { %s6514_s17 = smov (!%p1754_p2, %s1755_s17), %s4340_s30 }
0x1f81   : > { %s1757_s18 = scalar_select %p1754_p2, 1, 0 }
0x1f82   : > { %s1366_s27 = ssub.f32 %s5381_s2, %s6514_s17  ;;  %s6474_s30 = smov %s6514_s17 }
0x1f83   : > { %v1758_v38 = vstv %s1757_s18 }
0x1f84   : > { %vm1759_vm13 = vcmp.eq.s32.totalorder %v1758_v38, 1  ;;  %p1367_p4 = scmp.gt.f32.partialorder %s1366_s27, %s1358_s7 }
0x1f85   : > { %v1760_v16 = vsel %vm1759_vm13, %v5573_v5, %v4336_v47   ;;  %v1761_v49 = vsel %vm1759_vm13, %v1697_v0, %v4328_v46  }
0x1f86   : > { %p1369_p5 = pnand %p1368_p3, %p1367_p4  ;;  %v6471_v46 = vmov %v1761_v49  ;;  %v6473_v47 = vmov %v1760_v16 }
0x1f87   :  { %v6475_v0 = vmov (%p1369_p5), %v1761_v49  ;;  %v6477_v45 = vmov (%p1369_p5), %v1760_v16 }
0x1f95   : > { %s3208_s19 = spop %3207 }
0x1f96   : > { %s1752_s21 = smax.f32 %s4470_s20, %s3208_s19 }
0x1f97   : > { %s1753_s24 = smin.f32 %s4471_s23, %s1752_s21  ;;  %1372 = sbr.rel (!%p1369_p5) target bundleno = 6154 (0x180a), region = 137 }
0x1f98   : > { %s1762_s25 = smul.f32 %s1753_s24, %s5429_s14 }
0x1f9a   : > { %s1764_s26 = smax.f32 %s1763_s22, %s1762_s25  }
0x1f9b   : > { %s6472_s4 = smov %s1764_s26  ;;  %s6476_s10 = smov (%p1369_p5), %s1764_s26 }
0x1f9c PF:  { %3172 = vst.msk [vmem:[%s6433_s6 + $0x20] sm:$0xff] %vm55_vm0, %v4352_v45  ;;  %s3173_s1 = sld [smem:[#allocation2 + $0x4]]   ;;  %v6478_v46 = vmov %v4344_v0  ;;  %v6480_v47 = vmov %v4352_v45  ;;  %v4352_v45 = vphi %v6469_v45, %v6477_v45   ;;  %s4348_s10 = sphi %s6468_s10, %s6476_s10   ;;  %v4344_v0 = vphi %v6467_v0, %v6475_v0  }
0x1f9d   :  { %s5642_s29 = sld [smem:[#allocation2 + $0x5]] }
0x1fa3   :  { %s5645_s30 = ssub.f32 %s5642_s29, %s3173_s1  ;;  %s1771_s2 = sand.u32 2147483647, %s5642_s29 }
0x1fa4   :  { %s5649_s3 = smax.f32 %s4447_s11, %s1771_s2 }
0x1fa5   :  { %s1773_s8 = smul.f32 1e-10, %s5649_s3  ;;  %s1774_s9 = smin.f32 %s4348_s10, %s5645_s30  }
0x1fa6   :  { %s6479_s7 = smov %s1774_s9 }
0x1fa7   :  { %p3104_p6 = scmp.gt.f32.partialorder %s5645_s30, %s1773_s8 }
0x1fa8   :  { %s5662_s4 = smov (%p3104_p6), 0  }
0x1fa9   :  { %3107 = sbr.rel (!%p3104_p6) target bundleno = 10048 (0x2740), region = 142 }
0x1fae LB: > { %v4472_v5 = vmov 0   ;;  %v4473_v35 = vmov 2   ;;  %s1788_s10 = ssub.f32 %s5642_s29, %s4372_s1  ;;  %v4474_v29 = vmov 1   ;;  %v4475_v26 = vmov 3   ;;  %s2180_s13 = sadd.s32 1, %s4356_s4   ;;  %s4372_s1 = sphi %s3173_s1, %s6485_s1   ;;  %v4368_v45 = vphi %v4352_v45, %v6484_v45   ;;  %s4364_s9 = sphi %s1774_s9, %s6483_s9   ;;  %v4360_v0 = vphi %v4344_v0, %v6482_v0   ;;  %s4356_s4 = sphi %s5662_s4, %s6481_s4  }
0x1faf   : > { %3876 = vset.pattern.permute.xlu0 %v4472_v5  ;;  %3878 = vset.pattern.permute.xlu1 %v4473_v35  ;;  %s4476_s18 = smov 0.2   ;;  %s2178_s20 = smul.f32 1e-06, %s5645_s30 }
0x1fb0   : > { %3881 = vset.pattern.permute.xlu2 %v4474_v29  ;;  %s5690_s12 = smin.f32 %s4364_s9, %s1788_s10  ;;  %s4477_s21 = smov 10.0  }
0x1fb1   : > { %v5693_v39 = vstv %s5690_s12  ;;  %s2170_s15 = sadd.f32 %s4372_s1, %s5690_s12  ;;  %p1783_p8 = scmp.lt.s32.totalorder %s2180_s13, 1000 }
0x1fb2   : > { %v5697_v42 = vmul.f32 %v4360_v0, %v5693_v39  ;;  %s6481_s4 = smov %s2180_s13 }
0x1fb4   : > { %v1792_v51 = vmul.f32 0.2, %v5697_v42  ;;  %v1841_v14 = vmul.f32 0.075, %v5697_v42 }
0x1fb6   : > { %v1793_v32 = vadd.f32 %v4368_v45, %v1792_v51 }
0x1fb8   : > { %1796 = vperm.xlu0 %3876, %v1793_v32   ;;  %1806 = vperm.xlu1 %3878, %v1793_v32  }
0x1fc0   : > { %3877 = vset.pattern.permute.xlu0 %v4474_v29  ;;  %3879 = vset.pattern.permute.xlu1 %v4475_v26 }
0x1fc1   : > { %1801 = vperm.xlu0 %3877, %v1793_v32   ;;  %1811 = vperm.xlu1 %3879, %v1793_v32  }
0x1fc9   : > { %3880 = vset.pattern.permute.xlu0 %v4472_v5  ;;  %3884 = vset.pattern.permute.xlu1 %v4472_v5 }
0x202a   : > { %v1797_v57 = vpop.permute.xlu0 %1796  ;;  %v1807_v41 = vpop.permute.xlu1 %1806 }
0x202b   : > { %v1799_v2 = vmul.f32 %v1797_v57, %v4545_v8  ;;  %v1809_v54 = vmul.f32 %v1807_v41, %v4547_v9 }
0x202d   : > { %v1815_v60 = vadd.f32 %v4554_v11, %v1799_v2 }
0x2033   : > { %v1802_v43 = vpop.permute.xlu0 %1801  ;;  %v1812_v3 = vpop.permute.xlu1 %1811 }
0x2034   : > { %v1804_v36 = vmul.f32 %v1802_v43, %v4549_v10  ;;  %v1814_v56 = vmul.f32 %v1812_v3, %v4557_v13 }
0x2036   : > { %v1816_v37 = vadd.f32 %v1809_v54, %v1804_v36 }
0x2038   : > { %v1817_v20 = vadd.f32 %v1816_v37, %v1815_v60 }
0x203a   : > { %v1818_v52 = vadd.f32 %v1817_v20, %v1814_v56 }
0x203c   : > { %3898 = vtanh.f32 %v1818_v52 }
0x2042   : > { %v3899_v6 = vpop.eup %3898 }
0x2043   : > { %v1828_v62 = vmul.f32 %v3899_v6, %v4566_v24  ;;  %v1820_v48 = vmul.f32 %v3899_v6, %v4568_v25  ;;  %v1824_v12 = vmul.f32 %v3899_v6, %v4578_v31  ;;  %v1832_v63 = vmul.f32 %v3899_v6, %v4593_v34 }
0x2045   : > { %v1829_v19 = vsel %vm88_vm1, %v1828_v62, 0.0  ;;  %v1821_v4 = vsel %vm88_vm1, %v1820_v48, 0.0  ;;  %v1825_v59 = vsel %vm88_vm1, %v1824_v12, 0.0  ;;  %v1833_v58 = vsel %vm88_vm1, %v1832_v63, 0.0 }
0x2046   : > { %1830 = vadd.xlane.f32.xlu1 %v1829_v19  ;;  %1822 = vadd.xlane.f32.xlu2 %v1821_v4  ;;  %v1892_v12 = vmul.f32 0.9777778, %v5697_v42 }
0x204e   : > { %1826 = vadd.xlane.f32.xlu2 %v1825_v59 }
0x2056   : > { %1834 = vadd.xlane.f32.xlu2 %v1833_v58 }
0x20b9   : > { %v1823_v30 = vpop.xlane.xlu2 %1822  ;;  %v1831_v17 = vpop.xlane.xlu1 %1830 }
0x20c1   : > { %v1827_v61 = vpop.xlane.xlu2 %1826 }
0x20c2   : > { %v1836_v50 = vsel %vm104_vm2, %v1823_v30, %v1827_v61  ;;  %v1893_v61 = vadd.f32 %v4368_v45, %v1892_v12 }
0x20c3   : > { %v1837_v1 = vsel %vm106_vm3, %v1836_v50, %v1831_v17 }
0x20c9   : > { %v1835_v27 = vpop.xlane.xlu2 %1834 }
0x20ca   : > { %v1838_v18 = vsel %vm108_vm4, %v1837_v1, %v1835_v27 }
0x20cb   : > { %v1839_v21 = vadd.f32 %v4601_v40, %v1838_v18 }
0x20cd   : > { %v1840_v22 = vmul.f32 %v1839_v21, %v5693_v39 }
0x20cf   : > { %v1842_v28 = vmul.f32 0.225, %v1840_v22  ;;  %v1894_v63 = vmul.f32 -3.7333333, %v1840_v22  ;;  %v1947_v58 = vmul.f32 -11.595794, %v1840_v22 }
0x20d0   : > { %v2002_v30 = vmul.f32 -10.757576, %v1840_v22 }
0x20d1   : > { %v1843_v15 = vadd.f32 %v1842_v28, %v1841_v14 }
0x20d3   : > { %v1844_v7 = vadd.f32 %v4368_v45, %v1843_v15 }
0x20d5   : > { %1852 = vperm.xlu2 %3881, %v1844_v7   ;;  %1847 = vperm.xlu0 %3880, %v1844_v7  }
0x20dd   : > { %3883 = vset.pattern.permute.xlu2 %v4475_v26  ;;  %3882 = vset.pattern.permute.xlu0 %v4473_v35 }
0x20de   : > { %1862 = vperm.xlu2 %3883, %v1844_v7   ;;  %1857 = vperm.xlu0 %3882, %v1844_v7  }
0x20e6   : > { %3885 = vset.pattern.permute.xlu2 %v4474_v29 }
0x212f   : > { %v1853_v23 = vpop.permute.xlu2 %1852 }
0x2130   : > { %v1855_v55 = vmul.f32 %v1853_v23, %v4549_v10 }
0x2138   : > { %v1863_v16 = vpop.permute.xlu2 %1862 }
0x2139   : > { %v1865_v47 = vmul.f32 %v1863_v16, %v4557_v13 }
0x2147   : > { %v1848_v44 = vpop.permute.xlu0 %1847 }
0x2148   : > { %v1850_v53 = vmul.f32 %v1848_v44, %v4545_v8 }
0x214a   : > { %v1866_v49 = vadd.f32 %v4554_v11, %v1850_v53 }
0x2150   : > { %v1858_v33 = vpop.permute.xlu0 %1857 }
0x2151   : > { %v1860_v38 = vmul.f32 %v1858_v33, %v4547_v9 }
0x2153   : > { %v1867_v46 = vadd.f32 %v1860_v38, %v1855_v55 }
0x2155   : > { %v1868_v51 = vadd.f32 %v1867_v46, %v1866_v49 }
0x2157   : > { %v1869_v32 = vadd.f32 %v1868_v51, %v1865_v47 }
0x2159   : > { %3900 = vtanh.f32 %v1869_v32 }
0x215f   : > { %v3901_v57 = vpop.eup %3900 }
0x2160   : > { %v1879_v41 = vmul.f32 %v3901_v57, %v4566_v24  ;;  %v1875_v2 = vmul.f32 %v3901_v57, %v4578_v31  ;;  %v1871_v43 = vmul.f32 %v3901_v57, %v4568_v25  ;;  %v1883_v60 = vmul.f32 %v3901_v57, %v4593_v34 }
0x2162   : > { %v1880_v3 = vsel %vm88_vm1, %v1879_v41, 0.0  ;;  %v1876_v54 = vsel %vm88_vm1, %v1875_v2, 0.0  ;;  %v1872_v36 = vsel %vm88_vm1, %v1871_v43, 0.0  ;;  %v1884_v37 = vsel %vm88_vm1, %v1883_v60, 0.0 }
0x2163   : > { %1881 = vadd.xlane.f32.xlu1 %v1880_v3  ;;  %1877 = vadd.xlane.f32.xlu2 %v1876_v54 }
0x2164   : > { %1873 = vadd.xlane.f32.xlu0 %v1872_v36 }
0x216b   : > { %1885 = vadd.xlane.f32.xlu1 %v1884_v37 }
0x21d6   : > { %v1882_v56 = vpop.xlane.xlu1 %1881  ;;  %v1878_v20 = vpop.xlane.xlu2 %1877 }
0x21d7   : > { %v1874_v52 = vpop.xlane.xlu0 %1873 }
0x21d8   : > { %v1887_v6 = vsel %vm104_vm2, %v1874_v52, %v1878_v20 }
0x21d9   : > { %v1888_v48 = vsel %vm106_vm3, %v1887_v6, %v1882_v56 }
0x21de   : > { %v1886_v62 = vpop.xlane.xlu1 %1885 }
0x21df   : > { %v1889_v19 = vsel %vm108_vm4, %v1888_v48, %v1886_v62  ;;  %v1945_v62 = vmul.f32 2.9525986, %v5697_v42 }
0x21e0   : > { %v1890_v4 = vadd.f32 %v4601_v40, %v1889_v19 }
0x21e1   : > { %v1946_v12 = vadd.f32 %v4368_v45, %v1945_v62 }
0x21e2   : > { %v5747_v59 = vmul.f32 %v1890_v4, %v5693_v39 }
0x21e4   : > { %v1895_v50 = vmul.f32 3.5555556, %v5747_v59  ;;  %v1948_v17 = vmul.f32 9.822893, %v5747_v59  ;;  %v2003_v1 = vmul.f32 8.906423, %v5747_v59 }
0x21e6   : > { %v1896_v27 = vadd.f32 %v1895_v50, %v1894_v63  ;;  %v1949_v18 = vadd.f32 %v1948_v17, %v1947_v58  ;;  %v5753_v21 = vadd.f32 %v2003_v1, %v2002_v30  ;;  %v2059_v63 = vmul.f32 0.4492363, %v5747_v59 }
0x21e8   : > { %v1897_v14 = vadd.f32 %v1896_v27, %v1893_v61 }
0x21ea   : > { %1910 = vperm.xlu0 %3882, %v1897_v14   ;;  %1905 = vperm.xlu2 %3885, %v1897_v14  }
0x21eb   : > { %1900 = vperm.xlu1 %3884, %v1897_v14  }
0x21f2   : > { %3888 = vset.pattern.permute.xlu0 %v4474_v29  ;;  %3889 = vset.pattern.permute.xlu2 %v4473_v35 }
0x21f3   : > { %3886 = vset.pattern.permute.xlu1 %v4475_v26 }
0x21f4   : > { %1915 = vperm.xlu1 %3886, %v1897_v14  }
0x21fc   : > { %3887 = vset.pattern.permute.xlu1 %v4472_v5 }
0x2244   : > { %v1906_v15 = vpop.permute.xlu2 %1905 }
0x2245   : > { %v1908_v23 = vmul.f32 %v1906_v15, %v4549_v10 }
0x225c   : > { %v1911_v22 = vpop.permute.xlu0 %1910 }
0x225d   : > { %v1901_v28 = vpop.permute.xlu1 %1900  ;;  %v1913_v7 = vmul.f32 %v1911_v22, %v4547_v9 }
0x225e   : > { %v1903_v44 = vmul.f32 %v1901_v28, %v4545_v8 }
0x225f   : > { %v1920_v53 = vadd.f32 %v1913_v7, %v1908_v23 }
0x2260   : > { %v1919_v33 = vadd.f32 %v4554_v11, %v1903_v44 }
0x2262   : > { %v1921_v38 = vadd.f32 %v1920_v53, %v1919_v33 }
0x2266   : > { %v1916_v55 = vpop.permute.xlu1 %1915 }
0x2267   : > { %v1918_v16 = vmul.f32 %v1916_v55, %v4557_v13 }
0x2269   : > { %v1922_v49 = vadd.f32 %v1921_v38, %v1918_v16 }
0x226b   : > { %3902 = vtanh.f32 %v1922_v49 }
0x2271   : > { %v3903_v46 = vpop.eup %3902 }
0x2272   : > { %v1932_v47 = vmul.f32 %v3903_v46, %v4566_v24  ;;  %v1928_v51 = vmul.f32 %v3903_v46, %v4578_v31  ;;  %v1924_v32 = vmul.f32 %v3903_v46, %v4568_v25  ;;  %v1936_v43 = vmul.f32 %v3903_v46, %v4593_v34 }
0x2274   : > { %v1933_v57 = vsel %vm88_vm1, %v1932_v47, 0.0  ;;  %v1929_v41 = vsel %vm88_vm1, %v1928_v51, 0.0  ;;  %v1925_v2 = vsel %vm88_vm1, %v1924_v32, 0.0  ;;  %v1937_v3 = vsel %vm88_vm1, %v1936_v43, 0.0 }
0x2275   : > { %1934 = vadd.xlane.f32.xlu2 %v1933_v57  ;;  %1930 = vadd.xlane.f32.xlu0 %v1929_v41  ;;  %v2000_v43 = vmul.f32 2.8462753, %v5697_v42 }
0x2276   : > { %1926 = vadd.xlane.f32.xlu1 %v1925_v2 }
0x227e   : > { %1938 = vadd.xlane.f32.xlu1 %v1937_v3 }
0x22e8   : > { %v1931_v36 = vpop.xlane.xlu0 %1930  ;;  %v1935_v60 = vpop.xlane.xlu2 %1934 }
0x22e9   : > { %v1927_v54 = vpop.xlane.xlu1 %1926 }
0x22ea   : > { %v1940_v37 = vsel %vm104_vm2, %v1927_v54, %v1931_v36 }
0x22eb   : > { %v1941_v56 = vsel %vm106_vm3, %v1940_v37, %v1935_v60  ;;  %v2001_v60 = vadd.f32 %v4368_v45, %v2000_v43  ;;  %v2114_v37 = vmul.f32 0.0012326388, %v5697_v42 }
0x22f1   : > { %v1939_v20 = vpop.xlane.xlu1 %1938 }
0x22f2   : > { %v1942_v52 = vsel %vm108_vm4, %v1941_v56, %v1939_v20  ;;  %v2115_v56 = vmul.f32 -0.0042527704, %v5747_v59 }
0x22f3   : > { %v1943_v6 = vadd.f32 %v4601_v40, %v1942_v52 }
0x22f5   : > { %v1944_v48 = vmul.f32 %v1943_v6, %v5693_v39 }
0x22f7   : > { %v1950_v19 = vmul.f32 -0.29080933, %v1944_v48  ;;  %v2060_v4 = vmul.f32 0.6510417, %v1944_v48  ;;  %v2006_v20 = vmul.f32 0.2784091, %v1944_v48 }
0x22f8   : > { %v2117_v62 = vmul.f32 0.036979165, %v1944_v48 }
0x22f9   : > { %v1951_v58 = vadd.f32 %v1950_v19, %v1949_v18  ;;  %v5780_v30 = vadd.f32 %v2060_v4, %v2059_v63  ;;  %v2005_v4 = vadd.f32 %v5753_v21, %v2001_v60 }
0x22fb   : > { %v1952_v61 = vadd.f32 %v1951_v58, %v1946_v12  ;;  %v2116_v12 = vadd.f32 %v2115_v56, %v2114_v37 }
0x22fd   : > { %1965 = vperm.xlu2 %3889, %v1952_v61   ;;  %1960 = vperm.xlu0 %3888, %v1952_v61  }
0x22fe   : > { %1955 = vperm.xlu1 %3887, %v1952_v61  }
0x2305   : > { %3892 = vset.pattern.permute.xlu2 %v4474_v29  ;;  %3893 = vset.pattern.permute.xlu0 %v4473_v35 }
0x2306   : > { %3890 = vset.pattern.permute.xlu1 %v4475_v26 }
0x2307   : > { %1970 = vperm.xlu1 %3890, %v1952_v61  }
0x230f   : > { %3891 = vset.pattern.permute.xlu1 %v4472_v5 }
0x2357   : > { %v1966_v1 = vpop.permute.xlu2 %1965 }
0x2358   : > { %v1968_v14 = vmul.f32 %v1966_v1, %v4547_v9 }
0x236f   : > { %v1961_v50 = vpop.permute.xlu0 %1960 }
0x2370   : > { %v1956_v17 = vpop.permute.xlu1 %1955  ;;  %v1963_v27 = vmul.f32 %v1961_v50, %v4549_v10 }
0x2371   : > { %v1958_v18 = vmul.f32 %v1956_v17, %v4545_v8 }
0x2372   : > { %v1975_v22 = vadd.f32 %v1968_v14, %v1963_v27 }
0x2373   : > { %v1974_v28 = vadd.f32 %v4554_v11, %v1958_v18 }
0x2375   : > { %v1976_v15 = vadd.f32 %v1975_v22, %v1974_v28 }
0x2379   : > { %v1971_v29 = vpop.permute.xlu1 %1970 }
0x237a   : > { %v1973_v35 = vmul.f32 %v1971_v29, %v4557_v13 }
0x237c   : > { %v1977_v7 = vadd.f32 %v1976_v15, %v1973_v35 }
0x237e   : > { %3904 = vtanh.f32 %v1977_v7 }
0x2384   : > { %v3905_v44 = vpop.eup %3904 }
0x2385   : > { %v1987_v23 = vmul.f32 %v3905_v44, %v4566_v24  ;;  %v1983_v53 = vmul.f32 %v3905_v44, %v4578_v31  ;;  %v1979_v33 = vmul.f32 %v3905_v44, %v4568_v25  ;;  %v1991_v49 = vmul.f32 %v3905_v44, %v4593_v34 }
0x2387   : > { %v1988_v55 = vsel %vm88_vm1, %v1987_v23, 0.0  ;;  %v1984_v38 = vsel %vm88_vm1, %v1983_v53, 0.0  ;;  %v1980_v16 = vsel %vm88_vm1, %v1979_v33, 0.0  ;;  %v1992_v46 = vsel %vm88_vm1, %v1991_v49, 0.0 }
0x2388   : > { %1989 = vadd.xlane.f32.xlu0 %v1988_v55  ;;  %1985 = vadd.xlane.f32.xlu1 %v1984_v38 }
0x2389   : > { %1981 = vadd.xlane.f32.xlu2 %v1980_v16 }
0x2391   : > { %1993 = vadd.xlane.f32.xlu2 %v1992_v46 }
0x23fb   : > { %v1986_v51 = vpop.xlane.xlu1 %1985  ;;  %v1990_v32 = vpop.xlane.xlu0 %1989 }
0x23fc   : > { %v1982_v47 = vpop.xlane.xlu2 %1981 }
0x23fd   : > { %v1995_v57 = vsel %vm104_vm2, %v1982_v47, %v1986_v51  ;;  %v2057_v51 = vmul.f32 0.091145836, %v5697_v42 }
0x23fe   : > { %v1996_v41 = vsel %vm106_vm3, %v1995_v57, %v1990_v32 }
0x2404   : > { %v1994_v2 = vpop.xlane.xlu2 %1993 }
0x2405   : > { %v1997_v3 = vsel %vm108_vm4, %v1996_v41, %v1994_v2  ;;  %v2058_v2 = vadd.f32 %v4368_v45, %v2057_v51 }
0x2406   : > { %v1998_v54 = vadd.f32 %v4601_v40, %v1997_v3 }
0x2407   : > { %v2062_v60 = vadd.f32 %v5780_v30, %v2058_v2 }
0x2408   : > { %v1999_v36 = vmul.f32 %v1998_v54, %v5693_v39 }
0x240a   : > { %v2007_v52 = vmul.f32 -0.27353132, %v1999_v36  ;;  %v2118_v6 = vmul.f32 -0.0508638, %v1999_v36  ;;  %v2063_v3 = vmul.f32 -0.3223762, %v1999_v36 }
0x240c   : > { %v2008_v19 = vadd.f32 %v2007_v52, %v2006_v20  ;;  %v2119_v63 = vadd.f32 %v2118_v6, %v2117_v62 }
0x240e   : > { %v2009_v58 = vadd.f32 %v2008_v19, %v2005_v4  ;;  %v5809_v61 = vadd.f32 %v2119_v63, %v2116_v12 }
0x2410   : > { %2022 = vperm.xlu0 %3893, %v2009_v58   ;;  %2017 = vperm.xlu2 %3892, %v2009_v58  }
0x2411   : > { %2012 = vperm.xlu1 %3891, %v2009_v58  }
0x2419   : > { %3894 = vset.pattern.permute.xlu1 %v4475_v26 }
0x241a   : > { %2027 = vperm.xlu1 %3894, %v2009_v58  }
0x2422   : > { %3895 = vset.pattern.permute.xlu1 %v4472_v5 }
0x246a   : > { %v2018_v17 = vpop.permute.xlu2 %2017 }
0x246b   : > { %v2020_v1 = vmul.f32 %v2018_v17, %v4549_v10 }
0x2482   : > { %v2023_v59 = vpop.permute.xlu0 %2022 }
0x2483   : > { %v2013_v50 = vpop.permute.xlu1 %2012  ;;  %v2025_v48 = vmul.f32 %v2023_v59, %v4547_v9 }
0x2484   : > { %v2015_v21 = vmul.f32 %v2013_v50, %v4545_v8 }
0x2485   : > { %v2032_v27 = vadd.f32 %v2025_v48, %v2020_v1 }
0x2486   : > { %v2031_v18 = vadd.f32 %v4554_v11, %v2015_v21 }
0x2488   : > { %v2033_v22 = vadd.f32 %v2032_v27, %v2031_v18 }
0x248c   : > { %v2028_v14 = vpop.permute.xlu1 %2027 }
0x248d   : > { %v2030_v28 = vmul.f32 %v2028_v14, %v4557_v13  ;;  %v2125_v14 = vand.u32 2147483647, %v4368_v45 }
0x248f   : > { %v2034_v29 = vadd.f32 %v2033_v22, %v2030_v28 }
0x2491   : > { %3906 = vtanh.f32 %v2034_v29 }
0x2497   : > { %v3907_v15 = vpop.eup %3906 }
0x2498   : > { %v2044_v5 = vmul.f32 %v3907_v15, %v4566_v24  ;;  %v2040_v35 = vmul.f32 %v3907_v15, %v4578_v31  ;;  %v2036_v7 = vmul.f32 %v3907_v15, %v4568_v25  ;;  %v2048_v33 = vmul.f32 %v3907_v15, %v4593_v34 }
0x249a   : > { %v2045_v44 = vsel %vm88_vm1, %v2044_v5, 0.0  ;;  %v2041_v23 = vsel %vm88_vm1, %v2040_v35, 0.0  ;;  %v2037_v53 = vsel %vm88_vm1, %v2036_v7, 0.0  ;;  %v2049_v55 = vsel %vm88_vm1, %v2048_v33, 0.0 }
0x249b   : > { %2046 = vadd.xlane.f32.xlu0 %v2045_v44  ;;  %2042 = vadd.xlane.f32.xlu1 %v2041_v23 }
0x249c   : > { %2038 = vadd.xlane.f32.xlu2 %v2037_v53 }
0x24a4   : > { %2050 = vadd.xlane.f32.xlu2 %v2049_v55 }
0x250e   : > { %v2043_v16 = vpop.xlane.xlu1 %2042  ;;  %v2047_v49 = vpop.xlane.xlu0 %2046 }
0x250f   : > { %v2039_v38 = vpop.xlane.xlu2 %2038 }
0x2510   : > { %v2052_v46 = vsel %vm104_vm2, %v2039_v38, %v2043_v16 }
0x2511   : > { %v2053_v47 = vsel %vm106_vm3, %v2052_v46, %v2047_v49 }
0x2517   : > { %v2051_v32 = vpop.xlane.xlu2 %2050 }
0x2518   : > { %v2054_v57 = vsel %vm108_vm4, %v2053_v47, %v2051_v32 }
0x2519   : > { %v2055_v41 = vadd.f32 %v4601_v40, %v2054_v57 }
0x251b   : > { %v2056_v43 = vmul.f32 %v2055_v41, %v5693_v39 }
0x251d   : > { %v2064_v54 = vmul.f32 0.13095239, %v2056_v43  ;;  %v2121_v57 = vmul.f32 0.041904762, %v2056_v43 }
0x251f   : > { %v2065_v37 = vadd.f32 %v2064_v54, %v2063_v3 }
0x2521   : > { %v5834_v56 = vadd.f32 %v2065_v37, %v2062_v60 }
0x2523   : > { %2079 = vperm.xlu0 %3893, %v5834_v56   ;;  %2074 = vperm.xlu2 %3892, %v5834_v56   ;;  %v2126_v22 = vand.u32 2147483647, %v5834_v56 }
0x2524   : > { %2069 = vperm.xlu1 %3895, %v5834_v56  }
0x2525   : > { %v2127_v28 = vmax.f32 %v2125_v14, %v2126_v22 }
0x2527   : > { %v2128_v29 = vmul.f32 1e-06, %v2127_v28 }
0x2529   : > { %v2129_v15 = vadd.f32 1e-07, %v2128_v29 }
0x252b   : > { %3897 = vset.pattern.permute.xlu0 %v4475_v26  ;;  %v2141_v32 = vand.u32 2147483648, %v2129_v15  ;;  %vm2135_vm15 = vweird.f32 %v2129_v15  ;;  %v2139_v2 = vand.u32 2147483647, %v2129_v15 }
0x252c   : > { %3896 = vset.pattern.permute.xlu1 %v4475_v26 }
0x252d   : > { %2084 = vperm.xlu1 %3896, %v5834_v56   ;;  %v2142_v60 = vor.u32 1.1754944e-38, %v2141_v32  ;;  %vm2140_vm6 = vcmp.eq.f32.partialorder %v2139_v2, 8.507059e+37 }
0x257d   : > { %v2075_v20 = vpop.permute.xlu2 %2074 }
0x257e   : > { %v2077_v6 = vmul.f32 %v2075_v20, %v4549_v10 }
0x2595   : > { %v2080_v42 = vpop.permute.xlu0 %2079 }
0x2596   : > { %v2070_v36 = vpop.permute.xlu1 %2069  ;;  %v2082_v30 = vmul.f32 %v2080_v42, %v4547_v9 }
0x2597   : > { %v2072_v52 = vmul.f32 %v2070_v36, %v4545_v8 }
0x2598   : > { %v2089_v62 = vadd.f32 %v2082_v30, %v2077_v6 }
0x2599   : > { %v2088_v19 = vadd.f32 %v4554_v11, %v2072_v52 }
0x259b   : > { %v2090_v12 = vadd.f32 %v2089_v62, %v2088_v19 }
0x259f   : > { %v2085_v4 = vpop.permute.xlu1 %2084 }
0x25a0   : > { %v2087_v63 = vmul.f32 %v2085_v4, %v4557_v13 }
0x25a2   : > { %v2091_v58 = vadd.f32 %v2090_v12, %v2087_v63 }
0x25a4   : > { %3908 = vtanh.f32 %v2091_v58 }
0x25a5   : > { %3910 = vrcp.f32 %v2129_v15 }
0x25aa   : > { %v3909_v26 = vpop.eup %3908 }
0x25ab   : > { %v2101_v59 = vmul.f32 %v3909_v26, %v4566_v24  ;;  %v2097_v50 = vmul.f32 %v3909_v26, %v4578_v31  ;;  %v2093_v17 = vmul.f32 %v3909_v26, %v4568_v25  ;;  %v2105_v27 = vmul.f32 %v3909_v26, %v4593_v34  ;;  %v3911_v5 = vpop.eup %3910 }
0x25ac   : > { %v2131_v7 = vmul.f32 %v3911_v5, %v2129_v15  ;;  %vm2136_vm14 = vweird.f32 %v3911_v5 }
0x25ad   : > { %v2102_v48 = vsel %vm88_vm1, %v2101_v59, 0.0  ;;  %v2098_v21 = vsel %vm88_vm1, %v2097_v50, 0.0  ;;  %v2094_v1 = vsel %vm88_vm1, %v2093_v17, 0.0  ;;  %v2106_v18 = vsel %vm88_vm1, %v2105_v27, 0.0  ;;  %vm2137_vm5 = vmor %vm2135_vm15, %vm2136_vm14 }
0x25ae   : > { %2103 = vadd.xlane.f32.xlu0 %v2102_v48  ;;  %2099 = vadd.xlane.f32.xlu1 %v2098_v21  ;;  %v2132_v23 = vsub.f32 1.0, %v2131_v7 }
0x25af   : > { %2095 = vadd.xlane.f32.xlu2 %v2094_v1 }
0x25b0   : > { %v2133_v16 = vmul.f32 %v3911_v5, %v2132_v23 }
0x25b2   : > { %v2134_v51 = vadd.f32 %v3911_v5, %v2133_v16 }
0x25b4   : > { %v2138_v54 = vsel %vm2137_vm5, %v3911_v5, %v2134_v51 }
0x25b5   : > { %v2143_v42 = vsel %vm2140_vm6, %v2142_v60, %v2138_v54 }
0x25b7   : > { %2107 = vadd.xlane.f32.xlu2 %v2106_v18 }
0x2621   : > { %v2100_v44 = vpop.xlane.xlu1 %2099  ;;  %v2104_v53 = vpop.xlane.xlu0 %2103 }
0x2622   : > { %v2096_v35 = vpop.xlane.xlu2 %2095 }
0x2623   : > { %v2109_v33 = vsel %vm104_vm2, %v2096_v35, %v2100_v44 }
0x2624   : > { %v2110_v55 = vsel %vm106_vm3, %v2109_v33, %v2104_v53 }
0x262a   : > { %v2108_v38 = vpop.xlane.xlu2 %2107 }
0x262b   : > { %v2111_v49 = vsel %vm108_vm4, %v2110_v55, %v2108_v38 }
0x262c   : > { %v2112_v46 = vadd.f32 %v4601_v40, %v2111_v49 }
0x262e   : > { %v2113_v47 = vmul.f32 %v2112_v46, %v5693_v39 }
0x2630   : > { %v2122_v41 = vmul.f32 -0.025, %v2113_v47 }
0x2632   : > { %v2123_v3 = vadd.f32 %v2122_v41, %v2121_v57 }
0x2634   : > { %v2124_v37 = vadd.f32 %v2123_v3, %v5809_v61 }
0x2636   : > { %v2144_v36 = vmul.f32 %v2143_v42, %v2124_v37 }
0x2638   : > { %v2145_v20 = vmul.f32 %v2144_v36, %v2144_v36 }
0x263a   : > { %v2146_v39 = vsel %vm55_vm0, %v2145_v20, 0.0 }
0x263b   : > { %2147 = vadd.xlane.f32.xlu2 %v2146_v39 }
0x26ae   : > { %v2148_v30 = vpop.xlane.xlu2 %2147 }
0x26af   : > { %v2149_v52 = vrot.slane %v2148_v30, 4 }
0x26b1   : > { %v2150_v43 = vadd.f32 %v2149_v52, %v2148_v30 }
0x26b3   : > { %v2151_v6 = vrot.slane %v2150_v43, 2 }
0x26b5   : > { %v2152_v62 = vadd.f32 %v2151_v6, %v2150_v43 }
0x26b7   : > { %v2153_v19 = vrot.slane %v2152_v62, 1 }
0x26b9   : > { %v2154_v4 = vadd.f32 %v2153_v19, %v2152_v62 }
0x26bb   : > { %3209 = vpush %v2154_v4 }
0x26ec   : > { %s3210_s14 = spop %3209 }
0x26ed   : > { %v2156_v61 = vstv %s3210_s14 }
0x26ee   : > { %v2157_v12 = vmul.f32 0.03125, %v2156_v61 }
0x26f0   : > { %v2158_v63 = vadd.f32 1e-24, %v2157_v12  ;;  %3211 = vpush %v2157_v12 }
0x26f2   : > { %3912 = vlog2.f32 %v2158_v63 }
0x26f8   : > { %v3913_v58 = vpop.eup %3912 }
0x26f9   : > { %v2160_v26 = vmul.f32 0.6931472, %v3913_v58 }
0x26fb   : > { %v2161_v59 = vmul.f32 -0.1, %v2160_v26 }
0x26fd   : > { %v2162_v50 = vmul.f32 1.442695, %v2161_v59 }
0x26ff   : > { %3914 = vpow2.f32 %v2162_v50 }
0x2705   : > { %v3915_v17 = vpop.eup %3914 }
0x2706   : > { %v2164_v48 = vmul.f32 0.9, %v3915_v17 }
0x2708   : > { %3213 = vpush %v2164_v48 }
0x2721   : > { %s3212_s16 = spop %3211 }
0x2722   : > { %p2169_p7 = scmp.le.f32.partialorder %s3212_s16, 1.0 }
0x2724   : > { %s6516_s15 = smov (!%p2169_p7, %s2170_s15), %s4372_s1 }
0x2725   : > { %s2172_s17 = scalar_select %p2169_p7, 1, 0 }
0x2726   : > { %s1781_s25 = ssub.f32 %s5642_s29, %s6516_s15  ;;  %s6485_s1 = smov %s6516_s15 }
0x2727   : > { %v2173_v21 = vstv %s2172_s17 }
0x2728   : > { %vm2174_vm7 = vcmp.eq.s32.totalorder %v2173_v21, 1  ;;  %p1782_p9 = scmp.gt.f32.partialorder %s1781_s25, %s1773_s8 }
0x2729   : > { %v2175_v1 = vsel %vm2174_vm7, %v5834_v56, %v4368_v45   ;;  %v2176_v27 = vsel %vm2174_vm7, %v2112_v46, %v4360_v0  }
0x272a   : > { %p1784_p10 = pnand %p1783_p8, %p1782_p9  ;;  %v6482_v0 = vmov %v2176_v27  ;;  %v6484_v45 = vmov %v2175_v1 }
0x272b   :  { %v6486_v46 = vmov (%p1784_p10), %v2176_v27  ;;  %v6488_v47 = vmov (%p1784_p10), %v2175_v1 }
0x2739   : > { %s3214_s5 = spop %3213 }
0x273a   : > { %s2167_s19 = smax.f32 %s4476_s18, %s3214_s5 }
0x273b   : > { %s2168_s22 = smin.f32 %s4477_s21, %s2167_s19  ;;  %1787 = sbr.rel (!%p1784_p10) target bundleno = 8110 (0x1fae), region = 148 }
0x273c   : > { %s2177_s23 = smul.f32 %s2168_s22, %s5690_s12 }
0x273e   : > { %s2179_s24 = smax.f32 %s2178_s20, %s2177_s23  }
0x273f   : > { %s6483_s9 = smov %s2179_s24  ;;  %s6487_s7 = smov (%p1784_p10), %s2179_s24 }
0x2740 PF:  { %3176 = vst.msk [vmem:[%s6433_s6 + $0x28] sm:$0xff] %vm55_vm0, %v4384_v47  ;;  %s3177_s28 = sld [smem:[#allocation2 + $0x5]]   ;;  %v6489_v0 = vmov %v4376_v46  ;;  %v6491_v45 = vmov %v4384_v47  ;;  %v4384_v47 = vphi %v6480_v47, %v6488_v47   ;;  %s4380_s7 = sphi %s6479_s7, %s6487_s7   ;;  %v4376_v46 = vphi %v6478_v46, %v6486_v46  }
0x2741   :  { %s5903_s0 = sld [smem:[#allocation2 + $0x6]] }
0x2747   :  { %s5906_s1 = ssub.f32 %s5903_s0, %s3177_s28  ;;  %s2186_s29 = sand.u32 2147483647, %s5903_s0 }
0x2748   :  { %s5910_s30 = smax.f32 %s4447_s11, %s2186_s29 }
0x2749   :  { %s2188_s2 = smul.f32 1e-10, %s5910_s30  ;;  %s2189_s3 = smin.f32 %s4380_s7, %s5906_s1  }
0x274a   :  { %s6490_s8 = smov %s2189_s3 }
0x274b   :  { %p3124_p11 = scmp.gt.f32.partialorder %s5906_s1, %s2188_s2 }
0x274c   :  { %s5923_s9 = smov (%p3124_p11), 0  }
0x274d   :  { %3127 = sbr.rel (!%p3124_p11) target bundleno = 12004 (0x2ee4), region = 153 }
0x2752 LB: > { %v4478_v56 = vmov 0   ;;  %v4479_v18 = vmov 2   ;;  %s2203_s7 = ssub.f32 %s5903_s0, %s4404_s28  ;;  %v4480_v14 = vmov 1   ;;  %v4481_v5 = vmov 3   ;;  %s2595_s10 = sadd.s32 1, %s4388_s9   ;;  %s4404_s28 = sphi %s3177_s28, %s6496_s28   ;;  %v4400_v47 = vphi %v4384_v47, %v6495_v47   ;;  %s4396_s3 = sphi %s2189_s3, %s6494_s3   ;;  %v4392_v46 = vphi %v4376_v46, %v6493_v46   ;;  %s4388_s9 = sphi %s5923_s9, %s6492_s9  }
0x2753   : > { %3916 = vset.pattern.permute.xlu0 %v4478_v56  ;;  %3918 = vset.pattern.permute.xlu1 %v4479_v18  ;;  %s4482_s17 = smov 0.2   ;;  %s2593_s18 = smul.f32 1e-06, %s5906_s1 }
0x2754   : > { %3921 = vset.pattern.permute.xlu2 %v4480_v14  ;;  %s5951_s4 = smin.f32 %s4396_s3, %s2203_s7  ;;  %s4483_s19 = smov 10.0  }
0x2755   : > { %v5954_v22 = vstv %s5951_s4  ;;  %s2585_s13 = sadd.f32 %s4404_s28, %s5951_s4  ;;  %p2198_p13 = scmp.lt.s32.totalorder %s2595_s10, 1000 }
0x2756   : > { %v5958_v28 = vmul.f32 %v4392_v46, %v5954_v22  ;;  %s6492_s9 = smov %s2595_s10 }
0x2758   : > { %v2207_v29 = vmul.f32 0.2, %v5958_v28  ;;  %v2256_v61 = vmul.f32 0.075, %v5958_v28 }
0x275a   : > { %v2208_v15 = vadd.f32 %v4400_v47, %v2207_v29 }
0x275c   : > { %2211 = vperm.xlu0 %3916, %v2208_v15   ;;  %2221 = vperm.xlu1 %3918, %v2208_v15  }
0x2764   : > { %3917 = vset.pattern.permute.xlu0 %v4480_v14  ;;  %3919 = vset.pattern.permute.xlu1 %v4481_v5 }
0x2765   : > { %2216 = vperm.xlu0 %3917, %v2208_v15   ;;  %2226 = vperm.xlu1 %3919, %v2208_v15  }
0x276d   : > { %3920 = vset.pattern.permute.xlu0 %v4478_v56  ;;  %3924 = vset.pattern.permute.xlu1 %v4478_v56 }
0x27ce   : > { %v2212_v35 = vpop.permute.xlu0 %2211  ;;  %v2222_v7 = vpop.permute.xlu1 %2221 }
0x27cf   : > { %v2214_v44 = vmul.f32 %v2212_v35, %v4545_v8  ;;  %v2224_v33 = vmul.f32 %v2222_v7, %v4547_v9 }
0x27d1   : > { %v2230_v38 = vadd.f32 %v4554_v11, %v2214_v44 }
0x27d7   : > { %v2217_v23 = vpop.permute.xlu0 %2216  ;;  %v2227_v53 = vpop.permute.xlu1 %2226 }
0x27d8   : > { %v2219_v55 = vmul.f32 %v2217_v23, %v4549_v10  ;;  %v2229_v49 = vmul.f32 %v2227_v53, %v4557_v13 }
0x27da   : > { %v2231_v16 = vadd.f32 %v2224_v33, %v2219_v55 }
0x27dc   : > { %v2232_v51 = vadd.f32 %v2231_v16, %v2230_v38 }
0x27de   : > { %v2233_v32 = vadd.f32 %v2232_v51, %v2229_v49 }
0x27e0   : > { %3938 = vtanh.f32 %v2233_v32 }
0x27e6   : > { %v3939_v57 = vpop.eup %3938 }
0x27e7   : > { %v2243_v41 = vmul.f32 %v3939_v57, %v4566_v24  ;;  %v2235_v2 = vmul.f32 %v3939_v57, %v4568_v25  ;;  %v2239_v60 = vmul.f32 %v3939_v57, %v4578_v31  ;;  %v2247_v42 = vmul.f32 %v3939_v57, %v4593_v34 }
0x27e9   : > { %v2244_v3 = vsel %vm88_vm1, %v2243_v41, 0.0  ;;  %v2236_v54 = vsel %vm88_vm1, %v2235_v2, 0.0  ;;  %v2240_v37 = vsel %vm88_vm1, %v2239_v60, 0.0  ;;  %v2248_v36 = vsel %vm88_vm1, %v2247_v42, 0.0 }
0x27ea   : > { %2245 = vadd.xlane.f32.xlu1 %v2244_v3  ;;  %2237 = vadd.xlane.f32.xlu2 %v2236_v54  ;;  %v2307_v60 = vmul.f32 0.9777778, %v5958_v28 }
0x27f2   : > { %2241 = vadd.xlane.f32.xlu2 %v2240_v37 }
0x27fa   : > { %2249 = vadd.xlane.f32.xlu2 %v2248_v36 }
0x285d   : > { %v2238_v20 = vpop.xlane.xlu2 %2237  ;;  %v2246_v52 = vpop.xlane.xlu1 %2245 }
0x2865   : > { %v2242_v39 = vpop.xlane.xlu2 %2241 }
0x2866   : > { %v2251_v30 = vsel %vm104_vm2, %v2238_v20, %v2242_v39  ;;  %v2308_v39 = vadd.f32 %v4400_v47, %v2307_v60 }
0x2867   : > { %v2252_v43 = vsel %vm106_vm3, %v2251_v30, %v2246_v52 }
0x286d   : > { %v2250_v6 = vpop.xlane.xlu2 %2249 }
0x286e   : > { %v2253_v62 = vsel %vm108_vm4, %v2252_v43, %v2250_v6 }
0x286f   : > { %v2254_v19 = vadd.f32 %v4601_v40, %v2253_v62 }
0x2871   : > { %v2255_v4 = vmul.f32 %v2254_v19, %v5954_v22 }
0x2873   : > { %v2257_v12 = vmul.f32 0.225, %v2255_v4  ;;  %v2309_v42 = vmul.f32 -3.7333333, %v2255_v4  ;;  %v2362_v36 = vmul.f32 -11.595794, %v2255_v4 }
0x2874   : > { %v2417_v20 = vmul.f32 -10.757576, %v2255_v4 }
0x2875   : > { %v2258_v63 = vadd.f32 %v2257_v12, %v2256_v61 }
0x2877   : > { %v2259_v58 = vadd.f32 %v4400_v47, %v2258_v63 }
0x2879   : > { %2267 = vperm.xlu2 %3921, %v2259_v58   ;;  %2262 = vperm.xlu0 %3920, %v2259_v58  }
0x2881   : > { %3923 = vset.pattern.permute.xlu2 %v4481_v5  ;;  %3922 = vset.pattern.permute.xlu0 %v4479_v18 }
0x2882   : > { %2277 = vperm.xlu2 %3923, %v2259_v58   ;;  %2272 = vperm.xlu0 %3922, %v2259_v58  }
0x288a   : > { %3925 = vset.pattern.permute.xlu2 %v4480_v14 }
0x28d3   : > { %v2268_v59 = vpop.permute.xlu2 %2267 }
0x28d4   : > { %v2270_v48 = vmul.f32 %v2268_v59, %v4549_v10 }
0x28dc   : > { %v2278_v1 = vpop.permute.xlu2 %2277 }
0x28dd   : > { %v2280_v45 = vmul.f32 %v2278_v1, %v4557_v13 }
0x28eb   : > { %v2263_v26 = vpop.permute.xlu0 %2262 }
0x28ec   : > { %v2265_v50 = vmul.f32 %v2263_v26, %v4545_v8 }
0x28ee   : > { %v2281_v27 = vadd.f32 %v4554_v11, %v2265_v50 }
0x28f4   : > { %v2273_v17 = vpop.permute.xlu0 %2272 }
0x28f5   : > { %v2275_v21 = vmul.f32 %v2273_v17, %v4547_v9 }
0x28f7   : > { %v2282_v0 = vadd.f32 %v2275_v21, %v2270_v48 }
0x28f9   : > { %v2283_v29 = vadd.f32 %v2282_v0, %v2281_v27 }
0x28fb   : > { %v2284_v15 = vadd.f32 %v2283_v29, %v2280_v45 }
0x28fd   : > { %3940 = vtanh.f32 %v2284_v15 }
0x2903   : > { %v3941_v35 = vpop.eup %3940 }
0x2904   : > { %v2294_v7 = vmul.f32 %v3941_v35, %v4566_v24  ;;  %v2290_v44 = vmul.f32 %v3941_v35, %v4578_v31  ;;  %v2286_v23 = vmul.f32 %v3941_v35, %v4568_v25  ;;  %v2298_v38 = vmul.f32 %v3941_v35, %v4593_v34 }
0x2906   : > { %v2295_v53 = vsel %vm88_vm1, %v2294_v7, 0.0  ;;  %v2291_v33 = vsel %vm88_vm1, %v2290_v44, 0.0  ;;  %v2287_v55 = vsel %vm88_vm1, %v2286_v23, 0.0  ;;  %v2299_v16 = vsel %vm88_vm1, %v2298_v38, 0.0 }
0x2907   : > { %2296 = vadd.xlane.f32.xlu1 %v2295_v53  ;;  %2292 = vadd.xlane.f32.xlu2 %v2291_v33 }
0x2908   : > { %2288 = vadd.xlane.f32.xlu0 %v2287_v55 }
0x290f   : > { %2300 = vadd.xlane.f32.xlu1 %v2299_v16 }
0x297a   : > { %v2297_v49 = vpop.xlane.xlu1 %2296  ;;  %v2293_v51 = vpop.xlane.xlu2 %2292 }
0x297b   : > { %v2289_v32 = vpop.xlane.xlu0 %2288 }
0x297c   : > { %v2302_v57 = vsel %vm104_vm2, %v2289_v32, %v2293_v51 }
0x297d   : > { %v2303_v2 = vsel %vm106_vm3, %v2302_v57, %v2297_v49 }
0x2982   : > { %v2301_v41 = vpop.xlane.xlu1 %2300 }
0x2983   : > { %v2304_v3 = vsel %vm108_vm4, %v2303_v2, %v2301_v41  ;;  %v2360_v41 = vmul.f32 2.9525986, %v5958_v28 }
0x2984   : > { %v2305_v54 = vadd.f32 %v4601_v40, %v2304_v3 }
0x2985   : > { %v2361_v60 = vadd.f32 %v4400_v47, %v2360_v41 }
0x2986   : > { %v6008_v37 = vmul.f32 %v2305_v54, %v5954_v22 }
0x2988   : > { %v2310_v30 = vmul.f32 3.5555556, %v6008_v37  ;;  %v2363_v52 = vmul.f32 9.822893, %v6008_v37  ;;  %v2418_v43 = vmul.f32 8.906423, %v6008_v37 }
0x298a   : > { %v2311_v6 = vadd.f32 %v2310_v30, %v2309_v42  ;;  %v2364_v62 = vadd.f32 %v2363_v52, %v2362_v36  ;;  %v6014_v19 = vadd.f32 %v2418_v43, %v2417_v20  ;;  %v2474_v42 = vmul.f32 0.4492363, %v6008_v37 }
0x298c   : > { %v2312_v61 = vadd.f32 %v2311_v6, %v2308_v39 }
0x298e   : > { %2325 = vperm.xlu0 %3922, %v2312_v61   ;;  %2320 = vperm.xlu2 %3925, %v2312_v61  }
0x298f   : > { %2315 = vperm.xlu1 %3924, %v2312_v61  }
0x2996   : > { %3928 = vset.pattern.permute.xlu0 %v4480_v14  ;;  %3929 = vset.pattern.permute.xlu2 %v4479_v18 }
0x2997   : > { %3926 = vset.pattern.permute.xlu1 %v4481_v5 }
0x2998   : > { %2330 = vperm.xlu1 %3926, %v2312_v61  }
0x29a0   : > { %3927 = vset.pattern.permute.xlu1 %v4478_v56 }
0x29e8   : > { %v2321_v63 = vpop.permute.xlu2 %2320 }
0x29e9   : > { %v2323_v59 = vmul.f32 %v2321_v63, %v4549_v10 }
0x2a00   : > { %v2326_v4 = vpop.permute.xlu0 %2325 }
0x2a01   : > { %v2316_v12 = vpop.permute.xlu1 %2315  ;;  %v2328_v58 = vmul.f32 %v2326_v4, %v4547_v9 }
0x2a02   : > { %v2318_v26 = vmul.f32 %v2316_v12, %v4545_v8 }
0x2a03   : > { %v2335_v50 = vadd.f32 %v2328_v58, %v2323_v59 }
0x2a04   : > { %v2334_v17 = vadd.f32 %v4554_v11, %v2318_v26 }
0x2a06   : > { %v2336_v21 = vadd.f32 %v2335_v50, %v2334_v17 }
0x2a0a   : > { %v2331_v48 = vpop.permute.xlu1 %2330 }
0x2a0b   : > { %v2333_v1 = vmul.f32 %v2331_v48, %v4557_v13 }
0x2a0d   : > { %v2337_v27 = vadd.f32 %v2336_v21, %v2333_v1 }
0x2a0f   : > { %3942 = vtanh.f32 %v2337_v27 }
0x2a15   : > { %v3943_v0 = vpop.eup %3942 }
0x2a16   : > { %v2347_v45 = vmul.f32 %v3943_v0, %v4566_v24  ;;  %v2343_v29 = vmul.f32 %v3943_v0, %v4578_v31  ;;  %v2339_v15 = vmul.f32 %v3943_v0, %v4568_v25  ;;  %v2351_v23 = vmul.f32 %v3943_v0, %v4593_v34 }
0x2a18   : > { %v2348_v35 = vsel %vm88_vm1, %v2347_v45, 0.0  ;;  %v2344_v7 = vsel %vm88_vm1, %v2343_v29, 0.0  ;;  %v2340_v44 = vsel %vm88_vm1, %v2339_v15, 0.0  ;;  %v2352_v53 = vsel %vm88_vm1, %v2351_v23, 0.0 }
0x2a19   : > { %2349 = vadd.xlane.f32.xlu2 %v2348_v35  ;;  %2345 = vadd.xlane.f32.xlu0 %v2344_v7  ;;  %v2415_v23 = vmul.f32 2.8462753, %v5958_v28 }
0x2a1a   : > { %2341 = vadd.xlane.f32.xlu1 %v2340_v44 }
0x2a22   : > { %2353 = vadd.xlane.f32.xlu1 %v2352_v53 }
0x2a8c   : > { %v2346_v55 = vpop.xlane.xlu0 %2345  ;;  %v2350_v38 = vpop.xlane.xlu2 %2349 }
0x2a8d   : > { %v2342_v33 = vpop.xlane.xlu1 %2341 }
0x2a8e   : > { %v2355_v16 = vsel %vm104_vm2, %v2342_v33, %v2346_v55 }
0x2a8f   : > { %v2356_v49 = vsel %vm106_vm3, %v2355_v16, %v2350_v38  ;;  %v2416_v38 = vadd.f32 %v4400_v47, %v2415_v23  ;;  %v2529_v16 = vmul.f32 0.0012326388, %v5958_v28 }
0x2a95   : > { %v2354_v51 = vpop.xlane.xlu1 %2353 }
0x2a96   : > { %v2357_v32 = vsel %vm108_vm4, %v2356_v49, %v2354_v51  ;;  %v2530_v49 = vmul.f32 -0.0042527704, %v6008_v37 }
0x2a97   : > { %v2358_v57 = vadd.f32 %v4601_v40, %v2357_v32 }
0x2a99   : > { %v2359_v2 = vmul.f32 %v2358_v57, %v5954_v22 }
0x2a9b   : > { %v2365_v3 = vmul.f32 -0.29080933, %v2359_v2  ;;  %v2475_v54 = vmul.f32 0.6510417, %v2359_v2  ;;  %v2421_v51 = vmul.f32 0.2784091, %v2359_v2 }
0x2a9c   : > { %v2532_v41 = vmul.f32 0.036979165, %v2359_v2 }
0x2a9d   : > { %v2366_v36 = vadd.f32 %v2365_v3, %v2364_v62  ;;  %v6041_v20 = vadd.f32 %v2475_v54, %v2474_v42  ;;  %v2420_v54 = vadd.f32 %v6014_v19, %v2416_v38 }
0x2a9f   : > { %v2367_v39 = vadd.f32 %v2366_v36, %v2361_v60  ;;  %v2531_v60 = vadd.f32 %v2530_v49, %v2529_v16 }
0x2aa1   : > { %2380 = vperm.xlu2 %3929, %v2367_v39   ;;  %2375 = vperm.xlu0 %3928, %v2367_v39  }
0x2aa2   : > { %2370 = vperm.xlu1 %3927, %v2367_v39  }
0x2aa9   : > { %3932 = vset.pattern.permute.xlu2 %v4480_v14  ;;  %3933 = vset.pattern.permute.xlu0 %v4479_v18 }
0x2aaa   : > { %3930 = vset.pattern.permute.xlu1 %v4481_v5 }
0x2aab   : > { %2385 = vperm.xlu1 %3930, %v2367_v39  }
0x2ab3   : > { %3931 = vset.pattern.permute.xlu1 %v4478_v56 }
0x2afb   : > { %v2381_v43 = vpop.permute.xlu2 %2380 }
0x2afc   : > { %v2383_v61 = vmul.f32 %v2381_v43, %v4547_v9 }
0x2b13   : > { %v2376_v30 = vpop.permute.xlu0 %2375 }
0x2b14   : > { %v2371_v52 = vpop.permute.xlu1 %2370  ;;  %v2378_v6 = vmul.f32 %v2376_v30, %v4549_v10 }
0x2b15   : > { %v2373_v62 = vmul.f32 %v2371_v52, %v4545_v8 }
0x2b16   : > { %v2390_v4 = vadd.f32 %v2383_v61, %v2378_v6 }
0x2b17   : > { %v2389_v12 = vadd.f32 %v4554_v11, %v2373_v62 }
0x2b19   : > { %v2391_v63 = vadd.f32 %v2390_v4, %v2389_v12 }
0x2b1d   : > { %v2386_v14 = vpop.permute.xlu1 %2385 }
0x2b1e   : > { %v2388_v18 = vmul.f32 %v2386_v14, %v4557_v13 }
0x2b20   : > { %v2392_v58 = vadd.f32 %v2391_v63, %v2388_v18 }
0x2b22   : > { %3944 = vtanh.f32 %v2392_v58 }
0x2b28   : > { %v3945_v26 = vpop.eup %3944 }
0x2b29   : > { %v2402_v59 = vmul.f32 %v3945_v26, %v4566_v24  ;;  %v2398_v50 = vmul.f32 %v3945_v26, %v4578_v31  ;;  %v2394_v17 = vmul.f32 %v3945_v26, %v4568_v25  ;;  %v2406_v27 = vmul.f32 %v3945_v26, %v4593_v34 }
0x2b2b   : > { %v2403_v48 = vsel %vm88_vm1, %v2402_v59, 0.0  ;;  %v2399_v21 = vsel %vm88_vm1, %v2398_v50, 0.0  ;;  %v2395_v1 = vsel %vm88_vm1, %v2394_v17, 0.0  ;;  %v2407_v0 = vsel %vm88_vm1, %v2406_v27, 0.0 }
0x2b2c   : > { %2404 = vadd.xlane.f32.xlu0 %v2403_v48  ;;  %2400 = vadd.xlane.f32.xlu1 %v2399_v21 }
0x2b2d   : > { %2396 = vadd.xlane.f32.xlu2 %v2395_v1 }
0x2b35   : > { %2408 = vadd.xlane.f32.xlu2 %v2407_v0 }
0x2b9f   : > { %v2401_v29 = vpop.xlane.xlu1 %2400  ;;  %v2405_v15 = vpop.xlane.xlu0 %2404 }
0x2ba0   : > { %v2397_v45 = vpop.xlane.xlu2 %2396 }
0x2ba1   : > { %v2410_v35 = vsel %vm104_vm2, %v2397_v45, %v2401_v29  ;;  %v2472_v29 = vmul.f32 0.091145836, %v5958_v28 }
0x2ba2   : > { %v2411_v7 = vsel %vm106_vm3, %v2410_v35, %v2405_v15 }
0x2ba8   : > { %v2409_v44 = vpop.xlane.xlu2 %2408 }
0x2ba9   : > { %v2412_v53 = vsel %vm108_vm4, %v2411_v7, %v2409_v44  ;;  %v2473_v44 = vadd.f32 %v4400_v47, %v2472_v29 }
0x2baa   : > { %v2413_v33 = vadd.f32 %v4601_v40, %v2412_v53 }
0x2bab   : > { %v2477_v38 = vadd.f32 %v6041_v20, %v2473_v44 }
0x2bac   : > { %v2414_v55 = vmul.f32 %v2413_v33, %v5954_v22 }
0x2bae   : > { %v2422_v32 = vmul.f32 -0.27353132, %v2414_v55  ;;  %v2533_v57 = vmul.f32 -0.0508638, %v2414_v55  ;;  %v2478_v53 = vmul.f32 -0.3223762, %v2414_v55 }
0x2bb0   : > { %v2423_v3 = vadd.f32 %v2422_v32, %v2421_v51  ;;  %v2534_v42 = vadd.f32 %v2533_v57, %v2532_v41 }
0x2bb2   : > { %v2424_v36 = vadd.f32 %v2423_v3, %v2420_v54  ;;  %v6070_v39 = vadd.f32 %v2534_v42, %v2531_v60 }
0x2bb4   : > { %2437 = vperm.xlu0 %3933, %v2424_v36   ;;  %2432 = vperm.xlu2 %3932, %v2424_v36  }
0x2bb5   : > { %2427 = vperm.xlu1 %3931, %v2424_v36  }
0x2bbd   : > { %3934 = vset.pattern.permute.xlu1 %v4481_v5 }
0x2bbe   : > { %2442 = vperm.xlu1 %3934, %v2424_v36  }
0x2bc6   : > { %3935 = vset.pattern.permute.xlu1 %v4478_v56 }
0x2c0e   : > { %v2433_v52 = vpop.permute.xlu2 %2432 }
0x2c0f   : > { %v2435_v43 = vmul.f32 %v2433_v52, %v4549_v10 }
0x2c26   : > { %v2438_v37 = vpop.permute.xlu0 %2437 }
0x2c27   : > { %v2428_v30 = vpop.permute.xlu1 %2427  ;;  %v2440_v2 = vmul.f32 %v2438_v37, %v4547_v9 }
0x2c28   : > { %v2430_v19 = vmul.f32 %v2428_v30, %v4545_v8 }
0x2c29   : > { %v2447_v6 = vadd.f32 %v2440_v2, %v2435_v43 }
0x2c2a   : > { %v2446_v62 = vadd.f32 %v4554_v11, %v2430_v19 }
0x2c2c   : > { %v2448_v4 = vadd.f32 %v2447_v6, %v2446_v62 }
0x2c30   : > { %v2443_v61 = vpop.permute.xlu1 %2442 }
0x2c31   : > { %v2445_v12 = vmul.f32 %v2443_v61, %v4557_v13  ;;  %v2540_v61 = vand.u32 2147483647, %v4400_v47 }
0x2c33   : > { %v2449_v14 = vadd.f32 %v2448_v4, %v2445_v12 }
0x2c35   : > { %3946 = vtanh.f32 %v2449_v14 }
0x2c3b   : > { %v3947_v63 = vpop.eup %3946 }
0x2c3c   : > { %v2459_v56 = vmul.f32 %v3947_v63, %v4566_v24  ;;  %v2455_v18 = vmul.f32 %v3947_v63, %v4578_v31  ;;  %v2451_v58 = vmul.f32 %v3947_v63, %v4568_v25  ;;  %v2463_v17 = vmul.f32 %v3947_v63, %v4593_v34 }
0x2c3e   : > { %v2460_v26 = vsel %vm88_vm1, %v2459_v56, 0.0  ;;  %v2456_v59 = vsel %vm88_vm1, %v2455_v18, 0.0  ;;  %v2452_v50 = vsel %vm88_vm1, %v2451_v58, 0.0  ;;  %v2464_v48 = vsel %vm88_vm1, %v2463_v17, 0.0 }
0x2c3f   : > { %2461 = vadd.xlane.f32.xlu0 %v2460_v26  ;;  %2457 = vadd.xlane.f32.xlu1 %v2456_v59 }
0x2c40   : > { %2453 = vadd.xlane.f32.xlu2 %v2452_v50 }
0x2c48   : > { %2465 = vadd.xlane.f32.xlu2 %v2464_v48 }
0x2cb2   : > { %v2458_v1 = vpop.xlane.xlu1 %2457  ;;  %v2462_v27 = vpop.xlane.xlu0 %2461 }
0x2cb3   : > { %v2454_v21 = vpop.xlane.xlu2 %2453 }
0x2cb4   : > { %v2467_v0 = vsel %vm104_vm2, %v2454_v21, %v2458_v1 }
0x2cb5   : > { %v2468_v45 = vsel %vm106_vm3, %v2467_v0, %v2462_v27 }
0x2cbb   : > { %v2466_v15 = vpop.xlane.xlu2 %2465 }
0x2cbc   : > { %v2469_v35 = vsel %vm108_vm4, %v2468_v45, %v2466_v15 }
0x2cbd   : > { %v2470_v7 = vadd.f32 %v4601_v40, %v2469_v35 }
0x2cbf   : > { %v2471_v23 = vmul.f32 %v2470_v7, %v5954_v22 }
0x2cc1   : > { %v2479_v33 = vmul.f32 0.13095239, %v2471_v23  ;;  %v2536_v35 = vmul.f32 0.041904762, %v2471_v23 }
0x2cc3   : > { %v2480_v16 = vadd.f32 %v2479_v33, %v2478_v53 }
0x2cc5   : > { %v6095_v49 = vadd.f32 %v2480_v16, %v2477_v38 }
0x2cc7   : > { %2494 = vperm.xlu0 %3933, %v6095_v49   ;;  %2489 = vperm.xlu2 %3932, %v6095_v49   ;;  %v2541_v4 = vand.u32 2147483647, %v6095_v49 }
0x2cc8   : > { %2484 = vperm.xlu1 %3935, %v6095_v49  }
0x2cc9   : > { %v2542_v12 = vmax.f32 %v2540_v61, %v2541_v4 }
0x2ccb   : > { %v2543_v14 = vmul.f32 1e-06, %v2542_v12 }
0x2ccd   : > { %v2544_v63 = vadd.f32 1e-07, %v2543_v14 }
0x2ccf   : > { %3937 = vset.pattern.permute.xlu0 %v4481_v5  ;;  %v2556_v15 = vand.u32 2147483648, %v2544_v63  ;;  %vm2550_vm9 = vweird.f32 %v2544_v63  ;;  %v2554_v44 = vand.u32 2147483647, %v2544_v63 }
0x2cd0   : > { %3936 = vset.pattern.permute.xlu1 %v4481_v5 }
0x2cd1   : > { %2499 = vperm.xlu1 %3936, %v6095_v49   ;;  %v2557_v38 = vor.u32 1.1754944e-38, %v2556_v15  ;;  %vm2555_vm11 = vcmp.eq.f32.partialorder %v2554_v44, 8.507059e+37 }
0x2d21   : > { %v2490_v51 = vpop.permute.xlu2 %2489 }
0x2d22   : > { %v2492_v57 = vmul.f32 %v2490_v51, %v4549_v10 }
0x2d39   : > { %v2495_v28 = vpop.permute.xlu0 %2494 }
0x2d3a   : > { %v2485_v55 = vpop.permute.xlu1 %2484  ;;  %v2497_v20 = vmul.f32 %v2495_v28, %v4547_v9 }
0x2d3b   : > { %v2487_v32 = vmul.f32 %v2485_v55, %v4545_v8 }
0x2d3c   : > { %v2504_v41 = vadd.f32 %v2497_v20, %v2492_v57 }
0x2d3d   : > { %v2503_v3 = vadd.f32 %v4554_v11, %v2487_v32 }
0x2d3f   : > { %v2505_v60 = vadd.f32 %v2504_v41, %v2503_v3 }
0x2d43   : > { %v2500_v54 = vpop.permute.xlu1 %2499 }
0x2d44   : > { %v2502_v42 = vmul.f32 %v2500_v54, %v4557_v13 }
0x2d46   : > { %v2506_v36 = vadd.f32 %v2505_v60, %v2502_v42 }
0x2d48   : > { %3948 = vtanh.f32 %v2506_v36 }
0x2d49   : > { %3950 = vrcp.f32 %v2544_v63 }
0x2d4e   : > { %v3949_v5 = vpop.eup %3948 }
0x2d4f   : > { %v2516_v37 = vmul.f32 %v3949_v5, %v4566_v24  ;;  %v2512_v30 = vmul.f32 %v3949_v5, %v4578_v31  ;;  %v2508_v52 = vmul.f32 %v3949_v5, %v4568_v25  ;;  %v2520_v6 = vmul.f32 %v3949_v5, %v4593_v34  ;;  %v3951_v56 = vpop.eup %3950 }
0x2d50   : > { %v2546_v58 = vmul.f32 %v3951_v56, %v2544_v63  ;;  %vm2551_vm8 = vweird.f32 %v3951_v56 }
0x2d51   : > { %v2517_v2 = vsel %vm88_vm1, %v2516_v37, 0.0  ;;  %v2513_v19 = vsel %vm88_vm1, %v2512_v30, 0.0  ;;  %v2509_v43 = vsel %vm88_vm1, %v2508_v52, 0.0  ;;  %v2521_v62 = vsel %vm88_vm1, %v2520_v6, 0.0  ;;  %vm2552_vm10 = vmor %vm2550_vm9, %vm2551_vm8 }
0x2d52   : > { %2518 = vadd.xlane.f32.xlu0 %v2517_v2  ;;  %2514 = vadd.xlane.f32.xlu1 %v2513_v19  ;;  %v2547_v59 = vsub.f32 1.0, %v2546_v58 }
0x2d53   : > { %2510 = vadd.xlane.f32.xlu2 %v2509_v43 }
0x2d54   : > { %v2548_v1 = vmul.f32 %v3951_v56, %v2547_v59 }
0x2d56   : > { %v2549_v29 = vadd.f32 %v3951_v56, %v2548_v1 }
0x2d58   : > { %v2553_v33 = vsel %vm2552_vm10, %v3951_v56, %v2549_v29 }
0x2d59   : > { %v2558_v28 = vsel %vm2555_vm11, %v2557_v38, %v2553_v33 }
0x2d5b   : > { %2522 = vadd.xlane.f32.xlu2 %v2521_v62 }
0x2dc5   : > { %v2515_v26 = vpop.xlane.xlu1 %2514  ;;  %v2519_v50 = vpop.xlane.xlu0 %2518 }
0x2dc6   : > { %v2511_v18 = vpop.xlane.xlu2 %2510 }
0x2dc7   : > { %v2524_v17 = vsel %vm104_vm2, %v2511_v18, %v2515_v26 }
0x2dc8   : > { %v2525_v48 = vsel %vm106_vm3, %v2524_v17, %v2519_v50 }
0x2dce   : > { %v2523_v21 = vpop.xlane.xlu2 %2522 }
0x2dcf   : > { %v2526_v27 = vsel %vm108_vm4, %v2525_v48, %v2523_v21 }
0x2dd0   : > { %v2527_v0 = vadd.f32 %v4601_v40, %v2526_v27 }
0x2dd2   : > { %v2528_v45 = vmul.f32 %v2527_v0, %v5954_v22 }
0x2dd4   : > { %v2537_v7 = vmul.f32 -0.025, %v2528_v45 }
0x2dd6   : > { %v2538_v53 = vadd.f32 %v2537_v7, %v2536_v35 }
0x2dd8   : > { %v2539_v16 = vadd.f32 %v2538_v53, %v6070_v39 }
0x2dda   : > { %v2559_v55 = vmul.f32 %v2558_v28, %v2539_v16 }
0x2ddc   : > { %v2560_v51 = vmul.f32 %v2559_v55, %v2559_v55 }
0x2dde   : > { %v2561_v22 = vsel %vm55_vm0, %v2560_v51, 0.0 }
0x2ddf   : > { %2562 = vadd.xlane.f32.xlu2 %v2561_v22 }
0x2e52   : > { %v2563_v20 = vpop.xlane.xlu2 %2562 }
0x2e53   : > { %v2564_v32 = vrot.slane %v2563_v20, 4 }
0x2e55   : > { %v2565_v23 = vadd.f32 %v2564_v32, %v2563_v20 }
0x2e57   : > { %v2566_v57 = vrot.slane %v2565_v23, 2 }
0x2e59   : > { %v2567_v41 = vadd.f32 %v2566_v57, %v2565_v23 }
0x2e5b   : > { %v2568_v3 = vrot.slane %v2567_v41, 1 }
0x2e5d   : > { %v2569_v54 = vadd.f32 %v2568_v3, %v2567_v41 }
0x2e5f   : > { %3215 = vpush %v2569_v54 }
0x2e90   : > { %s3216_s12 = spop %3215 }
0x2e91   : > { %v2571_v39 = vstv %s3216_s12 }
0x2e92   : > { %v2572_v60 = vmul.f32 0.03125, %v2571_v39 }
0x2e94   : > { %v2573_v42 = vadd.f32 1e-24, %v2572_v60  ;;  %3217 = vpush %v2572_v60 }
0x2e96   : > { %3952 = vlog2.f32 %v2573_v42 }
0x2e9c   : > { %v3953_v36 = vpop.eup %3952 }
0x2e9d   : > { %v2575_v5 = vmul.f32 0.6931472, %v3953_v36 }
0x2e9f   : > { %v2576_v37 = vmul.f32 -0.1, %v2575_v5 }
0x2ea1   : > { %v2577_v30 = vmul.f32 1.442695, %v2576_v37 }
0x2ea3   : > { %3954 = vpow2.f32 %v2577_v30 }
0x2ea9   : > { %v3955_v52 = vpop.eup %3954 }
0x2eaa   : > { %v2579_v2 = vmul.f32 0.9, %v3955_v52 }
0x2eac   : > { %3219 = vpush %v2579_v2 }
0x2ec5   : > { %s3218_s14 = spop %3217 }
0x2ec6   : > { %p2584_p12 = scmp.le.f32.partialorder %s3218_s14, 1.0 }
0x2ec8   : > { %s6518_s13 = smov (!%p2584_p12, %s2585_s13), %s4404_s28 }
0x2ec9   : > { %s2587_s15 = scalar_select %p2584_p12, 1, 0 }
0x2eca   : > { %s2196_s23 = ssub.f32 %s5903_s0, %s6518_s13  ;;  %s6496_s28 = smov %s6518_s13 }
0x2ecb   : > { %v2588_v19 = vstv %s2587_s15 }
0x2ecc   : > { %vm2589_vm12 = vcmp.eq.s32.totalorder %v2588_v19, 1  ;;  %p2197_p0 = scmp.gt.f32.partialorder %s2196_s23, %s2188_s2 }
0x2ecd   : > { %v2590_v43 = vsel %vm2589_vm12, %v6095_v49, %v4400_v47   ;;  %v2591_v6 = vsel %vm2589_vm12, %v2527_v0, %v4392_v46  }
0x2ece   : > { %p2199_p1 = pnand %p2198_p13, %p2197_p0  ;;  %v6493_v46 = vmov %v2591_v6  ;;  %v6495_v47 = vmov %v2590_v43 }
0x2ecf   :  { %v6497_v0 = vmov (%p2199_p1), %v2591_v6  ;;  %v6499_v45 = vmov (%p2199_p1), %v2590_v43 }
0x2edd   : > { %s3220_s16 = spop %3219 }
0x2ede   : > { %s2582_s5 = smax.f32 %s4482_s17, %s3220_s16 }
0x2edf   : > { %s2583_s20 = smin.f32 %s4483_s19, %s2582_s5  ;;  %2202 = sbr.rel (!%p2199_p1) target bundleno = 10066 (0x2752), region = 159 }
0x2ee0   : > { %s2592_s21 = smul.f32 %s2583_s20, %s5951_s4 }
0x2ee2   : > { %s2594_s22 = smax.f32 %s2593_s18, %s2592_s21  }
0x2ee3   : > { %s6494_s3 = smov %s2594_s22  ;;  %s6498_s8 = smov (%p2199_p1), %s2594_s22 }
0x2ee4 PF:  { %3180 = vst.msk [vmem:[%s6433_s6 + $0x30] sm:$0xff] %vm55_vm0, %v4416_v45  ;;  %s3181_s26 = sld [smem:[#allocation2 + $0x6]]   ;;  %v6500_v46 = vmov %v4416_v45  ;;  %v4416_v45 = vphi %v6491_v45, %v6499_v45   ;;  %s4412_s8 = sphi %s6490_s8, %s6498_s8   ;;  %v4408_v0 = vphi %v6489_v0, %v6497_v0  }
0x2ee5   :  { %s6164_s27 = sld [smem:[#allocation2 + $0x7]] }
0x2eeb   :  { %s6167_s28 = ssub.f32 %s6164_s27, %s3181_s26  ;;  %s2601_s0 = sand.u32 2147483647, %s6164_s27 }
0x2eec   :  { %s6171_s1 = smax.f32 %s4447_s11, %s2601_s0 }
0x2eed   :  { %s2603_s29 = smul.f32 1e-10, %s6171_s1  ;;  %s2604_s30 = smin.f32 %s4412_s8, %s6167_s28  }
0x2eef   :  { %p3144_p2 = scmp.gt.f32.partialorder %s6167_s28, %s2603_s29 }
0x2ef0   :  { %s6180_s2 = smov (%p3144_p2), 0  }
0x2ef1   :  { %3147 = sbr.rel (!%p3144_p2) target bundleno = 13959 (0x3687), region = 164 }
0x2ef6 LB: > { %v4484_v47 = vmov 0   ;;  %v4485_v49 = vmov 2   ;;  %s2618_s11 = ssub.f32 %s6164_s27, %s4436_s26  ;;  %v4486_v62 = vmov 1   ;;  %v4487_v63 = vmov 3   ;;  %s3010_s8 = sadd.s32 1, %s4420_s2   ;;  %s4436_s26 = sphi %s3181_s26, %s6505_s26   ;;  %v4432_v45 = vphi %v4416_v45, %v6504_v45   ;;  %s4428_s30 = sphi %s2604_s30, %s3009_s30   ;;  %v4424_v0 = vphi %v4408_v0, %v3006_v0   ;;  %s4420_s2 = sphi %s6180_s2, %s6503_s2  }
0x2ef7   : > { %3956 = vset.pattern.permute.xlu0 %v4484_v47  ;;  %3958 = vset.pattern.permute.xlu1 %v4485_v49  ;;  %s4488_s13 = smov 0.2   ;;  %s3008_s15 = smul.f32 1e-06, %s6167_s28 }
0x2ef8   : > { %3961 = vset.pattern.permute.xlu2 %v4486_v62  ;;  %s6208_s3 = smin.f32 %s4428_s30, %s2618_s11  ;;  %s4489_s16 = smov 10.0  }
0x2ef9   : > { %v6211_v61 = vstv %s6208_s3  ;;  %s3000_s7 = sadd.f32 %s4436_s26, %s6208_s3  ;;  %p2613_p4 = scmp.lt.s32.totalorder %s3010_s8, 1000 }
0x2efa   : > { %v6215_v4 = vmul.f32 %v4424_v0, %v6211_v61  ;;  %s6503_s2 = smov %s3010_s8 }
0x2efc   : > { %v2622_v12 = vmul.f32 0.2, %v6215_v4  ;;  %v2671_v54 = vmul.f32 0.075, %v6215_v4 }
0x2efe   : > { %v2623_v14 = vadd.f32 %v4432_v45, %v2622_v12 }
0x2f00   : > { %2626 = vperm.xlu0 %3956, %v2623_v14   ;;  %2636 = vperm.xlu1 %3958, %v2623_v14  }
0x2f08   : > { %3957 = vset.pattern.permute.xlu0 %v4486_v62  ;;  %3959 = vset.pattern.permute.xlu1 %v4487_v63 }
0x2f09   : > { %2631 = vperm.xlu0 %3957, %v2623_v14   ;;  %2641 = vperm.xlu1 %3959, %v2623_v14  }
0x2f11   : > { %3960 = vset.pattern.permute.xlu0 %v4484_v47  ;;  %3964 = vset.pattern.permute.xlu1 %v4484_v47 }
0x2f72   : > { %v2627_v56 = vpop.permute.xlu0 %2626  ;;  %v2637_v18 = vpop.permute.xlu1 %2636 }
0x2f73   : > { %v2629_v58 = vmul.f32 %v2627_v56, %v4545_v8  ;;  %v2639_v50 = vmul.f32 %v2637_v18, %v4547_v9 }
0x2f75   : > { %v2645_v48 = vadd.f32 %v4554_v11, %v2629_v58 }
0x2f7b   : > { %v2632_v26 = vpop.permute.xlu0 %2631  ;;  %v2642_v59 = vpop.permute.xlu1 %2641 }
0x2f7c   : > { %v2634_v17 = vmul.f32 %v2632_v26, %v4549_v10  ;;  %v2644_v1 = vmul.f32 %v2642_v59, %v4557_v13 }
0x2f7e   : > { %v2646_v21 = vadd.f32 %v2639_v50, %v2634_v17 }
0x2f80   : > { %v2647_v27 = vadd.f32 %v2646_v21, %v2645_v48 }
0x2f82   : > { %v2648_v29 = vadd.f32 %v2647_v27, %v2644_v1 }
0x2f84   : > { %3978 = vtanh.f32 %v2648_v29 }
0x2f8a   : > { %v3979_v15 = vpop.eup %3978 }
0x2f8b   : > { %v2658_v35 = vmul.f32 %v3979_v15, %v4566_v24  ;;  %v2650_v7 = vmul.f32 %v3979_v15, %v4568_v25  ;;  %v2654_v33 = vmul.f32 %v3979_v15, %v4578_v31  ;;  %v2662_v16 = vmul.f32 %v3979_v15, %v4593_v34 }
0x2f8d   : > { %v2659_v44 = vsel %vm88_vm1, %v2658_v35, 0.0  ;;  %v2651_v53 = vsel %vm88_vm1, %v2650_v7, 0.0  ;;  %v2655_v38 = vsel %vm88_vm1, %v2654_v33, 0.0  ;;  %v2663_v28 = vsel %vm88_vm1, %v2662_v16, 0.0 }
0x2f8e   : > { %2660 = vadd.xlane.f32.xlu1 %v2659_v44  ;;  %2652 = vadd.xlane.f32.xlu2 %v2651_v53  ;;  %v2722_v33 = vmul.f32 0.9777778, %v6215_v4 }
0x2f96   : > { %2656 = vadd.xlane.f32.xlu2 %v2655_v38 }
0x2f9e   : > { %2664 = vadd.xlane.f32.xlu2 %v2663_v28 }
0x3001   : > { %v2653_v55 = vpop.xlane.xlu2 %2652  ;;  %v2661_v20 = vpop.xlane.xlu1 %2660 }
0x3009   : > { %v2657_v51 = vpop.xlane.xlu2 %2656 }
0x300a   : > { %v2666_v22 = vsel %vm104_vm2, %v2653_v55, %v2657_v51  ;;  %v2723_v51 = vadd.f32 %v4432_v45, %v2722_v33 }
0x300b   : > { %v2667_v32 = vsel %vm106_vm3, %v2666_v22, %v2661_v20 }
0x3011   : > { %v2665_v23 = vpop.xlane.xlu2 %2664 }
0x3012   : > { %v2668_v57 = vsel %vm108_vm4, %v2667_v32, %v2665_v23 }
0x3013   : > { %v2669_v41 = vadd.f32 %v4601_v40, %v2668_v57 }
0x3015   : > { %v2670_v3 = vmul.f32 %v2669_v41, %v6211_v61 }
0x3017   : > { %v2672_v39 = vmul.f32 0.225, %v2670_v3  ;;  %v2724_v16 = vmul.f32 -3.7333333, %v2670_v3  ;;  %v2777_v28 = vmul.f32 -11.595794, %v2670_v3 }
0x3018   : > { %v2832_v55 = vmul.f32 -10.757576, %v2670_v3 }
0x3019   : > { %v2673_v60 = vadd.f32 %v2672_v39, %v2671_v54 }
0x301b   : > { %v2674_v42 = vadd.f32 %v4432_v45, %v2673_v60 }
0x301d   : > { %2682 = vperm.xlu2 %3961, %v2674_v42   ;;  %2677 = vperm.xlu0 %3960, %v2674_v42  }
0x3025   : > { %3963 = vset.pattern.permute.xlu2 %v4487_v63  ;;  %3962 = vset.pattern.permute.xlu0 %v4485_v49 }
0x3026   : > { %2692 = vperm.xlu2 %3963, %v2674_v42   ;;  %2687 = vperm.xlu0 %3962, %v2674_v42  }
0x302e   : > { %3965 = vset.pattern.permute.xlu2 %v4486_v62 }
0x3077   : > { %v2683_v5 = vpop.permute.xlu2 %2682 }
0x3078   : > { %v2685_v52 = vmul.f32 %v2683_v5, %v4549_v10 }
0x3080   : > { %v2693_v19 = vpop.permute.xlu2 %2692 }
0x3081   : > { %v2695_v46 = vmul.f32 %v2693_v19, %v4557_v13 }
0x308f   : > { %v2678_v36 = vpop.permute.xlu0 %2677 }
0x3090   : > { %v2680_v37 = vmul.f32 %v2678_v36, %v4545_v8 }
0x3092   : > { %v2696_v43 = vadd.f32 %v4554_v11, %v2680_v37 }
0x3098   : > { %v2688_v30 = vpop.permute.xlu0 %2687 }
0x3099   : > { %v2690_v2 = vmul.f32 %v2688_v30, %v4547_v9 }
0x309b   : > { %v2697_v6 = vadd.f32 %v2690_v2, %v2685_v52 }
0x309d   : > { %v2698_v12 = vadd.f32 %v2697_v6, %v2696_v43 }
0x309f   : > { %v2699_v14 = vadd.f32 %v2698_v12, %v2695_v46 }
0x30a1   : > { %3980 = vtanh.f32 %v2699_v14 }
0x30a7   : > { %v3981_v56 = vpop.eup %3980 }
0x30a8   : > { %v2709_v18 = vmul.f32 %v3981_v56, %v4566_v24  ;;  %v2705_v58 = vmul.f32 %v3981_v56, %v4578_v31  ;;  %v2701_v26 = vmul.f32 %v3981_v56, %v4568_v25  ;;  %v2713_v48 = vmul.f32 %v3981_v56, %v4593_v34 }
0x30aa   : > { %v2710_v59 = vsel %vm88_vm1, %v2709_v18, 0.0  ;;  %v2706_v50 = vsel %vm88_vm1, %v2705_v58, 0.0  ;;  %v2702_v17 = vsel %vm88_vm1, %v2701_v26, 0.0  ;;  %v2714_v21 = vsel %vm88_vm1, %v2713_v48, 0.0 }
0x30ab   : > { %2711 = vadd.xlane.f32.xlu1 %v2710_v59  ;;  %2707 = vadd.xlane.f32.xlu2 %v2706_v50 }
0x30ac   : > { %2703 = vadd.xlane.f32.xlu0 %v2702_v17 }
0x30b3   : > { %2715 = vadd.xlane.f32.xlu1 %v2714_v21 }
0x311e   : > { %v2712_v1 = vpop.xlane.xlu1 %2711  ;;  %v2708_v27 = vpop.xlane.xlu2 %2707 }
0x311f   : > { %v2704_v29 = vpop.xlane.xlu0 %2703 }
0x3120   : > { %v2717_v15 = vsel %vm104_vm2, %v2704_v29, %v2708_v27 }
0x3121   : > { %v2718_v7 = vsel %vm106_vm3, %v2717_v15, %v2712_v1 }
0x3126   : > { %v2716_v35 = vpop.xlane.xlu1 %2715 }
0x3127   : > { %v2719_v44 = vsel %vm108_vm4, %v2718_v7, %v2716_v35  ;;  %v2775_v35 = vmul.f32 2.9525986, %v6215_v4 }
0x3128   : > { %v2720_v53 = vadd.f32 %v4601_v40, %v2719_v44 }
0x3129   : > { %v2776_v33 = vadd.f32 %v4432_v45, %v2775_v35 }
0x312a   : > { %v6265_v38 = vmul.f32 %v2720_v53, %v6211_v61 }
0x312c   : > { %v2725_v22 = vmul.f32 3.5555556, %v6265_v38  ;;  %v2778_v20 = vmul.f32 9.822893, %v6265_v38  ;;  %v2833_v32 = vmul.f32 8.906423, %v6265_v38 }
0x312e   : > { %v2726_v23 = vadd.f32 %v2725_v22, %v2724_v16  ;;  %v2779_v57 = vadd.f32 %v2778_v20, %v2777_v28  ;;  %v6271_v41 = vadd.f32 %v2833_v32, %v2832_v55  ;;  %v2889_v16 = vmul.f32 0.4492363, %v6265_v38 }
0x3130   : > { %v2727_v54 = vadd.f32 %v2726_v23, %v2723_v51 }
0x3132   : > { %2740 = vperm.xlu0 %3962, %v2727_v54   ;;  %2735 = vperm.xlu2 %3965, %v2727_v54  }
0x3133   : > { %2730 = vperm.xlu1 %3964, %v2727_v54  }
0x313a   : > { %3968 = vset.pattern.permute.xlu0 %v4486_v62  ;;  %3969 = vset.pattern.permute.xlu2 %v4485_v49 }
0x313b   : > { %3966 = vset.pattern.permute.xlu1 %v4487_v63 }
0x313c   : > { %2745 = vperm.xlu1 %3966, %v2727_v54  }
0x3144   : > { %3967 = vset.pattern.permute.xlu1 %v4484_v47 }
0x318c   : > { %v2736_v60 = vpop.permute.xlu2 %2735 }
0x318d   : > { %v2738_v5 = vmul.f32 %v2736_v60, %v4549_v10 }
0x31a4   : > { %v2741_v3 = vpop.permute.xlu0 %2740 }
0x31a5   : > { %v2731_v39 = vpop.permute.xlu1 %2730  ;;  %v2743_v42 = vmul.f32 %v2741_v3, %v4547_v9 }
0x31a6   : > { %v2733_v36 = vmul.f32 %v2731_v39, %v4545_v8 }
0x31a7   : > { %v2750_v37 = vadd.f32 %v2743_v42, %v2738_v5 }
0x31a8   : > { %v2749_v30 = vadd.f32 %v4554_v11, %v2733_v36 }
0x31aa   : > { %v2751_v2 = vadd.f32 %v2750_v37, %v2749_v30 }
0x31ae   : > { %v2746_v52 = vpop.permute.xlu1 %2745 }
0x31af   : > { %v2748_v19 = vmul.f32 %v2746_v52, %v4557_v13 }
0x31b1   : > { %v2752_v43 = vadd.f32 %v2751_v2, %v2748_v19 }
0x31b3   : > { %3982 = vtanh.f32 %v2752_v43 }
0x31b9   : > { %v3983_v6 = vpop.eup %3982 }
0x31ba   : > { %v2762_v46 = vmul.f32 %v3983_v6, %v4566_v24  ;;  %v2758_v12 = vmul.f32 %v3983_v6, %v4578_v31  ;;  %v2754_v14 = vmul.f32 %v3983_v6, %v4568_v25  ;;  %v2766_v26 = vmul.f32 %v3983_v6, %v4593_v34 }
0x31bc   : > { %v2763_v56 = vsel %vm88_vm1, %v2762_v46, 0.0  ;;  %v2759_v18 = vsel %vm88_vm1, %v2758_v12, 0.0  ;;  %v2755_v58 = vsel %vm88_vm1, %v2754_v14, 0.0  ;;  %v2767_v59 = vsel %vm88_vm1, %v2766_v26, 0.0 }
0x31bd   : > { %2764 = vadd.xlane.f32.xlu2 %v2763_v56  ;;  %2760 = vadd.xlane.f32.xlu0 %v2759_v18  ;;  %v2830_v26 = vmul.f32 2.8462753, %v6215_v4 }
0x31be   : > { %2756 = vadd.xlane.f32.xlu1 %v2755_v58 }
0x31c6   : > { %2768 = vadd.xlane.f32.xlu1 %v2767_v59 }
0x3230   : > { %v2761_v17 = vpop.xlane.xlu0 %2760  ;;  %v2765_v48 = vpop.xlane.xlu2 %2764 }
0x3231   : > { %v2757_v50 = vpop.xlane.xlu1 %2756 }
0x3232   : > { %v2770_v21 = vsel %vm104_vm2, %v2757_v50, %v2761_v17 }
0x3233   : > { %v2771_v1 = vsel %vm106_vm3, %v2770_v21, %v2765_v48  ;;  %v2831_v48 = vadd.f32 %v4432_v45, %v2830_v26  ;;  %v2944_v21 = vmul.f32 0.0012326388, %v6215_v4 }
0x3239   : > { %v2769_v27 = vpop.xlane.xlu1 %2768 }
0x323a   : > { %v2772_v29 = vsel %vm108_vm4, %v2771_v1, %v2769_v27  ;;  %v2945_v1 = vmul.f32 -0.0042527704, %v6265_v38 }
0x323b   : > { %v2773_v15 = vadd.f32 %v4601_v40, %v2772_v29 }
0x323d   : > { %v2774_v7 = vmul.f32 %v2773_v15, %v6211_v61 }
0x323f   : > { %v2780_v44 = vmul.f32 -0.29080933, %v2774_v7  ;;  %v2890_v53 = vmul.f32 0.6510417, %v2774_v7  ;;  %v2836_v27 = vmul.f32 0.2784091, %v2774_v7 }
0x3240   : > { %v2947_v35 = vmul.f32 0.036979165, %v2774_v7 }
0x3241   : > { %v2781_v28 = vadd.f32 %v2780_v44, %v2779_v57  ;;  %v6298_v55 = vadd.f32 %v2890_v53, %v2889_v16  ;;  %v2835_v53 = vadd.f32 %v6271_v41, %v2831_v48 }
0x3243   : > { %v2782_v51 = vadd.f32 %v2781_v28, %v2776_v33  ;;  %v2946_v33 = vadd.f32 %v2945_v1, %v2944_v21 }
0x3245   : > { %2795 = vperm.xlu2 %3969, %v2782_v51   ;;  %2790 = vperm.xlu0 %3968, %v2782_v51  }
0x3246   : > { %2785 = vperm.xlu1 %3967, %v2782_v51  }
0x324d   : > { %3972 = vset.pattern.permute.xlu2 %v4486_v62  ;;  %3973 = vset.pattern.permute.xlu0 %v4485_v49 }
0x324e   : > { %3970 = vset.pattern.permute.xlu1 %v4487_v63 }
0x324f   : > { %2800 = vperm.xlu1 %3970, %v2782_v51  }
0x3257   : > { %3971 = vset.pattern.permute.xlu1 %v4484_v47 }
0x329f   : > { %v2796_v32 = vpop.permute.xlu2 %2795 }
0x32a0   : > { %v2798_v54 = vmul.f32 %v2796_v32, %v4547_v9 }
0x32b7   : > { %v2791_v22 = vpop.permute.xlu0 %2790 }
0x32b8   : > { %v2786_v20 = vpop.permute.xlu1 %2785  ;;  %v2793_v23 = vmul.f32 %v2791_v22, %v4549_v10 }
0x32b9   : > { %v2788_v57 = vmul.f32 %v2786_v20, %v4545_v8 }
0x32ba   : > { %v2805_v3 = vadd.f32 %v2798_v54, %v2793_v23 }
0x32bb   : > { %v2804_v39 = vadd.f32 %v4554_v11, %v2788_v57 }
0x32bd   : > { %v2806_v60 = vadd.f32 %v2805_v3, %v2804_v39 }
0x32c1   : > { %v2801_v62 = vpop.permute.xlu1 %2800 }
0x32c2   : > { %v2803_v49 = vmul.f32 %v2801_v62, %v4557_v13 }
0x32c4   : > { %v2807_v42 = vadd.f32 %v2806_v60, %v2803_v49 }
0x32c6   : > { %3984 = vtanh.f32 %v2807_v42 }
0x32cc   : > { %v3985_v36 = vpop.eup %3984 }
0x32cd   : > { %v2817_v5 = vmul.f32 %v3985_v36, %v4566_v24  ;;  %v2813_v37 = vmul.f32 %v3985_v36, %v4578_v31  ;;  %v2809_v30 = vmul.f32 %v3985_v36, %v4568_v25  ;;  %v2821_v43 = vmul.f32 %v3985_v36, %v4593_v34 }
0x32cf   : > { %v2818_v52 = vsel %vm88_vm1, %v2817_v5, 0.0  ;;  %v2814_v2 = vsel %vm88_vm1, %v2813_v37, 0.0  ;;  %v2810_v19 = vsel %vm88_vm1, %v2809_v30, 0.0  ;;  %v2822_v6 = vsel %vm88_vm1, %v2821_v43, 0.0 }
0x32d0   : > { %2819 = vadd.xlane.f32.xlu0 %v2818_v52  ;;  %2815 = vadd.xlane.f32.xlu1 %v2814_v2 }
0x32d1   : > { %2811 = vadd.xlane.f32.xlu2 %v2810_v19 }
0x32d9   : > { %2823 = vadd.xlane.f32.xlu2 %v2822_v6 }
0x3343   : > { %v2816_v12 = vpop.xlane.xlu1 %2815  ;;  %v2820_v14 = vpop.xlane.xlu0 %2819 }
0x3344   : > { %v2812_v46 = vpop.xlane.xlu2 %2811 }
0x3345   : > { %v2825_v56 = vsel %vm104_vm2, %v2812_v46, %v2816_v12  ;;  %v2887_v12 = vmul.f32 0.091145836, %v6215_v4 }
0x3346   : > { %v2826_v18 = vsel %vm106_vm3, %v2825_v56, %v2820_v14 }
0x334c   : > { %v2824_v58 = vpop.xlane.xlu2 %2823 }
0x334d   : > { %v2827_v59 = vsel %vm108_vm4, %v2826_v18, %v2824_v58  ;;  %v2888_v58 = vadd.f32 %v4432_v45, %v2887_v12 }
0x334e   : > { %v2828_v50 = vadd.f32 %v4601_v40, %v2827_v59 }
0x334f   : > { %v2892_v48 = vadd.f32 %v6298_v55, %v2888_v58 }
0x3350   : > { %v2829_v17 = vmul.f32 %v2828_v50, %v6211_v61 }
0x3352   : > { %v2837_v29 = vmul.f32 -0.27353132, %v2829_v17  ;;  %v2948_v15 = vmul.f32 -0.0508638, %v2829_v17  ;;  %v2893_v59 = vmul.f32 -0.3223762, %v2829_v17 }
0x3354   : > { %v2838_v44 = vadd.f32 %v2837_v29, %v2836_v27  ;;  %v2949_v16 = vadd.f32 %v2948_v15, %v2947_v35 }
0x3356   : > { %v2839_v28 = vadd.f32 %v2838_v44, %v2835_v53  ;;  %v6327_v51 = vadd.f32 %v2949_v16, %v2946_v33 }
0x3358   : > { %2852 = vperm.xlu0 %3973, %v2839_v28   ;;  %2847 = vperm.xlu2 %3972, %v2839_v28  }
0x3359   : > { %2842 = vperm.xlu1 %3971, %v2839_v28  }
0x3361   : > { %3974 = vset.pattern.permute.xlu1 %v4487_v63 }
0x3362   : > { %2857 = vperm.xlu1 %3974, %v2839_v28  }
0x336a   : > { %3975 = vset.pattern.permute.xlu1 %v4484_v47 }
0x33b2   : > { %v2848_v20 = vpop.permute.xlu2 %2847 }
0x33b3   : > { %v2850_v32 = vmul.f32 %v2848_v20, %v4549_v10 }
0x33ca   : > { %v2853_v38 = vpop.permute.xlu0 %2852 }
0x33cb   : > { %v2843_v22 = vpop.permute.xlu1 %2842  ;;  %v2855_v7 = vmul.f32 %v2853_v38, %v4547_v9 }
0x33cc   : > { %v2845_v41 = vmul.f32 %v2843_v22, %v4545_v8 }
0x33cd   : > { %v2862_v23 = vadd.f32 %v2855_v7, %v2850_v32 }
0x33ce   : > { %v2861_v57 = vadd.f32 %v4554_v11, %v2845_v41 }
0x33d0   : > { %v2863_v3 = vadd.f32 %v2862_v23, %v2861_v57 }
0x33d4   : > { %v2858_v54 = vpop.permute.xlu1 %2857 }
0x33d5   : > { %v2860_v39 = vmul.f32 %v2858_v54, %v4557_v13  ;;  %v2955_v54 = vand.u32 2147483647, %v4432_v45 }
0x33d7   : > { %v2864_v62 = vadd.f32 %v2863_v3, %v2860_v39 }
0x33d9   : > { %3986 = vtanh.f32 %v2864_v62 }
0x33df   : > { %v3987_v60 = vpop.eup %3986 }
0x33e0   : > { %v2874_v47 = vmul.f32 %v3987_v60, %v4566_v24  ;;  %v2870_v49 = vmul.f32 %v3987_v60, %v4578_v31  ;;  %v2866_v42 = vmul.f32 %v3987_v60, %v4568_v25  ;;  %v2878_v30 = vmul.f32 %v3987_v60, %v4593_v34 }
0x33e2   : > { %v2875_v36 = vsel %vm88_vm1, %v2874_v47, 0.0  ;;  %v2871_v5 = vsel %vm88_vm1, %v2870_v49, 0.0  ;;  %v2867_v37 = vsel %vm88_vm1, %v2866_v42, 0.0  ;;  %v2879_v52 = vsel %vm88_vm1, %v2878_v30, 0.0 }
0x33e3   : > { %2876 = vadd.xlane.f32.xlu0 %v2875_v36  ;;  %2872 = vadd.xlane.f32.xlu1 %v2871_v5 }
0x33e4   : > { %2868 = vadd.xlane.f32.xlu2 %v2867_v37 }
0x33ec   : > { %2880 = vadd.xlane.f32.xlu2 %v2879_v52 }
0x3456   : > { %v2873_v19 = vpop.xlane.xlu1 %2872  ;;  %v2877_v43 = vpop.xlane.xlu0 %2876 }
0x3457   : > { %v2869_v2 = vpop.xlane.xlu2 %2868 }
0x3458   : > { %v2882_v6 = vsel %vm104_vm2, %v2869_v2, %v2873_v19 }
0x3459   : > { %v2883_v46 = vsel %vm106_vm3, %v2882_v6, %v2877_v43 }
0x345f   : > { %v2881_v14 = vpop.xlane.xlu2 %2880 }
0x3460   : > { %v2884_v56 = vsel %vm108_vm4, %v2883_v46, %v2881_v14 }
0x3461   : > { %v2885_v18 = vadd.f32 %v4601_v40, %v2884_v56 }
0x3463   : > { %v2886_v26 = vmul.f32 %v2885_v18, %v6211_v61 }
0x3465   : > { %v2894_v50 = vmul.f32 0.13095239, %v2886_v26  ;;  %v2951_v56 = vmul.f32 0.041904762, %v2886_v26 }
0x3467   : > { %v2895_v21 = vadd.f32 %v2894_v50, %v2893_v59 }
0x3469   : > { %v6352_v1 = vadd.f32 %v2895_v21, %v2892_v48 }
0x346b   : > { %2909 = vperm.xlu0 %3973, %v6352_v1   ;;  %2904 = vperm.xlu2 %3972, %v6352_v1   ;;  %v2956_v3 = vand.u32 2147483647, %v6352_v1 }
0x346c   : > { %2899 = vperm.xlu1 %3975, %v6352_v1  }
0x346d   : > { %v2957_v39 = vmax.f32 %v2955_v54, %v2956_v3 }
0x346f   : > { %v2958_v62 = vmul.f32 1e-06, %v2957_v39 }
0x3471   : > { %v2959_v60 = vadd.f32 1e-07, %v2958_v62 }
0x3473   : > { %3977 = vset.pattern.permute.xlu0 %v4487_v63  ;;  %v2971_v14 = vand.u32 2147483648, %v2959_v60  ;;  %vm2965_vm14 = vweird.f32 %v2959_v60  ;;  %v2969_v58 = vand.u32 2147483647, %v2959_v60 }
0x3474   : > { %3976 = vset.pattern.permute.xlu1 %v4487_v63 }
0x3475   : > { %2914 = vperm.xlu1 %3976, %v6352_v1   ;;  %v2972_v48 = vor.u32 1.1754944e-38, %v2971_v14  ;;  %vm2970_vm5 = vcmp.eq.f32.partialorder %v2969_v58, 8.507059e+37 }
0x34c5   : > { %v2905_v27 = vpop.permute.xlu2 %2904 }
0x34c6   : > { %v2907_v15 = vmul.f32 %v2905_v27, %v4549_v10 }
0x34dd   : > { %v2910_v4 = vpop.permute.xlu0 %2909 }
0x34de   : > { %v2900_v17 = vpop.permute.xlu1 %2899  ;;  %v2912_v55 = vmul.f32 %v2910_v4, %v4547_v9 }
0x34df   : > { %v2902_v29 = vmul.f32 %v2900_v17, %v4545_v8 }
0x34e0   : > { %v2919_v35 = vadd.f32 %v2912_v55, %v2907_v15 }
0x34e1   : > { %v2918_v44 = vadd.f32 %v4554_v11, %v2902_v29 }
0x34e3   : > { %v2920_v33 = vadd.f32 %v2919_v35, %v2918_v44 }
0x34e7   : > { %v2915_v53 = vpop.permute.xlu1 %2914 }
0x34e8   : > { %v2917_v16 = vmul.f32 %v2915_v53, %v4557_v13 }
0x34ea   : > { %v2921_v28 = vadd.f32 %v2920_v33, %v2917_v16 }
0x34ec   : > { %3988 = vtanh.f32 %v2921_v28 }
0x34ed   : > { %3990 = vrcp.f32 %v2959_v60 }
0x34f2   : > { %v3989_v63 = vpop.eup %3988 }
0x34f3   : > { %v2931_v38 = vmul.f32 %v3989_v63, %v4566_v24  ;;  %v2927_v22 = vmul.f32 %v3989_v63, %v4578_v31  ;;  %v2923_v20 = vmul.f32 %v3989_v63, %v4568_v25  ;;  %v2935_v23 = vmul.f32 %v3989_v63, %v4593_v34  ;;  %v3991_v47 = vpop.eup %3990 }
0x34f4   : > { %v2961_v42 = vmul.f32 %v3991_v47, %v2959_v60  ;;  %vm2966_vm13 = vweird.f32 %v3991_v47 }
0x34f5   : > { %v2932_v7 = vsel %vm88_vm1, %v2931_v38, 0.0  ;;  %v2928_v41 = vsel %vm88_vm1, %v2927_v22, 0.0  ;;  %v2924_v32 = vsel %vm88_vm1, %v2923_v20, 0.0  ;;  %v2936_v57 = vsel %vm88_vm1, %v2935_v23, 0.0  ;;  %vm2967_vm15 = vmor %vm2965_vm14, %vm2966_vm13 }
0x34f6   : > { %2933 = vadd.xlane.f32.xlu0 %v2932_v7  ;;  %2929 = vadd.xlane.f32.xlu1 %v2928_v41  ;;  %v2962_v5 = vsub.f32 1.0, %v2961_v42 }
0x34f7   : > { %2925 = vadd.xlane.f32.xlu2 %v2924_v32 }
0x34f8   : > { %v2963_v19 = vmul.f32 %v3991_v47, %v2962_v5 }
0x34fa   : > { %v2964_v12 = vadd.f32 %v3991_v47, %v2963_v19 }
0x34fc   : > { %v2968_v50 = vsel %vm2967_vm15, %v3991_v47, %v2964_v12 }
0x34fd   : > { %v2973_v4 = vsel %vm2970_vm5, %v2972_v48, %v2968_v50 }
0x34ff   : > { %2937 = vadd.xlane.f32.xlu2 %v2936_v57 }
0x3569   : > { %v2930_v36 = vpop.xlane.xlu1 %2929  ;;  %v2934_v37 = vpop.xlane.xlu0 %2933 }
0x356a   : > { %v2926_v49 = vpop.xlane.xlu2 %2925 }
0x356b   : > { %v2939_v30 = vsel %vm104_vm2, %v2926_v49, %v2930_v36 }
0x356c   : > { %v2940_v52 = vsel %vm106_vm3, %v2939_v30, %v2934_v37 }
0x3572   : > { %v2938_v2 = vpop.xlane.xlu2 %2937 }
0x3573   : > { %v2941_v43 = vsel %vm108_vm4, %v2940_v52, %v2938_v2 }
0x3574   : > { %v6379_v6 = vadd.f32 %v4601_v40, %v2941_v43 }
0x3576   : > { %v2943_v46 = vmul.f32 %v6379_v6, %v6211_v61 }
0x3578   : > { %v2952_v18 = vmul.f32 -0.025, %v2943_v46 }
0x357a   : > { %v2953_v59 = vadd.f32 %v2952_v18, %v2951_v56 }
0x357c   : > { %v2954_v21 = vadd.f32 %v2953_v59, %v6327_v51 }
0x357e   : > { %v2974_v17 = vmul.f32 %v2973_v4, %v2954_v21 }
0x3580   : > { %v2975_v27 = vmul.f32 %v2974_v17, %v2974_v17 }
0x3582   : > { %v2976_v61 = vsel %vm55_vm0, %v2975_v27, 0.0 }
0x3583   : > { %2977 = vadd.xlane.f32.xlu2 %v2976_v61 }
0x35f6   : > { %v2978_v55 = vpop.xlane.xlu2 %2977 }
0x35f7   : > { %v2979_v29 = vrot.slane %v2978_v55, 4 }
0x35f9   : > { %v2980_v26 = vadd.f32 %v2979_v29, %v2978_v55 }
0x35fb   : > { %v2981_v15 = vrot.slane %v2980_v26, 2 }
0x35fd   : > { %v2982_v35 = vadd.f32 %v2981_v15, %v2980_v26 }
0x35ff   : > { %v2983_v44 = vrot.slane %v2982_v35, 1 }
0x3601   : > { %v2984_v53 = vadd.f32 %v2983_v44, %v2982_v35 }
0x3603   : > { %3221 = vpush %v2984_v53 }
0x3634   : > { %s3222_s9 = spop %3221 }
0x3635   : > { %v2986_v51 = vstv %s3222_s9 }
0x3636   : > { %v2987_v33 = vmul.f32 0.03125, %v2986_v51 }
0x3638   : > { %v2988_v16 = vadd.f32 1e-24, %v2987_v33  ;;  %3223 = vpush %v2987_v33 }
0x363a   : > { %3992 = vlog2.f32 %v2988_v16 }
0x3640   : > { %v3993_v28 = vpop.eup %3992 }
0x3641   : > { %v2990_v63 = vmul.f32 0.6931472, %v3993_v28 }
0x3643   : > { %v2991_v38 = vmul.f32 -0.1, %v2990_v63 }
0x3645   : > { %v2992_v22 = vmul.f32 1.442695, %v2991_v38 }
0x3647   : > { %3994 = vpow2.f32 %v2992_v22 }
0x364d   : > { %v3995_v20 = vpop.eup %3994 }
0x364e   : > { %v2994_v7 = vmul.f32 0.9, %v3995_v20 }
0x3650   : > { %3225 = vpush %v2994_v7 }
0x3669   : > { %s3224_s4 = spop %3223 }
0x366a   : > { %p2999_p3 = scmp.le.f32.partialorder %s3224_s4, 1.0 }
0x366c   : > { %s6520_s7 = smov (!%p2999_p3, %s3000_s7), %s4436_s26 }
0x366d   : > { %s3002_s10 = scalar_select %p2999_p3, 1, 0 }
0x366e   : > { %s2611_s18 = ssub.f32 %s6164_s27, %s6520_s7  ;;  %s6505_s26 = smov %s6520_s7 }
0x366f   : > { %v3003_v41 = vstv %s3002_s10 }
0x3670   : > { %vm6389_vm6 = vcmp.eq.s32.totalorder %v3003_v41, 1  ;;  %p2612_p5 = scmp.gt.f32.partialorder %s2611_s18, %s2603_s29 }
0x3671   : > { %v3005_v23 = vsel %vm6389_vm6, %v6352_v1, %v4432_v45   ;;  %v3006_v0 = vsel %vm6389_vm6, %v6379_v6, %v4424_v0  }
0x3672   : > { %p2614_p6 = pnand %p2613_p4, %p2612_p5  ;;  %v6504_v45 = vmov %v3005_v23 }
0x3673   :  { %v6506_v46 = vmov (%p2614_p6), %v3005_v23 }
0x3681   : > { %s3226_s12 = spop %3225 }
0x3682   : > { %s2997_s14 = smax.f32 %s4488_s13, %s3226_s12  ;;  %2617 = sbr.rel (!%p2614_p6) target bundleno = 12022 (0x2ef6), region = 170 }
0x3683   : > { %s2998_s17 = smin.f32 %s4489_s16, %s2997_s14 }
0x3684   : > { %s3007_s5 = smul.f32 %s2998_s17, %s6208_s3 }
0x3686   : > { %s3009_s30 = smax.f32 %s3008_s15, %s3007_s5  }
0x3687 PF:  { %3184 = vst.msk [vmem:[%s6433_s6 + $0x38] sm:$0xff] %vm55_vm0, %v4440_v46  ;;  %v4440_v46 = vphi %v6500_v46, %v6506_v46  }
0x3688   :  { %3017 = vsyncpa [#allocation3], 1 }

</bundles_post_ra>
